<compile_context>
chip_gen: v6e
topology: v6e:2x2x1
jax: 0.10.0
libtpu: 0.0.40
codegen_flags: <defaults>
</compile_context>

<pallas_src>
import math
from functools import partial

import jax
import jax.numpy as jnp
from jax import lax
from jax.experimental import pallas as pl
from jax.experimental.pallas import tpu as pltpu

NEG_INF = -1e30
AGG_HEADS = 4          # self.num_head in the reference module


# --------------------------------------------------------------------------
# in-kernel helpers (traced inside Pallas kernels)
# --------------------------------------------------------------------------
def _gelu(x):
    # TODO(synk): PyTorch nn.GELU() default is the exact erf-based GELU; the
    # tanh approximation is used for guaranteed Mosaic lowering (small,
    # systematic numerical difference).
    return 0.5 * x * (1.0 + jnp.tanh(0.7978845608028654 * (x + 0.044715 * x * x * x)))


def _layernorm(x, g, b, eps=1e-5):
    mu = jnp.mean(x, axis=-1, keepdims=True)
    var = jnp.mean(jnp.square(x - mu), axis=-1, keepdims=True)
    return (x - mu) * lax.rsqrt(var + eps) * g + b


def _dot(a, b):
    # MXU matmul: bf16 operands (native on v6e/v7x), f32 accumulation.
    return jnp.dot(a.astype(jnp.bfloat16), b.astype(jnp.bfloat16),
                   preferred_element_type=jnp.float32)


def _dot_nt(a, b, exact=False):
    # a @ b.T without materializing a transpose (MXU consumes it directly).
    if not exact:
        a = a.astype(jnp.bfloat16)
        b = b.astype(jnp.bfloat16)
    return lax.dot_general(a, b, (((1,), (1,)), ((), ())),
                           preferred_element_type=jnp.float32)


def _softmax_rows(s):
    s = s - jnp.max(s, axis=-1, keepdims=True)
    p = jnp.exp(s)
    return p * pl.reciprocal(jnp.sum(p, axis=-1, keepdims=True), approx=True)


def _full_spec(arr):
    """Whole-array BlockSpec (same block every grid step -> stays VMEM-resident)."""
    zeros = (0,) * arr.ndim
    return pl.BlockSpec(arr.shape, lambda b: zeros)


def _bf16(w):
    # Only MXU operands are narrowed; biases / LN params stay f32 (v5e has no
    # bf16 VALU/EUP).  Halves weight bytes held in VMEM.
    return w.astype(jnp.bfloat16)


# --------------------------------------------------------------------------
# kernel A: fused Self_Interaction (3 layers + projection)
#           + consist_encoder + cosine-similarity matrix
# --------------------------------------------------------------------------
def pallas_si_consist(sp, cp, feats, kp, pos_emb, num_head):
    B, N, C = feats.shape
    L = sp['wqkv'].shape[0]
    H = num_head
    Dh = C // H
    Do = sp['proj_w'].shape[1]
    Dc = cp['w3'].shape[1]
    scale = 1.0 / math.sqrt(Dh)
    kp3 = kp[:, None, :]                                    # [B,1,N]

    def kernel(x_ref, pos_ref, kp_ref,
               wqkv_ref, bqkv_ref, wo_ref, bo_ref,
               ln1_g_ref, ln1_b_ref,
               f1_w_ref, f1_b_ref, f2_w_ref, f2_b_ref,
               ln2_g_ref, ln2_b_ref,
               pw_ref, pb_ref,
               w1, b1, g1, be1, w2, b2, g2, be2, w3, b3,
               feat_ref, cf_ref, sim_ref):
        x = x_ref[...] + pos_ref[...]                       # [N, C] f32
        kp_row = kp_ref[...]                                # [1, N] key-padding bias
        for l in range(L):                                  # static unroll, L=3
            # packed QKV: one full-width matmul instead of 3*H Dh-wide ones
            qkv = _dot(x, wqkv_ref[l]) + bqkv_ref[l]        # [N, 3C]
            heads = []
            for h in range(H):
                q = qkv[:, h * Dh:(h + 1) * Dh]
                k = qkv[:, C + h * Dh:C + (h + 1) * Dh]
                v = qkv[:, 2 * C + h * Dh:2 * C + (h + 1) * Dh]
                p = _softmax_rows(_dot_nt(q * scale, k) + kp_row)
                heads.append(_dot(p, v))                    # [N, Dh]
            ctx = jnp.concatenate(heads, axis=-1)           # [N, C]
            a = _dot(ctx, wo_ref[l]) + bo_ref[l]            # single packed out-proj
            x = _layernorm(x + a, ln1_g_ref[l], ln1_b_ref[l])
            f = _gelu(_dot(x, f1_w_ref[l]) + f1_b_ref[l])
            f = _dot(f, f2_w_ref[l]) + f2_b_ref[l]
            x = _layernorm(x + f, ln2_g_ref[l], ln2_b_ref[l])
        feat = _dot(x, pw_ref[...]) + pb_ref[...]           # [N, Do]
        feat_ref[...] = feat
        # --- consist_encoder fused in (consumes `feat` directly, no HBM trip)
        h1 = _gelu(_layernorm(_dot(feat, w1[...]) + b1[...], g1[...], be1[...]))
        h2 = _gelu(_layernorm(_dot(h1, w2[...]) + b2[...], g2[...], be2[...]))
        cf = _dot(h2, w3[...]) + b3[...]                    # [N, 64]
        cf_ref[...] = cf
        ssq = jnp.sum(cf * cf, axis=-1, keepdims=True)
        nv = cf * lax.rsqrt(ssq + 1e-12)                    # eps guards zero rows
        # exact f32 dot: the similarity matrix feeds top-k selection downstream
        s = _dot_nt(nv, nv, exact=True)
        sim_ref[...] = jnp.clip((s + 1.0) * 0.5, 0.0, 1.0)

    weights = (_bf16(sp['wqkv']), sp['bqkv'], _bf16(sp['wo']), sp['bo'],
               sp['ln1_g'], sp['ln1_b'],
               _bf16(sp['f1_w']), sp['f1_b'], _bf16(sp['f2_w']), sp['f2_b'],
               sp['ln2_g'], sp['ln2_b'],
               _bf16(sp['proj_w']), sp['proj_b'],
               _bf16(cp['w1']), cp['b1'], cp['g1'], cp['be1'],
               _bf16(cp['w2']), cp['b2'], cp['g2'], cp['be2'],
               _bf16(cp['w3']), cp['b3'])

    return pl.pallas_call(
        kernel,
        out_shape=(jax.ShapeDtypeStruct((B, N, Do), jnp.float32),
                   jax.ShapeDtypeStruct((B, N, Dc), jnp.float32),
                   jax.ShapeDtypeStruct((B, N, N), jnp.float32)),
        grid=(B,),
        in_specs=[pl.BlockSpec((None, N, C), lambda b: (b, 0, 0)),   # feats
                  pl.BlockSpec((None, N, C), lambda b: (0, 0, 0)),   # pos_emb
                  pl.BlockSpec((None, 1, N), lambda b: (b, 0, 0))]   # kp bias
                 + [_full_spec(w) for w in weights],
        out_specs=[pl.BlockSpec((None, N, Do), lambda b: (b, 0, 0)),
                   pl.BlockSpec((None, N, Dc), lambda b: (b, 0, 0)),
                   pl.BlockSpec((None, N, N), lambda b: (b, 0, 0))],
        compiler_params=pltpu.CompilerParams(dimension_semantics=("parallel",)),
    )(feats, pos_emb, kp3, *weights)


# --------------------------------------------------------------------------
# kernel B: both aggregation stages (MHA + aggregator_mlp + residual, twice)
#           attention biases are built IN-KERNEL from the top-k index tensors
# --------------------------------------------------------------------------
def pallas_aggregate(ap, feats, sim_idx, unsim_idx, num_head):
    B, N, E = feats.shape
    H = num_head
    Dh = E // H
    T = sim_idx.shape[-1]                                   # tok_num
    scale = 1.0 / math.sqrt(Dh)
    ndist = min(H, B)                                       # distinct biases/stage

    def kernel(x_ref, sidx_ref, uidx_ref,
               wqkv_ref, bqkv_ref, wo_ref, bo_ref,
               mw1, mb1, mg1, mbe1, mw2, mb2, mg2, mbe2, mw3, mb3,
               o_ref):
        b = pl.program_id(0)
        x = x_ref[...]                                      # [N, E]
        col = lax.broadcasted_iota(jnp.int32, (N, N), 1)
        idx_refs = (sidx_ref, uidx_ref)                     # stage 0 / stage 1
        for s in range(2):
            # Reference builds attn_mask via `mask.repeat(num_head,1,1)` while
            # nn.MultiheadAttention flattens (batch, head) batch-major, so head
            # (b, h) sees mask[(b*H+h) % B].  Since (b*H+h)%B == (b*H + h%B)%B,
            # only min(H,B) distinct biases exist per (batch, stage); build them
            # once per stage from the [N,T] top-k indices (no [B,N,N] bias ever
            # touches HBM or VMEM).
            biases = []
            for r in range(ndist):
                jb = (b * H + r) % B
                idx = idx_refs[s][jb]                       # [N, T] int32
                allowed = jnp.zeros((N, N), jnp.bool_)
                for t in range(T):                          # static unroll, T=tok
                    allowed = jnp.logical_or(allowed, col == idx[:, t:t + 1])
                biases.append(jnp.where(allowed, 0.0, NEG_INF).astype(jnp.float32))
            qkv = _dot(x, wqkv_ref[s]) + bqkv_ref[s]        # packed QKV, [N, 3E]
            heads = []
            for h in range(H):
                q = qkv[:, h * Dh:(h + 1) * Dh]
                k = qkv[:, E + h * Dh:E + (h + 1) * Dh]
                v = qkv[:, 2 * E + h * Dh:2 * E + (h + 1) * Dh]
                p = _softmax_rows(_dot_nt(q * scale, k) + biases[h % ndist])
                heads.append(_dot(p, v))                    # [N, Dh]
            ctx = jnp.concatenate(heads, axis=-1)           # [N, E]
            attn = _dot(ctx, wo_ref[s]) + bo_ref[s]         # packed out-proj
            hdn = _gelu(_layernorm(_dot(attn, mw1[s]) + mb1[s], mg1[s], mbe1[s]))
            hdn = _gelu(_layernorm(_dot(hdn, mw2[s]) + mb2[s], mg2[s], mbe2[s]))
            x = x + _dot(hdn, mw3[s]) + mb3[s]              # residual
        o_ref[...] = x

    weights = (_bf16(ap['wqkv']), ap['bqkv'], _bf16(ap['wo']), ap['bo'],
               _bf16(ap['m_w1']), ap['m_b1'], ap['m_g1'], ap['m_be1'],
               _bf16(ap['m_w2']), ap['m_b2'], ap['m_g2'], ap['m_be2'],
               _bf16(ap['m_w3']), ap['m_b3'])

    return pl.pallas_call(
        kernel,
        out_shape=jax.ShapeDtypeStruct((B, N, E), jnp.float32),
        grid=(B,),
        in_specs=[pl.BlockSpec((None, N, E), lambda b: (b, 0, 0)),
                  _full_spec(sim_idx), _full_spec(unsim_idx)]
                 + [_full_spec(w) for w in weights],
        out_specs=pl.BlockSpec((None, N, E), lambda b: (b, 0, 0)),
        compiler_params=pltpu.CompilerParams(dimension_semantics=("parallel",)),
    )(feats, sim_idx, unsim_idx, *weights)


# --------------------------------------------------------------------------
# glue (plain JAX, all inside jax.jit — no host syncs)
# --------------------------------------------------------------------------
def _topk_indices(sim, mask, matrix_mask, tok_num):
    """Branchless equivalent of the reference's `if mask.sum() > 0:` block.
    Returns int32 [B,N,tok] index tensors (biases are built in-kernel)."""
    B, N, _ = sim.shape
    has_pad = jnp.sum(mask) > 0
    if matrix_mask is None:
        mm = jnp.ones((B, N, N), dtype=bool)
    else:
        mm = jnp.logical_or(matrix_mask, jnp.logical_not(has_pad))
    diag = jnp.eye(N, dtype=jnp.float32)[None]
    sim_unsim = jnp.where(mm, sim, 2.0)
    sim_sim = jnp.where(mm, sim, -1.0) - diag
    # no clean Pallas TPU top-k primitive; tiny, fused by XLA
    unsim_idx = jax.lax.top_k(-sim_unsim, tok_num)[1]       # smallest (largest=False)
    sim_idx = jax.lax.top_k(sim_sim, tok_num)[1]            # largest  (largest=True)
    return sim_idx.astype(jnp.int32), unsim_idx.astype(jnp.int32)


@partial(jax.jit, static_argnames=("tok_num", "num_head_si"))
def intra_modal_modeling(params, feats, mask, pos_emb, matrix_mask=None, *,
                         tok_num, num_head_si):
    # key-padding additive bias for Self_Interaction
    kp = jnp.where(mask, NEG_INF, 0.0).astype(jnp.float32)  # [B,N]

    # fused correlation_model + consist_encoder + similarity matrix
    feats, consist_feats, similarity_matrix = pallas_si_consist(
        params['si'], params['ce'], feats, kp, pos_emb, num_head_si)

    # top-k selection (indices only; biases built inside the aggregate kernel)
    sim_idx, unsim_idx = _topk_indices(similarity_matrix, mask, matrix_mask, tok_num)

    # both aggregation stages, fused
    feats = pallas_aggregate(params['agg'], feats, sim_idx, unsim_idx, AGG_HEADS)

    return feats, similarity_matrix, consist_feats


# --------------------------------------------------------------------------
# deterministic parameter init (synthetic weights; packed-QKV / packed
# out-proj layout matches nn.MultiheadAttention's in_proj / out_proj weights)
# --------------------------------------------------------------------------
def init_params(key, num_head, hidden_dim, input_dim, output_dim):
    kit = iter(jax.random.split(key, 64))

    def w(shape, scale=0.02):
        return jax.random.normal(next(kit), shape, jnp.float32) * scale

    z = lambda shape: jnp.zeros(shape, jnp.float32)
    o = lambda shape: jnp.ones(shape, jnp.float32)

    L, C, Hd, Do = 3, input_dim, hidden_dim, output_dim
    E = output_dim

    p = {}
    p['si'] = dict(
        wqkv=w((L, C, 3 * C)), bqkv=z((L, 1, 3 * C)),
        wo=w((L, C, C)), bo=z((L, 1, C)),
        ln1_g=o((L, 1, C)), ln1_b=z((L, 1, C)),
        f1_w=w((L, C, Hd)), f1_b=z((L, 1, Hd)),
        f2_w=w((L, Hd, C)), f2_b=z((L, 1, C)),
        ln2_g=o((L, 1, C)), ln2_b=z((L, 1, C)),
        proj_w=w((C, Do)), proj_b=z((1, Do)),
    )
    p['ce'] = dict(
        w1=w((Do, 256)), b1=z((1, 256)), g1=o((1, 256)), be1=z((1, 256)),
        w2=w((256, 128)), b2=z((1, 128)), g2=o((1, 128)), be2=z((1, 128)),
        w3=w((128, 64)), b3=z((1, 64)),
    )
    p['agg'] = dict(
        wqkv=w((2, E, 3 * E)), bqkv=z((2, 1, 3 * E)),
        wo=w((2, E, E)), bo=z((2, 1, E)),
        m_w1=w((2, E, 2 * E)), m_b1=z((2, 1, 2 * E)),
        m_g1=o((2, 1, 2 * E)), m_be1=z((2, 1, 2 * E)),
        m_w2=w((2, 2 * E, 2 * E)), m_b2=z((2, 1, 2 * E)),
        m_g2=o((2, 1, 2 * E)), m_be2=z((2, 1, 2 * E)),
        m_w3=w((2, 2 * E, E)), m_b3=z((2, 1, E)),
    )
    return p


# --------------------------------------------------------------------------
if __name__ == "__main__":
    key = jax.random.PRNGKey(0)
    B, N = 2, 8
    num_head, hidden_dim, input_dim, output_dim, tok_num = 4, 64, 32, 32, 4

    pkey, fkey, ekey = jax.random.split(key, 3)
    params = init_params(pkey, num_head, hidden_dim, input_dim, output_dim)

    feats = jax.random.normal(fkey, (B, N, input_dim), jnp.float32)
    pos_emb = jax.random.normal(ekey, (1, N, input_dim), jnp.float32) * 0.02
    mask = jnp.zeros((B, N), dtype=bool)   # no padded tokens -> `else` branch

    out_feats, sim, consist = intra_modal_modeling(
        params, feats, mask, pos_emb, None,
        tok_num=tok_num, num_head_si=num_head)

    jax.block_until_ready((out_feats, sim, consist))
    assert out_feats.shape == (B, N, output_dim)
    assert sim.shape == (B, N, N)
    assert consist.shape == (B, N, 64)
    assert bool(jnp.all(jnp.isfinite(out_feats)))
    assert bool(jnp.all(jnp.isfinite(sim)))
    print("KERNEL_OK")
</pallas_src>

<mosaic_0001>
module attributes {stable_mosaic.version = 11 : i64} {
  func.func @kernel(%arg0: i32, %arg1: memref<1x8x32xf32, #tpu.memory_space<vmem>>, %arg2: memref<1x8x32xf32, #tpu.memory_space<vmem>>, %arg3: memref<1x1x8xf32, #tpu.memory_space<vmem>>, %arg4: memref<3x32x96xbf16, #tpu.memory_space<vmem>>, %arg5: memref<3x1x96xf32, #tpu.memory_space<vmem>>, %arg6: memref<3x32x32xbf16, #tpu.memory_space<vmem>>, %arg7: memref<3x1x32xf32, #tpu.memory_space<vmem>>, %arg8: memref<3x1x32xf32, #tpu.memory_space<vmem>>, %arg9: memref<3x1x32xf32, #tpu.memory_space<vmem>>, %arg10: memref<3x32x64xbf16, #tpu.memory_space<vmem>>, %arg11: memref<3x1x64xf32, #tpu.memory_space<vmem>>, %arg12: memref<3x64x32xbf16, #tpu.memory_space<vmem>>, %arg13: memref<3x1x32xf32, #tpu.memory_space<vmem>>, %arg14: memref<3x1x32xf32, #tpu.memory_space<vmem>>, %arg15: memref<3x1x32xf32, #tpu.memory_space<vmem>>, %arg16: memref<32x32xbf16, #tpu.memory_space<vmem>>, %arg17: memref<1x32xf32, #tpu.memory_space<vmem>>, %arg18: memref<32x256xbf16, #tpu.memory_space<vmem>>, %arg19: memref<1x256xf32, #tpu.memory_space<vmem>>, %arg20: memref<1x256xf32, #tpu.memory_space<vmem>>, %arg21: memref<1x256xf32, #tpu.memory_space<vmem>>, %arg22: memref<256x128xbf16, #tpu.memory_space<vmem>>, %arg23: memref<1x128xf32, #tpu.memory_space<vmem>>, %arg24: memref<1x128xf32, #tpu.memory_space<vmem>>, %arg25: memref<1x128xf32, #tpu.memory_space<vmem>>, %arg26: memref<128x64xbf16, #tpu.memory_space<vmem>>, %arg27: memref<1x64xf32, #tpu.memory_space<vmem>>, %arg28: memref<1x8x32xf32, #tpu.memory_space<vmem>>, %arg29: memref<1x8x64xf32, #tpu.memory_space<vmem>>, %arg30: memref<1x8x8xf32, #tpu.memory_space<vmem>>) attributes {dimension_semantics = [#tpu.dimension_semantics<parallel>], iteration_bounds = array<i64: 2>, scalar_prefetch = 0 : i64, scratch_operands = 0 : i64, tpu.core_type = #tpu.core_type<tc>, window_params = [{transform_indices = @transform_0, window_bounds = array<i64: 1, 8, 32>}, {pipeline_mode = #tpu.pipeline_mode<synchronous>, transform_indices = @transform_1, window_bounds = array<i64: 1, 8, 32>}, {transform_indices = @transform_2, window_bounds = array<i64: 1, 1, 8>}, {pipeline_mode = #tpu.pipeline_mode<synchronous>, transform_indices = @transform_3, window_bounds = array<i64: 3, 32, 96>}, {pipeline_mode = #tpu.pipeline_mode<synchronous>, transform_indices = @transform_4, window_bounds = array<i64: 3, 1, 96>}, {pipeline_mode = #tpu.pipeline_mode<synchronous>, transform_indices = @transform_5, window_bounds = array<i64: 3, 32, 32>}, {pipeline_mode = #tpu.pipeline_mode<synchronous>, transform_indices = @transform_6, window_bounds = array<i64: 3, 1, 32>}, {pipeline_mode = #tpu.pipeline_mode<synchronous>, transform_indices = @transform_7, window_bounds = array<i64: 3, 1, 32>}, {pipeline_mode = #tpu.pipeline_mode<synchronous>, transform_indices = @transform_8, window_bounds = array<i64: 3, 1, 32>}, {pipeline_mode = #tpu.pipeline_mode<synchronous>, transform_indices = @transform_9, window_bounds = array<i64: 3, 32, 64>}, {pipeline_mode = #tpu.pipeline_mode<synchronous>, transform_indices = @transform_10, window_bounds = array<i64: 3, 1, 64>}, {pipeline_mode = #tpu.pipeline_mode<synchronous>, transform_indices = @transform_11, window_bounds = array<i64: 3, 64, 32>}, {pipeline_mode = #tpu.pipeline_mode<synchronous>, transform_indices = @transform_12, window_bounds = array<i64: 3, 1, 32>}, {pipeline_mode = #tpu.pipeline_mode<synchronous>, transform_indices = @transform_13, window_bounds = array<i64: 3, 1, 32>}, {pipeline_mode = #tpu.pipeline_mode<synchronous>, transform_indices = @transform_14, window_bounds = array<i64: 3, 1, 32>}, {pipeline_mode = #tpu.pipeline_mode<synchronous>, transform_indices = @transform_15, window_bounds = array<i64: 32, 32>}, {pipeline_mode = #tpu.pipeline_mode<synchronous>, transform_indices = @transform_16, window_bounds = array<i64: 1, 32>}, {pipeline_mode = #tpu.pipeline_mode<synchronous>, transform_indices = @transform_17, window_bounds = array<i64: 32, 256>}, {pipeline_mode = #tpu.pipeline_mode<synchronous>, transform_indices = @transform_18, window_bounds = array<i64: 1, 256>}, {pipeline_mode = #tpu.pipeline_mode<synchronous>, transform_indices = @transform_19, window_bounds = array<i64: 1, 256>}, {pipeline_mode = #tpu.pipeline_mode<synchronous>, transform_indices = @transform_20, window_bounds = array<i64: 1, 256>}, {pipeline_mode = #tpu.pipeline_mode<synchronous>, transform_indices = @transform_21, window_bounds = array<i64: 256, 128>}, {pipeline_mode = #tpu.pipeline_mode<synchronous>, transform_indices = @transform_22, window_bounds = array<i64: 1, 128>}, {pipeline_mode = #tpu.pipeline_mode<synchronous>, transform_indices = @transform_23, window_bounds = array<i64: 1, 128>}, {pipeline_mode = #tpu.pipeline_mode<synchronous>, transform_indices = @transform_24, window_bounds = array<i64: 1, 128>}, {pipeline_mode = #tpu.pipeline_mode<synchronous>, transform_indices = @transform_25, window_bounds = array<i64: 128, 64>}, {pipeline_mode = #tpu.pipeline_mode<synchronous>, transform_indices = @transform_26, window_bounds = array<i64: 1, 64>}, {transform_indices = @transform_27, window_bounds = array<i64: 1, 8, 32>}, {transform_indices = @transform_28, window_bounds = array<i64: 1, 8, 64>}, {transform_indices = @transform_29, window_bounds = array<i64: 1, 8, 8>}]} {
    %c0 = arith.constant 0 : index
    %c0_0 = arith.constant 0 : index
    %c0_1 = arith.constant 0 : index
    %0 = vector.load %arg1[%c0, %c0_0, %c0_1] : memref<1x8x32xf32, #tpu.memory_space<vmem>>, vector<1x8x32xf32>
    %1 = vector.shape_cast %0 : vector<1x8x32xf32> to vector<8x32xf32>
    %c0_2 = arith.constant 0 : index
    %c0_3 = arith.constant 0 : index
    %c0_4 = arith.constant 0 : index
    %2 = vector.load %arg2[%c0_2, %c0_3, %c0_4] : memref<1x8x32xf32, #tpu.memory_space<vmem>>, vector<1x8x32xf32>
    %3 = vector.shape_cast %2 : vector<1x8x32xf32> to vector<8x32xf32>
    %4 = arith.addf %1, %3 : vector<8x32xf32>
    %c0_5 = arith.constant 0 : index
    %c0_6 = arith.constant 0 : index
    %c0_7 = arith.constant 0 : index
    %5 = vector.load %arg3[%c0_5, %c0_6, %c0_7] : memref<1x1x8xf32, #tpu.memory_space<vmem>>, vector<1x1x8xf32>
    %6 = vector.shape_cast %5 : vector<1x1x8xf32> to vector<1x8xf32>
    %c0_8 = arith.constant 0 : index
    %c0_9 = arith.constant 0 : index
    %c0_10 = arith.constant 0 : index
    %7 = vector.load %arg4[%c0_8, %c0_9, %c0_10] : memref<3x32x96xbf16, #tpu.memory_space<vmem>>, vector<1x32x96xbf16>
    %8 = vector.shape_cast %7 : vector<1x32x96xbf16> to vector<32x96xbf16>
    %9 = arith.truncf %4 : vector<8x32xf32> to vector<8x32xbf16>
    %cst = arith.constant dense<0.000000e+00> : vector<8x96xf32>
    %10 = tpu.matmul %9, %8, %cst {dimension_numbers = #tpu.dot_dimension_numbers<[1], [0], [0], [1], [0, 0, 1, 1], [], []>} : vector<8x32xbf16>, vector<32x96xbf16>, vector<8x96xf32> -> vector<8x96xf32>
    %c0_11 = arith.constant 0 : index
    %c0_12 = arith.constant 0 : index
    %c0_13 = arith.constant 0 : index
    %11 = vector.load %arg5[%c0_11, %c0_12, %c0_13] : memref<3x1x96xf32, #tpu.memory_space<vmem>>, vector<1x1x96xf32>
    %12 = vector.shape_cast %11 : vector<1x1x96xf32> to vector<1x96xf32>
    %13 = vector.broadcast %12 : vector<1x96xf32> to vector<8x96xf32>
    %14 = arith.addf %10, %13 : vector<8x96xf32>
    %15 = vector.extract_strided_slice %14 {offsets = [0, 0], sizes = [8, 8], strides = [1, 1]} : vector<8x96xf32> to vector<8x8xf32>
    %16 = vector.extract_strided_slice %14 {offsets = [0, 32], sizes = [8, 8], strides = [1, 1]} : vector<8x96xf32> to vector<8x8xf32>
    %17 = vector.extract_strided_slice %14 {offsets = [0, 64], sizes = [8, 8], strides = [1, 1]} : vector<8x96xf32> to vector<8x8xf32>
    %cst_14 = arith.constant 0.353553385 : f32
    %18 = vector.broadcast %cst_14 : f32 to vector<8x8xf32>
    %19 = arith.mulf %15, %18 : vector<8x8xf32>
    %20 = arith.truncf %19 : vector<8x8xf32> to vector<8x8xbf16>
    %21 = arith.truncf %16 : vector<8x8xf32> to vector<8x8xbf16>
    %cst_15 = arith.constant dense<0.000000e+00> : vector<8x8xf32>
    %22 = tpu.matmul %20, %21, %cst_15 {dimension_numbers = #tpu.dot_dimension_numbers<[1], [1], [0], [0], [0, 0, 1, 0], [], []>} : vector<8x8xbf16>, vector<8x8xbf16>, vector<8x8xf32> -> vector<8x8xf32>
    %23 = vector.broadcast %6 : vector<1x8xf32> to vector<8x8xf32>
    %24 = arith.addf %22, %23 : vector<8x8xf32>
    %cst_16 = arith.constant dense<0xFF800000> : vector<8xf32>
    %25 = vector.multi_reduction <maximumf>, %24, %cst_16 [1] : vector<8x8xf32> to vector<8xf32>
    %26 = vector.shape_cast %25 : vector<8xf32> to vector<8x1xf32>
    %27 = vector.broadcast %26 : vector<8x1xf32> to vector<8x8xf32>
    %28 = arith.subf %24, %27 : vector<8x8xf32>
    %29 = math.exp %28 : vector<8x8xf32>
    %cst_17 = arith.constant dense<0.000000e+00> : vector<8xf32>
    %30 = vector.multi_reduction <add>, %29, %cst_17 [1] : vector<8x8xf32> to vector<8xf32>
    %31 = vector.shape_cast %30 : vector<8xf32> to vector<8x1xf32>
    %32 = tpu.reciprocal %31 {approx = true} : vector<8x1xf32> -> vector<8x1xf32>
    %33 = vector.broadcast %32 : vector<8x1xf32> to vector<8x8xf32>
    %34 = arith.mulf %29, %33 : vector<8x8xf32>
    %35 = arith.truncf %34 : vector<8x8xf32> to vector<8x8xbf16>
    %36 = arith.truncf %17 : vector<8x8xf32> to vector<8x8xbf16>
    %cst_18 = arith.constant dense<0.000000e+00> : vector<8x8xf32>
    %37 = tpu.matmul %35, %36, %cst_18 {dimension_numbers = #tpu.dot_dimension_numbers<[1], [0], [0], [1], [0, 0, 1, 1], [], []>} : vector<8x8xbf16>, vector<8x8xbf16>, vector<8x8xf32> -> vector<8x8xf32>
    %38 = vector.extract_strided_slice %14 {offsets = [0, 8], sizes = [8, 8], strides = [1, 1]} : vector<8x96xf32> to vector<8x8xf32>
    %39 = vector.extract_strided_slice %14 {offsets = [0, 40], sizes = [8, 8], strides = [1, 1]} : vector<8x96xf32> to vector<8x8xf32>
    %40 = vector.extract_strided_slice %14 {offsets = [0, 72], sizes = [8, 8], strides = [1, 1]} : vector<8x96xf32> to vector<8x8xf32>
    %cst_19 = arith.constant 0.353553385 : f32
    %41 = vector.broadcast %cst_19 : f32 to vector<8x8xf32>
    %42 = arith.mulf %38, %41 : vector<8x8xf32>
    %43 = arith.truncf %42 : vector<8x8xf32> to vector<8x8xbf16>
    %44 = arith.truncf %39 : vector<8x8xf32> to vector<8x8xbf16>
    %cst_20 = arith.constant dense<0.000000e+00> : vector<8x8xf32>
    %45 = tpu.matmul %43, %44, %cst_20 {dimension_numbers = #tpu.dot_dimension_numbers<[1], [1], [0], [0], [0, 0, 1, 0], [], []>} : vector<8x8xbf16>, vector<8x8xbf16>, vector<8x8xf32> -> vector<8x8xf32>
    %46 = vector.broadcast %6 : vector<1x8xf32> to vector<8x8xf32>
    %47 = arith.addf %45, %46 : vector<8x8xf32>
    %cst_21 = arith.constant dense<0xFF800000> : vector<8xf32>
    %48 = vector.multi_reduction <maximumf>, %47, %cst_21 [1] : vector<8x8xf32> to vector<8xf32>
    %49 = vector.shape_cast %48 : vector<8xf32> to vector<8x1xf32>
    %50 = vector.broadcast %49 : vector<8x1xf32> to vector<8x8xf32>
    %51 = arith.subf %47, %50 : vector<8x8xf32>
    %52 = math.exp %51 : vector<8x8xf32>
    %cst_22 = arith.constant dense<0.000000e+00> : vector<8xf32>
    %53 = vector.multi_reduction <add>, %52, %cst_22 [1] : vector<8x8xf32> to vector<8xf32>
    %54 = vector.shape_cast %53 : vector<8xf32> to vector<8x1xf32>
    %55 = tpu.reciprocal %54 {approx = true} : vector<8x1xf32> -> vector<8x1xf32>
    %56 = vector.broadcast %55 : vector<8x1xf32> to vector<8x8xf32>
    %57 = arith.mulf %52, %56 : vector<8x8xf32>
    %58 = arith.truncf %57 : vector<8x8xf32> to vector<8x8xbf16>
    %59 = arith.truncf %40 : vector<8x8xf32> to vector<8x8xbf16>
    %cst_23 = arith.constant dense<0.000000e+00> : vector<8x8xf32>
    %60 = tpu.matmul %58, %59, %cst_23 {dimension_numbers = #tpu.dot_dimension_numbers<[1], [0], [0], [1], [0, 0, 1, 1], [], []>} : vector<8x8xbf16>, vector<8x8xbf16>, vector<8x8xf32> -> vector<8x8xf32>
    %61 = vector.extract_strided_slice %14 {offsets = [0, 16], sizes = [8, 8], strides = [1, 1]} : vector<8x96xf32> to vector<8x8xf32>
    %62 = vector.extract_strided_slice %14 {offsets = [0, 48], sizes = [8, 8], strides = [1, 1]} : vector<8x96xf32> to vector<8x8xf32>
    %63 = vector.extract_strided_slice %14 {offsets = [0, 80], sizes = [8, 8], strides = [1, 1]} : vector<8x96xf32> to vector<8x8xf32>
    %cst_24 = arith.constant 0.353553385 : f32
    %64 = vector.broadcast %cst_24 : f32 to vector<8x8xf32>
    %65 = arith.mulf %61, %64 : vector<8x8xf32>
    %66 = arith.truncf %65 : vector<8x8xf32> to vector<8x8xbf16>
    %67 = arith.truncf %62 : vector<8x8xf32> to vector<8x8xbf16>
    %cst_25 = arith.constant dense<0.000000e+00> : vector<8x8xf32>
    %68 = tpu.matmul %66, %67, %cst_25 {dimension_numbers = #tpu.dot_dimension_numbers<[1], [1], [0], [0], [0, 0, 1, 0], [], []>} : vector<8x8xbf16>, vector<8x8xbf16>, vector<8x8xf32> -> vector<8x8xf32>
    %69 = vector.broadcast %6 : vector<1x8xf32> to vector<8x8xf32>
    %70 = arith.addf %68, %69 : vector<8x8xf32>
    %cst_26 = arith.constant dense<0xFF800000> : vector<8xf32>
    %71 = vector.multi_reduction <maximumf>, %70, %cst_26 [1] : vector<8x8xf32> to vector<8xf32>
    %72 = vector.shape_cast %71 : vector<8xf32> to vector<8x1xf32>
    %73 = vector.broadcast %72 : vector<8x1xf32> to vector<8x8xf32>
    %74 = arith.subf %70, %73 : vector<8x8xf32>
    %75 = math.exp %74 : vector<8x8xf32>
    %cst_27 = arith.constant dense<0.000000e+00> : vector<8xf32>
    %76 = vector.multi_reduction <add>, %75, %cst_27 [1] : vector<8x8xf32> to vector<8xf32>
    %77 = vector.shape_cast %76 : vector<8xf32> to vector<8x1xf32>
    %78 = tpu.reciprocal %77 {approx = true} : vector<8x1xf32> -> vector<8x1xf32>
    %79 = vector.broadcast %78 : vector<8x1xf32> to vector<8x8xf32>
    %80 = arith.mulf %75, %79 : vector<8x8xf32>
    %81 = arith.truncf %80 : vector<8x8xf32> to vector<8x8xbf16>
    %82 = arith.truncf %63 : vector<8x8xf32> to vector<8x8xbf16>
    %cst_28 = arith.constant dense<0.000000e+00> : vector<8x8xf32>
    %83 = tpu.matmul %81, %82, %cst_28 {dimension_numbers = #tpu.dot_dimension_numbers<[1], [0], [0], [1], [0, 0, 1, 1], [], []>} : vector<8x8xbf16>, vector<8x8xbf16>, vector<8x8xf32> -> vector<8x8xf32>
    %84 = vector.extract_strided_slice %14 {offsets = [0, 24], sizes = [8, 8], strides = [1, 1]} : vector<8x96xf32> to vector<8x8xf32>
    %85 = vector.extract_strided_slice %14 {offsets = [0, 56], sizes = [8, 8], strides = [1, 1]} : vector<8x96xf32> to vector<8x8xf32>
    %86 = vector.extract_strided_slice %14 {offsets = [0, 88], sizes = [8, 8], strides = [1, 1]} : vector<8x96xf32> to vector<8x8xf32>
    %cst_29 = arith.constant 0.353553385 : f32
    %87 = vector.broadcast %cst_29 : f32 to vector<8x8xf32>
    %88 = arith.mulf %84, %87 : vector<8x8xf32>
    %89 = arith.truncf %88 : vector<8x8xf32> to vector<8x8xbf16>
    %90 = arith.truncf %85 : vector<8x8xf32> to vector<8x8xbf16>
    %cst_30 = arith.constant dense<0.000000e+00> : vector<8x8xf32>
    %91 = tpu.matmul %89, %90, %cst_30 {dimension_numbers = #tpu.dot_dimension_numbers<[1], [1], [0], [0], [0, 0, 1, 0], [], []>} : vector<8x8xbf16>, vector<8x8xbf16>, vector<8x8xf32> -> vector<8x8xf32>
    %92 = vector.broadcast %6 : vector<1x8xf32> to vector<8x8xf32>
    %93 = arith.addf %91, %92 : vector<8x8xf32>
    %cst_31 = arith.constant dense<0xFF800000> : vector<8xf32>
    %94 = vector.multi_reduction <maximumf>, %93, %cst_31 [1] : vector<8x8xf32> to vector<8xf32>
    %95 = vector.shape_cast %94 : vector<8xf32> to vector<8x1xf32>
    %96 = vector.broadcast %95 : vector<8x1xf32> to vector<8x8xf32>
    %97 = arith.subf %93, %96 : vector<8x8xf32>
    %98 = math.exp %97 : vector<8x8xf32>
    %cst_32 = arith.constant dense<0.000000e+00> : vector<8xf32>
    %99 = vector.multi_reduction <add>, %98, %cst_32 [1] : vector<8x8xf32> to vector<8xf32>
    %100 = vector.shape_cast %99 : vector<8xf32> to vector<8x1xf32>
    %101 = tpu.reciprocal %100 {approx = true} : vector<8x1xf32> -> vector<8x1xf32>
    %102 = vector.broadcast %101 : vector<8x1xf32> to vector<8x8xf32>
    %103 = arith.mulf %98, %102 : vector<8x8xf32>
    %104 = arith.truncf %103 : vector<8x8xf32> to vector<8x8xbf16>
    %105 = arith.truncf %86 : vector<8x8xf32> to vector<8x8xbf16>
    %cst_33 = arith.constant dense<0.000000e+00> : vector<8x8xf32>
    %106 = tpu.matmul %104, %105, %cst_33 {dimension_numbers = #tpu.dot_dimension_numbers<[1], [0], [0], [1], [0, 0, 1, 1], [], []>} : vector<8x8xbf16>, vector<8x8xbf16>, vector<8x8xf32> -> vector<8x8xf32>
    %107 = tpu.concatenate %37, %60, %83, %106 in 1 : vector<8x8xf32>, vector<8x8xf32>, vector<8x8xf32>, vector<8x8xf32> -> vector<8x32xf32>
    %c0_34 = arith.constant 0 : index
    %c0_35 = arith.constant 0 : index
    %c0_36 = arith.constant 0 : index
    %108 = vector.load %arg6[%c0_34, %c0_35, %c0_36] : memref<3x32x32xbf16, #tpu.memory_space<vmem>>, vector<1x32x32xbf16>
    %109 = vector.shape_cast %108 : vector<1x32x32xbf16> to vector<32x32xbf16>
    %110 = arith.truncf %107 : vector<8x32xf32> to vector<8x32xbf16>
    %cst_37 = arith.constant dense<0.000000e+00> : vector<8x32xf32>
    %111 = tpu.matmul %110, %109, %cst_37 {dimension_numbers = #tpu.dot_dimension_numbers<[1], [0], [0], [1], [0, 0, 1, 1], [], []>} : vector<8x32xbf16>, vector<32x32xbf16>, vector<8x32xf32> -> vector<8x32xf32>
    %c0_38 = arith.constant 0 : index
    %c0_39 = arith.constant 0 : index
    %c0_40 = arith.constant 0 : index
    %112 = vector.load %arg7[%c0_38, %c0_39, %c0_40] : memref<3x1x32xf32, #tpu.memory_space<vmem>>, vector<1x1x32xf32>
    %113 = vector.shape_cast %112 : vector<1x1x32xf32> to vector<1x32xf32>
    %114 = vector.broadcast %113 : vector<1x32xf32> to vector<8x32xf32>
    %115 = arith.addf %111, %114 : vector<8x32xf32>
    %116 = arith.addf %4, %115 : vector<8x32xf32>
    %c0_41 = arith.constant 0 : index
    %c0_42 = arith.constant 0 : index
    %c0_43 = arith.constant 0 : index
    %117 = vector.load %arg8[%c0_41, %c0_42, %c0_43] : memref<3x1x32xf32, #tpu.memory_space<vmem>>, vector<1x1x32xf32>
    %118 = vector.shape_cast %117 : vector<1x1x32xf32> to vector<1x32xf32>
    %c0_44 = arith.constant 0 : index
    %c0_45 = arith.constant 0 : index
    %c0_46 = arith.constant 0 : index
    %119 = vector.load %arg9[%c0_44, %c0_45, %c0_46] : memref<3x1x32xf32, #tpu.memory_space<vmem>>, vector<1x1x32xf32>
    %120 = vector.shape_cast %119 : vector<1x1x32xf32> to vector<1x32xf32>
    %cst_47 = arith.constant dense<0.000000e+00> : vector<8xf32>
    %121 = vector.multi_reduction <add>, %116, %cst_47 [1] : vector<8x32xf32> to vector<8xf32>
    %122 = vector.shape_cast %121 : vector<8xf32> to vector<8x1xf32>
    %cst_48 = arith.constant 3.200000e+01 : f32
    %123 = vector.broadcast %cst_48 : f32 to vector<8x1xf32>
    %124 = arith.divf %122, %123 : vector<8x1xf32>
    %125 = vector.broadcast %124 : vector<8x1xf32> to vector<8x32xf32>
    %126 = arith.subf %116, %125 : vector<8x32xf32>
    %127 = arith.mulf %126, %126 : vector<8x32xf32>
    %cst_49 = arith.constant dense<0.000000e+00> : vector<8xf32>
    %128 = vector.multi_reduction <add>, %127, %cst_49 [1] : vector<8x32xf32> to vector<8xf32>
    %129 = vector.shape_cast %128 : vector<8xf32> to vector<8x1xf32>
    %cst_50 = arith.constant 3.200000e+01 : f32
    %130 = vector.broadcast %cst_50 : f32 to vector<8x1xf32>
    %131 = arith.divf %129, %130 : vector<8x1xf32>
    %132 = vector.broadcast %124 : vector<8x1xf32> to vector<8x32xf32>
    %133 = arith.subf %116, %132 : vector<8x32xf32>
    %cst_51 = arith.constant 9.99999974E-6 : f32
    %134 = vector.broadcast %cst_51 : f32 to vector<8x1xf32>
    %135 = arith.addf %131, %134 : vector<8x1xf32>
    %136 = math.rsqrt %135 : vector<8x1xf32>
    %137 = vector.broadcast %136 : vector<8x1xf32> to vector<8x32xf32>
    %138 = arith.mulf %133, %137 : vector<8x32xf32>
    %139 = vector.broadcast %118 : vector<1x32xf32> to vector<8x32xf32>
    %140 = arith.mulf %138, %139 : vector<8x32xf32>
    %141 = vector.broadcast %120 : vector<1x32xf32> to vector<8x32xf32>
    %142 = arith.addf %140, %141 : vector<8x32xf32>
    %c0_52 = arith.constant 0 : index
    %c0_53 = arith.constant 0 : index
    %c0_54 = arith.constant 0 : index
    %143 = vector.load %arg10[%c0_52, %c0_53, %c0_54] : memref<3x32x64xbf16, #tpu.memory_space<vmem>>, vector<1x32x64xbf16>
    %144 = vector.shape_cast %143 : vector<1x32x64xbf16> to vector<32x64xbf16>
    %145 = arith.truncf %142 : vector<8x32xf32> to vector<8x32xbf16>
    %cst_55 = arith.constant dense<0.000000e+00> : vector<8x64xf32>
    %146 = tpu.matmul %145, %144, %cst_55 {dimension_numbers = #tpu.dot_dimension_numbers<[1], [0], [0], [1], [0, 0, 1, 1], [], []>} : vector<8x32xbf16>, vector<32x64xbf16>, vector<8x64xf32> -> vector<8x64xf32>
    %c0_56 = arith.constant 0 : index
    %c0_57 = arith.constant 0 : index
    %c0_58 = arith.constant 0 : index
    %147 = vector.load %arg11[%c0_56, %c0_57, %c0_58] : memref<3x1x64xf32, #tpu.memory_space<vmem>>, vector<1x1x64xf32>
    %148 = vector.shape_cast %147 : vector<1x1x64xf32> to vector<1x64xf32>
    %149 = vector.broadcast %148 : vector<1x64xf32> to vector<8x64xf32>
    %150 = arith.addf %146, %149 : vector<8x64xf32>
    %cst_59 = arith.constant 5.000000e-01 : f32
    %151 = vector.broadcast %cst_59 : f32 to vector<8x64xf32>
    %152 = arith.mulf %151, %150 : vector<8x64xf32>
    %cst_60 = arith.constant 4.471500e-02 : f32
    %153 = vector.broadcast %cst_60 : f32 to vector<8x64xf32>
    %154 = arith.mulf %153, %150 : vector<8x64xf32>
    %155 = arith.mulf %154, %150 : vector<8x64xf32>
    %156 = arith.mulf %155, %150 : vector<8x64xf32>
    %157 = arith.addf %150, %156 : vector<8x64xf32>
    %cst_61 = arith.constant 0.797884583 : f32
    %158 = vector.broadcast %cst_61 : f32 to vector<8x64xf32>
    %159 = arith.mulf %158, %157 : vector<8x64xf32>
    %160 = math.tanh %159 : vector<8x64xf32>
    %cst_62 = arith.constant 1.000000e+00 : f32
    %161 = vector.broadcast %cst_62 : f32 to vector<8x64xf32>
    %162 = arith.addf %161, %160 : vector<8x64xf32>
    %163 = arith.mulf %152, %162 : vector<8x64xf32>
    %c0_63 = arith.constant 0 : index
    %c0_64 = arith.constant 0 : index
    %c0_65 = arith.constant 0 : index
    %164 = vector.load %arg12[%c0_63, %c0_64, %c0_65] : memref<3x64x32xbf16, #tpu.memory_space<vmem>>, vector<1x64x32xbf16>
    %165 = vector.shape_cast %164 : vector<1x64x32xbf16> to vector<64x32xbf16>
    %166 = arith.truncf %163 : vector<8x64xf32> to vector<8x64xbf16>
    %cst_66 = arith.constant dense<0.000000e+00> : vector<8x32xf32>
    %167 = tpu.matmul %166, %165, %cst_66 {dimension_numbers = #tpu.dot_dimension_numbers<[1], [0], [0], [1], [0, 0, 1, 1], [], []>} : vector<8x64xbf16>, vector<64x32xbf16>, vector<8x32xf32> -> vector<8x32xf32>
    %c0_67 = arith.constant 0 : index
    %c0_68 = arith.constant 0 : index
    %c0_69 = arith.constant 0 : index
    %168 = vector.load %arg13[%c0_67, %c0_68, %c0_69] : memref<3x1x32xf32, #tpu.memory_space<vmem>>, vector<1x1x32xf32>
    %169 = vector.shape_cast %168 : vector<1x1x32xf32> to vector<1x32xf32>
    %170 = vector.broadcast %169 : vector<1x32xf32> to vector<8x32xf32>
    %171 = arith.addf %167, %170 : vector<8x32xf32>
    %172 = arith.addf %142, %171 : vector<8x32xf32>
    %c0_70 = arith.constant 0 : index
    %c0_71 = arith.constant 0 : index
    %c0_72 = arith.constant 0 : index
    %173 = vector.load %arg14[%c0_70, %c0_71, %c0_72] : memref<3x1x32xf32, #tpu.memory_space<vmem>>, vector<1x1x32xf32>
    %174 = vector.shape_cast %173 : vector<1x1x32xf32> to vector<1x32xf32>
    %c0_73 = arith.constant 0 : index
    %c0_74 = arith.constant 0 : index
    %c0_75 = arith.constant 0 : index
    %175 = vector.load %arg15[%c0_73, %c0_74, %c0_75] : memref<3x1x32xf32, #tpu.memory_space<vmem>>, vector<1x1x32xf32>
    %176 = vector.shape_cast %175 : vector<1x1x32xf32> to vector<1x32xf32>
    %cst_76 = arith.constant dense<0.000000e+00> : vector<8xf32>
    %177 = vector.multi_reduction <add>, %172, %cst_76 [1] : vector<8x32xf32> to vector<8xf32>
    %178 = vector.shape_cast %177 : vector<8xf32> to vector<8x1xf32>
    %cst_77 = arith.constant 3.200000e+01 : f32
    %179 = vector.broadcast %cst_77 : f32 to vector<8x1xf32>
    %180 = arith.divf %178, %179 : vector<8x1xf32>
    %181 = vector.broadcast %180 : vector<8x1xf32> to vector<8x32xf32>
    %182 = arith.subf %172, %181 : vector<8x32xf32>
    %183 = arith.mulf %182, %182 : vector<8x32xf32>
    %cst_78 = arith.constant dense<0.000000e+00> : vector<8xf32>
    %184 = vector.multi_reduction <add>, %183, %cst_78 [1] : vector<8x32xf32> to vector<8xf32>
    %185 = vector.shape_cast %184 : vector<8xf32> to vector<8x1xf32>
    %cst_79 = arith.constant 3.200000e+01 : f32
    %186 = vector.broadcast %cst_79 : f32 to vector<8x1xf32>
    %187 = arith.divf %185, %186 : vector<8x1xf32>
    %188 = vector.broadcast %180 : vector<8x1xf32> to vector<8x32xf32>
    %189 = arith.subf %172, %188 : vector<8x32xf32>
    %cst_80 = arith.constant 9.99999974E-6 : f32
    %190 = vector.broadcast %cst_80 : f32 to vector<8x1xf32>
    %191 = arith.addf %187, %190 : vector<8x1xf32>
    %192 = math.rsqrt %191 : vector<8x1xf32>
    %193 = vector.broadcast %192 : vector<8x1xf32> to vector<8x32xf32>
    %194 = arith.mulf %189, %193 : vector<8x32xf32>
    %195 = vector.broadcast %174 : vector<1x32xf32> to vector<8x32xf32>
    %196 = arith.mulf %194, %195 : vector<8x32xf32>
    %197 = vector.broadcast %176 : vector<1x32xf32> to vector<8x32xf32>
    %198 = arith.addf %196, %197 : vector<8x32xf32>
    %c1 = arith.constant 1 : index
    %c0_81 = arith.constant 0 : index
    %c0_82 = arith.constant 0 : index
    %199 = vector.load %arg4[%c1, %c0_81, %c0_82] : memref<3x32x96xbf16, #tpu.memory_space<vmem>>, vector<1x32x96xbf16>
    %200 = vector.shape_cast %199 : vector<1x32x96xbf16> to vector<32x96xbf16>
    %201 = arith.truncf %198 : vector<8x32xf32> to vector<8x32xbf16>
    %cst_83 = arith.constant dense<0.000000e+00> : vector<8x96xf32>
    %202 = tpu.matmul %201, %200, %cst_83 {dimension_numbers = #tpu.dot_dimension_numbers<[1], [0], [0], [1], [0, 0, 1, 1], [], []>} : vector<8x32xbf16>, vector<32x96xbf16>, vector<8x96xf32> -> vector<8x96xf32>
    %c1_84 = arith.constant 1 : index
    %c0_85 = arith.constant 0 : index
    %c0_86 = arith.constant 0 : index
    %203 = vector.load %arg5[%c1_84, %c0_85, %c0_86] : memref<3x1x96xf32, #tpu.memory_space<vmem>>, vector<1x1x96xf32>
    %204 = vector.shape_cast %203 : vector<1x1x96xf32> to vector<1x96xf32>
    %205 = vector.broadcast %204 : vector<1x96xf32> to vector<8x96xf32>
    %206 = arith.addf %202, %205 : vector<8x96xf32>
    %207 = vector.extract_strided_slice %206 {offsets = [0, 0], sizes = [8, 8], strides = [1, 1]} : vector<8x96xf32> to vector<8x8xf32>
    %208 = vector.extract_strided_slice %206 {offsets = [0, 32], sizes = [8, 8], strides = [1, 1]} : vector<8x96xf32> to vector<8x8xf32>
    %209 = vector.extract_strided_slice %206 {offsets = [0, 64], sizes = [8, 8], strides = [1, 1]} : vector<8x96xf32> to vector<8x8xf32>
    %cst_87 = arith.constant 0.353553385 : f32
    %210 = vector.broadcast %cst_87 : f32 to vector<8x8xf32>
    %211 = arith.mulf %207, %210 : vector<8x8xf32>
    %212 = arith.truncf %211 : vector<8x8xf32> to vector<8x8xbf16>
    %213 = arith.truncf %208 : vector<8x8xf32> to vector<8x8xbf16>
    %cst_88 = arith.constant dense<0.000000e+00> : vector<8x8xf32>
    %214 = tpu.matmul %212, %213, %cst_88 {dimension_numbers = #tpu.dot_dimension_numbers<[1], [1], [0], [0], [0, 0, 1, 0], [], []>} : vector<8x8xbf16>, vector<8x8xbf16>, vector<8x8xf32> -> vector<8x8xf32>
    %215 = vector.broadcast %6 : vector<1x8xf32> to vector<8x8xf32>
    %216 = arith.addf %214, %215 : vector<8x8xf32>
    %cst_89 = arith.constant dense<0xFF800000> : vector<8xf32>
    %217 = vector.multi_reduction <maximumf>, %216, %cst_89 [1] : vector<8x8xf32> to vector<8xf32>
    %218 = vector.shape_cast %217 : vector<8xf32> to vector<8x1xf32>
    %219 = vector.broadcast %218 : vector<8x1xf32> to vector<8x8xf32>
    %220 = arith.subf %216, %219 : vector<8x8xf32>
    %221 = math.exp %220 : vector<8x8xf32>
    %cst_90 = arith.constant dense<0.000000e+00> : vector<8xf32>
    %222 = vector.multi_reduction <add>, %221, %cst_90 [1] : vector<8x8xf32> to vector<8xf32>
    %223 = vector.shape_cast %222 : vector<8xf32> to vector<8x1xf32>
    %224 = tpu.reciprocal %223 {approx = true} : vector<8x1xf32> -> vector<8x1xf32>
    %225 = vector.broadcast %224 : vector<8x1xf32> to vector<8x8xf32>
    %226 = arith.mulf %221, %225 : vector<8x8xf32>
    %227 = arith.truncf %226 : vector<8x8xf32> to vector<8x8xbf16>
    %228 = arith.truncf %209 : vector<8x8xf32> to vector<8x8xbf16>
    %cst_91 = arith.constant dense<0.000000e+00> : vector<8x8xf32>
    %229 = tpu.matmul %227, %228, %cst_91 {dimension_numbers = #tpu.dot_dimension_numbers<[1], [0], [0], [1], [0, 0, 1, 1], [], []>} : vector<8x8xbf16>, vector<8x8xbf16>, vector<8x8xf32> -> vector<8x8xf32>
    %230 = vector.extract_strided_slice %206 {offsets = [0, 8], sizes = [8, 8], strides = [1, 1]} : vector<8x96xf32> to vector<8x8xf32>
    %231 = vector.extract_strided_slice %206 {offsets = [0, 40], sizes = [8, 8], strides = [1, 1]} : vector<8x96xf32> to vector<8x8xf32>
    %232 = vector.extract_strided_slice %206 {offsets = [0, 72], sizes = [8, 8], strides = [1, 1]} : vector<8x96xf32> to vector<8x8xf32>
    %cst_92 = arith.constant 0.353553385 : f32
    %233 = vector.broadcast %cst_92 : f32 to vector<8x8xf32>
    %234 = arith.mulf %230, %233 : vector<8x8xf32>
    %235 = arith.truncf %234 : vector<8x8xf32> to vector<8x8xbf16>
    %236 = arith.truncf %231 : vector<8x8xf32> to vector<8x8xbf16>
    %cst_93 = arith.constant dense<0.000000e+00> : vector<8x8xf32>
    %237 = tpu.matmul %235, %236, %cst_93 {dimension_numbers = #tpu.dot_dimension_numbers<[1], [1], [0], [0], [0, 0, 1, 0], [], []>} : vector<8x8xbf16>, vector<8x8xbf16>, vector<8x8xf32> -> vector<8x8xf32>
    %238 = vector.broadcast %6 : vector<1x8xf32> to vector<8x8xf32>
    %239 = arith.addf %237, %238 : vector<8x8xf32>
    %cst_94 = arith.constant dense<0xFF800000> : vector<8xf32>
    %240 = vector.multi_reduction <maximumf>, %239, %cst_94 [1] : vector<8x8xf32> to vector<8xf32>
    %241 = vector.shape_cast %240 : vector<8xf32> to vector<8x1xf32>
    %242 = vector.broadcast %241 : vector<8x1xf32> to vector<8x8xf32>
    %243 = arith.subf %239, %242 : vector<8x8xf32>
    %244 = math.exp %243 : vector<8x8xf32>
    %cst_95 = arith.constant dense<0.000000e+00> : vector<8xf32>
    %245 = vector.multi_reduction <add>, %244, %cst_95 [1] : vector<8x8xf32> to vector<8xf32>
    %246 = vector.shape_cast %245 : vector<8xf32> to vector<8x1xf32>
    %247 = tpu.reciprocal %246 {approx = true} : vector<8x1xf32> -> vector<8x1xf32>
    %248 = vector.broadcast %247 : vector<8x1xf32> to vector<8x8xf32>
    %249 = arith.mulf %244, %248 : vector<8x8xf32>
    %250 = arith.truncf %249 : vector<8x8xf32> to vector<8x8xbf16>
    %251 = arith.truncf %232 : vector<8x8xf32> to vector<8x8xbf16>
    %cst_96 = arith.constant dense<0.000000e+00> : vector<8x8xf32>
    %252 = tpu.matmul %250, %251, %cst_96 {dimension_numbers = #tpu.dot_dimension_numbers<[1], [0], [0], [1], [0, 0, 1, 1], [], []>} : vector<8x8xbf16>, vector<8x8xbf16>, vector<8x8xf32> -> vector<8x8xf32>
    %253 = vector.extract_strided_slice %206 {offsets = [0, 16], sizes = [8, 8], strides = [1, 1]} : vector<8x96xf32> to vector<8x8xf32>
    %254 = vector.extract_strided_slice %206 {offsets = [0, 48], sizes = [8, 8], strides = [1, 1]} : vector<8x96xf32> to vector<8x8xf32>
    %255 = vector.extract_strided_slice %206 {offsets = [0, 80], sizes = [8, 8], strides = [1, 1]} : vector<8x96xf32> to vector<8x8xf32>
    %cst_97 = arith.constant 0.353553385 : f32
    %256 = vector.broadcast %cst_97 : f32 to vector<8x8xf32>
    %257 = arith.mulf %253, %256 : vector<8x8xf32>
    %258 = arith.truncf %257 : vector<8x8xf32> to vector<8x8xbf16>
    %259 = arith.truncf %254 : vector<8x8xf32> to vector<8x8xbf16>
    %cst_98 = arith.constant dense<0.000000e+00> : vector<8x8xf32>
    %260 = tpu.matmul %258, %259, %cst_98 {dimension_numbers = #tpu.dot_dimension_numbers<[1], [1], [0], [0], [0, 0, 1, 0], [], []>} : vector<8x8xbf16>, vector<8x8xbf16>, vector<8x8xf32> -> vector<8x8xf32>
    %261 = vector.broadcast %6 : vector<1x8xf32> to vector<8x8xf32>
    %262 = arith.addf %260, %261 : vector<8x8xf32>
    %cst_99 = arith.constant dense<0xFF800000> : vector<8xf32>
    %263 = vector.multi_reduction <maximumf>, %262, %cst_99 [1] : vector<8x8xf32> to vector<8xf32>
    %264 = vector.shape_cast %263 : vector<8xf32> to vector<8x1xf32>
    %265 = vector.broadcast %264 : vector<8x1xf32> to vector<8x8xf32>
    %266 = arith.subf %262, %265 : vector<8x8xf32>
    %267 = math.exp %266 : vector<8x8xf32>
    %cst_100 = arith.constant dense<0.000000e+00> : vector<8xf32>
    %268 = vector.multi_reduction <add>, %267, %cst_100 [1] : vector<8x8xf32> to vector<8xf32>
    %269 = vector.shape_cast %268 : vector<8xf32> to vector<8x1xf32>
    %270 = tpu.reciprocal %269 {approx = true} : vector<8x1xf32> -> vector<8x1xf32>
    %271 = vector.broadcast %270 : vector<8x1xf32> to vector<8x8xf32>
    %272 = arith.mulf %267, %271 : vector<8x8xf32>
    %273 = arith.truncf %272 : vector<8x8xf32> to vector<8x8xbf16>
    %274 = arith.truncf %255 : vector<8x8xf32> to vector<8x8xbf16>
    %cst_101 = arith.constant dense<0.000000e+00> : vector<8x8xf32>
    %275 = tpu.matmul %273, %274, %cst_101 {dimension_numbers = #tpu.dot_dimension_numbers<[1], [0], [0], [1], [0, 0, 1, 1], [], []>} : vector<8x8xbf16>, vector<8x8xbf16>, vector<8x8xf32> -> vector<8x8xf32>
    %276 = vector.extract_strided_slice %206 {offsets = [0, 24], sizes = [8, 8], strides = [1, 1]} : vector<8x96xf32> to vector<8x8xf32>
    %277 = vector.extract_strided_slice %206 {offsets = [0, 56], sizes = [8, 8], strides = [1, 1]} : vector<8x96xf32> to vector<8x8xf32>
    %278 = vector.extract_strided_slice %206 {offsets = [0, 88], sizes = [8, 8], strides = [1, 1]} : vector<8x96xf32> to vector<8x8xf32>
    %cst_102 = arith.constant 0.353553385 : f32
    %279 = vector.broadcast %cst_102 : f32 to vector<8x8xf32>
    %280 = arith.mulf %276, %279 : vector<8x8xf32>
    %281 = arith.truncf %280 : vector<8x8xf32> to vector<8x8xbf16>
    %282 = arith.truncf %277 : vector<8x8xf32> to vector<8x8xbf16>
    %cst_103 = arith.constant dense<0.000000e+00> : vector<8x8xf32>
    %283 = tpu.matmul %281, %282, %cst_103 {dimension_numbers = #tpu.dot_dimension_numbers<[1], [1], [0], [0], [0, 0, 1, 0], [], []>} : vector<8x8xbf16>, vector<8x8xbf16>, vector<8x8xf32> -> vector<8x8xf32>
    %284 = vector.broadcast %6 : vector<1x8xf32> to vector<8x8xf32>
    %285 = arith.addf %283, %284 : vector<8x8xf32>
    %cst_104 = arith.constant dense<0xFF800000> : vector<8xf32>
    %286 = vector.multi_reduction <maximumf>, %285, %cst_104 [1] : vector<8x8xf32> to vector<8xf32>
    %287 = vector.shape_cast %286 : vector<8xf32> to vector<8x1xf32>
    %288 = vector.broadcast %287 : vector<8x1xf32> to vector<8x8xf32>
    %289 = arith.subf %285, %288 : vector<8x8xf32>
    %290 = math.exp %289 : vector<8x8xf32>
    %cst_105 = arith.constant dense<0.000000e+00> : vector<8xf32>
    %291 = vector.multi_reduction <add>, %290, %cst_105 [1] : vector<8x8xf32> to vector<8xf32>
    %292 = vector.shape_cast %291 : vector<8xf32> to vector<8x1xf32>
    %293 = tpu.reciprocal %292 {approx = true} : vector<8x1xf32> -> vector<8x1xf32>
    %294 = vector.broadcast %293 : vector<8x1xf32> to vector<8x8xf32>
    %295 = arith.mulf %290, %294 : vector<8x8xf32>
    %296 = arith.truncf %295 : vector<8x8xf32> to vector<8x8xbf16>
    %297 = arith.truncf %278 : vector<8x8xf32> to vector<8x8xbf16>
    %cst_106 = arith.constant dense<0.000000e+00> : vector<8x8xf32>
    %298 = tpu.matmul %296, %297, %cst_106 {dimension_numbers = #tpu.dot_dimension_numbers<[1], [0], [0], [1], [0, 0, 1, 1], [], []>} : vector<8x8xbf16>, vector<8x8xbf16>, vector<8x8xf32> -> vector<8x8xf32>
    %299 = tpu.concatenate %229, %252, %275, %298 in 1 : vector<8x8xf32>, vector<8x8xf32>, vector<8x8xf32>, vector<8x8xf32> -> vector<8x32xf32>
    %c1_107 = arith.constant 1 : index
    %c0_108 = arith.constant 0 : index
    %c0_109 = arith.constant 0 : index
    %300 = vector.load %arg6[%c1_107, %c0_108, %c0_109] : memref<3x32x32xbf16, #tpu.memory_space<vmem>>, vector<1x32x32xbf16>
    %301 = vector.shape_cast %300 : vector<1x32x32xbf16> to vector<32x32xbf16>
    %302 = arith.truncf %299 : vector<8x32xf32> to vector<8x32xbf16>
    %cst_110 = arith.constant dense<0.000000e+00> : vector<8x32xf32>
    %303 = tpu.matmul %302, %301, %cst_110 {dimension_numbers = #tpu.dot_dimension_numbers<[1], [0], [0], [1], [0, 0, 1, 1], [], []>} : vector<8x32xbf16>, vector<32x32xbf16>, vector<8x32xf32> -> vector<8x32xf32>
    %c1_111 = arith.constant 1 : index
    %c0_112 = arith.constant 0 : index
    %c0_113 = arith.constant 0 : index
    %304 = vector.load %arg7[%c1_111, %c0_112, %c0_113] : memref<3x1x32xf32, #tpu.memory_space<vmem>>, vector<1x1x32xf32>
    %305 = vector.shape_cast %304 : vector<1x1x32xf32> to vector<1x32xf32>
    %306 = vector.broadcast %305 : vector<1x32xf32> to vector<8x32xf32>
    %307 = arith.addf %303, %306 : vector<8x32xf32>
    %308 = arith.addf %198, %307 : vector<8x32xf32>
    %c1_114 = arith.constant 1 : index
    %c0_115 = arith.constant 0 : index
    %c0_116 = arith.constant 0 : index
    %309 = vector.load %arg8[%c1_114, %c0_115, %c0_116] : memref<3x1x32xf32, #tpu.memory_space<vmem>>, vector<1x1x32xf32>
    %310 = vector.shape_cast %309 : vector<1x1x32xf32> to vector<1x32xf32>
    %c1_117 = arith.constant 1 : index
    %c0_118 = arith.constant 0 : index
    %c0_119 = arith.constant 0 : index
    %311 = vector.load %arg9[%c1_117, %c0_118, %c0_119] : memref<3x1x32xf32, #tpu.memory_space<vmem>>, vector<1x1x32xf32>
    %312 = vector.shape_cast %311 : vector<1x1x32xf32> to vector<1x32xf32>
    %cst_120 = arith.constant dense<0.000000e+00> : vector<8xf32>
    %313 = vector.multi_reduction <add>, %308, %cst_120 [1] : vector<8x32xf32> to vector<8xf32>
    %314 = vector.shape_cast %313 : vector<8xf32> to vector<8x1xf32>
    %cst_121 = arith.constant 3.200000e+01 : f32
    %315 = vector.broadcast %cst_121 : f32 to vector<8x1xf32>
    %316 = arith.divf %314, %315 : vector<8x1xf32>
    %317 = vector.broadcast %316 : vector<8x1xf32> to vector<8x32xf32>
    %318 = arith.subf %308, %317 : vector<8x32xf32>
    %319 = arith.mulf %318, %318 : vector<8x32xf32>
    %cst_122 = arith.constant dense<0.000000e+00> : vector<8xf32>
    %320 = vector.multi_reduction <add>, %319, %cst_122 [1] : vector<8x32xf32> to vector<8xf32>
    %321 = vector.shape_cast %320 : vector<8xf32> to vector<8x1xf32>
    %cst_123 = arith.constant 3.200000e+01 : f32
    %322 = vector.broadcast %cst_123 : f32 to vector<8x1xf32>
    %323 = arith.divf %321, %322 : vector<8x1xf32>
    %324 = vector.broadcast %316 : vector<8x1xf32> to vector<8x32xf32>
    %325 = arith.subf %308, %324 : vector<8x32xf32>
    %cst_124 = arith.constant 9.99999974E-6 : f32
    %326 = vector.broadcast %cst_124 : f32 to vector<8x1xf32>
    %327 = arith.addf %323, %326 : vector<8x1xf32>
    %328 = math.rsqrt %327 : vector<8x1xf32>
    %329 = vector.broadcast %328 : vector<8x1xf32> to vector<8x32xf32>
    %330 = arith.mulf %325, %329 : vector<8x32xf32>
    %331 = vector.broadcast %310 : vector<1x32xf32> to vector<8x32xf32>
    %332 = arith.mulf %330, %331 : vector<8x32xf32>
    %333 = vector.broadcast %312 : vector<1x32xf32> to vector<8x32xf32>
    %334 = arith.addf %332, %333 : vector<8x32xf32>
    %c1_125 = arith.constant 1 : index
    %c0_126 = arith.constant 0 : index
    %c0_127 = arith.constant 0 : index
    %335 = vector.load %arg10[%c1_125, %c0_126, %c0_127] : memref<3x32x64xbf16, #tpu.memory_space<vmem>>, vector<1x32x64xbf16>
    %336 = vector.shape_cast %335 : vector<1x32x64xbf16> to vector<32x64xbf16>
    %337 = arith.truncf %334 : vector<8x32xf32> to vector<8x32xbf16>
    %cst_128 = arith.constant dense<0.000000e+00> : vector<8x64xf32>
    %338 = tpu.matmul %337, %336, %cst_128 {dimension_numbers = #tpu.dot_dimension_numbers<[1], [0], [0], [1], [0, 0, 1, 1], [], []>} : vector<8x32xbf16>, vector<32x64xbf16>, vector<8x64xf32> -> vector<8x64xf32>
    %c1_129 = arith.constant 1 : index
    %c0_130 = arith.constant 0 : index
    %c0_131 = arith.constant 0 : index
    %339 = vector.load %arg11[%c1_129, %c0_130, %c0_131] : memref<3x1x64xf32, #tpu.memory_space<vmem>>, vector<1x1x64xf32>
    %340 = vector.shape_cast %339 : vector<1x1x64xf32> to vector<1x64xf32>
    %341 = vector.broadcast %340 : vector<1x64xf32> to vector<8x64xf32>
    %342 = arith.addf %338, %341 : vector<8x64xf32>
    %cst_132 = arith.constant 5.000000e-01 : f32
    %343 = vector.broadcast %cst_132 : f32 to vector<8x64xf32>
    %344 = arith.mulf %343, %342 : vector<8x64xf32>
    %cst_133 = arith.constant 4.471500e-02 : f32
    %345 = vector.broadcast %cst_133 : f32 to vector<8x64xf32>
    %346 = arith.mulf %345, %342 : vector<8x64xf32>
    %347 = arith.mulf %346, %342 : vector<8x64xf32>
    %348 = arith.mulf %347, %342 : vector<8x64xf32>
    %349 = arith.addf %342, %348 : vector<8x64xf32>
    %cst_134 = arith.constant 0.797884583 : f32
    %350 = vector.broadcast %cst_134 : f32 to vector<8x64xf32>
    %351 = arith.mulf %350, %349 : vector<8x64xf32>
    %352 = math.tanh %351 : vector<8x64xf32>
    %cst_135 = arith.constant 1.000000e+00 : f32
    %353 = vector.broadcast %cst_135 : f32 to vector<8x64xf32>
    %354 = arith.addf %353, %352 : vector<8x64xf32>
    %355 = arith.mulf %344, %354 : vector<8x64xf32>
    %c1_136 = arith.constant 1 : index
    %c0_137 = arith.constant 0 : index
    %c0_138 = arith.constant 0 : index
    %356 = vector.load %arg12[%c1_136, %c0_137, %c0_138] : memref<3x64x32xbf16, #tpu.memory_space<vmem>>, vector<1x64x32xbf16>
    %357 = vector.shape_cast %356 : vector<1x64x32xbf16> to vector<64x32xbf16>
    %358 = arith.truncf %355 : vector<8x64xf32> to vector<8x64xbf16>
    %cst_139 = arith.constant dense<0.000000e+00> : vector<8x32xf32>
    %359 = tpu.matmul %358, %357, %cst_139 {dimension_numbers = #tpu.dot_dimension_numbers<[1], [0], [0], [1], [0, 0, 1, 1], [], []>} : vector<8x64xbf16>, vector<64x32xbf16>, vector<8x32xf32> -> vector<8x32xf32>
    %c1_140 = arith.constant 1 : index
    %c0_141 = arith.constant 0 : index
    %c0_142 = arith.constant 0 : index
    %360 = vector.load %arg13[%c1_140, %c0_141, %c0_142] : memref<3x1x32xf32, #tpu.memory_space<vmem>>, vector<1x1x32xf32>
    %361 = vector.shape_cast %360 : vector<1x1x32xf32> to vector<1x32xf32>
    %362 = vector.broadcast %361 : vector<1x32xf32> to vector<8x32xf32>
    %363 = arith.addf %359, %362 : vector<8x32xf32>
    %364 = arith.addf %334, %363 : vector<8x32xf32>
    %c1_143 = arith.constant 1 : index
    %c0_144 = arith.constant 0 : index
    %c0_145 = arith.constant 0 : index
    %365 = vector.load %arg14[%c1_143, %c0_144, %c0_145] : memref<3x1x32xf32, #tpu.memory_space<vmem>>, vector<1x1x32xf32>
    %366 = vector.shape_cast %365 : vector<1x1x32xf32> to vector<1x32xf32>
    %c1_146 = arith.constant 1 : index
    %c0_147 = arith.constant 0 : index
    %c0_148 = arith.constant 0 : index
    %367 = vector.load %arg15[%c1_146, %c0_147, %c0_148] : memref<3x1x32xf32, #tpu.memory_space<vmem>>, vector<1x1x32xf32>
    %368 = vector.shape_cast %367 : vector<1x1x32xf32> to vector<1x32xf32>
    %cst_149 = arith.constant dense<0.000000e+00> : vector<8xf32>
    %369 = vector.multi_reduction <add>, %364, %cst_149 [1] : vector<8x32xf32> to vector<8xf32>
    %370 = vector.shape_cast %369 : vector<8xf32> to vector<8x1xf32>
    %cst_150 = arith.constant 3.200000e+01 : f32
    %371 = vector.broadcast %cst_150 : f32 to vector<8x1xf32>
    %372 = arith.divf %370, %371 : vector<8x1xf32>
    %373 = vector.broadcast %372 : vector<8x1xf32> to vector<8x32xf32>
    %374 = arith.subf %364, %373 : vector<8x32xf32>
    %375 = arith.mulf %374, %374 : vector<8x32xf32>
    %cst_151 = arith.constant dense<0.000000e+00> : vector<8xf32>
    %376 = vector.multi_reduction <add>, %375, %cst_151 [1] : vector<8x32xf32> to vector<8xf32>
    %377 = vector.shape_cast %376 : vector<8xf32> to vector<8x1xf32>
    %cst_152 = arith.constant 3.200000e+01 : f32
    %378 = vector.broadcast %cst_152 : f32 to vector<8x1xf32>
    %379 = arith.divf %377, %378 : vector<8x1xf32>
    %380 = vector.broadcast %372 : vector<8x1xf32> to vector<8x32xf32>
    %381 = arith.subf %364, %380 : vector<8x32xf32>
    %cst_153 = arith.constant 9.99999974E-6 : f32
    %382 = vector.broadcast %cst_153 : f32 to vector<8x1xf32>
    %383 = arith.addf %379, %382 : vector<8x1xf32>
    %384 = math.rsqrt %383 : vector<8x1xf32>
    %385 = vector.broadcast %384 : vector<8x1xf32> to vector<8x32xf32>
    %386 = arith.mulf %381, %385 : vector<8x32xf32>
    %387 = vector.broadcast %366 : vector<1x32xf32> to vector<8x32xf32>
    %388 = arith.mulf %386, %387 : vector<8x32xf32>
    %389 = vector.broadcast %368 : vector<1x32xf32> to vector<8x32xf32>
    %390 = arith.addf %388, %389 : vector<8x32xf32>
    %c2 = arith.constant 2 : index
    %c0_154 = arith.constant 0 : index
    %c0_155 = arith.constant 0 : index
    %391 = vector.load %arg4[%c2, %c0_154, %c0_155] : memref<3x32x96xbf16, #tpu.memory_space<vmem>>, vector<1x32x96xbf16>
    %392 = vector.shape_cast %391 : vector<1x32x96xbf16> to vector<32x96xbf16>
    %393 = arith.truncf %390 : vector<8x32xf32> to vector<8x32xbf16>
    %cst_156 = arith.constant dense<0.000000e+00> : vector<8x96xf32>
    %394 = tpu.matmul %393, %392, %cst_156 {dimension_numbers = #tpu.dot_dimension_numbers<[1], [0], [0], [1], [0, 0, 1, 1], [], []>} : vector<8x32xbf16>, vector<32x96xbf16>, vector<8x96xf32> -> vector<8x96xf32>
    %c2_157 = arith.constant 2 : index
    %c0_158 = arith.constant 0 : index
    %c0_159 = arith.constant 0 : index
    %395 = vector.load %arg5[%c2_157, %c0_158, %c0_159] : memref<3x1x96xf32, #tpu.memory_space<vmem>>, vector<1x1x96xf32>
    %396 = vector.shape_cast %395 : vector<1x1x96xf32> to vector<1x96xf32>
    %397 = vector.broadcast %396 : vector<1x96xf32> to vector<8x96xf32>
    %398 = arith.addf %394, %397 : vector<8x96xf32>
    %399 = vector.extract_strided_slice %398 {offsets = [0, 0], sizes = [8, 8], strides = [1, 1]} : vector<8x96xf32> to vector<8x8xf32>
    %400 = vector.extract_strided_slice %398 {offsets = [0, 32], sizes = [8, 8], strides = [1, 1]} : vector<8x96xf32> to vector<8x8xf32>
    %401 = vector.extract_strided_slice %398 {offsets = [0, 64], sizes = [8, 8], strides = [1, 1]} : vector<8x96xf32> to vector<8x8xf32>
    %cst_160 = arith.constant 0.353553385 : f32
    %402 = vector.broadcast %cst_160 : f32 to vector<8x8xf32>
    %403 = arith.mulf %399, %402 : vector<8x8xf32>
    %404 = arith.truncf %403 : vector<8x8xf32> to vector<8x8xbf16>
    %405 = arith.truncf %400 : vector<8x8xf32> to vector<8x8xbf16>
    %cst_161 = arith.constant dense<0.000000e+00> : vector<8x8xf32>
    %406 = tpu.matmul %404, %405, %cst_161 {dimension_numbers = #tpu.dot_dimension_numbers<[1], [1], [0], [0], [0, 0, 1, 0], [], []>} : vector<8x8xbf16>, vector<8x8xbf16>, vector<8x8xf32> -> vector<8x8xf32>
    %407 = vector.broadcast %6 : vector<1x8xf32> to vector<8x8xf32>
    %408 = arith.addf %406, %407 : vector<8x8xf32>
    %cst_162 = arith.constant dense<0xFF800000> : vector<8xf32>
    %409 = vector.multi_reduction <maximumf>, %408, %cst_162 [1] : vector<8x8xf32> to vector<8xf32>
    %410 = vector.shape_cast %409 : vector<8xf32> to vector<8x1xf32>
    %411 = vector.broadcast %410 : vector<8x1xf32> to vector<8x8xf32>
    %412 = arith.subf %408, %411 : vector<8x8xf32>
    %413 = math.exp %412 : vector<8x8xf32>
    %cst_163 = arith.constant dense<0.000000e+00> : vector<8xf32>
    %414 = vector.multi_reduction <add>, %413, %cst_163 [1] : vector<8x8xf32> to vector<8xf32>
    %415 = vector.shape_cast %414 : vector<8xf32> to vector<8x1xf32>
    %416 = tpu.reciprocal %415 {approx = true} : vector<8x1xf32> -> vector<8x1xf32>
    %417 = vector.broadcast %416 : vector<8x1xf32> to vector<8x8xf32>
    %418 = arith.mulf %413, %417 : vector<8x8xf32>
    %419 = arith.truncf %418 : vector<8x8xf32> to vector<8x8xbf16>
    %420 = arith.truncf %401 : vector<8x8xf32> to vector<8x8xbf16>
    %cst_164 = arith.constant dense<0.000000e+00> : vector<8x8xf32>
    %421 = tpu.matmul %419, %420, %cst_164 {dimension_numbers = #tpu.dot_dimension_numbers<[1], [0], [0], [1], [0, 0, 1, 1], [], []>} : vector<8x8xbf16>, vector<8x8xbf16>, vector<8x8xf32> -> vector<8x8xf32>
    %422 = vector.extract_strided_slice %398 {offsets = [0, 8], sizes = [8, 8], strides = [1, 1]} : vector<8x96xf32> to vector<8x8xf32>
    %423 = vector.extract_strided_slice %398 {offsets = [0, 40], sizes = [8, 8], strides = [1, 1]} : vector<8x96xf32> to vector<8x8xf32>
    %424 = vector.extract_strided_slice %398 {offsets = [0, 72], sizes = [8, 8], strides = [1, 1]} : vector<8x96xf32> to vector<8x8xf32>
    %cst_165 = arith.constant 0.353553385 : f32
    %425 = vector.broadcast %cst_165 : f32 to vector<8x8xf32>
    %426 = arith.mulf %422, %425 : vector<8x8xf32>
    %427 = arith.truncf %426 : vector<8x8xf32> to vector<8x8xbf16>
    %428 = arith.truncf %423 : vector<8x8xf32> to vector<8x8xbf16>
    %cst_166 = arith.constant dense<0.000000e+00> : vector<8x8xf32>
    %429 = tpu.matmul %427, %428, %cst_166 {dimension_numbers = #tpu.dot_dimension_numbers<[1], [1], [0], [0], [0, 0, 1, 0], [], []>} : vector<8x8xbf16>, vector<8x8xbf16>, vector<8x8xf32> -> vector<8x8xf32>
    %430 = vector.broadcast %6 : vector<1x8xf32> to vector<8x8xf32>
    %431 = arith.addf %429, %430 : vector<8x8xf32>
    %cst_167 = arith.constant dense<0xFF800000> : vector<8xf32>
    %432 = vector.multi_reduction <maximumf>, %431, %cst_167 [1] : vector<8x8xf32> to vector<8xf32>
    %433 = vector.shape_cast %432 : vector<8xf32> to vector<8x1xf32>
    %434 = vector.broadcast %433 : vector<8x1xf32> to vector<8x8xf32>
    %435 = arith.subf %431, %434 : vector<8x8xf32>
    %436 = math.exp %435 : vector<8x8xf32>
    %cst_168 = arith.constant dense<0.000000e+00> : vector<8xf32>
    %437 = vector.multi_reduction <add>, %436, %cst_168 [1] : vector<8x8xf32> to vector<8xf32>
    %438 = vector.shape_cast %437 : vector<8xf32> to vector<8x1xf32>
    %439 = tpu.reciprocal %438 {approx = true} : vector<8x1xf32> -> vector<8x1xf32>
    %440 = vector.broadcast %439 : vector<8x1xf32> to vector<8x8xf32>
    %441 = arith.mulf %436, %440 : vector<8x8xf32>
    %442 = arith.truncf %441 : vector<8x8xf32> to vector<8x8xbf16>
    %443 = arith.truncf %424 : vector<8x8xf32> to vector<8x8xbf16>
    %cst_169 = arith.constant dense<0.000000e+00> : vector<8x8xf32>
    %444 = tpu.matmul %442, %443, %cst_169 {dimension_numbers = #tpu.dot_dimension_numbers<[1], [0], [0], [1], [0, 0, 1, 1], [], []>} : vector<8x8xbf16>, vector<8x8xbf16>, vector<8x8xf32> -> vector<8x8xf32>
    %445 = vector.extract_strided_slice %398 {offsets = [0, 16], sizes = [8, 8], strides = [1, 1]} : vector<8x96xf32> to vector<8x8xf32>
    %446 = vector.extract_strided_slice %398 {offsets = [0, 48], sizes = [8, 8], strides = [1, 1]} : vector<8x96xf32> to vector<8x8xf32>
    %447 = vector.extract_strided_slice %398 {offsets = [0, 80], sizes = [8, 8], strides = [1, 1]} : vector<8x96xf32> to vector<8x8xf32>
    %cst_170 = arith.constant 0.353553385 : f32
    %448 = vector.broadcast %cst_170 : f32 to vector<8x8xf32>
    %449 = arith.mulf %445, %448 : vector<8x8xf32>
    %450 = arith.truncf %449 : vector<8x8xf32> to vector<8x8xbf16>
    %451 = arith.truncf %446 : vector<8x8xf32> to vector<8x8xbf16>
    %cst_171 = arith.constant dense<0.000000e+00> : vector<8x8xf32>
    %452 = tpu.matmul %450, %451, %cst_171 {dimension_numbers = #tpu.dot_dimension_numbers<[1], [1], [0], [0], [0, 0, 1, 0], [], []>} : vector<8x8xbf16>, vector<8x8xbf16>, vector<8x8xf32> -> vector<8x8xf32>
    %453 = vector.broadcast %6 : vector<1x8xf32> to vector<8x8xf32>
    %454 = arith.addf %452, %453 : vector<8x8xf32>
    %cst_172 = arith.constant dense<0xFF800000> : vector<8xf32>
    %455 = vector.multi_reduction <maximumf>, %454, %cst_172 [1] : vector<8x8xf32> to vector<8xf32>
    %456 = vector.shape_cast %455 : vector<8xf32> to vector<8x1xf32>
    %457 = vector.broadcast %456 : vector<8x1xf32> to vector<8x8xf32>
    %458 = arith.subf %454, %457 : vector<8x8xf32>
    %459 = math.exp %458 : vector<8x8xf32>
    %cst_173 = arith.constant dense<0.000000e+00> : vector<8xf32>
    %460 = vector.multi_reduction <add>, %459, %cst_173 [1] : vector<8x8xf32> to vector<8xf32>
    %461 = vector.shape_cast %460 : vector<8xf32> to vector<8x1xf32>
    %462 = tpu.reciprocal %461 {approx = true} : vector<8x1xf32> -> vector<8x1xf32>
    %463 = vector.broadcast %462 : vector<8x1xf32> to vector<8x8xf32>
    %464 = arith.mulf %459, %463 : vector<8x8xf32>
    %465 = arith.truncf %464 : vector<8x8xf32> to vector<8x8xbf16>
    %466 = arith.truncf %447 : vector<8x8xf32> to vector<8x8xbf16>
    %cst_174 = arith.constant dense<0.000000e+00> : vector<8x8xf32>
    %467 = tpu.matmul %465, %466, %cst_174 {dimension_numbers = #tpu.dot_dimension_numbers<[1], [0], [0], [1], [0, 0, 1, 1], [], []>} : vector<8x8xbf16>, vector<8x8xbf16>, vector<8x8xf32> -> vector<8x8xf32>
    %468 = vector.extract_strided_slice %398 {offsets = [0, 24], sizes = [8, 8], strides = [1, 1]} : vector<8x96xf32> to vector<8x8xf32>
    %469 = vector.extract_strided_slice %398 {offsets = [0, 56], sizes = [8, 8], strides = [1, 1]} : vector<8x96xf32> to vector<8x8xf32>
    %470 = vector.extract_strided_slice %398 {offsets = [0, 88], sizes = [8, 8], strides = [1, 1]} : vector<8x96xf32> to vector<8x8xf32>
    %cst_175 = arith.constant 0.353553385 : f32
    %471 = vector.broadcast %cst_175 : f32 to vector<8x8xf32>
    %472 = arith.mulf %468, %471 : vector<8x8xf32>
    %473 = arith.truncf %472 : vector<8x8xf32> to vector<8x8xbf16>
    %474 = arith.truncf %469 : vector<8x8xf32> to vector<8x8xbf16>
    %cst_176 = arith.constant dense<0.000000e+00> : vector<8x8xf32>
    %475 = tpu.matmul %473, %474, %cst_176 {dimension_numbers = #tpu.dot_dimension_numbers<[1], [1], [0], [0], [0, 0, 1, 0], [], []>} : vector<8x8xbf16>, vector<8x8xbf16>, vector<8x8xf32> -> vector<8x8xf32>
    %476 = vector.broadcast %6 : vector<1x8xf32> to vector<8x8xf32>
    %477 = arith.addf %475, %476 : vector<8x8xf32>
    %cst_177 = arith.constant dense<0xFF800000> : vector<8xf32>
    %478 = vector.multi_reduction <maximumf>, %477, %cst_177 [1] : vector<8x8xf32> to vector<8xf32>
    %479 = vector.shape_cast %478 : vector<8xf32> to vector<8x1xf32>
    %480 = vector.broadcast %479 : vector<8x1xf32> to vector<8x8xf32>
    %481 = arith.subf %477, %480 : vector<8x8xf32>
    %482 = math.exp %481 : vector<8x8xf32>
    %cst_178 = arith.constant dense<0.000000e+00> : vector<8xf32>
    %483 = vector.multi_reduction <add>, %482, %cst_178 [1] : vector<8x8xf32> to vector<8xf32>
    %484 = vector.shape_cast %483 : vector<8xf32> to vector<8x1xf32>
    %485 = tpu.reciprocal %484 {approx = true} : vector<8x1xf32> -> vector<8x1xf32>
    %486 = vector.broadcast %485 : vector<8x1xf32> to vector<8x8xf32>
    %487 = arith.mulf %482, %486 : vector<8x8xf32>
    %488 = arith.truncf %487 : vector<8x8xf32> to vector<8x8xbf16>
    %489 = arith.truncf %470 : vector<8x8xf32> to vector<8x8xbf16>
    %cst_179 = arith.constant dense<0.000000e+00> : vector<8x8xf32>
    %490 = tpu.matmul %488, %489, %cst_179 {dimension_numbers = #tpu.dot_dimension_numbers<[1], [0], [0], [1], [0, 0, 1, 1], [], []>} : vector<8x8xbf16>, vector<8x8xbf16>, vector<8x8xf32> -> vector<8x8xf32>
    %491 = tpu.concatenate %421, %444, %467, %490 in 1 : vector<8x8xf32>, vector<8x8xf32>, vector<8x8xf32>, vector<8x8xf32> -> vector<8x32xf32>
    %c2_180 = arith.constant 2 : index
    %c0_181 = arith.constant 0 : index
    %c0_182 = arith.constant 0 : index
    %492 = vector.load %arg6[%c2_180, %c0_181, %c0_182] : memref<3x32x32xbf16, #tpu.memory_space<vmem>>, vector<1x32x32xbf16>
    %493 = vector.shape_cast %492 : vector<1x32x32xbf16> to vector<32x32xbf16>
    %494 = arith.truncf %491 : vector<8x32xf32> to vector<8x32xbf16>
    %cst_183 = arith.constant dense<0.000000e+00> : vector<8x32xf32>
    %495 = tpu.matmul %494, %493, %cst_183 {dimension_numbers = #tpu.dot_dimension_numbers<[1], [0], [0], [1], [0, 0, 1, 1], [], []>} : vector<8x32xbf16>, vector<32x32xbf16>, vector<8x32xf32> -> vector<8x32xf32>
    %c2_184 = arith.constant 2 : index
    %c0_185 = arith.constant 0 : index
    %c0_186 = arith.constant 0 : index
    %496 = vector.load %arg7[%c2_184, %c0_185, %c0_186] : memref<3x1x32xf32, #tpu.memory_space<vmem>>, vector<1x1x32xf32>
    %497 = vector.shape_cast %496 : vector<1x1x32xf32> to vector<1x32xf32>
    %498 = vector.broadcast %497 : vector<1x32xf32> to vector<8x32xf32>
    %499 = arith.addf %495, %498 : vector<8x32xf32>
    %500 = arith.addf %390, %499 : vector<8x32xf32>
    %c2_187 = arith.constant 2 : index
    %c0_188 = arith.constant 0 : index
    %c0_189 = arith.constant 0 : index
    %501 = vector.load %arg8[%c2_187, %c0_188, %c0_189] : memref<3x1x32xf32, #tpu.memory_space<vmem>>, vector<1x1x32xf32>
    %502 = vector.shape_cast %501 : vector<1x1x32xf32> to vector<1x32xf32>
    %c2_190 = arith.constant 2 : index
    %c0_191 = arith.constant 0 : index
    %c0_192 = arith.constant 0 : index
    %503 = vector.load %arg9[%c2_190, %c0_191, %c0_192] : memref<3x1x32xf32, #tpu.memory_space<vmem>>, vector<1x1x32xf32>
    %504 = vector.shape_cast %503 : vector<1x1x32xf32> to vector<1x32xf32>
    %cst_193 = arith.constant dense<0.000000e+00> : vector<8xf32>
    %505 = vector.multi_reduction <add>, %500, %cst_193 [1] : vector<8x32xf32> to vector<8xf32>
    %506 = vector.shape_cast %505 : vector<8xf32> to vector<8x1xf32>
    %cst_194 = arith.constant 3.200000e+01 : f32
    %507 = vector.broadcast %cst_194 : f32 to vector<8x1xf32>
    %508 = arith.divf %506, %507 : vector<8x1xf32>
    %509 = vector.broadcast %508 : vector<8x1xf32> to vector<8x32xf32>
    %510 = arith.subf %500, %509 : vector<8x32xf32>
    %511 = arith.mulf %510, %510 : vector<8x32xf32>
    %cst_195 = arith.constant dense<0.000000e+00> : vector<8xf32>
    %512 = vector.multi_reduction <add>, %511, %cst_195 [1] : vector<8x32xf32> to vector<8xf32>
    %513 = vector.shape_cast %512 : vector<8xf32> to vector<8x1xf32>
    %cst_196 = arith.constant 3.200000e+01 : f32
    %514 = vector.broadcast %cst_196 : f32 to vector<8x1xf32>
    %515 = arith.divf %513, %514 : vector<8x1xf32>
    %516 = vector.broadcast %508 : vector<8x1xf32> to vector<8x32xf32>
    %517 = arith.subf %500, %516 : vector<8x32xf32>
    %cst_197 = arith.constant 9.99999974E-6 : f32
    %518 = vector.broadcast %cst_197 : f32 to vector<8x1xf32>
    %519 = arith.addf %515, %518 : vector<8x1xf32>
    %520 = math.rsqrt %519 : vector<8x1xf32>
    %521 = vector.broadcast %520 : vector<8x1xf32> to vector<8x32xf32>
    %522 = arith.mulf %517, %521 : vector<8x32xf32>
    %523 = vector.broadcast %502 : vector<1x32xf32> to vector<8x32xf32>
    %524 = arith.mulf %522, %523 : vector<8x32xf32>
    %525 = vector.broadcast %504 : vector<1x32xf32> to vector<8x32xf32>
    %526 = arith.addf %524, %525 : vector<8x32xf32>
    %c2_198 = arith.constant 2 : index
    %c0_199 = arith.constant 0 : index
    %c0_200 = arith.constant 0 : index
    %527 = vector.load %arg10[%c2_198, %c0_199, %c0_200] : memref<3x32x64xbf16, #tpu.memory_space<vmem>>, vector<1x32x64xbf16>
    %528 = vector.shape_cast %527 : vector<1x32x64xbf16> to vector<32x64xbf16>
    %529 = arith.truncf %526 : vector<8x32xf32> to vector<8x32xbf16>
    %cst_201 = arith.constant dense<0.000000e+00> : vector<8x64xf32>
    %530 = tpu.matmul %529, %528, %cst_201 {dimension_numbers = #tpu.dot_dimension_numbers<[1], [0], [0], [1], [0, 0, 1, 1], [], []>} : vector<8x32xbf16>, vector<32x64xbf16>, vector<8x64xf32> -> vector<8x64xf32>
    %c2_202 = arith.constant 2 : index
    %c0_203 = arith.constant 0 : index
    %c0_204 = arith.constant 0 : index
    %531 = vector.load %arg11[%c2_202, %c0_203, %c0_204] : memref<3x1x64xf32, #tpu.memory_space<vmem>>, vector<1x1x64xf32>
    %532 = vector.shape_cast %531 : vector<1x1x64xf32> to vector<1x64xf32>
    %533 = vector.broadcast %532 : vector<1x64xf32> to vector<8x64xf32>
    %534 = arith.addf %530, %533 : vector<8x64xf32>
    %cst_205 = arith.constant 5.000000e-01 : f32
    %535 = vector.broadcast %cst_205 : f32 to vector<8x64xf32>
    %536 = arith.mulf %535, %534 : vector<8x64xf32>
    %cst_206 = arith.constant 4.471500e-02 : f32
    %537 = vector.broadcast %cst_206 : f32 to vector<8x64xf32>
    %538 = arith.mulf %537, %534 : vector<8x64xf32>
    %539 = arith.mulf %538, %534 : vector<8x64xf32>
    %540 = arith.mulf %539, %534 : vector<8x64xf32>
    %541 = arith.addf %534, %540 : vector<8x64xf32>
    %cst_207 = arith.constant 0.797884583 : f32
    %542 = vector.broadcast %cst_207 : f32 to vector<8x64xf32>
    %543 = arith.mulf %542, %541 : vector<8x64xf32>
    %544 = math.tanh %543 : vector<8x64xf32>
    %cst_208 = arith.constant 1.000000e+00 : f32
    %545 = vector.broadcast %cst_208 : f32 to vector<8x64xf32>
    %546 = arith.addf %545, %544 : vector<8x64xf32>
    %547 = arith.mulf %536, %546 : vector<8x64xf32>
    %c2_209 = arith.constant 2 : index
    %c0_210 = arith.constant 0 : index
    %c0_211 = arith.constant 0 : index
    %548 = vector.load %arg12[%c2_209, %c0_210, %c0_211] : memref<3x64x32xbf16, #tpu.memory_space<vmem>>, vector<1x64x32xbf16>
    %549 = vector.shape_cast %548 : vector<1x64x32xbf16> to vector<64x32xbf16>
    %550 = arith.truncf %547 : vector<8x64xf32> to vector<8x64xbf16>
    %cst_212 = arith.constant dense<0.000000e+00> : vector<8x32xf32>
    %551 = tpu.matmul %550, %549, %cst_212 {dimension_numbers = #tpu.dot_dimension_numbers<[1], [0], [0], [1], [0, 0, 1, 1], [], []>} : vector<8x64xbf16>, vector<64x32xbf16>, vector<8x32xf32> -> vector<8x32xf32>
    %c2_213 = arith.constant 2 : index
    %c0_214 = arith.constant 0 : index
    %c0_215 = arith.constant 0 : index
    %552 = vector.load %arg13[%c2_213, %c0_214, %c0_215] : memref<3x1x32xf32, #tpu.memory_space<vmem>>, vector<1x1x32xf32>
    %553 = vector.shape_cast %552 : vector<1x1x32xf32> to vector<1x32xf32>
    %554 = vector.broadcast %553 : vector<1x32xf32> to vector<8x32xf32>
    %555 = arith.addf %551, %554 : vector<8x32xf32>
    %556 = arith.addf %526, %555 : vector<8x32xf32>
    %c2_216 = arith.constant 2 : index
    %c0_217 = arith.constant 0 : index
    %c0_218 = arith.constant 0 : index
    %557 = vector.load %arg14[%c2_216, %c0_217, %c0_218] : memref<3x1x32xf32, #tpu.memory_space<vmem>>, vector<1x1x32xf32>
    %558 = vector.shape_cast %557 : vector<1x1x32xf32> to vector<1x32xf32>
    %c2_219 = arith.constant 2 : index
    %c0_220 = arith.constant 0 : index
    %c0_221 = arith.constant 0 : index
    %559 = vector.load %arg15[%c2_219, %c0_220, %c0_221] : memref<3x1x32xf32, #tpu.memory_space<vmem>>, vector<1x1x32xf32>
    %560 = vector.shape_cast %559 : vector<1x1x32xf32> to vector<1x32xf32>
    %cst_222 = arith.constant dense<0.000000e+00> : vector<8xf32>
    %561 = vector.multi_reduction <add>, %556, %cst_222 [1] : vector<8x32xf32> to vector<8xf32>
    %562 = vector.shape_cast %561 : vector<8xf32> to vector<8x1xf32>
    %cst_223 = arith.constant 3.200000e+01 : f32
    %563 = vector.broadcast %cst_223 : f32 to vector<8x1xf32>
    %564 = arith.divf %562, %563 : vector<8x1xf32>
    %565 = vector.broadcast %564 : vector<8x1xf32> to vector<8x32xf32>
    %566 = arith.subf %556, %565 : vector<8x32xf32>
    %567 = arith.mulf %566, %566 : vector<8x32xf32>
    %cst_224 = arith.constant dense<0.000000e+00> : vector<8xf32>
    %568 = vector.multi_reduction <add>, %567, %cst_224 [1] : vector<8x32xf32> to vector<8xf32>
    %569 = vector.shape_cast %568 : vector<8xf32> to vector<8x1xf32>
    %cst_225 = arith.constant 3.200000e+01 : f32
    %570 = vector.broadcast %cst_225 : f32 to vector<8x1xf32>
    %571 = arith.divf %569, %570 : vector<8x1xf32>
    %572 = vector.broadcast %564 : vector<8x1xf32> to vector<8x32xf32>
    %573 = arith.subf %556, %572 : vector<8x32xf32>
    %cst_226 = arith.constant 9.99999974E-6 : f32
    %574 = vector.broadcast %cst_226 : f32 to vector<8x1xf32>
    %575 = arith.addf %571, %574 : vector<8x1xf32>
    %576 = math.rsqrt %575 : vector<8x1xf32>
    %577 = vector.broadcast %576 : vector<8x1xf32> to vector<8x32xf32>
    %578 = arith.mulf %573, %577 : vector<8x32xf32>
    %579 = vector.broadcast %558 : vector<1x32xf32> to vector<8x32xf32>
    %580 = arith.mulf %578, %579 : vector<8x32xf32>
    %581 = vector.broadcast %560 : vector<1x32xf32> to vector<8x32xf32>
    %582 = arith.addf %580, %581 : vector<8x32xf32>
    %c0_227 = arith.constant 0 : index
    %c0_228 = arith.constant 0 : index
    %583 = vector.load %arg16[%c0_227, %c0_228] : memref<32x32xbf16, #tpu.memory_space<vmem>>, vector<32x32xbf16>
    %584 = arith.truncf %582 : vector<8x32xf32> to vector<8x32xbf16>
    %cst_229 = arith.constant dense<0.000000e+00> : vector<8x32xf32>
    %585 = tpu.matmul %584, %583, %cst_229 {dimension_numbers = #tpu.dot_dimension_numbers<[1], [0], [0], [1], [0, 0, 1, 1], [], []>} : vector<8x32xbf16>, vector<32x32xbf16>, vector<8x32xf32> -> vector<8x32xf32>
    %c0_230 = arith.constant 0 : index
    %c0_231 = arith.constant 0 : index
    %586 = vector.load %arg17[%c0_230, %c0_231] : memref<1x32xf32, #tpu.memory_space<vmem>>, vector<1x32xf32>
    %587 = vector.broadcast %586 : vector<1x32xf32> to vector<8x32xf32>
    %588 = arith.addf %585, %587 : vector<8x32xf32>
    %c0_232 = arith.constant 0 : index
    %c0_233 = arith.constant 0 : index
    %c0_234 = arith.constant 0 : index
    %589 = vector.load %arg28[%c0_232, %c0_233, %c0_234] : memref<1x8x32xf32, #tpu.memory_space<vmem>>, vector<1x8x32xf32>
    %590 = vector.shape_cast %589 : vector<1x8x32xf32> to vector<8x32xf32>
    %591 = vector.shape_cast %588 : vector<8x32xf32> to vector<1x8x32xf32>
    tpu.vector_store %arg28[%c0_232, %c0_233, %c0_234], %591 {strides = array<i32>} : memref<1x8x32xf32, #tpu.memory_space<vmem>>, vector<1x8x32xf32>,
    %c0_235 = arith.constant 0 : index
    %c0_236 = arith.constant 0 : index
    %592 = vector.load %arg18[%c0_235, %c0_236] : memref<32x256xbf16, #tpu.memory_space<vmem>>, vector<32x256xbf16>
    %593 = arith.truncf %588 : vector<8x32xf32> to vector<8x32xbf16>
    %cst_237 = arith.constant dense<0.000000e+00> : vector<8x256xf32>
    %594 = tpu.matmul %593, %592, %cst_237 {dimension_numbers = #tpu.dot_dimension_numbers<[1], [0], [0], [1], [0, 0, 1, 1], [], []>} : vector<8x32xbf16>, vector<32x256xbf16>, vector<8x256xf32> -> vector<8x256xf32>
    %c0_238 = arith.constant 0 : index
    %c0_239 = arith.constant 0 : index
    %595 = vector.load %arg19[%c0_238, %c0_239] : memref<1x256xf32, #tpu.memory_space<vmem>>, vector<1x256xf32>
    %596 = vector.broadcast %595 : vector<1x256xf32> to vector<8x256xf32>
    %597 = arith.addf %594, %596 : vector<8x256xf32>
    %c0_240 = arith.constant 0 : index
    %c0_241 = arith.constant 0 : index
    %598 = vector.load %arg20[%c0_240, %c0_241] : memref<1x256xf32, #tpu.memory_space<vmem>>, vector<1x256xf32>
    %c0_242 = arith.constant 0 : index
    %c0_243 = arith.constant 0 : index
    %599 = vector.load %arg21[%c0_242, %c0_243] : memref<1x256xf32, #tpu.memory_space<vmem>>, vector<1x256xf32>
    %cst_244 = arith.constant dense<0.000000e+00> : vector<8xf32>
    %600 = vector.multi_reduction <add>, %597, %cst_244 [1] : vector<8x256xf32> to vector<8xf32>
    %601 = vector.shape_cast %600 : vector<8xf32> to vector<8x1xf32>
    %cst_245 = arith.constant 2.560000e+02 : f32
    %602 = vector.broadcast %cst_245 : f32 to vector<8x1xf32>
    %603 = arith.divf %601, %602 : vector<8x1xf32>
    %604 = vector.broadcast %603 : vector<8x1xf32> to vector<8x256xf32>
    %605 = arith.subf %597, %604 : vector<8x256xf32>
    %606 = arith.mulf %605, %605 : vector<8x256xf32>
    %cst_246 = arith.constant dense<0.000000e+00> : vector<8xf32>
    %607 = vector.multi_reduction <add>, %606, %cst_246 [1] : vector<8x256xf32> to vector<8xf32>
    %608 = vector.shape_cast %607 : vector<8xf32> to vector<8x1xf32>
    %cst_247 = arith.constant 2.560000e+02 : f32
    %609 = vector.broadcast %cst_247 : f32 to vector<8x1xf32>
    %610 = arith.divf %608, %609 : vector<8x1xf32>
    %611 = vector.broadcast %603 : vector<8x1xf32> to vector<8x256xf32>
    %612 = arith.subf %597, %611 : vector<8x256xf32>
    %cst_248 = arith.constant 9.99999974E-6 : f32
    %613 = vector.broadcast %cst_248 : f32 to vector<8x1xf32>
    %614 = arith.addf %610, %613 : vector<8x1xf32>
    %615 = math.rsqrt %614 : vector<8x1xf32>
    %616 = vector.broadcast %615 : vector<8x1xf32> to vector<8x256xf32>
    %617 = arith.mulf %612, %616 : vector<8x256xf32>
    %618 = vector.broadcast %598 : vector<1x256xf32> to vector<8x256xf32>
    %619 = arith.mulf %617, %618 : vector<8x256xf32>
    %620 = vector.broadcast %599 : vector<1x256xf32> to vector<8x256xf32>
    %621 = arith.addf %619, %620 : vector<8x256xf32>
    %cst_249 = arith.constant 5.000000e-01 : f32
    %622 = vector.broadcast %cst_249 : f32 to vector<8x256xf32>
    %623 = arith.mulf %622, %621 : vector<8x256xf32>
    %cst_250 = arith.constant 4.471500e-02 : f32
    %624 = vector.broadcast %cst_250 : f32 to vector<8x256xf32>
    %625 = arith.mulf %624, %621 : vector<8x256xf32>
    %626 = arith.mulf %625, %621 : vector<8x256xf32>
    %627 = arith.mulf %626, %621 : vector<8x256xf32>
    %628 = arith.addf %621, %627 : vector<8x256xf32>
    %cst_251 = arith.constant 0.797884583 : f32
    %629 = vector.broadcast %cst_251 : f32 to vector<8x256xf32>
    %630 = arith.mulf %629, %628 : vector<8x256xf32>
    %631 = math.tanh %630 : vector<8x256xf32>
    %cst_252 = arith.constant 1.000000e+00 : f32
    %632 = vector.broadcast %cst_252 : f32 to vector<8x256xf32>
    %633 = arith.addf %632, %631 : vector<8x256xf32>
    %634 = arith.mulf %623, %633 : vector<8x256xf32>
    %c0_253 = arith.constant 0 : index
    %c0_254 = arith.constant 0 : index
    %635 = vector.load %arg22[%c0_253, %c0_254] : memref<256x128xbf16, #tpu.memory_space<vmem>>, vector<256x128xbf16>
    %636 = arith.truncf %634 : vector<8x256xf32> to vector<8x256xbf16>
    %cst_255 = arith.constant dense<0.000000e+00> : vector<8x128xf32>
    %637 = tpu.matmul %636, %635, %cst_255 {dimension_numbers = #tpu.dot_dimension_numbers<[1], [0], [0], [1], [0, 0, 1, 1], [], []>} : vector<8x256xbf16>, vector<256x128xbf16>, vector<8x128xf32> -> vector<8x128xf32>
    %c0_256 = arith.constant 0 : index
    %c0_257 = arith.constant 0 : index
    %638 = vector.load %arg23[%c0_256, %c0_257] : memref<1x128xf32, #tpu.memory_space<vmem>>, vector<1x128xf32>
    %639 = vector.broadcast %638 : vector<1x128xf32> to vector<8x128xf32>
    %640 = arith.addf %637, %639 : vector<8x128xf32>
    %c0_258 = arith.constant 0 : index
    %c0_259 = arith.constant 0 : index
    %641 = vector.load %arg24[%c0_258, %c0_259] : memref<1x128xf32, #tpu.memory_space<vmem>>, vector<1x128xf32>
    %c0_260 = arith.constant 0 : index
    %c0_261 = arith.constant 0 : index
    %642 = vector.load %arg25[%c0_260, %c0_261] : memref<1x128xf32, #tpu.memory_space<vmem>>, vector<1x128xf32>
    %cst_262 = arith.constant dense<0.000000e+00> : vector<8xf32>
    %643 = vector.multi_reduction <add>, %640, %cst_262 [1] : vector<8x128xf32> to vector<8xf32>
    %644 = vector.shape_cast %643 : vector<8xf32> to vector<8x1xf32>
    %cst_263 = arith.constant 1.280000e+02 : f32
    %645 = vector.broadcast %cst_263 : f32 to vector<8x1xf32>
    %646 = arith.divf %644, %645 : vector<8x1xf32>
    %647 = vector.broadcast %646 : vector<8x1xf32> to vector<8x128xf32>
    %648 = arith.subf %640, %647 : vector<8x128xf32>
    %649 = arith.mulf %648, %648 : vector<8x128xf32>
    %cst_264 = arith.constant dense<0.000000e+00> : vector<8xf32>
    %650 = vector.multi_reduction <add>, %649, %cst_264 [1] : vector<8x128xf32> to vector<8xf32>
    %651 = vector.shape_cast %650 : vector<8xf32> to vector<8x1xf32>
    %cst_265 = arith.constant 1.280000e+02 : f32
    %652 = vector.broadcast %cst_265 : f32 to vector<8x1xf32>
    %653 = arith.divf %651, %652 : vector<8x1xf32>
    %654 = vector.broadcast %646 : vector<8x1xf32> to vector<8x128xf32>
    %655 = arith.subf %640, %654 : vector<8x128xf32>
    %cst_266 = arith.constant 9.99999974E-6 : f32
    %656 = vector.broadcast %cst_266 : f32 to vector<8x1xf32>
    %657 = arith.addf %653, %656 : vector<8x1xf32>
    %658 = math.rsqrt %657 : vector<8x1xf32>
    %659 = vector.broadcast %658 : vector<8x1xf32> to vector<8x128xf32>
    %660 = arith.mulf %655, %659 : vector<8x128xf32>
    %661 = vector.broadcast %641 : vector<1x128xf32> to vector<8x128xf32>
    %662 = arith.mulf %660, %661 : vector<8x128xf32>
    %663 = vector.broadcast %642 : vector<1x128xf32> to vector<8x128xf32>
    %664 = arith.addf %662, %663 : vector<8x128xf32>
    %cst_267 = arith.constant 5.000000e-01 : f32
    %665 = vector.broadcast %cst_267 : f32 to vector<8x128xf32>
    %666 = arith.mulf %665, %664 : vector<8x128xf32>
    %cst_268 = arith.constant 4.471500e-02 : f32
    %667 = vector.broadcast %cst_268 : f32 to vector<8x128xf32>
    %668 = arith.mulf %667, %664 : vector<8x128xf32>
    %669 = arith.mulf %668, %664 : vector<8x128xf32>
    %670 = arith.mulf %669, %664 : vector<8x128xf32>
    %671 = arith.addf %664, %670 : vector<8x128xf32>
    %cst_269 = arith.constant 0.797884583 : f32
    %672 = vector.broadcast %cst_269 : f32 to vector<8x128xf32>
    %673 = arith.mulf %672, %671 : vector<8x128xf32>
    %674 = math.tanh %673 : vector<8x128xf32>
    %cst_270 = arith.constant 1.000000e+00 : f32
    %675 = vector.broadcast %cst_270 : f32 to vector<8x128xf32>
    %676 = arith.addf %675, %674 : vector<8x128xf32>
    %677 = arith.mulf %666, %676 : vector<8x128xf32>
    %c0_271 = arith.constant 0 : index
    %c0_272 = arith.constant 0 : index
    %678 = vector.load %arg26[%c0_271, %c0_272] : memref<128x64xbf16, #tpu.memory_space<vmem>>, vector<128x64xbf16>
    %679 = arith.truncf %677 : vector<8x128xf32> to vector<8x128xbf16>
    %cst_273 = arith.constant dense<0.000000e+00> : vector<8x64xf32>
    %680 = tpu.matmul %679, %678, %cst_273 {dimension_numbers = #tpu.dot_dimension_numbers<[1], [0], [0], [1], [0, 0, 1, 1], [], []>} : vector<8x128xbf16>, vector<128x64xbf16>, vector<8x64xf32> -> vector<8x64xf32>
    %c0_274 = arith.constant 0 : index
    %c0_275 = arith.constant 0 : index
    %681 = vector.load %arg27[%c0_274, %c0_275] : memref<1x64xf32, #tpu.memory_space<vmem>>, vector<1x64xf32>
    %682 = vector.broadcast %681 : vector<1x64xf32> to vector<8x64xf32>
    %683 = arith.addf %680, %682 : vector<8x64xf32>
    %c0_276 = arith.constant 0 : index
    %c0_277 = arith.constant 0 : index
    %c0_278 = arith.constant 0 : index
    %684 = vector.load %arg29[%c0_276, %c0_277, %c0_278] : memref<1x8x64xf32, #tpu.memory_space<vmem>>, vector<1x8x64xf32>
    %685 = vector.shape_cast %684 : vector<1x8x64xf32> to vector<8x64xf32>
    %686 = vector.shape_cast %683 : vector<8x64xf32> to vector<1x8x64xf32>
    tpu.vector_store %arg29[%c0_276, %c0_277, %c0_278], %686 {strides = array<i32>} : memref<1x8x64xf32, #tpu.memory_space<vmem>>, vector<1x8x64xf32>,
    %687 = arith.mulf %683, %683 : vector<8x64xf32>
    %cst_279 = arith.constant dense<0.000000e+00> : vector<8xf32>
    %688 = vector.multi_reduction <add>, %687, %cst_279 [1] : vector<8x64xf32> to vector<8xf32>
    %689 = vector.shape_cast %688 : vector<8xf32> to vector<8x1xf32>
    %cst_280 = arith.constant 9.99999996E-13 : f32
    %690 = vector.broadcast %cst_280 : f32 to vector<8x1xf32>
    %691 = arith.addf %689, %690 : vector<8x1xf32>
    %692 = math.rsqrt %691 : vector<8x1xf32>
    %693 = vector.broadcast %692 : vector<8x1xf32> to vector<8x64xf32>
    %694 = arith.mulf %683, %693 : vector<8x64xf32>
    %cst_281 = arith.constant dense<0.000000e+00> : vector<8x8xf32>
    %695 = tpu.matmul %694, %694, %cst_281 {dimension_numbers = #tpu.dot_dimension_numbers<[1], [1], [0], [0], [0, 0, 1, 0], [], []>} : vector<8x64xf32>, vector<8x64xf32>, vector<8x8xf32> -> vector<8x8xf32>
    %cst_282 = arith.constant 1.000000e+00 : f32
    %696 = vector.broadcast %cst_282 : f32 to vector<8x8xf32>
    %697 = arith.addf %695, %696 : vector<8x8xf32>
    %cst_283 = arith.constant 5.000000e-01 : f32
    %698 = vector.broadcast %cst_283 : f32 to vector<8x8xf32>
    %699 = arith.mulf %697, %698 : vector<8x8xf32>
    %cst_284 = arith.constant 0.000000e+00 : f32
    %cst_285 = arith.constant 1.000000e+00 : f32
    %700 = vector.broadcast %cst_284 : f32 to vector<8x8xf32>
    %701 = arith.maximumf %700, %699 : vector<8x8xf32>
    %702 = vector.broadcast %cst_285 : f32 to vector<8x8xf32>
    %703 = arith.minimumf %702, %701 : vector<8x8xf32>
    %c0_286 = arith.constant 0 : index
    %c0_287 = arith.constant 0 : index
    %c0_288 = arith.constant 0 : index
    %704 = vector.load %arg30[%c0_286, %c0_287, %c0_288] : memref<1x8x8xf32, #tpu.memory_space<vmem>>, vector<1x8x8xf32>
    %705 = vector.shape_cast %704 : vector<1x8x8xf32> to vector<8x8xf32>
    %706 = vector.shape_cast %703 : vector<8x8xf32> to vector<1x8x8xf32>
    tpu.vector_store %arg30[%c0_286, %c0_287, %c0_288], %706 {strides = array<i32>} : memref<1x8x8xf32, #tpu.memory_space<vmem>>, vector<1x8x8xf32>,
    return
  }
  func.func @transform_0(%arg0: i32) -> (i32, i32, i32) {
    %c0_i32 = arith.constant 0 : i32
    %c0_i32_0 = arith.constant 0 : i32
    %c0_i32_1 = arith.constant 0 : i32
    return %arg0, %c0_i32, %c0_i32_0 : i32, i32, i32
  }
  func.func @transform_1(%arg0: i32) -> (i32, i32, i32) {
    %c0_i32 = arith.constant 0 : i32
    %c0_i32_0 = arith.constant 0 : i32
    %c0_i32_1 = arith.constant 0 : i32
    %c0_i32_2 = arith.constant 0 : i32
    return %c0_i32, %c0_i32_0, %c0_i32_1 : i32, i32, i32
  }
  func.func @transform_2(%arg0: i32) -> (i32, i32, i32) {
    %c0_i32 = arith.constant 0 : i32
    %c0_i32_0 = arith.constant 0 : i32
    %c0_i32_1 = arith.constant 0 : i32
    return %arg0, %c0_i32, %c0_i32_0 : i32, i32, i32
  }
  func.func @transform_3(%arg0: i32) -> (i32, i32, i32) {
    %c0_i32 = arith.constant 0 : i32
    %c0_i32_0 = arith.constant 0 : i32
    %c0_i32_1 = arith.constant 0 : i32
    %c0_i32_2 = arith.constant 0 : i32
    return %c0_i32, %c0_i32_0, %c0_i32_1 : i32, i32, i32
  }
  func.func @transform_4(%arg0: i32) -> (i32, i32, i32) {
    %c0_i32 = arith.constant 0 : i32
    %c0_i32_0 = arith.constant 0 : i32
    %c0_i32_1 = arith.constant 0 : i32
    %c0_i32_2 = arith.constant 0 : i32
    return %c0_i32, %c0_i32_0, %c0_i32_1 : i32, i32, i32
  }
  func.func @transform_5(%arg0: i32) -> (i32, i32, i32) {
    %c0_i32 = arith.constant 0 : i32
    %c0_i32_0 = arith.constant 0 : i32
    %c0_i32_1 = arith.constant 0 : i32
    %c0_i32_2 = arith.constant 0 : i32
    return %c0_i32, %c0_i32_0, %c0_i32_1 : i32, i32, i32
  }
  func.func @transform_6(%arg0: i32) -> (i32, i32, i32) {
    %c0_i32 = arith.constant 0 : i32
    %c0_i32_0 = arith.constant 0 : i32
    %c0_i32_1 = arith.constant 0 : i32
    %c0_i32_2 = arith.constant 0 : i32
    return %c0_i32, %c0_i32_0, %c0_i32_1 : i32, i32, i32
  }
  func.func @transform_7(%arg0: i32) -> (i32, i32, i32) {
    %c0_i32 = arith.constant 0 : i32
    %c0_i32_0 = arith.constant 0 : i32
    %c0_i32_1 = arith.constant 0 : i32
    %c0_i32_2 = arith.constant 0 : i32
    return %c0_i32, %c0_i32_0, %c0_i32_1 : i32, i32, i32
  }
  func.func @transform_8(%arg0: i32) -> (i32, i32, i32) {
    %c0_i32 = arith.constant 0 : i32
    %c0_i32_0 = arith.constant 0 : i32
    %c0_i32_1 = arith.constant 0 : i32
    %c0_i32_2 = arith.constant 0 : i32
    return %c0_i32, %c0_i32_0, %c0_i32_1 : i32, i32, i32
  }
  func.func @transform_9(%arg0: i32) -> (i32, i32, i32) {
    %c0_i32 = arith.constant 0 : i32
    %c0_i32_0 = arith.constant 0 : i32
    %c0_i32_1 = arith.constant 0 : i32
    %c0_i32_2 = arith.constant 0 : i32
    return %c0_i32, %c0_i32_0, %c0_i32_1 : i32, i32, i32
  }
  func.func @transform_10(%arg0: i32) -> (i32, i32, i32) {
    %c0_i32 = arith.constant 0 : i32
    %c0_i32_0 = arith.constant 0 : i32
    %c0_i32_1 = arith.constant 0 : i32
    %c0_i32_2 = arith.constant 0 : i32
    return %c0_i32, %c0_i32_0, %c0_i32_1 : i32, i32, i32
  }
  func.func @transform_11(%arg0: i32) -> (i32, i32, i32) {
    %c0_i32 = arith.constant 0 : i32
    %c0_i32_0 = arith.constant 0 : i32
    %c0_i32_1 = arith.constant 0 : i32
    %c0_i32_2 = arith.constant 0 : i32
    return %c0_i32, %c0_i32_0, %c0_i32_1 : i32, i32, i32
  }
  func.func @transform_12(%arg0: i32) -> (i32, i32, i32) {
    %c0_i32 = arith.constant 0 : i32
    %c0_i32_0 = arith.constant 0 : i32
    %c0_i32_1 = arith.constant 0 : i32
    %c0_i32_2 = arith.constant 0 : i32
    return %c0_i32, %c0_i32_0, %c0_i32_1 : i32, i32, i32
  }
  func.func @transform_13(%arg0: i32) -> (i32, i32, i32) {
    %c0_i32 = arith.constant 0 : i32
    %c0_i32_0 = arith.constant 0 : i32
    %c0_i32_1 = arith.constant 0 : i32
    %c0_i32_2 = arith.constant 0 : i32
    return %c0_i32, %c0_i32_0, %c0_i32_1 : i32, i32, i32
  }
  func.func @transform_14(%arg0: i32) -> (i32, i32, i32) {
    %c0_i32 = arith.constant 0 : i32
    %c0_i32_0 = arith.constant 0 : i32
    %c0_i32_1 = arith.constant 0 : i32
    %c0_i32_2 = arith.constant 0 : i32
    return %c0_i32, %c0_i32_0, %c0_i32_1 : i32, i32, i32
  }
  func.func @transform_15(%arg0: i32) -> (i32, i32) {
    %c0_i32 = arith.constant 0 : i32
    %c0_i32_0 = arith.constant 0 : i32
    %c0_i32_1 = arith.constant 0 : i32
    return %c0_i32, %c0_i32_0 : i32, i32
  }
  func.func @transform_16(%arg0: i32) -> (i32, i32) {
    %c0_i32 = arith.constant 0 : i32
    %c0_i32_0 = arith.constant 0 : i32
    %c0_i32_1 = arith.constant 0 : i32
    return %c0_i32, %c0_i32_0 : i32, i32
  }
  func.func @transform_17(%arg0: i32) -> (i32, i32) {
    %c0_i32 = arith.constant 0 : i32
    %c0_i32_0 = arith.constant 0 : i32
    %c0_i32_1 = arith.constant 0 : i32
    return %c0_i32, %c0_i32_0 : i32, i32
  }
  func.func @transform_18(%arg0: i32) -> (i32, i32) {
    %c0_i32 = arith.constant 0 : i32
    %c0_i32_0 = arith.constant 0 : i32
    %c0_i32_1 = arith.constant 0 : i32
    return %c0_i32, %c0_i32_0 : i32, i32
  }
  func.func @transform_19(%arg0: i32) -> (i32, i32) {
    %c0_i32 = arith.constant 0 : i32
    %c0_i32_0 = arith.constant 0 : i32
    %c0_i32_1 = arith.constant 0 : i32
    return %c0_i32, %c0_i32_0 : i32, i32
  }
  func.func @transform_20(%arg0: i32) -> (i32, i32) {
    %c0_i32 = arith.constant 0 : i32
    %c0_i32_0 = arith.constant 0 : i32
    %c0_i32_1 = arith.constant 0 : i32
    return %c0_i32, %c0_i32_0 : i32, i32
  }
  func.func @transform_21(%arg0: i32) -> (i32, i32) {
    %c0_i32 = arith.constant 0 : i32
    %c0_i32_0 = arith.constant 0 : i32
    %c0_i32_1 = arith.constant 0 : i32
    return %c0_i32, %c0_i32_0 : i32, i32
  }
  func.func @transform_22(%arg0: i32) -> (i32, i32) {
    %c0_i32 = arith.constant 0 : i32
    %c0_i32_0 = arith.constant 0 : i32
    %c0_i32_1 = arith.constant 0 : i32
    return %c0_i32, %c0_i32_0 : i32, i32
  }
  func.func @transform_23(%arg0: i32) -> (i32, i32) {
    %c0_i32 = arith.constant 0 : i32
    %c0_i32_0 = arith.constant 0 : i32
    %c0_i32_1 = arith.constant 0 : i32
    return %c0_i32, %c0_i32_0 : i32, i32
  }
  func.func @transform_24(%arg0: i32) -> (i32, i32) {
    %c0_i32 = arith.constant 0 : i32
    %c0_i32_0 = arith.constant 0 : i32
    %c0_i32_1 = arith.constant 0 : i32
    return %c0_i32, %c0_i32_0 : i32, i32
  }
  func.func @transform_25(%arg0: i32) -> (i32, i32) {
    %c0_i32 = arith.constant 0 : i32
    %c0_i32_0 = arith.constant 0 : i32
    %c0_i32_1 = arith.constant 0 : i32
    return %c0_i32, %c0_i32_0 : i32, i32
  }
  func.func @transform_26(%arg0: i32) -> (i32, i32) {
    %c0_i32 = arith.constant 0 : i32
    %c0_i32_0 = arith.constant 0 : i32
    %c0_i32_1 = arith.constant 0 : i32
    return %c0_i32, %c0_i32_0 : i32, i32
  }
  func.func @transform_27(%arg0: i32) -> (i32, i32, i32) {
    %c0_i32 = arith.constant 0 : i32
    %c0_i32_0 = arith.constant 0 : i32
    %c0_i32_1 = arith.constant 0 : i32
    return %arg0, %c0_i32, %c0_i32_0 : i32, i32, i32
  }
  func.func @transform_28(%arg0: i32) -> (i32, i32, i32) {
    %c0_i32 = arith.constant 0 : i32
    %c0_i32_0 = arith.constant 0 : i32
    %c0_i32_1 = arith.constant 0 : i32
    return %arg0, %c0_i32, %c0_i32_0 : i32, i32, i32
  }
  func.func @transform_29(%arg0: i32) -> (i32, i32, i32) {
    %c0_i32 = arith.constant 0 : i32
    %c0_i32_0 = arith.constant 0 : i32
    %c0_i32_1 = arith.constant 0 : i32
    return %arg0, %c0_i32, %c0_i32_0 : i32, i32, i32
  }
}

module attributes {stable_mosaic.version = 11 : i64} {
  func.func @kernel(%arg0: i32, %arg1: memref<1x8x32xf32, #tpu.memory_space<vmem>>, %arg2: memref<2x8x4xi32, #tpu.memory_space<vmem>>, %arg3: memref<2x8x4xi32, #tpu.memory_space<vmem>>, %arg4: memref<2x32x96xbf16, #tpu.memory_space<vmem>>, %arg5: memref<2x1x96xf32, #tpu.memory_space<vmem>>, %arg6: memref<2x32x32xbf16, #tpu.memory_space<vmem>>, %arg7: memref<2x1x32xf32, #tpu.memory_space<vmem>>, %arg8: memref<2x32x64xbf16, #tpu.memory_space<vmem>>, %arg9: memref<2x1x64xf32, #tpu.memory_space<vmem>>, %arg10: memref<2x1x64xf32, #tpu.memory_space<vmem>>, %arg11: memref<2x1x64xf32, #tpu.memory_space<vmem>>, %arg12: memref<2x64x64xbf16, #tpu.memory_space<vmem>>, %arg13: memref<2x1x64xf32, #tpu.memory_space<vmem>>, %arg14: memref<2x1x64xf32, #tpu.memory_space<vmem>>, %arg15: memref<2x1x64xf32, #tpu.memory_space<vmem>>, %arg16: memref<2x64x32xbf16, #tpu.memory_space<vmem>>, %arg17: memref<2x1x32xf32, #tpu.memory_space<vmem>>, %arg18: memref<1x8x32xf32, #tpu.memory_space<vmem>>) attributes {dimension_semantics = [#tpu.dimension_semantics<parallel>], iteration_bounds = array<i64: 2>, scalar_prefetch = 0 : i64, scratch_operands = 0 : i64, tpu.core_type = #tpu.core_type<tc>, window_params = [{transform_indices = @transform_0, window_bounds = array<i64: 1, 8, 32>}, {pipeline_mode = #tpu.pipeline_mode<synchronous>, transform_indices = @transform_1, window_bounds = array<i64: 2, 8, 4>}, {pipeline_mode = #tpu.pipeline_mode<synchronous>, transform_indices = @transform_2, window_bounds = array<i64: 2, 8, 4>}, {pipeline_mode = #tpu.pipeline_mode<synchronous>, transform_indices = @transform_3, window_bounds = array<i64: 2, 32, 96>}, {pipeline_mode = #tpu.pipeline_mode<synchronous>, transform_indices = @transform_4, window_bounds = array<i64: 2, 1, 96>}, {pipeline_mode = #tpu.pipeline_mode<synchronous>, transform_indices = @transform_5, window_bounds = array<i64: 2, 32, 32>}, {pipeline_mode = #tpu.pipeline_mode<synchronous>, transform_indices = @transform_6, window_bounds = array<i64: 2, 1, 32>}, {pipeline_mode = #tpu.pipeline_mode<synchronous>, transform_indices = @transform_7, window_bounds = array<i64: 2, 32, 64>}, {pipeline_mode = #tpu.pipeline_mode<synchronous>, transform_indices = @transform_8, window_bounds = array<i64: 2, 1, 64>}, {pipeline_mode = #tpu.pipeline_mode<synchronous>, transform_indices = @transform_9, window_bounds = array<i64: 2, 1, 64>}, {pipeline_mode = #tpu.pipeline_mode<synchronous>, transform_indices = @transform_10, window_bounds = array<i64: 2, 1, 64>}, {pipeline_mode = #tpu.pipeline_mode<synchronous>, transform_indices = @transform_11, window_bounds = array<i64: 2, 64, 64>}, {pipeline_mode = #tpu.pipeline_mode<synchronous>, transform_indices = @transform_12, window_bounds = array<i64: 2, 1, 64>}, {pipeline_mode = #tpu.pipeline_mode<synchronous>, transform_indices = @transform_13, window_bounds = array<i64: 2, 1, 64>}, {pipeline_mode = #tpu.pipeline_mode<synchronous>, transform_indices = @transform_14, window_bounds = array<i64: 2, 1, 64>}, {pipeline_mode = #tpu.pipeline_mode<synchronous>, transform_indices = @transform_15, window_bounds = array<i64: 2, 64, 32>}, {pipeline_mode = #tpu.pipeline_mode<synchronous>, transform_indices = @transform_16, window_bounds = array<i64: 2, 1, 32>}, {transform_indices = @transform_17, window_bounds = array<i64: 1, 8, 32>}]} {
    %c0 = arith.constant 0 : index
    %c0_0 = arith.constant 0 : index
    %c0_1 = arith.constant 0 : index
    %0 = vector.load %arg1[%c0, %c0_0, %c0_1] : memref<1x8x32xf32, #tpu.memory_space<vmem>>, vector<1x8x32xf32>
    %1 = vector.shape_cast %0 : vector<1x8x32xf32> to vector<8x32xf32>
    %2 = tpu.iota {dimensions = array<i32: 1>} : vector<8x8xi32>
    %c4_i32 = arith.constant 4 : i32
    %3 = arith.muli %arg0, %c4_i32 : i32
    %c0_i32 = arith.constant 0 : i32
    %4 = arith.addi %3, %c0_i32 : i32
    %c2_i32 = arith.constant 2 : i32
    %c0_i32_2 = arith.constant 0 : i32
    %5 = arith.cmpi eq, %c2_i32, %c0_i32_2 : i32
    %c1_i32 = arith.constant 1 : i32
    %6 = arith.select %5, %c1_i32, %c2_i32 : i32
    %7 = arith.remsi %4, %6 : i32
    %c0_i32_3 = arith.constant 0 : i32
    %8 = arith.cmpi ne, %7, %c0_i32_3 : i32
    %c0_i32_4 = arith.constant 0 : i32
    %9 = arith.cmpi slt, %7, %c0_i32_4 : i32
    %c0_i32_5 = arith.constant 0 : i32
    %10 = arith.cmpi slt, %6, %c0_i32_5 : i32
    %11 = arith.xori %9, %10 : i1
    %12 = arith.andi %11, %8 : i1
    %13 = arith.addi %7, %6 : i32
    %14 = arith.select %12, %13, %7 : i32
    %15 = arith.index_cast %14 : i32 to index
    %c0_6 = arith.constant 0 : index
    %c0_7 = arith.constant 0 : index
    %16 = vector.load %arg2[%15, %c0_6, %c0_7] : memref<2x8x4xi32, #tpu.memory_space<vmem>>, vector<1x8x4xi32>
    %17 = vector.shape_cast %16 : vector<1x8x4xi32> to vector<8x4xi32>
    %false = arith.constant false
    %18 = vector.broadcast %false : i1 to vector<8x8xi1>
    %19 = vector.extract_strided_slice %17 {offsets = [0, 0], sizes = [8, 1], strides = [1, 1]} : vector<8x4xi32> to vector<8x1xi32>
    %20 = vector.broadcast %19 : vector<8x1xi32> to vector<8x8xi32>
    %21 = arith.cmpi eq, %2, %20 : vector<8x8xi32>
    %22 = arith.ori %18, %21 : vector<8x8xi1>
    %23 = vector.extract_strided_slice %17 {offsets = [0, 1], sizes = [8, 1], strides = [1, 1]} : vector<8x4xi32> to vector<8x1xi32>
    %24 = vector.broadcast %23 : vector<8x1xi32> to vector<8x8xi32>
    %25 = arith.cmpi eq, %2, %24 : vector<8x8xi32>
    %26 = arith.ori %22, %25 : vector<8x8xi1>
    %27 = vector.extract_strided_slice %17 {offsets = [0, 2], sizes = [8, 1], strides = [1, 1]} : vector<8x4xi32> to vector<8x1xi32>
    %28 = vector.broadcast %27 : vector<8x1xi32> to vector<8x8xi32>
    %29 = arith.cmpi eq, %2, %28 : vector<8x8xi32>
    %30 = arith.ori %26, %29 : vector<8x8xi1>
    %31 = vector.extract_strided_slice %17 {offsets = [0, 3], sizes = [8, 1], strides = [1, 1]} : vector<8x4xi32> to vector<8x1xi32>
    %32 = vector.broadcast %31 : vector<8x1xi32> to vector<8x8xi32>
    %33 = arith.cmpi eq, %2, %32 : vector<8x8xi32>
    %34 = arith.ori %30, %33 : vector<8x8xi1>
    %cst = arith.constant 0.000000e+00 : f32
    %cst_8 = arith.constant -1.000000e+30 : f32
    %35 = vector.broadcast %cst : f32 to vector<8x8xf32>
    %36 = vector.broadcast %cst_8 : f32 to vector<8x8xf32>
    %37 = arith.select %34, %35, %36 : vector<8x8xi1>, vector<8x8xf32>
    %c4_i32_9 = arith.constant 4 : i32
    %38 = arith.muli %arg0, %c4_i32_9 : i32
    %c1_i32_10 = arith.constant 1 : i32
    %39 = arith.addi %38, %c1_i32_10 : i32
    %c2_i32_11 = arith.constant 2 : i32
    %c0_i32_12 = arith.constant 0 : i32
    %40 = arith.cmpi eq, %c2_i32_11, %c0_i32_12 : i32
    %c1_i32_13 = arith.constant 1 : i32
    %41 = arith.select %40, %c1_i32_13, %c2_i32_11 : i32
    %42 = arith.remsi %39, %41 : i32
    %c0_i32_14 = arith.constant 0 : i32
    %43 = arith.cmpi ne, %42, %c0_i32_14 : i32
    %c0_i32_15 = arith.constant 0 : i32
    %44 = arith.cmpi slt, %42, %c0_i32_15 : i32
    %c0_i32_16 = arith.constant 0 : i32
    %45 = arith.cmpi slt, %41, %c0_i32_16 : i32
    %46 = arith.xori %44, %45 : i1
    %47 = arith.andi %46, %43 : i1
    %48 = arith.addi %42, %41 : i32
    %49 = arith.select %47, %48, %42 : i32
    %50 = arith.index_cast %49 : i32 to index
    %c0_17 = arith.constant 0 : index
    %c0_18 = arith.constant 0 : index
    %51 = vector.load %arg2[%50, %c0_17, %c0_18] : memref<2x8x4xi32, #tpu.memory_space<vmem>>, vector<1x8x4xi32>
    %52 = vector.shape_cast %51 : vector<1x8x4xi32> to vector<8x4xi32>
    %false_19 = arith.constant false
    %53 = vector.broadcast %false_19 : i1 to vector<8x8xi1>
    %54 = vector.extract_strided_slice %52 {offsets = [0, 0], sizes = [8, 1], strides = [1, 1]} : vector<8x4xi32> to vector<8x1xi32>
    %55 = vector.broadcast %54 : vector<8x1xi32> to vector<8x8xi32>
    %56 = arith.cmpi eq, %2, %55 : vector<8x8xi32>
    %57 = arith.ori %53, %56 : vector<8x8xi1>
    %58 = vector.extract_strided_slice %52 {offsets = [0, 1], sizes = [8, 1], strides = [1, 1]} : vector<8x4xi32> to vector<8x1xi32>
    %59 = vector.broadcast %58 : vector<8x1xi32> to vector<8x8xi32>
    %60 = arith.cmpi eq, %2, %59 : vector<8x8xi32>
    %61 = arith.ori %57, %60 : vector<8x8xi1>
    %62 = vector.extract_strided_slice %52 {offsets = [0, 2], sizes = [8, 1], strides = [1, 1]} : vector<8x4xi32> to vector<8x1xi32>
    %63 = vector.broadcast %62 : vector<8x1xi32> to vector<8x8xi32>
    %64 = arith.cmpi eq, %2, %63 : vector<8x8xi32>
    %65 = arith.ori %61, %64 : vector<8x8xi1>
    %66 = vector.extract_strided_slice %52 {offsets = [0, 3], sizes = [8, 1], strides = [1, 1]} : vector<8x4xi32> to vector<8x1xi32>
    %67 = vector.broadcast %66 : vector<8x1xi32> to vector<8x8xi32>
    %68 = arith.cmpi eq, %2, %67 : vector<8x8xi32>
    %69 = arith.ori %65, %68 : vector<8x8xi1>
    %cst_20 = arith.constant 0.000000e+00 : f32
    %cst_21 = arith.constant -1.000000e+30 : f32
    %70 = vector.broadcast %cst_20 : f32 to vector<8x8xf32>
    %71 = vector.broadcast %cst_21 : f32 to vector<8x8xf32>
    %72 = arith.select %69, %70, %71 : vector<8x8xi1>, vector<8x8xf32>
    %c0_22 = arith.constant 0 : index
    %c0_23 = arith.constant 0 : index
    %c0_24 = arith.constant 0 : index
    %73 = vector.load %arg4[%c0_22, %c0_23, %c0_24] : memref<2x32x96xbf16, #tpu.memory_space<vmem>>, vector<1x32x96xbf16>
    %74 = vector.shape_cast %73 : vector<1x32x96xbf16> to vector<32x96xbf16>
    %75 = arith.truncf %1 : vector<8x32xf32> to vector<8x32xbf16>
    %cst_25 = arith.constant dense<0.000000e+00> : vector<8x96xf32>
    %76 = tpu.matmul %75, %74, %cst_25 {dimension_numbers = #tpu.dot_dimension_numbers<[1], [0], [0], [1], [0, 0, 1, 1], [], []>} : vector<8x32xbf16>, vector<32x96xbf16>, vector<8x96xf32> -> vector<8x96xf32>
    %c0_26 = arith.constant 0 : index
    %c0_27 = arith.constant 0 : index
    %c0_28 = arith.constant 0 : index
    %77 = vector.load %arg5[%c0_26, %c0_27, %c0_28] : memref<2x1x96xf32, #tpu.memory_space<vmem>>, vector<1x1x96xf32>
    %78 = vector.shape_cast %77 : vector<1x1x96xf32> to vector<1x96xf32>
    %79 = vector.broadcast %78 : vector<1x96xf32> to vector<8x96xf32>
    %80 = arith.addf %76, %79 : vector<8x96xf32>
    %81 = vector.extract_strided_slice %80 {offsets = [0, 0], sizes = [8, 8], strides = [1, 1]} : vector<8x96xf32> to vector<8x8xf32>
    %82 = vector.extract_strided_slice %80 {offsets = [0, 32], sizes = [8, 8], strides = [1, 1]} : vector<8x96xf32> to vector<8x8xf32>
    %83 = vector.extract_strided_slice %80 {offsets = [0, 64], sizes = [8, 8], strides = [1, 1]} : vector<8x96xf32> to vector<8x8xf32>
    %cst_29 = arith.constant 0.353553385 : f32
    %84 = vector.broadcast %cst_29 : f32 to vector<8x8xf32>
    %85 = arith.mulf %81, %84 : vector<8x8xf32>
    %86 = arith.truncf %85 : vector<8x8xf32> to vector<8x8xbf16>
    %87 = arith.truncf %82 : vector<8x8xf32> to vector<8x8xbf16>
    %cst_30 = arith.constant dense<0.000000e+00> : vector<8x8xf32>
    %88 = tpu.matmul %86, %87, %cst_30 {dimension_numbers = #tpu.dot_dimension_numbers<[1], [1], [0], [0], [0, 0, 1, 0], [], []>} : vector<8x8xbf16>, vector<8x8xbf16>, vector<8x8xf32> -> vector<8x8xf32>
    %89 = arith.addf %88, %37 : vector<8x8xf32>
    %cst_31 = arith.constant dense<0xFF800000> : vector<8xf32>
    %90 = vector.multi_reduction <maximumf>, %89, %cst_31 [1] : vector<8x8xf32> to vector<8xf32>
    %91 = vector.shape_cast %90 : vector<8xf32> to vector<8x1xf32>
    %92 = vector.broadcast %91 : vector<8x1xf32> to vector<8x8xf32>
    %93 = arith.subf %89, %92 : vector<8x8xf32>
    %94 = math.exp %93 : vector<8x8xf32>
    %cst_32 = arith.constant dense<0.000000e+00> : vector<8xf32>
    %95 = vector.multi_reduction <add>, %94, %cst_32 [1] : vector<8x8xf32> to vector<8xf32>
    %96 = vector.shape_cast %95 : vector<8xf32> to vector<8x1xf32>
    %97 = tpu.reciprocal %96 {approx = true} : vector<8x1xf32> -> vector<8x1xf32>
    %98 = vector.broadcast %97 : vector<8x1xf32> to vector<8x8xf32>
    %99 = arith.mulf %94, %98 : vector<8x8xf32>
    %100 = arith.truncf %99 : vector<8x8xf32> to vector<8x8xbf16>
    %101 = arith.truncf %83 : vector<8x8xf32> to vector<8x8xbf16>
    %cst_33 = arith.constant dense<0.000000e+00> : vector<8x8xf32>
    %102 = tpu.matmul %100, %101, %cst_33 {dimension_numbers = #tpu.dot_dimension_numbers<[1], [0], [0], [1], [0, 0, 1, 1], [], []>} : vector<8x8xbf16>, vector<8x8xbf16>, vector<8x8xf32> -> vector<8x8xf32>
    %103 = vector.extract_strided_slice %80 {offsets = [0, 8], sizes = [8, 8], strides = [1, 1]} : vector<8x96xf32> to vector<8x8xf32>
    %104 = vector.extract_strided_slice %80 {offsets = [0, 40], sizes = [8, 8], strides = [1, 1]} : vector<8x96xf32> to vector<8x8xf32>
    %105 = vector.extract_strided_slice %80 {offsets = [0, 72], sizes = [8, 8], strides = [1, 1]} : vector<8x96xf32> to vector<8x8xf32>
    %cst_34 = arith.constant 0.353553385 : f32
    %106 = vector.broadcast %cst_34 : f32 to vector<8x8xf32>
    %107 = arith.mulf %103, %106 : vector<8x8xf32>
    %108 = arith.truncf %107 : vector<8x8xf32> to vector<8x8xbf16>
    %109 = arith.truncf %104 : vector<8x8xf32> to vector<8x8xbf16>
    %cst_35 = arith.constant dense<0.000000e+00> : vector<8x8xf32>
    %110 = tpu.matmul %108, %109, %cst_35 {dimension_numbers = #tpu.dot_dimension_numbers<[1], [1], [0], [0], [0, 0, 1, 0], [], []>} : vector<8x8xbf16>, vector<8x8xbf16>, vector<8x8xf32> -> vector<8x8xf32>
    %111 = arith.addf %110, %72 : vector<8x8xf32>
    %cst_36 = arith.constant dense<0xFF800000> : vector<8xf32>
    %112 = vector.multi_reduction <maximumf>, %111, %cst_36 [1] : vector<8x8xf32> to vector<8xf32>
    %113 = vector.shape_cast %112 : vector<8xf32> to vector<8x1xf32>
    %114 = vector.broadcast %113 : vector<8x1xf32> to vector<8x8xf32>
    %115 = arith.subf %111, %114 : vector<8x8xf32>
    %116 = math.exp %115 : vector<8x8xf32>
    %cst_37 = arith.constant dense<0.000000e+00> : vector<8xf32>
    %117 = vector.multi_reduction <add>, %116, %cst_37 [1] : vector<8x8xf32> to vector<8xf32>
    %118 = vector.shape_cast %117 : vector<8xf32> to vector<8x1xf32>
    %119 = tpu.reciprocal %118 {approx = true} : vector<8x1xf32> -> vector<8x1xf32>
    %120 = vector.broadcast %119 : vector<8x1xf32> to vector<8x8xf32>
    %121 = arith.mulf %116, %120 : vector<8x8xf32>
    %122 = arith.truncf %121 : vector<8x8xf32> to vector<8x8xbf16>
    %123 = arith.truncf %105 : vector<8x8xf32> to vector<8x8xbf16>
    %cst_38 = arith.constant dense<0.000000e+00> : vector<8x8xf32>
    %124 = tpu.matmul %122, %123, %cst_38 {dimension_numbers = #tpu.dot_dimension_numbers<[1], [0], [0], [1], [0, 0, 1, 1], [], []>} : vector<8x8xbf16>, vector<8x8xbf16>, vector<8x8xf32> -> vector<8x8xf32>
    %125 = vector.extract_strided_slice %80 {offsets = [0, 16], sizes = [8, 8], strides = [1, 1]} : vector<8x96xf32> to vector<8x8xf32>
    %126 = vector.extract_strided_slice %80 {offsets = [0, 48], sizes = [8, 8], strides = [1, 1]} : vector<8x96xf32> to vector<8x8xf32>
    %127 = vector.extract_strided_slice %80 {offsets = [0, 80], sizes = [8, 8], strides = [1, 1]} : vector<8x96xf32> to vector<8x8xf32>
    %cst_39 = arith.constant 0.353553385 : f32
    %128 = vector.broadcast %cst_39 : f32 to vector<8x8xf32>
    %129 = arith.mulf %125, %128 : vector<8x8xf32>
    %130 = arith.truncf %129 : vector<8x8xf32> to vector<8x8xbf16>
    %131 = arith.truncf %126 : vector<8x8xf32> to vector<8x8xbf16>
    %cst_40 = arith.constant dense<0.000000e+00> : vector<8x8xf32>
    %132 = tpu.matmul %130, %131, %cst_40 {dimension_numbers = #tpu.dot_dimension_numbers<[1], [1], [0], [0], [0, 0, 1, 0], [], []>} : vector<8x8xbf16>, vector<8x8xbf16>, vector<8x8xf32> -> vector<8x8xf32>
    %133 = arith.addf %132, %37 : vector<8x8xf32>
    %cst_41 = arith.constant dense<0xFF800000> : vector<8xf32>
    %134 = vector.multi_reduction <maximumf>, %133, %cst_41 [1] : vector<8x8xf32> to vector<8xf32>
    %135 = vector.shape_cast %134 : vector<8xf32> to vector<8x1xf32>
    %136 = vector.broadcast %135 : vector<8x1xf32> to vector<8x8xf32>
    %137 = arith.subf %133, %136 : vector<8x8xf32>
    %138 = math.exp %137 : vector<8x8xf32>
    %cst_42 = arith.constant dense<0.000000e+00> : vector<8xf32>
    %139 = vector.multi_reduction <add>, %138, %cst_42 [1] : vector<8x8xf32> to vector<8xf32>
    %140 = vector.shape_cast %139 : vector<8xf32> to vector<8x1xf32>
    %141 = tpu.reciprocal %140 {approx = true} : vector<8x1xf32> -> vector<8x1xf32>
    %142 = vector.broadcast %141 : vector<8x1xf32> to vector<8x8xf32>
    %143 = arith.mulf %138, %142 : vector<8x8xf32>
    %144 = arith.truncf %143 : vector<8x8xf32> to vector<8x8xbf16>
    %145 = arith.truncf %127 : vector<8x8xf32> to vector<8x8xbf16>
    %cst_43 = arith.constant dense<0.000000e+00> : vector<8x8xf32>
    %146 = tpu.matmul %144, %145, %cst_43 {dimension_numbers = #tpu.dot_dimension_numbers<[1], [0], [0], [1], [0, 0, 1, 1], [], []>} : vector<8x8xbf16>, vector<8x8xbf16>, vector<8x8xf32> -> vector<8x8xf32>
    %147 = vector.extract_strided_slice %80 {offsets = [0, 24], sizes = [8, 8], strides = [1, 1]} : vector<8x96xf32> to vector<8x8xf32>
    %148 = vector.extract_strided_slice %80 {offsets = [0, 56], sizes = [8, 8], strides = [1, 1]} : vector<8x96xf32> to vector<8x8xf32>
    %149 = vector.extract_strided_slice %80 {offsets = [0, 88], sizes = [8, 8], strides = [1, 1]} : vector<8x96xf32> to vector<8x8xf32>
    %cst_44 = arith.constant 0.353553385 : f32
    %150 = vector.broadcast %cst_44 : f32 to vector<8x8xf32>
    %151 = arith.mulf %147, %150 : vector<8x8xf32>
    %152 = arith.truncf %151 : vector<8x8xf32> to vector<8x8xbf16>
    %153 = arith.truncf %148 : vector<8x8xf32> to vector<8x8xbf16>
    %cst_45 = arith.constant dense<0.000000e+00> : vector<8x8xf32>
    %154 = tpu.matmul %152, %153, %cst_45 {dimension_numbers = #tpu.dot_dimension_numbers<[1], [1], [0], [0], [0, 0, 1, 0], [], []>} : vector<8x8xbf16>, vector<8x8xbf16>, vector<8x8xf32> -> vector<8x8xf32>
    %155 = arith.addf %154, %72 : vector<8x8xf32>
    %cst_46 = arith.constant dense<0xFF800000> : vector<8xf32>
    %156 = vector.multi_reduction <maximumf>, %155, %cst_46 [1] : vector<8x8xf32> to vector<8xf32>
    %157 = vector.shape_cast %156 : vector<8xf32> to vector<8x1xf32>
    %158 = vector.broadcast %157 : vector<8x1xf32> to vector<8x8xf32>
    %159 = arith.subf %155, %158 : vector<8x8xf32>
    %160 = math.exp %159 : vector<8x8xf32>
    %cst_47 = arith.constant dense<0.000000e+00> : vector<8xf32>
    %161 = vector.multi_reduction <add>, %160, %cst_47 [1] : vector<8x8xf32> to vector<8xf32>
    %162 = vector.shape_cast %161 : vector<8xf32> to vector<8x1xf32>
    %163 = tpu.reciprocal %162 {approx = true} : vector<8x1xf32> -> vector<8x1xf32>
    %164 = vector.broadcast %163 : vector<8x1xf32> to vector<8x8xf32>
    %165 = arith.mulf %160, %164 : vector<8x8xf32>
    %166 = arith.truncf %165 : vector<8x8xf32> to vector<8x8xbf16>
    %167 = arith.truncf %149 : vector<8x8xf32> to vector<8x8xbf16>
    %cst_48 = arith.constant dense<0.000000e+00> : vector<8x8xf32>
    %168 = tpu.matmul %166, %167, %cst_48 {dimension_numbers = #tpu.dot_dimension_numbers<[1], [0], [0], [1], [0, 0, 1, 1], [], []>} : vector<8x8xbf16>, vector<8x8xbf16>, vector<8x8xf32> -> vector<8x8xf32>
    %169 = tpu.concatenate %102, %124, %146, %168 in 1 : vector<8x8xf32>, vector<8x8xf32>, vector<8x8xf32>, vector<8x8xf32> -> vector<8x32xf32>
    %c0_49 = arith.constant 0 : index
    %c0_50 = arith.constant 0 : index
    %c0_51 = arith.constant 0 : index
    %170 = vector.load %arg6[%c0_49, %c0_50, %c0_51] : memref<2x32x32xbf16, #tpu.memory_space<vmem>>, vector<1x32x32xbf16>
    %171 = vector.shape_cast %170 : vector<1x32x32xbf16> to vector<32x32xbf16>
    %172 = arith.truncf %169 : vector<8x32xf32> to vector<8x32xbf16>
    %cst_52 = arith.constant dense<0.000000e+00> : vector<8x32xf32>
    %173 = tpu.matmul %172, %171, %cst_52 {dimension_numbers = #tpu.dot_dimension_numbers<[1], [0], [0], [1], [0, 0, 1, 1], [], []>} : vector<8x32xbf16>, vector<32x32xbf16>, vector<8x32xf32> -> vector<8x32xf32>
    %c0_53 = arith.constant 0 : index
    %c0_54 = arith.constant 0 : index
    %c0_55 = arith.constant 0 : index
    %174 = vector.load %arg7[%c0_53, %c0_54, %c0_55] : memref<2x1x32xf32, #tpu.memory_space<vmem>>, vector<1x1x32xf32>
    %175 = vector.shape_cast %174 : vector<1x1x32xf32> to vector<1x32xf32>
    %176 = vector.broadcast %175 : vector<1x32xf32> to vector<8x32xf32>
    %177 = arith.addf %173, %176 : vector<8x32xf32>
    %c0_56 = arith.constant 0 : index
    %c0_57 = arith.constant 0 : index
    %c0_58 = arith.constant 0 : index
    %178 = vector.load %arg8[%c0_56, %c0_57, %c0_58] : memref<2x32x64xbf16, #tpu.memory_space<vmem>>, vector<1x32x64xbf16>
    %179 = vector.shape_cast %178 : vector<1x32x64xbf16> to vector<32x64xbf16>
    %180 = arith.truncf %177 : vector<8x32xf32> to vector<8x32xbf16>
    %cst_59 = arith.constant dense<0.000000e+00> : vector<8x64xf32>
    %181 = tpu.matmul %180, %179, %cst_59 {dimension_numbers = #tpu.dot_dimension_numbers<[1], [0], [0], [1], [0, 0, 1, 1], [], []>} : vector<8x32xbf16>, vector<32x64xbf16>, vector<8x64xf32> -> vector<8x64xf32>
    %c0_60 = arith.constant 0 : index
    %c0_61 = arith.constant 0 : index
    %c0_62 = arith.constant 0 : index
    %182 = vector.load %arg9[%c0_60, %c0_61, %c0_62] : memref<2x1x64xf32, #tpu.memory_space<vmem>>, vector<1x1x64xf32>
    %183 = vector.shape_cast %182 : vector<1x1x64xf32> to vector<1x64xf32>
    %184 = vector.broadcast %183 : vector<1x64xf32> to vector<8x64xf32>
    %185 = arith.addf %181, %184 : vector<8x64xf32>
    %c0_63 = arith.constant 0 : index
    %c0_64 = arith.constant 0 : index
    %c0_65 = arith.constant 0 : index
    %186 = vector.load %arg10[%c0_63, %c0_64, %c0_65] : memref<2x1x64xf32, #tpu.memory_space<vmem>>, vector<1x1x64xf32>
    %187 = vector.shape_cast %186 : vector<1x1x64xf32> to vector<1x64xf32>
    %c0_66 = arith.constant 0 : index
    %c0_67 = arith.constant 0 : index
    %c0_68 = arith.constant 0 : index
    %188 = vector.load %arg11[%c0_66, %c0_67, %c0_68] : memref<2x1x64xf32, #tpu.memory_space<vmem>>, vector<1x1x64xf32>
    %189 = vector.shape_cast %188 : vector<1x1x64xf32> to vector<1x64xf32>
    %cst_69 = arith.constant dense<0.000000e+00> : vector<8xf32>
    %190 = vector.multi_reduction <add>, %185, %cst_69 [1] : vector<8x64xf32> to vector<8xf32>
    %191 = vector.shape_cast %190 : vector<8xf32> to vector<8x1xf32>
    %cst_70 = arith.constant 6.400000e+01 : f32
    %192 = vector.broadcast %cst_70 : f32 to vector<8x1xf32>
    %193 = arith.divf %191, %192 : vector<8x1xf32>
    %194 = vector.broadcast %193 : vector<8x1xf32> to vector<8x64xf32>
    %195 = arith.subf %185, %194 : vector<8x64xf32>
    %196 = arith.mulf %195, %195 : vector<8x64xf32>
    %cst_71 = arith.constant dense<0.000000e+00> : vector<8xf32>
    %197 = vector.multi_reduction <add>, %196, %cst_71 [1] : vector<8x64xf32> to vector<8xf32>
    %198 = vector.shape_cast %197 : vector<8xf32> to vector<8x1xf32>
    %cst_72 = arith.constant 6.400000e+01 : f32
    %199 = vector.broadcast %cst_72 : f32 to vector<8x1xf32>
    %200 = arith.divf %198, %199 : vector<8x1xf32>
    %201 = vector.broadcast %193 : vector<8x1xf32> to vector<8x64xf32>
    %202 = arith.subf %185, %201 : vector<8x64xf32>
    %cst_73 = arith.constant 9.99999974E-6 : f32
    %203 = vector.broadcast %cst_73 : f32 to vector<8x1xf32>
    %204 = arith.addf %200, %203 : vector<8x1xf32>
    %205 = math.rsqrt %204 : vector<8x1xf32>
    %206 = vector.broadcast %205 : vector<8x1xf32> to vector<8x64xf32>
    %207 = arith.mulf %202, %206 : vector<8x64xf32>
    %208 = vector.broadcast %187 : vector<1x64xf32> to vector<8x64xf32>
    %209 = arith.mulf %207, %208 : vector<8x64xf32>
    %210 = vector.broadcast %189 : vector<1x64xf32> to vector<8x64xf32>
    %211 = arith.addf %209, %210 : vector<8x64xf32>
    %cst_74 = arith.constant 5.000000e-01 : f32
    %212 = vector.broadcast %cst_74 : f32 to vector<8x64xf32>
    %213 = arith.mulf %212, %211 : vector<8x64xf32>
    %cst_75 = arith.constant 4.471500e-02 : f32
    %214 = vector.broadcast %cst_75 : f32 to vector<8x64xf32>
    %215 = arith.mulf %214, %211 : vector<8x64xf32>
    %216 = arith.mulf %215, %211 : vector<8x64xf32>
    %217 = arith.mulf %216, %211 : vector<8x64xf32>
    %218 = arith.addf %211, %217 : vector<8x64xf32>
    %cst_76 = arith.constant 0.797884583 : f32
    %219 = vector.broadcast %cst_76 : f32 to vector<8x64xf32>
    %220 = arith.mulf %219, %218 : vector<8x64xf32>
    %221 = math.tanh %220 : vector<8x64xf32>
    %cst_77 = arith.constant 1.000000e+00 : f32
    %222 = vector.broadcast %cst_77 : f32 to vector<8x64xf32>
    %223 = arith.addf %222, %221 : vector<8x64xf32>
    %224 = arith.mulf %213, %223 : vector<8x64xf32>
    %c0_78 = arith.constant 0 : index
    %c0_79 = arith.constant 0 : index
    %c0_80 = arith.constant 0 : index
    %225 = vector.load %arg12[%c0_78, %c0_79, %c0_80] : memref<2x64x64xbf16, #tpu.memory_space<vmem>>, vector<1x64x64xbf16>
    %226 = vector.shape_cast %225 : vector<1x64x64xbf16> to vector<64x64xbf16>
    %227 = arith.truncf %224 : vector<8x64xf32> to vector<8x64xbf16>
    %cst_81 = arith.constant dense<0.000000e+00> : vector<8x64xf32>
    %228 = tpu.matmul %227, %226, %cst_81 {dimension_numbers = #tpu.dot_dimension_numbers<[1], [0], [0], [1], [0, 0, 1, 1], [], []>} : vector<8x64xbf16>, vector<64x64xbf16>, vector<8x64xf32> -> vector<8x64xf32>
    %c0_82 = arith.constant 0 : index
    %c0_83 = arith.constant 0 : index
    %c0_84 = arith.constant 0 : index
    %229 = vector.load %arg13[%c0_82, %c0_83, %c0_84] : memref<2x1x64xf32, #tpu.memory_space<vmem>>, vector<1x1x64xf32>
    %230 = vector.shape_cast %229 : vector<1x1x64xf32> to vector<1x64xf32>
    %231 = vector.broadcast %230 : vector<1x64xf32> to vector<8x64xf32>
    %232 = arith.addf %228, %231 : vector<8x64xf32>
    %c0_85 = arith.constant 0 : index
    %c0_86 = arith.constant 0 : index
    %c0_87 = arith.constant 0 : index
    %233 = vector.load %arg14[%c0_85, %c0_86, %c0_87] : memref<2x1x64xf32, #tpu.memory_space<vmem>>, vector<1x1x64xf32>
    %234 = vector.shape_cast %233 : vector<1x1x64xf32> to vector<1x64xf32>
    %c0_88 = arith.constant 0 : index
    %c0_89 = arith.constant 0 : index
    %c0_90 = arith.constant 0 : index
    %235 = vector.load %arg15[%c0_88, %c0_89, %c0_90] : memref<2x1x64xf32, #tpu.memory_space<vmem>>, vector<1x1x64xf32>
    %236 = vector.shape_cast %235 : vector<1x1x64xf32> to vector<1x64xf32>
    %cst_91 = arith.constant dense<0.000000e+00> : vector<8xf32>
    %237 = vector.multi_reduction <add>, %232, %cst_91 [1] : vector<8x64xf32> to vector<8xf32>
    %238 = vector.shape_cast %237 : vector<8xf32> to vector<8x1xf32>
    %cst_92 = arith.constant 6.400000e+01 : f32
    %239 = vector.broadcast %cst_92 : f32 to vector<8x1xf32>
    %240 = arith.divf %238, %239 : vector<8x1xf32>
    %241 = vector.broadcast %240 : vector<8x1xf32> to vector<8x64xf32>
    %242 = arith.subf %232, %241 : vector<8x64xf32>
    %243 = arith.mulf %242, %242 : vector<8x64xf32>
    %cst_93 = arith.constant dense<0.000000e+00> : vector<8xf32>
    %244 = vector.multi_reduction <add>, %243, %cst_93 [1] : vector<8x64xf32> to vector<8xf32>
    %245 = vector.shape_cast %244 : vector<8xf32> to vector<8x1xf32>
    %cst_94 = arith.constant 6.400000e+01 : f32
    %246 = vector.broadcast %cst_94 : f32 to vector<8x1xf32>
    %247 = arith.divf %245, %246 : vector<8x1xf32>
    %248 = vector.broadcast %240 : vector<8x1xf32> to vector<8x64xf32>
    %249 = arith.subf %232, %248 : vector<8x64xf32>
    %cst_95 = arith.constant 9.99999974E-6 : f32
    %250 = vector.broadcast %cst_95 : f32 to vector<8x1xf32>
    %251 = arith.addf %247, %250 : vector<8x1xf32>
    %252 = math.rsqrt %251 : vector<8x1xf32>
    %253 = vector.broadcast %252 : vector<8x1xf32> to vector<8x64xf32>
    %254 = arith.mulf %249, %253 : vector<8x64xf32>
    %255 = vector.broadcast %234 : vector<1x64xf32> to vector<8x64xf32>
    %256 = arith.mulf %254, %255 : vector<8x64xf32>
    %257 = vector.broadcast %236 : vector<1x64xf32> to vector<8x64xf32>
    %258 = arith.addf %256, %257 : vector<8x64xf32>
    %cst_96 = arith.constant 5.000000e-01 : f32
    %259 = vector.broadcast %cst_96 : f32 to vector<8x64xf32>
    %260 = arith.mulf %259, %258 : vector<8x64xf32>
    %cst_97 = arith.constant 4.471500e-02 : f32
    %261 = vector.broadcast %cst_97 : f32 to vector<8x64xf32>
    %262 = arith.mulf %261, %258 : vector<8x64xf32>
    %263 = arith.mulf %262, %258 : vector<8x64xf32>
    %264 = arith.mulf %263, %258 : vector<8x64xf32>
    %265 = arith.addf %258, %264 : vector<8x64xf32>
    %cst_98 = arith.constant 0.797884583 : f32
    %266 = vector.broadcast %cst_98 : f32 to vector<8x64xf32>
    %267 = arith.mulf %266, %265 : vector<8x64xf32>
    %268 = math.tanh %267 : vector<8x64xf32>
    %cst_99 = arith.constant 1.000000e+00 : f32
    %269 = vector.broadcast %cst_99 : f32 to vector<8x64xf32>
    %270 = arith.addf %269, %268 : vector<8x64xf32>
    %271 = arith.mulf %260, %270 : vector<8x64xf32>
    %c0_100 = arith.constant 0 : index
    %c0_101 = arith.constant 0 : index
    %c0_102 = arith.constant 0 : index
    %272 = vector.load %arg16[%c0_100, %c0_101, %c0_102] : memref<2x64x32xbf16, #tpu.memory_space<vmem>>, vector<1x64x32xbf16>
    %273 = vector.shape_cast %272 : vector<1x64x32xbf16> to vector<64x32xbf16>
    %274 = arith.truncf %271 : vector<8x64xf32> to vector<8x64xbf16>
    %cst_103 = arith.constant dense<0.000000e+00> : vector<8x32xf32>
    %275 = tpu.matmul %274, %273, %cst_103 {dimension_numbers = #tpu.dot_dimension_numbers<[1], [0], [0], [1], [0, 0, 1, 1], [], []>} : vector<8x64xbf16>, vector<64x32xbf16>, vector<8x32xf32> -> vector<8x32xf32>
    %276 = arith.addf %1, %275 : vector<8x32xf32>
    %c0_104 = arith.constant 0 : index
    %c0_105 = arith.constant 0 : index
    %c0_106 = arith.constant 0 : index
    %277 = vector.load %arg17[%c0_104, %c0_105, %c0_106] : memref<2x1x32xf32, #tpu.memory_space<vmem>>, vector<1x1x32xf32>
    %278 = vector.shape_cast %277 : vector<1x1x32xf32> to vector<1x32xf32>
    %279 = vector.broadcast %278 : vector<1x32xf32> to vector<8x32xf32>
    %280 = arith.addf %276, %279 : vector<8x32xf32>
    %c4_i32_107 = arith.constant 4 : i32
    %281 = arith.muli %arg0, %c4_i32_107 : i32
    %c0_i32_108 = arith.constant 0 : i32
    %282 = arith.addi %281, %c0_i32_108 : i32
    %c2_i32_109 = arith.constant 2 : i32
    %c0_i32_110 = arith.constant 0 : i32
    %283 = arith.cmpi eq, %c2_i32_109, %c0_i32_110 : i32
    %c1_i32_111 = arith.constant 1 : i32
    %284 = arith.select %283, %c1_i32_111, %c2_i32_109 : i32
    %285 = arith.remsi %282, %284 : i32
    %c0_i32_112 = arith.constant 0 : i32
    %286 = arith.cmpi ne, %285, %c0_i32_112 : i32
    %c0_i32_113 = arith.constant 0 : i32
    %287 = arith.cmpi slt, %285, %c0_i32_113 : i32
    %c0_i32_114 = arith.constant 0 : i32
    %288 = arith.cmpi slt, %284, %c0_i32_114 : i32
    %289 = arith.xori %287, %288 : i1
    %290 = arith.andi %289, %286 : i1
    %291 = arith.addi %285, %284 : i32
    %292 = arith.select %290, %291, %285 : i32
    %293 = arith.index_cast %292 : i32 to index
    %c0_115 = arith.constant 0 : index
    %c0_116 = arith.constant 0 : index
    %294 = vector.load %arg3[%293, %c0_115, %c0_116] : memref<2x8x4xi32, #tpu.memory_space<vmem>>, vector<1x8x4xi32>
    %295 = vector.shape_cast %294 : vector<1x8x4xi32> to vector<8x4xi32>
    %false_117 = arith.constant false
    %296 = vector.broadcast %false_117 : i1 to vector<8x8xi1>
    %297 = vector.extract_strided_slice %295 {offsets = [0, 0], sizes = [8, 1], strides = [1, 1]} : vector<8x4xi32> to vector<8x1xi32>
    %298 = vector.broadcast %297 : vector<8x1xi32> to vector<8x8xi32>
    %299 = arith.cmpi eq, %2, %298 : vector<8x8xi32>
    %300 = arith.ori %296, %299 : vector<8x8xi1>
    %301 = vector.extract_strided_slice %295 {offsets = [0, 1], sizes = [8, 1], strides = [1, 1]} : vector<8x4xi32> to vector<8x1xi32>
    %302 = vector.broadcast %301 : vector<8x1xi32> to vector<8x8xi32>
    %303 = arith.cmpi eq, %2, %302 : vector<8x8xi32>
    %304 = arith.ori %300, %303 : vector<8x8xi1>
    %305 = vector.extract_strided_slice %295 {offsets = [0, 2], sizes = [8, 1], strides = [1, 1]} : vector<8x4xi32> to vector<8x1xi32>
    %306 = vector.broadcast %305 : vector<8x1xi32> to vector<8x8xi32>
    %307 = arith.cmpi eq, %2, %306 : vector<8x8xi32>
    %308 = arith.ori %304, %307 : vector<8x8xi1>
    %309 = vector.extract_strided_slice %295 {offsets = [0, 3], sizes = [8, 1], strides = [1, 1]} : vector<8x4xi32> to vector<8x1xi32>
    %310 = vector.broadcast %309 : vector<8x1xi32> to vector<8x8xi32>
    %311 = arith.cmpi eq, %2, %310 : vector<8x8xi32>
    %312 = arith.ori %308, %311 : vector<8x8xi1>
    %cst_118 = arith.constant 0.000000e+00 : f32
    %cst_119 = arith.constant -1.000000e+30 : f32
    %313 = vector.broadcast %cst_118 : f32 to vector<8x8xf32>
    %314 = vector.broadcast %cst_119 : f32 to vector<8x8xf32>
    %315 = arith.select %312, %313, %314 : vector<8x8xi1>, vector<8x8xf32>
    %c4_i32_120 = arith.constant 4 : i32
    %316 = arith.muli %arg0, %c4_i32_120 : i32
    %c1_i32_121 = arith.constant 1 : i32
    %317 = arith.addi %316, %c1_i32_121 : i32
    %c2_i32_122 = arith.constant 2 : i32
    %c0_i32_123 = arith.constant 0 : i32
    %318 = arith.cmpi eq, %c2_i32_122, %c0_i32_123 : i32
    %c1_i32_124 = arith.constant 1 : i32
    %319 = arith.select %318, %c1_i32_124, %c2_i32_122 : i32
    %320 = arith.remsi %317, %319 : i32
    %c0_i32_125 = arith.constant 0 : i32
    %321 = arith.cmpi ne, %320, %c0_i32_125 : i32
    %c0_i32_126 = arith.constant 0 : i32
    %322 = arith.cmpi slt, %320, %c0_i32_126 : i32
    %c0_i32_127 = arith.constant 0 : i32
    %323 = arith.cmpi slt, %319, %c0_i32_127 : i32
    %324 = arith.xori %322, %323 : i1
    %325 = arith.andi %324, %321 : i1
    %326 = arith.addi %320, %319 : i32
    %327 = arith.select %325, %326, %320 : i32
    %328 = arith.index_cast %327 : i32 to index
    %c0_128 = arith.constant 0 : index
    %c0_129 = arith.constant 0 : index
    %329 = vector.load %arg3[%328, %c0_128, %c0_129] : memref<2x8x4xi32, #tpu.memory_space<vmem>>, vector<1x8x4xi32>
    %330 = vector.shape_cast %329 : vector<1x8x4xi32> to vector<8x4xi32>
    %false_130 = arith.constant false
    %331 = vector.broadcast %false_130 : i1 to vector<8x8xi1>
    %332 = vector.extract_strided_slice %330 {offsets = [0, 0], sizes = [8, 1], strides = [1, 1]} : vector<8x4xi32> to vector<8x1xi32>
    %333 = vector.broadcast %332 : vector<8x1xi32> to vector<8x8xi32>
    %334 = arith.cmpi eq, %2, %333 : vector<8x8xi32>
    %335 = arith.ori %331, %334 : vector<8x8xi1>
    %336 = vector.extract_strided_slice %330 {offsets = [0, 1], sizes = [8, 1], strides = [1, 1]} : vector<8x4xi32> to vector<8x1xi32>
    %337 = vector.broadcast %336 : vector<8x1xi32> to vector<8x8xi32>
    %338 = arith.cmpi eq, %2, %337 : vector<8x8xi32>
    %339 = arith.ori %335, %338 : vector<8x8xi1>
    %340 = vector.extract_strided_slice %330 {offsets = [0, 2], sizes = [8, 1], strides = [1, 1]} : vector<8x4xi32> to vector<8x1xi32>
    %341 = vector.broadcast %340 : vector<8x1xi32> to vector<8x8xi32>
    %342 = arith.cmpi eq, %2, %341 : vector<8x8xi32>
    %343 = arith.ori %339, %342 : vector<8x8xi1>
    %344 = vector.extract_strided_slice %330 {offsets = [0, 3], sizes = [8, 1], strides = [1, 1]} : vector<8x4xi32> to vector<8x1xi32>
    %345 = vector.broadcast %344 : vector<8x1xi32> to vector<8x8xi32>
    %346 = arith.cmpi eq, %2, %345 : vector<8x8xi32>
    %347 = arith.ori %343, %346 : vector<8x8xi1>
    %cst_131 = arith.constant 0.000000e+00 : f32
    %cst_132 = arith.constant -1.000000e+30 : f32
    %348 = vector.broadcast %cst_131 : f32 to vector<8x8xf32>
    %349 = vector.broadcast %cst_132 : f32 to vector<8x8xf32>
    %350 = arith.select %347, %348, %349 : vector<8x8xi1>, vector<8x8xf32>
    %c1 = arith.constant 1 : index
    %c0_133 = arith.constant 0 : index
    %c0_134 = arith.constant 0 : index
    %351 = vector.load %arg4[%c1, %c0_133, %c0_134] : memref<2x32x96xbf16, #tpu.memory_space<vmem>>, vector<1x32x96xbf16>
    %352 = vector.shape_cast %351 : vector<1x32x96xbf16> to vector<32x96xbf16>
    %353 = arith.truncf %280 : vector<8x32xf32> to vector<8x32xbf16>
    %cst_135 = arith.constant dense<0.000000e+00> : vector<8x96xf32>
    %354 = tpu.matmul %353, %352, %cst_135 {dimension_numbers = #tpu.dot_dimension_numbers<[1], [0], [0], [1], [0, 0, 1, 1], [], []>} : vector<8x32xbf16>, vector<32x96xbf16>, vector<8x96xf32> -> vector<8x96xf32>
    %c1_136 = arith.constant 1 : index
    %c0_137 = arith.constant 0 : index
    %c0_138 = arith.constant 0 : index
    %355 = vector.load %arg5[%c1_136, %c0_137, %c0_138] : memref<2x1x96xf32, #tpu.memory_space<vmem>>, vector<1x1x96xf32>
    %356 = vector.shape_cast %355 : vector<1x1x96xf32> to vector<1x96xf32>
    %357 = vector.broadcast %356 : vector<1x96xf32> to vector<8x96xf32>
    %358 = arith.addf %354, %357 : vector<8x96xf32>
    %359 = vector.extract_strided_slice %358 {offsets = [0, 0], sizes = [8, 8], strides = [1, 1]} : vector<8x96xf32> to vector<8x8xf32>
    %360 = vector.extract_strided_slice %358 {offsets = [0, 32], sizes = [8, 8], strides = [1, 1]} : vector<8x96xf32> to vector<8x8xf32>
    %361 = vector.extract_strided_slice %358 {offsets = [0, 64], sizes = [8, 8], strides = [1, 1]} : vector<8x96xf32> to vector<8x8xf32>
    %cst_139 = arith.constant 0.353553385 : f32
    %362 = vector.broadcast %cst_139 : f32 to vector<8x8xf32>
    %363 = arith.mulf %359, %362 : vector<8x8xf32>
    %364 = arith.truncf %363 : vector<8x8xf32> to vector<8x8xbf16>
    %365 = arith.truncf %360 : vector<8x8xf32> to vector<8x8xbf16>
    %cst_140 = arith.constant dense<0.000000e+00> : vector<8x8xf32>
    %366 = tpu.matmul %364, %365, %cst_140 {dimension_numbers = #tpu.dot_dimension_numbers<[1], [1], [0], [0], [0, 0, 1, 0], [], []>} : vector<8x8xbf16>, vector<8x8xbf16>, vector<8x8xf32> -> vector<8x8xf32>
    %367 = arith.addf %366, %315 : vector<8x8xf32>
    %cst_141 = arith.constant dense<0xFF800000> : vector<8xf32>
    %368 = vector.multi_reduction <maximumf>, %367, %cst_141 [1] : vector<8x8xf32> to vector<8xf32>
    %369 = vector.shape_cast %368 : vector<8xf32> to vector<8x1xf32>
    %370 = vector.broadcast %369 : vector<8x1xf32> to vector<8x8xf32>
    %371 = arith.subf %367, %370 : vector<8x8xf32>
    %372 = math.exp %371 : vector<8x8xf32>
    %cst_142 = arith.constant dense<0.000000e+00> : vector<8xf32>
    %373 = vector.multi_reduction <add>, %372, %cst_142 [1] : vector<8x8xf32> to vector<8xf32>
    %374 = vector.shape_cast %373 : vector<8xf32> to vector<8x1xf32>
    %375 = tpu.reciprocal %374 {approx = true} : vector<8x1xf32> -> vector<8x1xf32>
    %376 = vector.broadcast %375 : vector<8x1xf32> to vector<8x8xf32>
    %377 = arith.mulf %372, %376 : vector<8x8xf32>
    %378 = arith.truncf %377 : vector<8x8xf32> to vector<8x8xbf16>
    %379 = arith.truncf %361 : vector<8x8xf32> to vector<8x8xbf16>
    %cst_143 = arith.constant dense<0.000000e+00> : vector<8x8xf32>
    %380 = tpu.matmul %378, %379, %cst_143 {dimension_numbers = #tpu.dot_dimension_numbers<[1], [0], [0], [1], [0, 0, 1, 1], [], []>} : vector<8x8xbf16>, vector<8x8xbf16>, vector<8x8xf32> -> vector<8x8xf32>
    %381 = vector.extract_strided_slice %358 {offsets = [0, 8], sizes = [8, 8], strides = [1, 1]} : vector<8x96xf32> to vector<8x8xf32>
    %382 = vector.extract_strided_slice %358 {offsets = [0, 40], sizes = [8, 8], strides = [1, 1]} : vector<8x96xf32> to vector<8x8xf32>
    %383 = vector.extract_strided_slice %358 {offsets = [0, 72], sizes = [8, 8], strides = [1, 1]} : vector<8x96xf32> to vector<8x8xf32>
    %cst_144 = arith.constant 0.353553385 : f32
    %384 = vector.broadcast %cst_144 : f32 to vector<8x8xf32>
    %385 = arith.mulf %381, %384 : vector<8x8xf32>
    %386 = arith.truncf %385 : vector<8x8xf32> to vector<8x8xbf16>
    %387 = arith.truncf %382 : vector<8x8xf32> to vector<8x8xbf16>
    %cst_145 = arith.constant dense<0.000000e+00> : vector<8x8xf32>
    %388 = tpu.matmul %386, %387, %cst_145 {dimension_numbers = #tpu.dot_dimension_numbers<[1], [1], [0], [0], [0, 0, 1, 0], [], []>} : vector<8x8xbf16>, vector<8x8xbf16>, vector<8x8xf32> -> vector<8x8xf32>
    %389 = arith.addf %388, %350 : vector<8x8xf32>
    %cst_146 = arith.constant dense<0xFF800000> : vector<8xf32>
    %390 = vector.multi_reduction <maximumf>, %389, %cst_146 [1] : vector<8x8xf32> to vector<8xf32>
    %391 = vector.shape_cast %390 : vector<8xf32> to vector<8x1xf32>
    %392 = vector.broadcast %391 : vector<8x1xf32> to vector<8x8xf32>
    %393 = arith.subf %389, %392 : vector<8x8xf32>
    %394 = math.exp %393 : vector<8x8xf32>
    %cst_147 = arith.constant dense<0.000000e+00> : vector<8xf32>
    %395 = vector.multi_reduction <add>, %394, %cst_147 [1] : vector<8x8xf32> to vector<8xf32>
    %396 = vector.shape_cast %395 : vector<8xf32> to vector<8x1xf32>
    %397 = tpu.reciprocal %396 {approx = true} : vector<8x1xf32> -> vector<8x1xf32>
    %398 = vector.broadcast %397 : vector<8x1xf32> to vector<8x8xf32>
    %399 = arith.mulf %394, %398 : vector<8x8xf32>
    %400 = arith.truncf %399 : vector<8x8xf32> to vector<8x8xbf16>
    %401 = arith.truncf %383 : vector<8x8xf32> to vector<8x8xbf16>
    %cst_148 = arith.constant dense<0.000000e+00> : vector<8x8xf32>
    %402 = tpu.matmul %400, %401, %cst_148 {dimension_numbers = #tpu.dot_dimension_numbers<[1], [0], [0], [1], [0, 0, 1, 1], [], []>} : vector<8x8xbf16>, vector<8x8xbf16>, vector<8x8xf32> -> vector<8x8xf32>
    %403 = vector.extract_strided_slice %358 {offsets = [0, 16], sizes = [8, 8], strides = [1, 1]} : vector<8x96xf32> to vector<8x8xf32>
    %404 = vector.extract_strided_slice %358 {offsets = [0, 48], sizes = [8, 8], strides = [1, 1]} : vector<8x96xf32> to vector<8x8xf32>
    %405 = vector.extract_strided_slice %358 {offsets = [0, 80], sizes = [8, 8], strides = [1, 1]} : vector<8x96xf32> to vector<8x8xf32>
    %cst_149 = arith.constant 0.353553385 : f32
    %406 = vector.broadcast %cst_149 : f32 to vector<8x8xf32>
    %407 = arith.mulf %403, %406 : vector<8x8xf32>
    %408 = arith.truncf %407 : vector<8x8xf32> to vector<8x8xbf16>
    %409 = arith.truncf %404 : vector<8x8xf32> to vector<8x8xbf16>
    %cst_150 = arith.constant dense<0.000000e+00> : vector<8x8xf32>
    %410 = tpu.matmul %408, %409, %cst_150 {dimension_numbers = #tpu.dot_dimension_numbers<[1], [1], [0], [0], [0, 0, 1, 0], [], []>} : vector<8x8xbf16>, vector<8x8xbf16>, vector<8x8xf32> -> vector<8x8xf32>
    %411 = arith.addf %410, %315 : vector<8x8xf32>
    %cst_151 = arith.constant dense<0xFF800000> : vector<8xf32>
    %412 = vector.multi_reduction <maximumf>, %411, %cst_151 [1] : vector<8x8xf32> to vector<8xf32>
    %413 = vector.shape_cast %412 : vector<8xf32> to vector<8x1xf32>
    %414 = vector.broadcast %413 : vector<8x1xf32> to vector<8x8xf32>
    %415 = arith.subf %411, %414 : vector<8x8xf32>
    %416 = math.exp %415 : vector<8x8xf32>
    %cst_152 = arith.constant dense<0.000000e+00> : vector<8xf32>
    %417 = vector.multi_reduction <add>, %416, %cst_152 [1] : vector<8x8xf32> to vector<8xf32>
    %418 = vector.shape_cast %417 : vector<8xf32> to vector<8x1xf32>
    %419 = tpu.reciprocal %418 {approx = true} : vector<8x1xf32> -> vector<8x1xf32>
    %420 = vector.broadcast %419 : vector<8x1xf32> to vector<8x8xf32>
    %421 = arith.mulf %416, %420 : vector<8x8xf32>
    %422 = arith.truncf %421 : vector<8x8xf32> to vector<8x8xbf16>
    %423 = arith.truncf %405 : vector<8x8xf32> to vector<8x8xbf16>
    %cst_153 = arith.constant dense<0.000000e+00> : vector<8x8xf32>
    %424 = tpu.matmul %422, %423, %cst_153 {dimension_numbers = #tpu.dot_dimension_numbers<[1], [0], [0], [1], [0, 0, 1, 1], [], []>} : vector<8x8xbf16>, vector<8x8xbf16>, vector<8x8xf32> -> vector<8x8xf32>
    %425 = vector.extract_strided_slice %358 {offsets = [0, 24], sizes = [8, 8], strides = [1, 1]} : vector<8x96xf32> to vector<8x8xf32>
    %426 = vector.extract_strided_slice %358 {offsets = [0, 56], sizes = [8, 8], strides = [1, 1]} : vector<8x96xf32> to vector<8x8xf32>
    %427 = vector.extract_strided_slice %358 {offsets = [0, 88], sizes = [8, 8], strides = [1, 1]} : vector<8x96xf32> to vector<8x8xf32>
    %cst_154 = arith.constant 0.353553385 : f32
    %428 = vector.broadcast %cst_154 : f32 to vector<8x8xf32>
    %429 = arith.mulf %425, %428 : vector<8x8xf32>
    %430 = arith.truncf %429 : vector<8x8xf32> to vector<8x8xbf16>
    %431 = arith.truncf %426 : vector<8x8xf32> to vector<8x8xbf16>
    %cst_155 = arith.constant dense<0.000000e+00> : vector<8x8xf32>
    %432 = tpu.matmul %430, %431, %cst_155 {dimension_numbers = #tpu.dot_dimension_numbers<[1], [1], [0], [0], [0, 0, 1, 0], [], []>} : vector<8x8xbf16>, vector<8x8xbf16>, vector<8x8xf32> -> vector<8x8xf32>
    %433 = arith.addf %432, %350 : vector<8x8xf32>
    %cst_156 = arith.constant dense<0xFF800000> : vector<8xf32>
    %434 = vector.multi_reduction <maximumf>, %433, %cst_156 [1] : vector<8x8xf32> to vector<8xf32>
    %435 = vector.shape_cast %434 : vector<8xf32> to vector<8x1xf32>
    %436 = vector.broadcast %435 : vector<8x1xf32> to vector<8x8xf32>
    %437 = arith.subf %433, %436 : vector<8x8xf32>
    %438 = math.exp %437 : vector<8x8xf32>
    %cst_157 = arith.constant dense<0.000000e+00> : vector<8xf32>
    %439 = vector.multi_reduction <add>, %438, %cst_157 [1] : vector<8x8xf32> to vector<8xf32>
    %440 = vector.shape_cast %439 : vector<8xf32> to vector<8x1xf32>
    %441 = tpu.reciprocal %440 {approx = true} : vector<8x1xf32> -> vector<8x1xf32>
    %442 = vector.broadcast %441 : vector<8x1xf32> to vector<8x8xf32>
    %443 = arith.mulf %438, %442 : vector<8x8xf32>
    %444 = arith.truncf %443 : vector<8x8xf32> to vector<8x8xbf16>
    %445 = arith.truncf %427 : vector<8x8xf32> to vector<8x8xbf16>
    %cst_158 = arith.constant dense<0.000000e+00> : vector<8x8xf32>
    %446 = tpu.matmul %444, %445, %cst_158 {dimension_numbers = #tpu.dot_dimension_numbers<[1], [0], [0], [1], [0, 0, 1, 1], [], []>} : vector<8x8xbf16>, vector<8x8xbf16>, vector<8x8xf32> -> vector<8x8xf32>
    %447 = tpu.concatenate %380, %402, %424, %446 in 1 : vector<8x8xf32>, vector<8x8xf32>, vector<8x8xf32>, vector<8x8xf32> -> vector<8x32xf32>
    %c1_159 = arith.constant 1 : index
    %c0_160 = arith.constant 0 : index
    %c0_161 = arith.constant 0 : index
    %448 = vector.load %arg6[%c1_159, %c0_160, %c0_161] : memref<2x32x32xbf16, #tpu.memory_space<vmem>>, vector<1x32x32xbf16>
    %449 = vector.shape_cast %448 : vector<1x32x32xbf16> to vector<32x32xbf16>
    %450 = arith.truncf %447 : vector<8x32xf32> to vector<8x32xbf16>
    %cst_162 = arith.constant dense<0.000000e+00> : vector<8x32xf32>
    %451 = tpu.matmul %450, %449, %cst_162 {dimension_numbers = #tpu.dot_dimension_numbers<[1], [0], [0], [1], [0, 0, 1, 1], [], []>} : vector<8x32xbf16>, vector<32x32xbf16>, vector<8x32xf32> -> vector<8x32xf32>
    %c1_163 = arith.constant 1 : index
    %c0_164 = arith.constant 0 : index
    %c0_165 = arith.constant 0 : index
    %452 = vector.load %arg7[%c1_163, %c0_164, %c0_165] : memref<2x1x32xf32, #tpu.memory_space<vmem>>, vector<1x1x32xf32>
    %453 = vector.shape_cast %452 : vector<1x1x32xf32> to vector<1x32xf32>
    %454 = vector.broadcast %453 : vector<1x32xf32> to vector<8x32xf32>
    %455 = arith.addf %451, %454 : vector<8x32xf32>
    %c1_166 = arith.constant 1 : index
    %c0_167 = arith.constant 0 : index
    %c0_168 = arith.constant 0 : index
    %456 = vector.load %arg8[%c1_166, %c0_167, %c0_168] : memref<2x32x64xbf16, #tpu.memory_space<vmem>>, vector<1x32x64xbf16>
    %457 = vector.shape_cast %456 : vector<1x32x64xbf16> to vector<32x64xbf16>
    %458 = arith.truncf %455 : vector<8x32xf32> to vector<8x32xbf16>
    %cst_169 = arith.constant dense<0.000000e+00> : vector<8x64xf32>
    %459 = tpu.matmul %458, %457, %cst_169 {dimension_numbers = #tpu.dot_dimension_numbers<[1], [0], [0], [1], [0, 0, 1, 1], [], []>} : vector<8x32xbf16>, vector<32x64xbf16>, vector<8x64xf32> -> vector<8x64xf32>
    %c1_170 = arith.constant 1 : index
    %c0_171 = arith.constant 0 : index
    %c0_172 = arith.constant 0 : index
    %460 = vector.load %arg9[%c1_170, %c0_171, %c0_172] : memref<2x1x64xf32, #tpu.memory_space<vmem>>, vector<1x1x64xf32>
    %461 = vector.shape_cast %460 : vector<1x1x64xf32> to vector<1x64xf32>
    %462 = vector.broadcast %461 : vector<1x64xf32> to vector<8x64xf32>
    %463 = arith.addf %459, %462 : vector<8x64xf32>
    %c1_173 = arith.constant 1 : index
    %c0_174 = arith.constant 0 : index
    %c0_175 = arith.constant 0 : index
    %464 = vector.load %arg10[%c1_173, %c0_174, %c0_175] : memref<2x1x64xf32, #tpu.memory_space<vmem>>, vector<1x1x64xf32>
    %465 = vector.shape_cast %464 : vector<1x1x64xf32> to vector<1x64xf32>
    %c1_176 = arith.constant 1 : index
    %c0_177 = arith.constant 0 : index
    %c0_178 = arith.constant 0 : index
    %466 = vector.load %arg11[%c1_176, %c0_177, %c0_178] : memref<2x1x64xf32, #tpu.memory_space<vmem>>, vector<1x1x64xf32>
    %467 = vector.shape_cast %466 : vector<1x1x64xf32> to vector<1x64xf32>
    %cst_179 = arith.constant dense<0.000000e+00> : vector<8xf32>
    %468 = vector.multi_reduction <add>, %463, %cst_179 [1] : vector<8x64xf32> to vector<8xf32>
    %469 = vector.shape_cast %468 : vector<8xf32> to vector<8x1xf32>
    %cst_180 = arith.constant 6.400000e+01 : f32
    %470 = vector.broadcast %cst_180 : f32 to vector<8x1xf32>
    %471 = arith.divf %469, %470 : vector<8x1xf32>
    %472 = vector.broadcast %471 : vector<8x1xf32> to vector<8x64xf32>
    %473 = arith.subf %463, %472 : vector<8x64xf32>
    %474 = arith.mulf %473, %473 : vector<8x64xf32>
    %cst_181 = arith.constant dense<0.000000e+00> : vector<8xf32>
    %475 = vector.multi_reduction <add>, %474, %cst_181 [1] : vector<8x64xf32> to vector<8xf32>
    %476 = vector.shape_cast %475 : vector<8xf32> to vector<8x1xf32>
    %cst_182 = arith.constant 6.400000e+01 : f32
    %477 = vector.broadcast %cst_182 : f32 to vector<8x1xf32>
    %478 = arith.divf %476, %477 : vector<8x1xf32>
    %479 = vector.broadcast %471 : vector<8x1xf32> to vector<8x64xf32>
    %480 = arith.subf %463, %479 : vector<8x64xf32>
    %cst_183 = arith.constant 9.99999974E-6 : f32
    %481 = vector.broadcast %cst_183 : f32 to vector<8x1xf32>
    %482 = arith.addf %478, %481 : vector<8x1xf32>
    %483 = math.rsqrt %482 : vector<8x1xf32>
    %484 = vector.broadcast %483 : vector<8x1xf32> to vector<8x64xf32>
    %485 = arith.mulf %480, %484 : vector<8x64xf32>
    %486 = vector.broadcast %465 : vector<1x64xf32> to vector<8x64xf32>
    %487 = arith.mulf %485, %486 : vector<8x64xf32>
    %488 = vector.broadcast %467 : vector<1x64xf32> to vector<8x64xf32>
    %489 = arith.addf %487, %488 : vector<8x64xf32>
    %cst_184 = arith.constant 5.000000e-01 : f32
    %490 = vector.broadcast %cst_184 : f32 to vector<8x64xf32>
    %491 = arith.mulf %490, %489 : vector<8x64xf32>
    %cst_185 = arith.constant 4.471500e-02 : f32
    %492 = vector.broadcast %cst_185 : f32 to vector<8x64xf32>
    %493 = arith.mulf %492, %489 : vector<8x64xf32>
    %494 = arith.mulf %493, %489 : vector<8x64xf32>
    %495 = arith.mulf %494, %489 : vector<8x64xf32>
    %496 = arith.addf %489, %495 : vector<8x64xf32>
    %cst_186 = arith.constant 0.797884583 : f32
    %497 = vector.broadcast %cst_186 : f32 to vector<8x64xf32>
    %498 = arith.mulf %497, %496 : vector<8x64xf32>
    %499 = math.tanh %498 : vector<8x64xf32>
    %cst_187 = arith.constant 1.000000e+00 : f32
    %500 = vector.broadcast %cst_187 : f32 to vector<8x64xf32>
    %501 = arith.addf %500, %499 : vector<8x64xf32>
    %502 = arith.mulf %491, %501 : vector<8x64xf32>
    %c1_188 = arith.constant 1 : index
    %c0_189 = arith.constant 0 : index
    %c0_190 = arith.constant 0 : index
    %503 = vector.load %arg12[%c1_188, %c0_189, %c0_190] : memref<2x64x64xbf16, #tpu.memory_space<vmem>>, vector<1x64x64xbf16>
    %504 = vector.shape_cast %503 : vector<1x64x64xbf16> to vector<64x64xbf16>
    %505 = arith.truncf %502 : vector<8x64xf32> to vector<8x64xbf16>
    %cst_191 = arith.constant dense<0.000000e+00> : vector<8x64xf32>
    %506 = tpu.matmul %505, %504, %cst_191 {dimension_numbers = #tpu.dot_dimension_numbers<[1], [0], [0], [1], [0, 0, 1, 1], [], []>} : vector<8x64xbf16>, vector<64x64xbf16>, vector<8x64xf32> -> vector<8x64xf32>
    %c1_192 = arith.constant 1 : index
    %c0_193 = arith.constant 0 : index
    %c0_194 = arith.constant 0 : index
    %507 = vector.load %arg13[%c1_192, %c0_193, %c0_194] : memref<2x1x64xf32, #tpu.memory_space<vmem>>, vector<1x1x64xf32>
    %508 = vector.shape_cast %507 : vector<1x1x64xf32> to vector<1x64xf32>
    %509 = vector.broadcast %508 : vector<1x64xf32> to vector<8x64xf32>
    %510 = arith.addf %506, %509 : vector<8x64xf32>
    %c1_195 = arith.constant 1 : index
    %c0_196 = arith.constant 0 : index
    %c0_197 = arith.constant 0 : index
    %511 = vector.load %arg14[%c1_195, %c0_196, %c0_197] : memref<2x1x64xf32, #tpu.memory_space<vmem>>, vector<1x1x64xf32>
    %512 = vector.shape_cast %511 : vector<1x1x64xf32> to vector<1x64xf32>
    %c1_198 = arith.constant 1 : index
    %c0_199 = arith.constant 0 : index
    %c0_200 = arith.constant 0 : index
    %513 = vector.load %arg15[%c1_198, %c0_199, %c0_200] : memref<2x1x64xf32, #tpu.memory_space<vmem>>, vector<1x1x64xf32>
    %514 = vector.shape_cast %513 : vector<1x1x64xf32> to vector<1x64xf32>
    %cst_201 = arith.constant dense<0.000000e+00> : vector<8xf32>
    %515 = vector.multi_reduction <add>, %510, %cst_201 [1] : vector<8x64xf32> to vector<8xf32>
    %516 = vector.shape_cast %515 : vector<8xf32> to vector<8x1xf32>
    %cst_202 = arith.constant 6.400000e+01 : f32
    %517 = vector.broadcast %cst_202 : f32 to vector<8x1xf32>
    %518 = arith.divf %516, %517 : vector<8x1xf32>
    %519 = vector.broadcast %518 : vector<8x1xf32> to vector<8x64xf32>
    %520 = arith.subf %510, %519 : vector<8x64xf32>
    %521 = arith.mulf %520, %520 : vector<8x64xf32>
    %cst_203 = arith.constant dense<0.000000e+00> : vector<8xf32>
    %522 = vector.multi_reduction <add>, %521, %cst_203 [1] : vector<8x64xf32> to vector<8xf32>
    %523 = vector.shape_cast %522 : vector<8xf32> to vector<8x1xf32>
    %cst_204 = arith.constant 6.400000e+01 : f32
    %524 = vector.broadcast %cst_204 : f32 to vector<8x1xf32>
    %525 = arith.divf %523, %524 : vector<8x1xf32>
    %526 = vector.broadcast %518 : vector<8x1xf32> to vector<8x64xf32>
    %527 = arith.subf %510, %526 : vector<8x64xf32>
    %cst_205 = arith.constant 9.99999974E-6 : f32
    %528 = vector.broadcast %cst_205 : f32 to vector<8x1xf32>
    %529 = arith.addf %525, %528 : vector<8x1xf32>
    %530 = math.rsqrt %529 : vector<8x1xf32>
    %531 = vector.broadcast %530 : vector<8x1xf32> to vector<8x64xf32>
    %532 = arith.mulf %527, %531 : vector<8x64xf32>
    %533 = vector.broadcast %512 : vector<1x64xf32> to vector<8x64xf32>
    %534 = arith.mulf %532, %533 : vector<8x64xf32>
    %535 = vector.broadcast %514 : vector<1x64xf32> to vector<8x64xf32>
    %536 = arith.addf %534, %535 : vector<8x64xf32>
    %cst_206 = arith.constant 5.000000e-01 : f32
    %537 = vector.broadcast %cst_206 : f32 to vector<8x64xf32>
    %538 = arith.mulf %537, %536 : vector<8x64xf32>
    %cst_207 = arith.constant 4.471500e-02 : f32
    %539 = vector.broadcast %cst_207 : f32 to vector<8x64xf32>
    %540 = arith.mulf %539, %536 : vector<8x64xf32>
    %541 = arith.mulf %540, %536 : vector<8x64xf32>
    %542 = arith.mulf %541, %536 : vector<8x64xf32>
    %543 = arith.addf %536, %542 : vector<8x64xf32>
    %cst_208 = arith.constant 0.797884583 : f32
    %544 = vector.broadcast %cst_208 : f32 to vector<8x64xf32>
    %545 = arith.mulf %544, %543 : vector<8x64xf32>
    %546 = math.tanh %545 : vector<8x64xf32>
    %cst_209 = arith.constant 1.000000e+00 : f32
    %547 = vector.broadcast %cst_209 : f32 to vector<8x64xf32>
    %548 = arith.addf %547, %546 : vector<8x64xf32>
    %549 = arith.mulf %538, %548 : vector<8x64xf32>
    %c1_210 = arith.constant 1 : index
    %c0_211 = arith.constant 0 : index
    %c0_212 = arith.constant 0 : index
    %550 = vector.load %arg16[%c1_210, %c0_211, %c0_212] : memref<2x64x32xbf16, #tpu.memory_space<vmem>>, vector<1x64x32xbf16>
    %551 = vector.shape_cast %550 : vector<1x64x32xbf16> to vector<64x32xbf16>
    %552 = arith.truncf %549 : vector<8x64xf32> to vector<8x64xbf16>
    %cst_213 = arith.constant dense<0.000000e+00> : vector<8x32xf32>
    %553 = tpu.matmul %552, %551, %cst_213 {dimension_numbers = #tpu.dot_dimension_numbers<[1], [0], [0], [1], [0, 0, 1, 1], [], []>} : vector<8x64xbf16>, vector<64x32xbf16>, vector<8x32xf32> -> vector<8x32xf32>
    %554 = arith.addf %280, %553 : vector<8x32xf32>
    %c1_214 = arith.constant 1 : index
    %c0_215 = arith.constant 0 : index
    %c0_216 = arith.constant 0 : index
    %555 = vector.load %arg17[%c1_214, %c0_215, %c0_216] : memref<2x1x32xf32, #tpu.memory_space<vmem>>, vector<1x1x32xf32>
    %556 = vector.shape_cast %555 : vector<1x1x32xf32> to vector<1x32xf32>
    %557 = vector.broadcast %556 : vector<1x32xf32> to vector<8x32xf32>
    %558 = arith.addf %554, %557 : vector<8x32xf32>
    %c0_217 = arith.constant 0 : index
    %c0_218 = arith.constant 0 : index
    %c0_219 = arith.constant 0 : index
    %559 = vector.load %arg18[%c0_217, %c0_218, %c0_219] : memref<1x8x32xf32, #tpu.memory_space<vmem>>, vector<1x8x32xf32>
    %560 = vector.shape_cast %559 : vector<1x8x32xf32> to vector<8x32xf32>
    %561 = vector.shape_cast %558 : vector<8x32xf32> to vector<1x8x32xf32>
    tpu.vector_store %arg18[%c0_217, %c0_218, %c0_219], %561 {strides = array<i32>} : memref<1x8x32xf32, #tpu.memory_space<vmem>>, vector<1x8x32xf32>,
    return
  }
  func.func @transform_0(%arg0: i32) -> (i32, i32, i32) {
    %c0_i32 = arith.constant 0 : i32
    %c0_i32_0 = arith.constant 0 : i32
    %c0_i32_1 = arith.constant 0 : i32
    return %arg0, %c0_i32, %c0_i32_0 : i32, i32, i32
  }
  func.func @transform_1(%arg0: i32) -> (i32, i32, i32) {
    %c0_i32 = arith.constant 0 : i32
    %c0_i32_0 = arith.constant 0 : i32
    %c0_i32_1 = arith.constant 0 : i32
    %c0_i32_2 = arith.constant 0 : i32
    return %c0_i32, %c0_i32_0, %c0_i32_1 : i32, i32, i32
  }
  func.func @transform_2(%arg0: i32) -> (i32, i32, i32) {
    %c0_i32 = arith.constant 0 : i32
    %c0_i32_0 = arith.constant 0 : i32
    %c0_i32_1 = arith.constant 0 : i32
    %c0_i32_2 = arith.constant 0 : i32
    return %c0_i32, %c0_i32_0, %c0_i32_1 : i32, i32, i32
  }
  func.func @transform_3(%arg0: i32) -> (i32, i32, i32) {
    %c0_i32 = arith.constant 0 : i32
    %c0_i32_0 = arith.constant 0 : i32
    %c0_i32_1 = arith.constant 0 : i32
    %c0_i32_2 = arith.constant 0 : i32
    return %c0_i32, %c0_i32_0, %c0_i32_1 : i32, i32, i32
  }
  func.func @transform_4(%arg0: i32) -> (i32, i32, i32) {
    %c0_i32 = arith.constant 0 : i32
    %c0_i32_0 = arith.constant 0 : i32
    %c0_i32_1 = arith.constant 0 : i32
    %c0_i32_2 = arith.constant 0 : i32
    return %c0_i32, %c0_i32_0, %c0_i32_1 : i32, i32, i32
  }
  func.func @transform_5(%arg0: i32) -> (i32, i32, i32) {
    %c0_i32 = arith.constant 0 : i32
    %c0_i32_0 = arith.constant 0 : i32
    %c0_i32_1 = arith.constant 0 : i32
    %c0_i32_2 = arith.constant 0 : i32
    return %c0_i32, %c0_i32_0, %c0_i32_1 : i32, i32, i32
  }
  func.func @transform_6(%arg0: i32) -> (i32, i32, i32) {
    %c0_i32 = arith.constant 0 : i32
    %c0_i32_0 = arith.constant 0 : i32
    %c0_i32_1 = arith.constant 0 : i32
    %c0_i32_2 = arith.constant 0 : i32
    return %c0_i32, %c0_i32_0, %c0_i32_1 : i32, i32, i32
  }
  func.func @transform_7(%arg0: i32) -> (i32, i32, i32) {
    %c0_i32 = arith.constant 0 : i32
    %c0_i32_0 = arith.constant 0 : i32
    %c0_i32_1 = arith.constant 0 : i32
    %c0_i32_2 = arith.constant 0 : i32
    return %c0_i32, %c0_i32_0, %c0_i32_1 : i32, i32, i32
  }
  func.func @transform_8(%arg0: i32) -> (i32, i32, i32) {
    %c0_i32 = arith.constant 0 : i32
    %c0_i32_0 = arith.constant 0 : i32
    %c0_i32_1 = arith.constant 0 : i32
    %c0_i32_2 = arith.constant 0 : i32
    return %c0_i32, %c0_i32_0, %c0_i32_1 : i32, i32, i32
  }
  func.func @transform_9(%arg0: i32) -> (i32, i32, i32) {
    %c0_i32 = arith.constant 0 : i32
    %c0_i32_0 = arith.constant 0 : i32
    %c0_i32_1 = arith.constant 0 : i32
    %c0_i32_2 = arith.constant 0 : i32
    return %c0_i32, %c0_i32_0, %c0_i32_1 : i32, i32, i32
  }
  func.func @transform_10(%arg0: i32) -> (i32, i32, i32) {
    %c0_i32 = arith.constant 0 : i32
    %c0_i32_0 = arith.constant 0 : i32
    %c0_i32_1 = arith.constant 0 : i32
    %c0_i32_2 = arith.constant 0 : i32
    return %c0_i32, %c0_i32_0, %c0_i32_1 : i32, i32, i32
  }
  func.func @transform_11(%arg0: i32) -> (i32, i32, i32) {
    %c0_i32 = arith.constant 0 : i32
    %c0_i32_0 = arith.constant 0 : i32
    %c0_i32_1 = arith.constant 0 : i32
    %c0_i32_2 = arith.constant 0 : i32
    return %c0_i32, %c0_i32_0, %c0_i32_1 : i32, i32, i32
  }
  func.func @transform_12(%arg0: i32) -> (i32, i32, i32) {
    %c0_i32 = arith.constant 0 : i32
    %c0_i32_0 = arith.constant 0 : i32
    %c0_i32_1 = arith.constant 0 : i32
    %c0_i32_2 = arith.constant 0 : i32
    return %c0_i32, %c0_i32_0, %c0_i32_1 : i32, i32, i32
  }
  func.func @transform_13(%arg0: i32) -> (i32, i32, i32) {
    %c0_i32 = arith.constant 0 : i32
    %c0_i32_0 = arith.constant 0 : i32
    %c0_i32_1 = arith.constant 0 : i32
    %c0_i32_2 = arith.constant 0 : i32
    return %c0_i32, %c0_i32_0, %c0_i32_1 : i32, i32, i32
  }
  func.func @transform_14(%arg0: i32) -> (i32, i32, i32) {
    %c0_i32 = arith.constant 0 : i32
    %c0_i32_0 = arith.constant 0 : i32
    %c0_i32_1 = arith.constant 0 : i32
    %c0_i32_2 = arith.constant 0 : i32
    return %c0_i32, %c0_i32_0, %c0_i32_1 : i32, i32, i32
  }
  func.func @transform_15(%arg0: i32) -> (i32, i32, i32) {
    %c0_i32 = arith.constant 0 : i32
    %c0_i32_0 = arith.constant 0 : i32
    %c0_i32_1 = arith.constant 0 : i32
    %c0_i32_2 = arith.constant 0 : i32
    return %c0_i32, %c0_i32_0, %c0_i32_1 : i32, i32, i32
  }
  func.func @transform_16(%arg0: i32) -> (i32, i32, i32) {
    %c0_i32 = arith.constant 0 : i32
    %c0_i32_0 = arith.constant 0 : i32
    %c0_i32_1 = arith.constant 0 : i32
    %c0_i32_2 = arith.constant 0 : i32
    return %c0_i32, %c0_i32_0, %c0_i32_1 : i32, i32, i32
  }
  func.func @transform_17(%arg0: i32) -> (i32, i32, i32) {
    %c0_i32 = arith.constant 0 : i32
    %c0_i32_0 = arith.constant 0 : i32
    %c0_i32_1 = arith.constant 0 : i32
    return %arg0, %c0_i32, %c0_i32_0 : i32, i32, i32
  }
}

</mosaic_0001>

<bundles_post_ra>
// kernel: intra_modal_modeling.3
= control target key start
LH: loop header
LB: loop body
LE: loop exit
PB: predicated region body
PF: predicated region fallthrough
CT: control target
= control target key end

     0   :  { %s3826_s0 = inlined_call_operand.vmem [shape: f32[2,8,32], index: 0, kind: input, shape index: {}]   ;;  %s3827_s1 = inlined_call_operand.vmem [shape: s32[2,8,4], index: 1, kind: input, shape index: {}]   ;;  %s3828_s2 = inlined_call_operand.vmem [shape: s32[2,8,4], index: 2, kind: input, shape index: {}]   ;;  %s3829_s3 = inlined_call_operand.vmem [shape: bf16[2,32,96], index: 3, kind: input, shape index: {}]   ;;  %s3830_s4 = inlined_call_operand.vmem [shape: f32[2,1,96], index: 4, kind: input, shape index: {}]   ;;  %s3831_s5 = inlined_call_operand.vmem [shape: bf16[2,32,32], index: 5, kind: input, shape index: {}]   ;;  %s3832_s6 = inlined_call_operand.vmem [shape: f32[2,1,32], index: 6, kind: input, shape index: {}]   ;;  %s3833_s7 = inlined_call_operand.vmem [shape: bf16[2,32,64], index: 7, kind: input, shape index: {}]   ;;  %s3834_s8 = inlined_call_operand.vmem [shape: f32[2,1,64], index: 8, kind: input, shape index: {}]   ;;  %s3835_s9 = inlined_call_operand.vmem [shape: f32[2,1,64], index: 9, kind: input, shape index: {}]   ;;  %s3836_s10 = inlined_call_operand.vmem [shape: f32[2,1,64], index: 10, kind: input, shape index: {}]   ;;  %s3837_s11 = inlined_call_operand.vmem [shape: bf16[2,64,64], index: 11, kind: input, shape index: {}]   ;;  %s3838_s12 = inlined_call_operand.vmem [shape: f32[2,1,64], index: 12, kind: input, shape index: {}]   ;;  %s3839_s13 = inlined_call_operand.vmem [shape: f32[2,1,64], index: 13, kind: input, shape index: {}]   ;;  %s3840_s14 = inlined_call_operand.vmem [shape: f32[2,1,64], index: 14, kind: input, shape index: {}]   ;;  %s3841_s15 = inlined_call_operand.vmem [shape: bf16[2,64,32], index: 15, kind: input, shape index: {}]   ;;  %s3842_s16 = inlined_call_operand.vmem [shape: f32[2,1,32], index: 16, kind: input, shape index: {}]   ;;  %s3843_s17 = inlined_call_operand.hbm [shape: f32[2,8,32], index: 17, kind: output, shape index: {}]  }
   0x1   :  { %3870 = sst [smem:[#allocation12_spill]] %s3826_s0 }
   0x2   :  { %3871 = sst [smem:[#allocation13_spill]] %s3827_s1 }
   0x3   :  { %3872 = sst [smem:[#allocation14_spill]] %s3843_s17 }
   0x4   :  { %22 = vsyncpa [#allocation3], 0 }
   0x5   :  { %24 = vsyncpa [#allocation3 + $0x1], 0  ;;  %s3290_s24 = smov 0   ;;  %s3292_s25 = smov 0  }
   0x6   :  { %s3294_s26 = smov 0   ;;  %s3296_s27 = smov 0  }
   0x7 LB: > { %3873 = sst [smem:[#allocation5_spill]] %s3164_s24  ;;  %s3311_s28 = sadd.s32 4294967295, %s3176_s27   ;;  %s3176_s27 = sphi %s3296_s27, %s3913_s27   ;;  %s3172_s26 = sphi %s3294_s26, %s3915_s26   ;;  %s3168_s25 = sphi %s3292_s25, %s3917_s25   ;;  %s3164_s24 = sphi %s3290_s24, %s3916_s24  }
   0x8   : > { %3874 = sst [smem:[#allocation6_spill]] %s3172_s26  ;;  %s2573_s29 = sadd.s32 4294967294, %s3176_s27  }
   0x9   : > { %3875 = sst [smem:[#allocation7_spill]] %s3176_s27  ;;  %s3315_s0 = sadd.s32 1, %s3176_s27  }
   0xa   : > { %3876 = sst [smem:[#allocation8_spill]] %s3315_s0  ;;  %s399_s30 = sadd.s32 1, %s3172_s26 }
   0xb   : > { %s396_s18 = ssub.s32 %s3176_s27, %s3315_s0  ;;  %p409_p0 = scmp.ne.s32.totalorder %s3172_s26, %s3168_s25 }
   0xc   : > { %p397_p1 = scmp.eq.s32.totalorder %s396_s18, 0  ;;  %p410_p2 = scmp.eq.s32.totalorder %s3311_s28, 1 }
   0xd   : > { %p415_p3 = scmp.ne.s32.totalorder %s3168_s25, %s3164_s24  ;;  %p416_p4 = scmp.eq.s32.totalorder %s2573_s29, 1 }
   0xe   : > { %s3326_s19 = scalar_select %p397_p1, %s3172_s26, %s399_s30  }
   0xf   : > { %p3328_p5 = por %p410_p2, %p409_p0  ;;  %p3332_p6 = por %p416_p4, %p415_p3 }
  0x10   : > { %3877 = sst [smem:[#allocation9_spill]] %s3326_s19  ;;  %p2576_p7 = scmp.ge.s32.totalorder %s3176_s27, 1 }
  0x11   : > { %s3878_s1 = scalar_select %p3328_p5, 1, 0 }
  0x12   : > { %s3880_s20 = scalar_select %p3332_p6, 1, 0 }
  0x13   : > { %3879 = sst [smem:[#allocation10_spill]] %s3878_s1  ;;  %p489_p8 = scmp.lt.s32.totalorder %s3176_s27, 3 }
  0x14   : > { %3881 = sst [smem:[#allocation11_spill]] %s3880_s20 }
  0x15   : > { %p490_p9 = pnand %p2576_p7, %p489_p8 }
  0x16   : > { %p540_p10 = scmp.lt.s32.totalorder (!%p490_p9), %s3311_s28, 1  ;;  %s3882_s19 = sld [smem:[#allocation12_spill]] (!%p490_p9) }
  0x17   : > { %493 = sbr.rel (%p490_p9) target bundleno = 5375 (0x14ff), region = 88  ;;  %s3849_s21 = smov (!%p490_p9), 112  }
  0x18   : > { %s3853_s22 = smov (!%p490_p9), 72   ;;  %s3855_s23 = smov (!%p490_p9), 104  }
  0x19   : > { %s2579_s29 = sshll.u32 (!%p490_p9), %s3311_s28, 2  ;;  %s3884_s17 = smov (!%p490_p9), 88  }
  0x1a   : > { %p549_p11 = scmp.lt.s32.totalorder (!%p490_p9), %s2579_s29, 0  ;;  %s3885_s1 = smov (!%p490_p9), 96  }
  0x1c   : > { %v3040_v0 = vld [vmem:[%s3829_s3 + $0x8] sm:$0xff]   ;;  %v3178_v1 = vmov 0.0   ;;  %v3041_v2 = vld [vmem:[%s3829_s3] sm:$0xff]   ;;  %vm3179_vm0 = vmmov 0   ;;  %s541_s30 = scalar_select %p540_p10, %s3311_s28, 1  ;;  %vm3869_vm1 = vcmask 261120   ;;  %v546_v33 = vlaneseq }
  0x1d   : > { %2771 = vmatprep.subr.bf16.mxu0 %v3178_v1  ;;  %2779 = vmatprep.subr.bf16.mxu1 %v3178_v1  ;;  %v2588_v5 = vld [vmem:[%s3830_s4] ss:$0 sm:$0xff]  ;;  %v3187_v14 = vmov 0   ;;  %v3188_v15 = vmov 1   ;;  %v3189_v17 = vmov 2   ;;  %v3190_v19 = vmov 3  }
  0x1e   : > { %2772 = vmatpush3.bf16.msra.mxu0 %v3040_v0  ;;  %2775 = vmatprep.mubr.msk.bf16.mxu0 %vm3179_vm0, %v3178_v1  ;;  %s2578_s18 = sshll.u32 %s541_s30, 3  ;;  %s3850_s30 = smov 88   ;;  %vm694_vm2 = vcmask 64512   ;;  %v3433_v34 = vand.u32 127, %v546_v33  ;;  %v3191_v41 = vmov -1e+30  }
  0x1f   : > { %2773 = vmatprep.subr.bf16.mxu0 %v3178_v1  ;;  %2781 = vmatprep.mubr.msk.bf16.mxu1 %vm3179_vm0, %v3178_v1  ;;  %s543_s26 = scalar_lea.vmem %s3882_s19, %s2578_s18  ;;  %s3846_s19 = smov 120  }
  0x20   : > { %v3357_v3 = vld [vmem:[%s543_s26] sm:$0xff]  ;;  %s3848_s26 = smov 96   ;;  %s3847_s18 = smov 80   ;;  %3023 = vset.pattern.permute.xlu1 %v3187_v14  ;;  %3024 = vset.pattern.permute.xlu0 %v3188_v15 }
  0x21   : > { %v624_v4 = vpack.c.bf16 %v3357_v3, %v3357_v3 }
  0x22   : > { %2774 = vmatpush3.bf16.msra.mxu0 %v3041_v2 }
  0x23   : > { %2785 = vmatprep.subr.bf16.mxu0 %v3178_v1 }
  0x25   : > { %2776 = vmatmul.mubr.msk.bf16.vlgmr.msra.gmra.mxu0 %vm3869_vm1, %v624_v4 }
  0x26   : > { %2787 = vmatprep.mubr.msk.bf16.mxu0 %vm3179_vm0, %v3178_v1 }
  0xe5   : > { %v682_v6 = vpop.f32.mrf.mxu0 }
  0xe6   : > { %v683_v7 = vadd.f32 %v2588_v5, %v682_v6 }
  0xe7   : > { %v2777_v8 = vpop.f32.mrf.mxu0 }
  0xe8   : > { %v688_v9 = vmul.f32 0.35355338, %v683_v7  ;;  %v3367_v10 = vpack.c.bf16 %v683_v7, %v683_v7 }
  0xe9   : > { %v685_v11 = vpop.f32.mrf.mxu0 }
  0xea   : > { %v3369_v12 = vpack.c.bf16 %v688_v9, %v688_v9  ;;  %692 = vrot.lane.b32.xlu0 %v3367_v10, %s3848_s26  ;;  %s584_s26 = sadd.s32 1, %s2579_s29 }
  0xeb   : > { %v2778_v13 = vpop.f32.mrf.mxu0  ;;  %s586_s0 = ssub.s32 0, %s584_s26  ;;  %p585_p13 = scmp.lt.s32.totalorder %s584_s26, 0 }
  0xec   : > { %803 = vrot.lane.b32.xlu1 %v3369_v12, %s3846_s19  ;;  %s550_s19 = ssub.s32 0, %s2579_s29 }
  0xee   : > { %805 = vrot.lane.b32.xlu0 %v3367_v10, %s3850_s30 }
  0xf0   : > { %915 = vrot.lane.b32.xlu1 %v3367_v10, %s3847_s18  ;;  %s2580_s18 = smin.u32 %s2579_s29, %s550_s19  ;;  %s3883_s19 = sld [smem:[#allocation13_spill]] }
  0xf2   : > { %913 = vrot.lane.b32.xlu0 %v3369_v12, %s3849_s21  ;;  %s552_s21 = sand.u32 1, %s2580_s18   ;;  %s3867_s18 = smov 56  }
  0xf3   : > { %s553_s30 = ssub.s32 0, %s552_s21 }
  0xf4   : > { %1025 = vrot.lane.b32.xlu1 %v3367_v10, %s3853_s22  ;;  %s3919_s30 = smov (!%p549_p11, %s553_s30), %s552_s21  ;;  %s2584_s22 = smin.u32 %s586_s0, %s584_s26 }
  0xf5   : > { %p2582_p12 = scmp.lt.s32.totalorder %s3919_s30, 0  ;;  %s559_s20 = sadd.s32 2, %s3919_s30 }
  0xf6   : > { %1023 = vrot.lane.b32.xlu0 %v3369_v12, %s3855_s23  ;;  %s588_s23 = sand.u32 1, %s2584_s22   ;;  %s3861_s21 = smov 48  }
  0xf7   : > { %s3921_s20 = smov (!%p2582_p12, %s559_s20), %s3919_s30  ;;  %s589_s24 = ssub.s32 0, %s588_s23 }
  0xf8   : > { %s2583_s27 = sshll.u32 %s3921_s20, 3  ;;  %s3923_s24 = smov (!%p585_p13, %s589_s24), %s588_s23 }
  0xf9   : > { %s562_s29 = scalar_lea.vmem %s3883_s19, %s2583_s27  ;;  %p2586_p0 = scmp.lt.s32.totalorder %s3923_s24, 0 }
  0xfa   : > { %v563_v16 = vld [vmem:[%s562_s29] sm:$0xff]  ;;  %s595_s0 = sadd.s32 2, %s3923_s24  ;;  %s3862_s22 = smov 40  }
  0xfb   : > { %565 = vperm.xlu1 %3023, %v563_v16   ;;  %569 = vperm.xlu0 %3024, %v563_v16   ;;  %s3925_s0 = smov (!%p2586_p0, %s595_s0), %s3923_s24  ;;  %s3866_s24 = smov 64  }
  0xfc   : > { %s2587_s26 = sshll.u32 %s3925_s0, 3  ;;  %s3863_s23 = smov 8  }
  0xfd   : > { %s598_s30 = scalar_lea.vmem %s3883_s19, %s2587_s26  ;;  %s3864_s29 = smov 24  }
  0xfe   : > { %v599_v18 = vld [vmem:[%s598_s30] sm:$0xff]  ;;  %s3888_s30 = smov 72   ;;  %s3892_s20 = smov 64  }
  0xff   : > { %3025 = vset.pattern.permute.xlu1 %v3189_v17  ;;  %3027 = vset.pattern.permute.xlu0 %v3187_v14  ;;  %s3893_s0 = smov 40  }
 0x100   : > { %574 = vperm.xlu1 %3025, %v563_v16   ;;  %601 = vperm.xlu0 %3027, %v599_v18  }
 0x104   : > { %3026 = vset.pattern.permute.xlu1 %v3190_v19  ;;  %3030 = vset.pattern.permute.xlu0 %v3190_v19 }
 0x105   : > { %579 = vperm.xlu1 %3026, %v563_v16   ;;  %615 = vperm.xlu0 %3030, %v599_v18  }
 0x109   : > { %3028 = vset.pattern.permute.xlu1 %v3188_v15  ;;  %3031 = vset.pattern.permute.xlu0 %v3187_v14 }
 0x10a   : > { %605 = vperm.xlu1 %3028, %v599_v18  }
 0x10e   : > { %3029 = vset.pattern.permute.xlu1 %v3189_v17 }
 0x10f   : > { %610 = vperm.xlu1 %3029, %v599_v18  }
 0x113   : > { %3032 = vset.pattern.permute.xlu1 %v3188_v15 }
 0x15c   : > { %v693_v20 = vpop.permute.xlu0 %692 }
 0x15d   : > { %v699_v21 = vsel %vm694_vm2, %v693_v20, 0 }
 0x15e   : > { %2780 = vmatpush3.bf16.xpose.msra.mxu1 %v699_v21  ;;  %v804_v23 = vpop.permute.xlu1 %803 }
 0x15f   : > { %2791 = vmatprep.subr.bf16.mxu1 %v3178_v1 }
 0x160   : > { %v806_v22 = vpop.permute.xlu0 %805 }
 0x161   : > { %v811_v24 = vsel %vm694_vm2, %v806_v22, 0 }
 0x162   : > { %v916_v25 = vpop.permute.xlu1 %915 }
 0x163   : > { %v921_v26 = vsel %vm694_vm2, %v916_v25, 0 }
 0x164   : > { %v914_v28 = vpop.permute.xlu0 %913 }
 0x165   : > { %2782 = vmatmul.mubr.msk.bf16.vlgmr.msra.gmra.mxu1 %vm694_vm2, %v3369_v12 }
 0x166   : > { %2792 = vmatpush3.bf16.xpose.msra.mxu1 %v811_v24  ;;  %2793 = vmatprep.mubr.msk.bf16.mxu1 %vm3179_vm0, %v3178_v1  ;;  %v1026_v27 = vpop.permute.xlu1 %1025 }
 0x167   : > { %2803 = vmatprep.subr.bf16.mxu1 %v3178_v1  ;;  %v1031_v29 = vsel %vm694_vm2, %v1026_v27, 0 }
 0x168   : > { %v1024_v30 = vpop.permute.xlu0 %1023 }
 0x16d   : > { %2794 = vmatmul.mubr.msk.bf16.vlgmr.msra.gmra.mxu1 %vm694_vm2, %v804_v23 }
 0x16e   : > { %2804 = vmatpush3.bf16.xpose.msra.mxu1 %v921_v26  ;;  %2805 = vmatprep.mubr.msk.bf16.mxu1 %vm3179_vm0, %v3178_v1 }
 0x16f   : > { %2815 = vmatprep.subr.bf16.mxu1 %v3178_v1 }
 0x175   : > { %2806 = vmatmul.mubr.msk.bf16.vlgmr.msra.gmra.mxu1 %vm694_vm2, %v914_v28 }
 0x176   : > { %2816 = vmatpush3.bf16.xpose.msra.mxu1 %v1031_v29  ;;  %2817 = vmatprep.mubr.msk.bf16.mxu1 %vm3179_vm0, %v3178_v1  ;;  %v566_v31 = vpop.permute.xlu1 %565  ;;  %v570_v35 = vpop.permute.xlu0 %569 }
 0x177   : > { %2827 = vmatprep.subr.bf16.mxu1 %v3178_v1  ;;  %vm567_vm3 = vcmp.eq.s32.totalorder %v3433_v34, %v566_v31  ;;  %vm571_vm4 = vcmp.eq.s32.totalorder %v3433_v34, %v570_v35 }
 0x178   : > { %vm572_vm6 = vmor %vm567_vm3, %vm571_vm4  ;;  %vm758_vm4 = vcmask 1043456  }
 0x17b   : > { %v575_v32 = vpop.permute.xlu1 %574  ;;  %v602_v38 = vpop.permute.xlu0 %601 }
 0x17c   : > { %vm576_vm5 = vcmp.eq.s32.totalorder %v3433_v34, %v575_v32  ;;  %vm603_vm10 = vcmp.eq.s32.totalorder %v3433_v34, %v602_v38 }
 0x17d   : > { %2818 = vmatmul.mubr.msk.bf16.vlgmr.msra.gmra.mxu1 %vm694_vm2, %v1024_v30  ;;  %vm577_vm7 = vmor %vm572_vm6, %vm576_vm5  ;;  %vm1146_vm5 = vcmask 130048   ;;  %vm1148_vm6 = vcmask 195584  }
 0x17e   : > { %2831 = vmatprep.mubr.msk.bf16.mxu1 %vm3179_vm0, %v3178_v1 }
 0x180   : > { %v580_v36 = vpop.permute.xlu1 %579  ;;  %v616_v40 = vpop.permute.xlu0 %615 }
 0x181   : > { %vm581_vm8 = vcmp.eq.s32.totalorder %v3433_v34, %v580_v36  ;;  %vm617_vm15 = vcmp.eq.s32.totalorder %v3433_v34, %v616_v40 }
 0x182   : > { %vm582_vm11 = vmor %vm577_vm7, %vm581_vm8  ;;  %vm3868_vm7 = vcmask 523264  }
 0x183   : > { %v583_v42 = vsel %vm582_vm11, 0.0, %v3191_v41 }
 0x185   : > { %v606_v37 = vpop.permute.xlu1 %605 }
 0x186   : > { %vm607_vm9 = vcmp.eq.s32.totalorder %v3433_v34, %v606_v37 }
 0x187   : > { %vm608_vm12 = vmor %vm603_vm10, %vm607_vm9 }
 0x18a   : > { %v611_v39 = vpop.permute.xlu1 %610 }
 0x18b   : > { %vm612_vm13 = vcmp.eq.s32.totalorder %v3433_v34, %v611_v39 }
 0x18c   : > { %vm613_vm14 = vmor %vm608_vm12, %vm612_vm13 }
 0x18d   : > { %vm618_vm3 = vmor %vm613_vm14, %vm617_vm15 }
 0x18e   : > { %v619_v49 = vsel %vm618_vm3, 0.0, %v3191_v41 }
 0x225   : > { %v735_v43 = vpop.f32.mrf.mxu1 }
 0x226   : > { %v736_v44 = vadd.f32 %v735_v43, %v583_v42 }
 0x227   : > { %v2783_v45 = vpop.f32.mrf.mxu1 }
 0x228   : > { %v741_v46 = vsel %vm694_vm2, %v736_v44, -inf }
 0x229   : > { %742 = vmax.xlane.f32.xlu1 %v741_v46  ;;  %v738_v47 = vpop.f32.mrf.mxu1 }
 0x22b   : > { %v2784_v48 = vpop.f32.mrf.mxu1 }
 0x22d   : > { %v847_v50 = vpop.f32.mrf.mxu1 }
 0x22e   : > { %v848_v51 = vadd.f32 %v847_v50, %v619_v49 }
 0x22f   : > { %v2795_v52 = vpop.f32.mrf.mxu1 }
 0x230   : > { %v853_v53 = vsel %vm694_vm2, %v848_v51, -inf }
 0x231   : > { %854 = vmax.xlane.f32.xlu0 %v853_v53  ;;  %v850_v54 = vpop.f32.mrf.mxu1 }
 0x233   : > { %v2796_v55 = vpop.f32.mrf.mxu1 }
 0x235   : > { %v957_v56 = vpop.f32.mrf.mxu1 }
 0x236   : > { %v958_v57 = vadd.f32 %v957_v56, %v583_v42 }
 0x237   : > { %v2807_v58 = vpop.f32.mrf.mxu1 }
 0x238   : > { %v963_v59 = vsel %vm694_vm2, %v958_v57, -inf }
 0x239   : > { %964 = vmax.xlane.f32.xlu1 %v963_v59  ;;  %v960_v60 = vpop.f32.mrf.mxu1 }
 0x23b   : > { %v2808_v61 = vpop.f32.mrf.mxu1 }
 0x23d   : > { %v1067_v62 = vpop.f32.mrf.mxu1 }
 0x23e   : > { %v1068_v63 = vadd.f32 %v1067_v62, %v619_v49 }
 0x23f   : > { %v2819_v0 = vpop.f32.mrf.mxu1 }
 0x240   : > { %v1073_v2 = vsel %vm694_vm2, %v1068_v63, -inf  ;;  %v3042_v0 = vld [vmem:[%s3831_s5 + $0x8] sm:$0xff]  }
 0x241   : > { %1074 = vmax.xlane.f32.xlu0 %v1073_v2  ;;  %v1070_v4 = vpop.f32.mrf.mxu1  ;;  %2828 = vmatpush3.bf16.msra.mxu1 %v3042_v0  ;;  %v3043_v2 = vld [vmem:[%s3831_s5] sm:$0xff]  }
 0x242   : > { %2829 = vmatprep.subr.bf16.mxu1 %v3178_v1  ;;  %v3044_v4 = vld [vmem:[%s3833_s7 + $0x8] sm:$0xff]  }
 0x243   : > { %v2820_v5 = vpop.f32.mrf.mxu1 }
 0x245   : > { %2830 = vmatpush3.bf16.msra.mxu1 %v3043_v2 }
 0x246   : > { %2843 = vmatprep.subr.bf16.mxu1 %v3178_v1 }
 0x2b2   : > { %v743_v6 = vpop.xlane.xlu1 %742 }
 0x2b3   : > { %v744_v7 = vsub.f32 %v736_v44, %v743_v6 }
 0x2b5   : > { %v745_v8 = vmul.f32 1.442695, %v744_v7 }
 0x2b7   : > { %3068 = vpow2.f32 %v745_v8 }
 0x2ba   : > { %v855_v9 = vpop.xlane.xlu0 %854 }
 0x2bb   : > { %v856_v11 = vsub.f32 %v848_v51, %v855_v9 }
 0x2bd   : > { %v857_v12 = vmul.f32 1.442695, %v856_v11 }
 0x2bf   : > { %3070 = vpow2.f32 %v857_v12 }
 0x2c2   : > { %v965_v26 = vpop.xlane.xlu1 %964 }
 0x2c3   : > { %v966_v27 = vsub.f32 %v958_v57, %v965_v26  ;;  %v2600_v26 = vld [vmem:[%s3832_s6] ss:$0 sm:$0xff] }
 0x2c4   : > { %v3069_v13 = vpop.eup %3068 }
 0x2c5   : > { %v747_v16 = vsel %vm694_vm2, %v3069_v13, 0.0  ;;  %v967_v28 = vmul.f32 1.442695, %v966_v27 }
 0x2c6   : > { %748 = vadd.xlane.f32.xlu1 %v747_v16 }
 0x2ca   : > { %v1075_v18 = vpop.xlane.xlu0 %1074 }
 0x2cb   : > { %v1076_v20 = vsub.f32 %v1068_v63, %v1075_v18 }
 0x2cc   : > { %v3071_v21 = vpop.eup %3070 }
 0x2cd   : > { %v1077_v22 = vmul.f32 1.442695, %v1076_v20  ;;  %v859_v23 = vsel %vm694_vm2, %v3071_v21, 0.0 }
 0x2ce   : > { %860 = vadd.xlane.f32.xlu0 %v859_v23 }
 0x2cf   : > { %3072 = vpow2.f32 %v1077_v22 }
 0x2d0   : > { %3074 = vpow2.f32 %v967_v28 }
 0x2d7   : > { %753 = vrot.lane.b32.xlu1 %v3367_v10, %s3866_s24  ;;  %s3886_s24 = smov 80  }
 0x2dc   : > { %v3073_v24 = vpop.eup %3072 }
 0x2dd   : > { %v1079_v25 = vsel %vm694_vm2, %v3073_v24, 0.0  ;;  %v3075_v29 = vpop.eup %3074 }
 0x2de   : > { %1080 = vadd.xlane.f32.xlu0 %v1079_v25  ;;  %v969_v30 = vsel %vm694_vm2, %v3075_v29, 0.0  ;;  %v3045_v25 = vld [vmem:[%s3833_s7] sm:$0xff]  }
 0x2f4   : > { %865 = vrot.lane.b32.xlu0 %v3367_v10, %s3867_s18  ;;  %s1530_s18 = scalar_lea.vmem %s3828_s2, %s2583_s27  ;;  %s3891_s27 = smov 56  }
 0x2fb   : > { %970 = vadd.xlane.f32.xlu1 %v969_v30 }
 0x30c   : > { %975 = vrot.lane.b32.xlu1 %v3367_v10, %s3861_s21  ;;  %s3889_s21 = smov 112  }
 0x310   : > { %1085 = vrot.lane.b32.xlu1 %v3367_v10, %s3862_s22  ;;  %s3890_s22 = smov 104  }
 0x34f   : > { %v749_v31 = vpop.xlane.xlu1 %748 }
 0x350   : > { %3076 = vrcp.f32 %v749_v31 }
 0x353   : > { %v754_v32 = vpop.permute.xlu1 %753 }
 0x354   : > { %v760_v33 = vsel %vm758_vm4, %v754_v32, 0 }
 0x355   : > { %2786 = vmatpush3.bf16.msra.mxu0 %v760_v33  ;;  %v2604_v33 = vld [vmem:[%s3834_s8] ss:$0 sm:$0xff] }
 0x356   : > { %2797 = vmatprep.subr.bf16.mxu0 %v3178_v1 }
 0x357   : > { %v861_v35 = vpop.xlane.xlu0 %860 }
 0x358   : > { %3078 = vrcp.f32 %v861_v35 }
 0x35d   : > { %v3077_v36 = vpop.eup %3076 }
 0x35e   : > { %v751_v37 = vmul.f32 %v3077_v36, %v3069_v13 }
 0x360   : > { %v752_v38 = vpack.c.bf16 %v751_v37, %v751_v37 }
 0x362   : > { %2788 = vmatmul.mubr.msk.bf16.vlgmr.msra.gmra.mxu0 %vm694_vm2, %v752_v38 }
 0x363   : > { %2799 = vmatprep.mubr.msk.bf16.mxu0 %vm3179_vm0, %v3178_v1 }
 0x365   : > { %v3079_v10 = vpop.eup %3078 }
 0x366   : > { %v863_v40 = vmul.f32 %v3079_v10, %v3071_v21 }
 0x367   : > { %v1081_v39 = vpop.xlane.xlu0 %1080 }
 0x368   : > { %v864_v44 = vpack.c.bf16 %v863_v40, %v863_v40 }
 0x36b   : > { %v866_v42 = vpop.permute.xlu0 %865 }
 0x36c   : > { %v871_v43 = vsel %vm758_vm4, %v866_v42, 0 }
 0x36d   : > { %2798 = vmatpush3.bf16.msra.mxu0 %v871_v43 }
 0x36e   : > { %2809 = vmatprep.subr.bf16.mxu0 %v3178_v1 }
 0x370   : > { %2800 = vmatmul.mubr.msk.bf16.vlgmr.msra.gmra.mxu0 %vm694_vm2, %v864_v44 }
 0x371   : > { %2811 = vmatprep.mubr.msk.bf16.mxu0 %vm3179_vm0, %v3178_v1 }
 0x384   : > { %v971_v45 = vpop.xlane.xlu1 %970 }
 0x385   : > { %3080 = vrcp.f32 %v971_v45 }
 0x386   : > { %3082 = vrcp.f32 %v1081_v39 }
 0x388   : > { %v976_v46 = vpop.permute.xlu1 %975 }
 0x389   : > { %v981_v47 = vsel %vm758_vm4, %v976_v46, 0  ;;  %v3046_v46 = vld [vmem:[%s3837_s11 + $0x18] sm:$0xff]  }
 0x38a   : > { %2810 = vmatpush3.bf16.msra.mxu0 %v981_v47  ;;  %v3047_v47 = vld [vmem:[%s3837_s11 + $0x10] sm:$0xff]  }
 0x38b   : > { %2821 = vmatprep.subr.bf16.mxu0 %v3178_v1 }
 0x38c   : > { %v1086_v50 = vpop.permute.xlu1 %1085 }
 0x38d   : > { %v1091_v53 = vsel %vm758_vm4, %v1086_v50, 0 }
 0x392   : > { %v3081_v48 = vpop.eup %3080 }
 0x393   : > { %v973_v49 = vmul.f32 %v3081_v48, %v3075_v29  ;;  %v3083_v52 = vpop.eup %3082  ;;  %v3048_v48 = vld [vmem:[%s3837_s11 + $0x8] sm:$0xff]  }
 0x394   : > { %v1083_v54 = vmul.f32 %v3083_v52, %v3073_v24 }
 0x395   : > { %v974_v51 = vpack.c.bf16 %v973_v49, %v973_v49  ;;  %v3049_v49 = vld [vmem:[%s3837_s11] sm:$0xff]  }
 0x396   : > { %v1084_v55 = vpack.c.bf16 %v1083_v54, %v1083_v54  ;;  %v2608_v54 = vld [vmem:[%s3835_s9] ss:$0 sm:$0xff] }
 0x397   : > { %2812 = vmatmul.mubr.msk.bf16.vlgmr.msra.gmra.mxu0 %vm694_vm2, %v974_v51 }
 0x398   : > { %2822 = vmatpush3.bf16.msra.mxu0 %v1091_v53  ;;  %2823 = vmatprep.mubr.msk.bf16.mxu0 %vm3179_vm0, %v3178_v1 }
 0x399   : > { %2835 = vmatprep.subr.bf16.mxu0 %v3178_v1 }
 0x39f   : > { %2824 = vmatmul.mubr.msk.bf16.vlgmr.msra.gmra.mxu0 %vm694_vm2, %v1084_v55 }
 0x3a0   : > { %2839 = vmatprep.mubr.msk.bf16.mxu0 %vm3179_vm0, %v3178_v1  ;;  %2836 = vmatpush3.bf16.msra.mxu0 %v3044_v4 }
 0x3a1   : > { %2837 = vmatprep.subr.bf16.mxu0 %v3178_v1 }
 0x3a4   : > { %2838 = vmatpush3.bf16.msra.mxu0 %v3045_v25  ;;  %v3051_v25 = vld [vmem:[%s3841_s15 + $0x10] sm:$0xff]  }
 0x3a5   : > { %2855 = vmatprep.subr.bf16.mxu0 %v3178_v1 }
 0x422   : > { %v796_v56 = vpop.f32.mrf.mxu0 }
 0x424   : > { %v2789_v57 = vpop.f32.mrf.mxu0 }
 0x426   : > { %v799_v58 = vpop.f32.mrf.mxu0 }
 0x428   : > { %v2790_v59 = vpop.f32.mrf.mxu0 }
 0x430   : > { %v907_v60 = vpop.f32.mrf.mxu0 }
 0x431   : > { %1134 = vrot.lane.b32.xlu0 %v907_v60, %s3863_s23  ;;  %s3865_s23 = smov 16  }
 0x432   : > { %v2801_v61 = vpop.f32.mrf.mxu0 }
 0x434   : > { %v910_v62 = vpop.f32.mrf.mxu0 }
 0x436   : > { %v2802_v63 = vpop.f32.mrf.mxu0 }
 0x457   : > { %v1017_v5 = vpop.f32.mrf.mxu0 }
 0x458   : > { %1138 = vrot.lane.b32.xlu1 %v1017_v5, %s3865_s23  ;;  %s3887_s23 = smov 120  }
 0x459   : > { %v2813_v6 = vpop.f32.mrf.mxu0 }
 0x45b   : > { %v1020_v7 = vpop.f32.mrf.mxu0 }
 0x45c   : > { %v2610_v7 = vld [vmem:[%s3838_s12] ss:$0 sm:$0xff] }
 0x45d   : > { %v2814_v8 = vpop.f32.mrf.mxu0 }
 0x45f   : > { %v1127_v9 = vpop.f32.mrf.mxu0 }
 0x460   : > { %1142 = vrot.lane.b32.xlu0 %v1127_v9, %s3864_s29  ;;  %s3199_s29 = smov [#allocation2]  }
 0x461   : > { %v2825_v11 = vpop.f32.mrf.mxu0 }
 0x463   : > { %v1130_v12 = vpop.f32.mrf.mxu0 }
 0x465   : > { %v2826_v13 = vpop.f32.mrf.mxu0 }
 0x4a3   : > { %v1135_v16 = vpop.permute.xlu0 %1134 }
 0x4a4   : > { %v1145_v20 = vsel %vm694_vm2, %v796_v56, %v1135_v16  ;;  %v2609_v56 = vld [vmem:[%s3836_s10] ss:$0 sm:$0xff] }
 0x4ca   : > { %v1139_v18 = vpop.permute.xlu1 %1138 }
 0x4cb   : > { %v1147_v21 = vsel %vm1146_vm5, %v1145_v20, %v1139_v18 }
 0x4d2   : > { %v1143_v22 = vpop.permute.xlu0 %1142 }
 0x4d3   : > { %v1149_v23 = vsel %vm1148_vm6, %v1147_v21, %v1143_v22 }
 0x4d4   : > { %v1154_v24 = vpack.c.bf16 %v1149_v23, %v1149_v23 }
 0x4d6   : > { %2832 = vmatmul.mubr.msk.bf16.vlgmr.msra.gmra.mxu1 %vm3869_vm1, %v1154_v24  ;;  %v3050_v24 = vld [vmem:[%s3841_s15 + $0x18] sm:$0xff]  }
 0x4d7   : > { %2851 = vmatprep.mubr.msk.bf16.mxu1 %vm3179_vm0, %v3178_v1  ;;  %2844 = vmatpush3.bf16.msra.mxu1 %v3046_v46 }
 0x4d8   : > { %2845 = vmatprep.subr.bf16.mxu1 %v3178_v1 }
 0x4db   : > { %2846 = vmatpush3.bf16.msra.mxu1 %v3047_v47 }
 0x4dc   : > { %2847 = vmatprep.subr.bf16.mxu1 %v3178_v1 }
 0x4df   : > { %2848 = vmatpush3.bf16.msra.mxu1 %v3048_v48  ;;  %v3054_v48 = vld [vmem:[%s3829_s3 + $0x18] sm:$0xff]  }
 0x4e0   : > { %2849 = vmatprep.subr.bf16.mxu1 %v3178_v1 }
 0x4e3   : > { %2850 = vmatpush3.bf16.msra.mxu1 %v3049_v49  ;;  %v3055_v49 = vld [vmem:[%s3829_s3 + $0x10] sm:$0xff]  }
 0x4e4   : > { %2867 = vmatprep.subr.bf16.mxu1 %v3178_v1 }
 0x596   : > { %v1211_v27 = vpop.f32.mrf.mxu1 }
 0x597   : > { %v1212_v28 = vadd.f32 %v2600_v26, %v1211_v27  ;;  %v3052_v26 = vld [vmem:[%s3841_s15 + $0x8] sm:$0xff]   ;;  %v3053_v27 = vld [vmem:[%s3841_s15] sm:$0xff]  }
 0x598   : > { %v2833_v29 = vpop.f32.mrf.mxu1 }
 0x599   : > { %v1221_v30 = vpack.c.bf16 %v1212_v28, %v1212_v28 }
 0x59a   : > { %v1214_v31 = vpop.f32.mrf.mxu1 }
 0x59b   : > { %2840 = vmatmul.mubr.msk.bf16.vlgmr.msra.gmra.mxu0 %vm3869_vm1, %v1221_v30 }
 0x59c   : > { %v2834_v32 = vpop.f32.mrf.mxu1  ;;  %2863 = vmatprep.mubr.msk.bf16.mxu0 %vm3179_vm0, %v3178_v1  ;;  %2856 = vmatpush3.bf16.msra.mxu0 %v3050_v24 }
 0x59d   : > { %2857 = vmatprep.subr.bf16.mxu0 %v3178_v1  ;;  %v2616_v32 = vld [vmem:[%s3839_s13] ss:$0 sm:$0xff] }
 0x5a0   : > { %2858 = vmatpush3.bf16.msra.mxu0 %v3051_v25 }
 0x5a1   : > { %2859 = vmatprep.subr.bf16.mxu0 %v3178_v1 }
 0x5a4   : > { %2860 = vmatpush3.bf16.msra.mxu0 %v3052_v26 }
 0x5a5   : > { %2861 = vmatprep.subr.bf16.mxu0 %v3178_v1 }
 0x5a8   : > { %2862 = vmatpush3.bf16.msra.mxu0 %v3053_v27 }
 0x5a9   : > { %2875 = vmatprep.subr.bf16.mxu0 %v3178_v1 }
 0x65b   : > { %v1278_v35 = vpop.f32.mrf.mxu0 }
 0x65c   : > { %v1279_v36 = vadd.f32 %v2604_v33, %v1278_v35  ;;  %v2617_v35 = vld [vmem:[%s3840_s14] ss:$0 sm:$0xff] }
 0x65d   : > { %v2841_v37 = vpop.f32.mrf.mxu0 }
 0x65e   : > { %v1287_v38 = vsel %vm3868_vm7, %v1279_v36, 0.0 }
 0x65f   : > { %1288 = vadd.xlane.f32.xlu1 %v1287_v38  ;;  %v1281_v10 = vpop.f32.mrf.mxu0 }
 0x661   : > { %v2842_v39 = vpop.f32.mrf.mxu0 }
 0x6e8   : > { %v1289_v40 = vpop.xlane.xlu1 %1288 }
 0x6e9   : > { %v1291_v42 = vmul.f32 0.015625, %v1289_v40 }
 0x6eb   : > { %v1292_v43 = vsub.f32 %v1279_v36, %v1291_v42 }
 0x6ed   : > { %v1293_v44 = vmul.f32 %v1292_v43, %v1292_v43 }
 0x6ef   : > { %v1294_v45 = vsel %vm3868_vm7, %v1293_v44, 0.0 }
 0x6f0   : > { %1295 = vadd.xlane.f32.xlu0 %v1294_v45 }
 0x779   : > { %v1296_v50 = vpop.xlane.xlu0 %1295 }
 0x77a   : > { %v1297_v51 = vmul.f32 0.015625, %v1296_v50 }
 0x77c   : > { %v1298_v52 = vadd.f32 1e-05, %v1297_v51  ;;  %v2623_v51 = vld [vmem:[%s3842_s16] ss:$0 sm:$0xff] }
 0x77e   : > { %3084 = vrsqrt.f32 %v1298_v52 }
 0x78b   : > { %v3085_v53 = vpop.eup %3084 }
 0x78c   : > { %v1300_v55 = vmul.f32 %v3085_v53, %v1292_v43 }
 0x78e   : > { %v1307_v57 = vmul.f32 %v2608_v54, %v1300_v55 }
 0x790   : > { %v1314_v58 = vadd.f32 %v2609_v56, %v1307_v57 }
 0x792   : > { %v1316_v59 = vmul.f32 0.044715, %v1314_v58  ;;  %v1315_v2 = vmul.f32 0.5, %v1314_v58 }
 0x794   : > { %v1317_v60 = vmul.f32 %v1316_v59, %v1314_v58 }
 0x796   : > { %v1318_v61 = vmul.f32 %v1317_v60, %v1314_v58 }
 0x798   : > { %v1319_v62 = vadd.f32 %v1318_v61, %v1314_v58  ;;  %v2629_v58 = vld [vmem:[%s3830_s4 + $0x1] ss:$0 sm:$0xff] }
 0x79a   : > { %v1320_v63 = vmul.f32 0.7978846, %v1319_v62 }
 0x79c   : > { %3086 = vtanh.f32 %v1320_v63 }
 0x7a9   : > { %v3087_v0 = vpop.eup %3086 }
 0x7aa   : > { %v1322_v4 = vadd.f32 1.0, %v3087_v0 }
 0x7ac   : > { %v1323_v5 = vmul.f32 %v1322_v4, %v1315_v2  ;;  %v1531_v4 = vld [vmem:[%s1530_s18] sm:$0xff]  ;;  %s3895_s18 = smov 8  }
 0x7ae   : > { %v1332_v6 = vpack.c.bf16 %v1323_v5, %v1323_v5 }
 0x7b0   : > { %2852 = vmatmul.mubr.msk.bf16.vlgmr.msra.gmra.mxu1 %vm3868_vm7, %v1332_v6 }
 0x7b1   : > { %2871 = vmatprep.mubr.msk.bf16.mxu1 %vm3179_vm0, %v3178_v1  ;;  %2868 = vmatpush3.bf16.msra.mxu1 %v3054_v48 }
 0x7b2   : > { %2869 = vmatprep.subr.bf16.mxu1 %v3178_v1 }
 0x7b5   : > { %2870 = vmatpush3.bf16.msra.mxu1 %v3055_v49 }
 0x7b6   : > { %2881 = vmatprep.subr.bf16.mxu1 %v3178_v1 }
 0x870   : > { %v1401_v8 = vpop.f32.mrf.mxu1 }
 0x871   : > { %v1402_v9 = vadd.f32 %v2610_v7, %v1401_v8 }
 0x872   : > { %v2853_v11 = vpop.f32.mrf.mxu1 }
 0x873   : > { %v1409_v12 = vsel %vm3868_vm7, %v1402_v9, 0.0 }
 0x874   : > { %1410 = vadd.xlane.f32.xlu0 %v1409_v12  ;;  %v1404_v13 = vpop.f32.mrf.mxu1 }
 0x876   : > { %v2854_v16 = vpop.f32.mrf.mxu1 }
 0x8fd   : > { %v1411_v18 = vpop.xlane.xlu0 %1410 }
 0x8fe   : > { %v1412_v20 = vmul.f32 0.015625, %v1411_v18 }
 0x900   : > { %v1413_v21 = vsub.f32 %v1402_v9, %v1412_v20 }
 0x902   : > { %v1414_v22 = vmul.f32 %v1413_v21, %v1413_v21 }
 0x904   : > { %v1415_v23 = vsel %vm3868_vm7, %v1414_v22, 0.0 }
 0x905   : > { %1416 = vadd.xlane.f32.xlu1 %v1415_v23 }
 0x98e   : > { %v1417_v28 = vpop.xlane.xlu1 %1416 }
 0x98f   : > { %v1418_v29 = vmul.f32 0.015625, %v1417_v28 }
 0x991   : > { %v1419_v30 = vadd.f32 1e-05, %v1418_v29 }
 0x993   : > { %3088 = vrsqrt.f32 %v1419_v30 }
 0x9a0   : > { %v3089_v31 = vpop.eup %3088 }
 0x9a1   : > { %v1421_v33 = vmul.f32 %v3089_v31, %v1413_v21 }
 0x9a3   : > { %v1428_v36 = vmul.f32 %v2616_v32, %v1421_v33 }
 0x9a5   : > { %v1435_v37 = vadd.f32 %v2617_v35, %v1428_v36 }
 0x9a7   : > { %v1437_v38 = vmul.f32 0.044715, %v1435_v37  ;;  %v1436_v44 = vmul.f32 0.5, %v1435_v37 }
 0x9a9   : > { %v1438_v10 = vmul.f32 %v1437_v38, %v1435_v37 }
 0x9ab   : > { %v1439_v39 = vmul.f32 %v1438_v10, %v1435_v37 }
 0x9ad   : > { %v1440_v40 = vadd.f32 %v1439_v39, %v1435_v37 }
 0x9af   : > { %v1441_v42 = vmul.f32 0.7978846, %v1440_v40 }
 0x9b1   : > { %3090 = vtanh.f32 %v1441_v42 }
 0x9be   : > { %v3091_v43 = vpop.eup %3090 }
 0x9bf   : > { %v1443_v45 = vadd.f32 1.0, %v3091_v43 }
 0x9c1   : > { %v1444_v46 = vmul.f32 %v1443_v45, %v1436_v44 }
 0x9c3   : > { %v1453_v47 = vpack.c.bf16 %v1444_v46, %v1444_v46 }
 0x9c5   : > { %2864 = vmatmul.mubr.msk.bf16.vlgmr.msra.gmra.mxu0 %vm3868_vm7, %v1453_v47 }
 0x9c6   : > { %2877 = vmatprep.mubr.msk.bf16.mxu0 %vm3179_vm0, %v3178_v1 }
 0xa85   : > { %v1515_v50 = vpop.f32.mrf.mxu0 }
 0xa86   : > { %v1521_v52 = vadd.f32 %v1515_v50, %v3357_v3 }
 0xa87   : > { %v2865_v53 = vpop.f32.mrf.mxu0 }
 0xa88   : > { %v3584_v54 = vadd.f32 %v2623_v51, %v1521_v52 }
 0xa89   : > { %v1518_v55 = vpop.f32.mrf.mxu0 }
 0xa8a   : > { %v1579_v56 = vpack.c.bf16 %v3584_v54, %v3584_v54 }
 0xa8b   : > { %v2866_v57 = vpop.f32.mrf.mxu0 }
 0xa8c   : > { %2872 = vmatmul.mubr.msk.bf16.vlgmr.msra.gmra.mxu1 %vm3869_vm1, %v1579_v56 }
 0xa8d   : > { %2883 = vmatprep.mubr.msk.bf16.mxu1 %vm3179_vm0, %v3178_v1 }
 0xb4c   : > { %v1637_v59 = vpop.f32.mrf.mxu1 }
 0xb4d   : > { %v1638_v3 = vadd.f32 %v2629_v58, %v1637_v59 }
 0xb4e   : > { %v2873_v60 = vpop.f32.mrf.mxu1 }
 0xb4f   : > { %v1643_v61 = vmul.f32 0.35355338, %v1638_v3  ;;  %v3594_v62 = vpack.c.bf16 %v1638_v3, %v1638_v3 }
 0xb50   : > { %v1640_v63 = vpop.f32.mrf.mxu1 }
 0xb51   : > { %1758 = vrot.lane.b32.xlu1 %v3594_v62, %s3884_s17  ;;  %1647 = vrot.lane.b32.xlu0 %v3594_v62, %s3885_s1  ;;  %v1644_v2 = vpack.c.bf16 %v1643_v61, %v1643_v61  ;;  %s3896_s17 = smov 16  }
 0xb52   : > { %v2874_v0 = vpop.f32.mrf.mxu1 }
 0xb55   : > { %1868 = vrot.lane.b32.xlu0 %v3594_v62, %s3886_s24  ;;  %1756 = vrot.lane.b32.xlu1 %v1644_v2, %s3887_s23  ;;  %s1552_s23 = scalar_lea.vmem %s3828_s2, %s2587_s26  ;;  %s3894_s26 = smov 48  }
 0xb56   : > { %v1553_v5 = vld [vmem:[%s1552_s23] sm:$0xff]  ;;  %s3897_s23 = smov 24   ;;  %s2698_s24 = sshll.u32 %s3311_s28, 7 }
 0xb59   : > { %1978 = vrot.lane.b32.xlu0 %v3594_v62, %s3888_s30  ;;  %1866 = vrot.lane.b32.xlu1 %v1644_v2, %s3889_s21  ;;  %s537_s21 = sand.u32 1, %s3168_s25  }
 0xb5a   : > { %s2493_s28 = scalar_lea.sflag [#allocation3], %s537_s21 }
 0xb5d   : > { %1976 = vrot.lane.b32.xlu1 %v1644_v2, %s3890_s22  ;;  %1533 = vperm.xlu0 %3031, %v1531_v4   ;;  %s2577_s22 = sshll.u32 %s537_s21, 3 }
 0xb61   : > { %1537 = vperm.xlu1 %3032, %v1531_v4   ;;  %3034 = vset.pattern.permute.xlu0 %v3190_v19 }
 0xb62   : > { %1547 = vperm.xlu0 %3034, %v1531_v4  }
 0xb65   : > { %3033 = vset.pattern.permute.xlu1 %v3189_v17 }
 0xb66   : > { %1542 = vperm.xlu1 %3033, %v1531_v4   ;;  %3037 = vset.pattern.permute.xlu0 %v3189_v17 }
 0xb67   : > { %1564 = vperm.xlu0 %3037, %v1553_v5  }
 0xb6a   : > { %3035 = vset.pattern.permute.xlu1 %v3187_v14 }
 0xb6b   : > { %1555 = vperm.xlu1 %3035, %v1553_v5   ;;  %3039 = vset.pattern.permute.xlu0 %v3190_v19 }
 0xb6f   : > { %3036 = vset.pattern.permute.xlu1 %v3188_v15 }
 0xb70   : > { %1559 = vperm.xlu1 %3036, %v1553_v5  }
 0xb74   : > { %3038 = vset.pattern.permute.xlu1 %v3190_v19 }
 0xb75   : > { %1569 = vperm.xlu1 %3038, %v1553_v5  }
 0xbc3   : > { %v1648_v6 = vpop.permute.xlu0 %1647  ;;  %v1759_v8 = vpop.permute.xlu1 %1758 }
 0xbc4   : > { %v1653_v7 = vsel %vm694_vm2, %v1648_v6, 0  ;;  %v1764_v14 = vsel %vm694_vm2, %v1759_v8, 0 }
 0xbc5   : > { %2876 = vmatpush3.bf16.xpose.msra.mxu0 %v1653_v7 }
 0xbc6   : > { %2887 = vmatprep.subr.bf16.mxu0 %v3178_v1 }
 0xbc7   : > { %v1869_v15 = vpop.permute.xlu0 %1868  ;;  %v1757_v17 = vpop.permute.xlu1 %1756 }
 0xbc8   : > { %v1874_v19 = vsel %vm694_vm2, %v1869_v15, 0 }
 0xbcb   : > { %v1979_v9 = vpop.permute.xlu0 %1978  ;;  %v1867_v11 = vpop.permute.xlu1 %1866 }
 0xbcc   : > { %2878 = vmatmul.mubr.msk.bf16.vlgmr.msra.gmra.mxu0 %vm694_vm2, %v1644_v2  ;;  %v1984_v12 = vsel %vm694_vm2, %v1979_v9, 0 }
 0xbcd   : > { %2888 = vmatpush3.bf16.xpose.msra.mxu0 %v1764_v14  ;;  %2889 = vmatprep.mubr.msk.bf16.mxu0 %vm3179_vm0, %v3178_v1 }
 0xbce   : > { %2899 = vmatprep.subr.bf16.mxu0 %v3178_v1 }
 0xbcf   : > { %v1977_v13 = vpop.permute.xlu1 %1976 }
 0xbd4   : > { %2890 = vmatmul.mubr.msk.bf16.vlgmr.msra.gmra.mxu0 %vm694_vm2, %v1757_v17 }
 0xbd5   : > { %2900 = vmatpush3.bf16.xpose.msra.mxu0 %v1874_v19  ;;  %2901 = vmatprep.mubr.msk.bf16.mxu0 %vm3179_vm0, %v3178_v1 }
 0xbd6   : > { %2911 = vmatprep.subr.bf16.mxu0 %v3178_v1 }
 0xbd8   : > { %v1534_v20 = vpop.permute.xlu0 %1533 }
 0xbd9   : > { %vm1535_vm9 = vcmp.eq.s32.totalorder %v3433_v34, %v1534_v20 }
 0xbdc   : > { %2902 = vmatmul.mubr.msk.bf16.vlgmr.msra.gmra.mxu0 %vm694_vm2, %v1867_v11  ;;  %v1538_v16 = vpop.permute.xlu1 %1537 }
 0xbdd   : > { %2912 = vmatpush3.bf16.xpose.msra.mxu0 %v1984_v12  ;;  %2913 = vmatprep.mubr.msk.bf16.mxu0 %vm3179_vm0, %v3178_v1  ;;  %vm1539_vm8 = vcmp.eq.s32.totalorder %v3433_v34, %v1538_v16  ;;  %v1548_v22 = vpop.permute.xlu0 %1547 }
 0xbde   : > { %2923 = vmatprep.subr.bf16.mxu0 %v3178_v1  ;;  %vm1540_vm10 = vmor %vm1535_vm9, %vm1539_vm8  ;;  %vm1549_vm13 = vcmp.eq.s32.totalorder %v3433_v34, %v1548_v22 }
 0xbe1   : > { %v1543_v18 = vpop.permute.xlu1 %1542 }
 0xbe2   : > { %vm1544_vm11 = vcmp.eq.s32.totalorder %v3433_v34, %v1543_v18  ;;  %v1565_v24 = vpop.permute.xlu0 %1564 }
 0xbe3   : > { %vm1545_vm12 = vmor %vm1540_vm10, %vm1544_vm11  ;;  %vm1566_vm1 = vcmp.eq.s32.totalorder %v3433_v34, %v1565_v24 }
 0xbe4   : > { %2914 = vmatmul.mubr.msk.bf16.vlgmr.msra.gmra.mxu0 %vm694_vm2, %v1977_v13  ;;  %vm1550_vm3 = vmor %vm1545_vm12, %vm1549_vm13 }
 0xbe5   : > { %2927 = vmatprep.mubr.msk.bf16.mxu0 %vm3179_vm0, %v3178_v1  ;;  %v1551_v26 = vsel %vm1550_vm3, 0.0, %v3191_v41 }
 0xbe6   : > { %v1556_v21 = vpop.permute.xlu1 %1555 }
 0xbe7   : > { %vm1557_vm14 = vcmp.eq.s32.totalorder %v3433_v34, %v1556_v21 }
 0xbeb   : > { %v1560_v23 = vpop.permute.xlu1 %1559 }
 0xbec   : > { %vm1561_vm15 = vcmp.eq.s32.totalorder %v3433_v34, %v1560_v23 }
 0xbed   : > { %vm1562_vm7 = vmor %vm1557_vm14, %vm1561_vm15 }
 0xbee   : > { %vm1567_vm8 = vmor %vm1562_vm7, %vm1566_vm1  ;;  %vm3898_vm1 = vcmask 261120  }
 0xbef   : > { %vm3909_vm12 = vmmov %vm3898_vm1 }
 0xbf0   : > { %v1570_v25 = vpop.permute.xlu1 %1569 }
 0xbf1   : > { %vm1571_vm9 = vcmp.eq.s32.totalorder %v3433_v34, %v1570_v25 }
 0xbf2   : > { %vm1572_vm10 = vmor %vm1567_vm8, %vm1571_vm9 }
 0xbf3   : > { %v1573_v33 = vsel %vm1572_vm10, 0.0, %v3191_v41 }
 0xc8c   : > { %v1689_v27 = vpop.f32.mrf.mxu0 }
 0xc8d   : > { %v1690_v28 = vadd.f32 %v1689_v27, %v1551_v26 }
 0xc8e   : > { %v2879_v29 = vpop.f32.mrf.mxu0 }
 0xc8f   : > { %v1695_v30 = vsel %vm694_vm2, %v1690_v28, -inf }
 0xc90   : > { %1696 = vmax.xlane.f32.xlu1 %v1695_v30  ;;  %v1692_v31 = vpop.f32.mrf.mxu0 }
 0xc92   : > { %v2880_v32 = vpop.f32.mrf.mxu0 }
 0xc94   : > { %v1800_v35 = vpop.f32.mrf.mxu0 }
 0xc95   : > { %v1801_v36 = vadd.f32 %v1800_v35, %v1573_v33 }
 0xc96   : > { %v2891_v37 = vpop.f32.mrf.mxu0 }
 0xc97   : > { %v1806_v38 = vsel %vm694_vm2, %v1801_v36, -inf }
 0xc98   : > { %1807 = vmax.xlane.f32.xlu0 %v1806_v38  ;;  %v1803_v10 = vpop.f32.mrf.mxu0 }
 0xc9a   : > { %v2892_v39 = vpop.f32.mrf.mxu0 }
 0xc9c   : > { %v1910_v40 = vpop.f32.mrf.mxu0 }
 0xc9d   : > { %v1911_v42 = vadd.f32 %v1910_v40, %v1551_v26 }
 0xc9e   : > { %v2903_v34 = vpop.f32.mrf.mxu0 }
 0xc9f   : > { %v1916_v43 = vsel %vm694_vm2, %v1911_v42, -inf  ;;  %v3056_v34 = vld [vmem:[%s3831_s5 + $0x18] sm:$0xff]  }
 0xca0   : > { %1917 = vmax.xlane.f32.xlu0 %v1916_v43  ;;  %v1913_v44 = vpop.f32.mrf.mxu0  ;;  %2924 = vmatpush3.bf16.msra.mxu0 %v3056_v34  ;;  %v3057_v43 = vld [vmem:[%s3831_s5 + $0x10] sm:$0xff]  }
 0xca1   : > { %2925 = vmatprep.subr.bf16.mxu0 %v3178_v1 }
 0xca2   : > { %v2904_v45 = vpop.f32.mrf.mxu0 }
 0xca3   : > { %v3058_v45 = vld [vmem:[%s3833_s7 + $0x18] sm:$0xff]  }
 0xca4   : > { %v2020_v46 = vpop.f32.mrf.mxu0  ;;  %2926 = vmatpush3.bf16.msra.mxu0 %v3057_v43 }
 0xca5   : > { %v2021_v47 = vadd.f32 %v2020_v46, %v1573_v33  ;;  %2939 = vmatprep.subr.bf16.mxu0 %v3178_v1 }
 0xca6   : > { %v2915_v48 = vpop.f32.mrf.mxu0 }
 0xca7   : > { %v2026_v41 = vsel %vm694_vm2, %v2021_v47, -inf }
 0xca8   : > { %2027 = vmax.xlane.f32.xlu1 %v2026_v41  ;;  %v2023_v49 = vpop.f32.mrf.mxu0 }
 0xcaa   : > { %v2916_v50 = vpop.f32.mrf.mxu0 }
 0xd19   : > { %v1697_v51 = vpop.xlane.xlu1 %1696 }
 0xd1a   : > { %v1698_v52 = vsub.f32 %v1690_v28, %v1697_v51 }
 0xd1c   : > { %v1699_v53 = vmul.f32 1.442695, %v1698_v52 }
 0xd1e   : > { %3092 = vpow2.f32 %v1699_v53 }
 0xd21   : > { %v1808_v55 = vpop.xlane.xlu0 %1807 }
 0xd22   : > { %v1809_v56 = vsub.f32 %v1801_v36, %v1808_v55 }
 0xd24   : > { %v1810_v57 = vmul.f32 1.442695, %v1809_v56 }
 0xd26   : > { %3094 = vpow2.f32 %v1810_v57 }
 0xd29   : > { %v1918_v58 = vpop.xlane.xlu0 %1917 }
 0xd2a   : > { %v1919_v59 = vsub.f32 %v1911_v42, %v1918_v58 }
 0xd2b   : > { %v3093_v3 = vpop.eup %3092 }
 0xd2c   : > { %v1920_v60 = vmul.f32 1.442695, %v1919_v59  ;;  %v1701_v61 = vsel %vm694_vm2, %v3093_v3, 0.0 }
 0xd2d   : > { %1702 = vadd.xlane.f32.xlu0 %v1701_v61 }
 0xd2e   : > { %3096 = vpow2.f32 %v1920_v60  ;;  %v2646_v60 = vld [vmem:[%s3832_s6 + $0x1] ss:$0 sm:$0xff] }
 0xd31   : > { %v2028_v5 = vpop.xlane.xlu1 %2027 }
 0xd32   : > { %v2029_v6 = vsub.f32 %v2021_v47, %v2028_v5 }
 0xd33   : > { %v3095_v63 = vpop.eup %3094 }
 0xd34   : > { %v1812_v0 = vsel %vm694_vm2, %v3095_v63, 0.0  ;;  %v2030_v7 = vmul.f32 1.442695, %v2029_v6  ;;  %v2655_v6 = vld [vmem:[%s3834_s8 + $0x1] ss:$0 sm:$0xff] }
 0xd35   : > { %1813 = vadd.xlane.f32.xlu1 %v1812_v0 }
 0xd36   : > { %3098 = vpow2.f32 %v2030_v7 }
 0xd3b   : > { %v3097_v2 = vpop.eup %3096 }
 0xd3c   : > { %v1922_v4 = vsel %vm694_vm2, %v3097_v2, 0.0 }
 0xd3d   : > { %1923 = vadd.xlane.f32.xlu0 %v1922_v4 }
 0xd43   : > { %v3099_v8 = vpop.eup %3098 }
 0xd44   : > { %v2032_v14 = vsel %vm694_vm2, %v3099_v8, 0.0 }
 0xd46   : > { %1818 = vrot.lane.b32.xlu1 %v3594_v62, %s3891_s27 }
 0xd53   : > { %1707 = vrot.lane.b32.xlu0 %v3594_v62, %s3892_s20 }
 0xd57   : > { %2038 = vrot.lane.b32.xlu0 %v3594_v62, %s3893_s0 }
 0xd6a   : > { %2033 = vadd.xlane.f32.xlu1 %v2032_v14 }
 0xd7b   : > { %1928 = vrot.lane.b32.xlu1 %v3594_v62, %s3894_s26  ;;  %s3907_s26 = sld [smem:[#allocation14_spill]] }
 0xd81   : > { %s3784_s30 = scalar_lea.hbm %s3907_s26, %s2698_s24 }
 0xdb6   : > { %v1703_v15 = vpop.xlane.xlu0 %1702 }
 0xdb7   : > { %3100 = vrcp.f32 %v1703_v15 }
 0xdbe   : > { %v1814_v17 = vpop.xlane.xlu1 %1813 }
 0xdbf   : > { %3102 = vrcp.f32 %v1814_v17 }
 0xdc2   : > { %v1819_v16 = vpop.permute.xlu1 %1818 }
 0xdc3   : > { %v1824_v21 = vsel %vm758_vm4, %v1819_v16, 0 }
 0xdc4   : > { %v3101_v19 = vpop.eup %3100 }
 0xdc5   : > { %v1705_v11 = vmul.f32 %v3101_v19, %v3093_v3  ;;  %v3059_v3 = vld [vmem:[%s3833_s7 + $0x10] sm:$0xff]  }
 0xdc6   : > { %v1924_v9 = vpop.xlane.xlu0 %1923 }
 0xdc7   : > { %v1706_v18 = vpack.c.bf16 %v1705_v11, %v1705_v11  ;;  %3104 = vrcp.f32 %v1924_v9 }
 0xdca   : > { %v1708_v12 = vpop.permute.xlu0 %1707 }
 0xdcb   : > { %v1713_v13 = vsel %vm758_vm4, %v1708_v12, 0 }
 0xdcc   : > { %2882 = vmatpush3.bf16.msra.mxu1 %v1713_v13  ;;  %v3103_v20 = vpop.eup %3102 }
 0xdcd   : > { %2893 = vmatprep.subr.bf16.mxu1 %v3178_v1  ;;  %v1816_v62 = vmul.f32 %v3103_v20, %v3095_v63  ;;  %v3061_v20 = vld [vmem:[%s3837_s11 + $0x30] sm:$0xff]  }
 0xdce   : > { %v2039_v28 = vpop.permute.xlu0 %2038 }
 0xdcf   : > { %2884 = vmatmul.mubr.msk.bf16.vlgmr.msra.gmra.mxu1 %vm694_vm2, %v1706_v18  ;;  %v1817_v22 = vpack.c.bf16 %v1816_v62, %v1816_v62  ;;  %v2044_v30 = vsel %vm758_vm4, %v2039_v28, 0  ;;  %v3060_v18 = vld [vmem:[%s3837_s11 + $0x38] sm:$0xff]   ;;  %v3063_v62 = vld [vmem:[%s3837_s11 + $0x20] sm:$0xff]  }
 0xdd0   : > { %2894 = vmatpush3.bf16.msra.mxu1 %v1824_v21  ;;  %2895 = vmatprep.mubr.msk.bf16.mxu1 %vm3179_vm0, %v3178_v1  ;;  %v3062_v21 = vld [vmem:[%s3837_s11 + $0x28] sm:$0xff]   ;;  %v2662_v28 = vld [vmem:[%s3836_s10 + $0x1] ss:$0 sm:$0xff] }
 0xdd1   : > { %2905 = vmatprep.subr.bf16.mxu1 %v3178_v1 }
 0xdd4   : > { %v3105_v23 = vpop.eup %3104 }
 0xdd5   : > { %v1926_v25 = vmul.f32 %v3105_v23, %v3097_v2 }
 0xdd7   : > { %2896 = vmatmul.mubr.msk.bf16.vlgmr.msra.gmra.mxu1 %vm694_vm2, %v1817_v22  ;;  %v1927_v29 = vpack.c.bf16 %v1926_v25, %v1926_v25 }
 0xdd8   : > { %2907 = vmatprep.mubr.msk.bf16.mxu1 %vm3179_vm0, %v3178_v1 }
 0xdf3   : > { %v2034_v24 = vpop.xlane.xlu1 %2033 }
 0xdf4   : > { %3106 = vrcp.f32 %v2034_v24 }
 0xdf7   : > { %v1929_v26 = vpop.permute.xlu1 %1928 }
 0xdf8   : > { %v1934_v27 = vsel %vm758_vm4, %v1929_v26, 0  ;;  %vm3900_vm4 = vcmask 523264   ;;  %v2661_v26 = vld [vmem:[%s3835_s9 + $0x1] ss:$0 sm:$0xff] }
 0xdf9   : > { %2906 = vmatpush3.bf16.msra.mxu1 %v1934_v27 }
 0xdfa   : > { %2917 = vmatprep.subr.bf16.mxu1 %v3178_v1 }
 0xdfc   : > { %2908 = vmatmul.mubr.msk.bf16.vlgmr.msra.gmra.mxu1 %vm694_vm2, %v1927_v29 }
 0xdfd   : > { %2918 = vmatpush3.bf16.msra.mxu1 %v2044_v30  ;;  %2919 = vmatprep.mubr.msk.bf16.mxu1 %vm3179_vm0, %v3178_v1 }
 0xdfe   : > { %2931 = vmatprep.subr.bf16.mxu1 %v3178_v1 }
 0xe01   : > { %v3107_v31 = vpop.eup %3106 }
 0xe02   : > { %v2036_v32 = vmul.f32 %v3107_v31, %v3099_v8 }
 0xe04   : > { %v2037_v33 = vpack.c.bf16 %v2036_v32, %v2036_v32 }
 0xe06   : > { %2920 = vmatmul.mubr.msk.bf16.vlgmr.msra.gmra.mxu1 %vm694_vm2, %v2037_v33 }
 0xe07   : > { %2935 = vmatprep.mubr.msk.bf16.mxu1 %vm3179_vm0, %v3178_v1  ;;  %2932 = vmatpush3.bf16.msra.mxu1 %v3058_v45 }
 0xe08   : > { %2933 = vmatprep.subr.bf16.mxu1 %v3178_v1 }
 0xe0b   : > { %2934 = vmatpush3.bf16.msra.mxu1 %v3059_v3 }
 0xe0c   : > { %2951 = vmatprep.subr.bf16.mxu1 %v3178_v1 }
 0xe8f   : > { %v1749_v35 = vpop.f32.mrf.mxu1 }
 0xe91   : > { %v2885_v36 = vpop.f32.mrf.mxu1 }
 0xe93   : > { %v1752_v37 = vpop.f32.mrf.mxu1 }
 0xe95   : > { %v2886_v38 = vpop.f32.mrf.mxu1 }
 0xe97   : > { %v1860_v10 = vpop.f32.mrf.mxu1 }
 0xe98   : > { %2087 = vrot.lane.b32.xlu1 %v1860_v10, %s3895_s18  ;;  %s3908_s18 = smov %s3907_s26 }
 0xe99   : > { %v2897_v39 = vpop.f32.mrf.mxu1 }
 0xe9b   : > { %v1863_v40 = vpop.f32.mrf.mxu1 }
 0xe9d   : > { %v2898_v42 = vpop.f32.mrf.mxu1 }
 0xe9e   : > { %v2672_v42 = vld [vmem:[%s3838_s12 + $0x1] ss:$0 sm:$0xff] }
 0xebc   : > { %v1970_v44 = vpop.f32.mrf.mxu1 }
 0xebd   : > { %2091 = vrot.lane.b32.xlu0 %v1970_v44, %s3896_s17  ;;  %s3120_s17 = sshll.u32 %s3199_s29, 4  ;;  %s3121_s17 = int_to_ptr.vmem [resolvable:$false] %s3120_s17 }
 0xebe   : > { %v2909_v46 = vpop.f32.mrf.mxu1  ;;  %s3122_s24 = scalar_lea.vmem %s3121_s17, 256 }
 0xec0   : > { %v1973_v47 = vpop.f32.mrf.mxu1 }
 0xec2   : > { %v2910_v48 = vpop.f32.mrf.mxu1 }
 0xec6   : > { %v2080_v41 = vpop.f32.mrf.mxu1 }
 0xec7   : > { %2095 = vrot.lane.b32.xlu1 %v2080_v41, %s3897_s23  ;;  %s539_s23 = scalar_lea.vmem [#allocation2], %s2577_s22 }
 0xec8   : > { %v2921_v49 = vpop.f32.mrf.mxu1  ;;  %s2506_s27 = sshll.u32 %s539_s23, 4  ;;  %s3786_s27 = int_to_ptr.vmem [resolvable:$true] %s2506_s27 }
 0xec9   : > { %s3116_s22 = scalar_lea.vmem %s3786_s27, 128  ;;  %p3123_p4 = scmp.lt.s32.totalorder %s3786_s27, %s3121_s17 }
 0xeca   : > { %v2083_v50 = vpop.f32.mrf.mxu1  ;;  %p3117_p1 = scmp.ne.s32.totalorder %s3786_s27, %s3116_s22  ;;  %p3124_p7 = scmp.lt.s32.totalorder %s3122_s24, %s3116_s22 }
 0xecc   : > { %v2922_v51 = vpop.f32.mrf.mxu1  ;;  %p3118_p2 = pnand %p3117_p1, %p3328_p5  ;;  %p3125_p8 = por %p3124_p7, %p3123_p4 }
 0xece   : > { %p3119_p3 = pneg %p3118_p2 }
 0xed0   : > { %p3126_p9 = pnand %p3125_p8, %p3119_p3 }
 0xf0a   : > { %v2088_v52 = vpop.permute.xlu1 %2087 }
 0xf0b   : > { %v2098_v55 = vsel %vm694_vm2, %v1749_v35, %v2088_v52  ;;  %vm3899_vm2 = vmmov %vm3898_vm1  ;;  %v3064_v52 = vld [vmem:[%s3841_s15 + $0x38] sm:$0xff]  }
 0xf2f   : > { %v2092_v53 = vpop.permute.xlu0 %2091 }
 0xf30   : > { %v2099_v56 = vsel %vm1146_vm5, %v2098_v55, %v2092_v53  ;;  %vm3901_vm5 = vmmov %vm3900_vm4  ;;  %v3065_v53 = vld [vmem:[%s3841_s15 + $0x30] sm:$0xff]   ;;  %v3066_v55 = vld [vmem:[%s3841_s15 + $0x28] sm:$0xff]  }
 0xf39   : > { %v2096_v57 = vpop.permute.xlu1 %2095 }
 0xf3a   : > { %v2100_v58 = vsel %vm1148_vm6, %v2099_v56, %v2096_v57  ;;  %v3067_v56 = vld [vmem:[%s3841_s15 + $0x20] sm:$0xff]  }
 0xf3b   : > { %v2106_v59 = vpack.c.bf16 %v2100_v58, %v2100_v58 }
 0xf3d   : > { %2928 = vmatmul.mubr.msk.bf16.vlgmr.msra.gmra.mxu0 %vm3898_vm1, %v2106_v59 }
 0xf3e   : > { %2947 = vmatprep.mubr.msk.bf16.mxu0 %vm3179_vm0, %v3178_v1  ;;  %2940 = vmatpush3.bf16.msra.mxu0 %v3060_v18 }
 0xf3f   : > { %2941 = vmatprep.subr.bf16.mxu0 %v3178_v1 }
 0xf42   : > { %2942 = vmatpush3.bf16.msra.mxu0 %v3061_v20 }
 0xf43   : > { %2943 = vmatprep.subr.bf16.mxu0 %v3178_v1 }
 0xf46   : > { %2944 = vmatpush3.bf16.msra.mxu0 %v3062_v21 }
 0xf47   : > { %2945 = vmatprep.subr.bf16.mxu0 %v3178_v1 }
 0xf4a   : > { %2946 = vmatpush3.bf16.msra.mxu0 %v3063_v62 }
 0xffd   : > { %v2164_v61 = vpop.f32.mrf.mxu0 }
 0xffe   : > { %v2165_v63 = vadd.f32 %v2646_v60, %v2164_v61  ;;  %v2680_v60 = vld [vmem:[%s3839_s13 + $0x1] ss:$0 sm:$0xff] }
 0xfff   : > { %v2929_v0 = vpop.f32.mrf.mxu0 }
0x1000   : > { %v2175_v2 = vpack.c.bf16 %v2165_v63, %v2165_v63  ;;  %v2681_v63 = vld [vmem:[%s3840_s14 + $0x1] ss:$0 sm:$0xff] }
0x1001   : > { %v2167_v4 = vpop.f32.mrf.mxu0 }
0x1002   : > { %2936 = vmatmul.mubr.msk.bf16.vlgmr.msra.gmra.mxu1 %vm3899_vm2, %v2175_v2 }
0x1003   : > { %v2930_v5 = vpop.f32.mrf.mxu0  ;;  %2959 = vmatprep.mubr.msk.bf16.mxu1 %vm3179_vm0, %v3178_v1  ;;  %vm3902_vm0 = vmmov %vm3900_vm4  ;;  %2952 = vmatpush3.bf16.msra.mxu1 %v3064_v52 }
0x1004   : > { %vm3903_vm6 = vmmov %vm3902_vm0  ;;  %2953 = vmatprep.subr.bf16.mxu1 %v3178_v1 }
0x1005   : > { %vm3904_vm7 = vmmov %vm3902_vm0 }
0x1006   : > { %vm3905_vm11 = vmmov %vm3902_vm0 }
0x1007   : > { %2954 = vmatpush3.bf16.msra.mxu1 %v3065_v53 }
0x1008   : > { %2955 = vmatprep.subr.bf16.mxu1 %v3178_v1 }
0x100b   : > { %2956 = vmatpush3.bf16.msra.mxu1 %v3066_v55 }
0x100c   : > { %2957 = vmatprep.subr.bf16.mxu1 %v3178_v1 }
0x100f   : > { %2958 = vmatpush3.bf16.msra.mxu1 %v3067_v56 }
0x10c2   : > { %v2233_v7 = vpop.f32.mrf.mxu1 }
0x10c3   : > { %v2234_v8 = vadd.f32 %v2655_v6, %v2233_v7 }
0x10c4   : > { %v2937_v14 = vpop.f32.mrf.mxu1 }
0x10c5   : > { %v2243_v15 = vsel %vm3900_vm4, %v2234_v8, 0.0 }
0x10c6   : > { %2244 = vadd.xlane.f32.xlu0 %v2243_v15  ;;  %v2236_v17 = vpop.f32.mrf.mxu1 }
0x10c8   : > { %v2938_v19 = vpop.f32.mrf.mxu1 }
0x114f   : > { %v2245_v9 = vpop.xlane.xlu0 %2244 }
0x1150   : > { %v2246_v11 = vmul.f32 0.015625, %v2245_v9 }
0x1152   : > { %v2247_v12 = vsub.f32 %v2234_v8, %v2246_v11  ;;  %v2696_v11 = vld [vmem:[%s3842_s16 + $0x1] ss:$0 sm:$0xff] }
0x1154   : > { %v2248_v13 = vmul.f32 %v2247_v12, %v2247_v12 }
0x1156   : > { %v2249_v16 = vsel %vm3901_vm5, %v2248_v13, 0.0 }
0x1157   : > { %2250 = vadd.xlane.f32.xlu1 %v2249_v16 }
0x11e0   : > { %v2251_v22 = vpop.xlane.xlu1 %2250 }
0x11e1   : > { %v2252_v23 = vmul.f32 0.015625, %v2251_v22 }
0x11e3   : > { %v2253_v24 = vadd.f32 1e-05, %v2252_v23 }
0x11e5   : > { %3108 = vrsqrt.f32 %v2253_v24 }
0x11f2   : > { %v3109_v25 = vpop.eup %3108 }
0x11f3   : > { %v2255_v27 = vmul.f32 %v3109_v25, %v2247_v12 }
0x11f5   : > { %v2262_v29 = vmul.f32 %v2661_v26, %v2255_v27 }
0x11f7   : > { %v2269_v30 = vadd.f32 %v2662_v28, %v2262_v29 }
0x11f9   : > { %v2271_v31 = vmul.f32 0.044715, %v2269_v30  ;;  %v2270_v38 = vmul.f32 0.5, %v2269_v30 }
0x11fb   : > { %v2272_v32 = vmul.f32 %v2271_v31, %v2269_v30 }
0x11fd   : > { %v2273_v33 = vmul.f32 %v2272_v32, %v2269_v30 }
0x11ff   : > { %v2274_v35 = vadd.f32 %v2273_v33, %v2269_v30 }
0x1201   : > { %v2275_v36 = vmul.f32 0.7978846, %v2274_v35 }
0x1203   : > { %3110 = vtanh.f32 %v2275_v36 }
0x1210   : > { %v3111_v37 = vpop.eup %3110 }
0x1211   : > { %v2277_v10 = vadd.f32 1.0, %v3111_v37 }
0x1213   : > { %v2278_v39 = vmul.f32 %v2277_v10, %v2270_v38 }
0x1215   : > { %v2288_v40 = vpack.c.bf16 %v2278_v39, %v2278_v39 }
0x1217   : > { %2948 = vmatmul.mubr.msk.bf16.vlgmr.msra.gmra.mxu0 %vm3902_vm0, %v2288_v40 }
0x12d7   : > { %v2358_v34 = vpop.f32.mrf.mxu0 }
0x12d8   : > { %v2359_v43 = vadd.f32 %v2672_v42, %v2358_v34 }
0x12d9   : > { %v2949_v44 = vpop.f32.mrf.mxu0 }
0x12da   : > { %v2368_v45 = vsel %vm3903_vm6, %v2359_v43, 0.0 }
0x12db   : > { %2369 = vadd.xlane.f32.xlu0 %v2368_v45  ;;  %v2361_v46 = vpop.f32.mrf.mxu0 }
0x12dd   : > { %v2950_v47 = vpop.f32.mrf.mxu0 }
0x1364   : > { %v2370_v48 = vpop.xlane.xlu0 %2369 }
0x1365   : > { %v2371_v41 = vmul.f32 0.015625, %v2370_v48 }
0x1367   : > { %v2372_v49 = vsub.f32 %v2359_v43, %v2371_v41 }
0x1369   : > { %v2373_v50 = vmul.f32 %v2372_v49, %v2372_v49 }
0x136b   : > { %v2374_v51 = vsel %vm3904_vm7, %v2373_v50, 0.0 }
0x136c   : > { %2375 = vadd.xlane.f32.xlu0 %v2374_v51 }
0x13f5   : > { %v2376_v57 = vpop.xlane.xlu0 %2375 }
0x13f6   : > { %v2377_v58 = vmul.f32 0.015625, %v2376_v57 }
0x13f8   : > { %v2378_v59 = vadd.f32 1e-05, %v2377_v58 }
0x13fa   : > { %3112 = vrsqrt.f32 %v2378_v59 }
0x1407   : > { %v3113_v3 = vpop.eup %3112 }
0x1408   : > { %v2380_v61 = vmul.f32 %v3113_v3, %v2372_v49 }
0x140a   : > { %v2387_v0 = vmul.f32 %v2680_v60, %v2380_v61 }
0x140c   : > { %v2394_v2 = vadd.f32 %v2681_v63, %v2387_v0 }
0x140e   : > { %v2396_v4 = vmul.f32 0.044715, %v2394_v2  ;;  %v2395_v14 = vmul.f32 0.5, %v2394_v2 }
0x1410   : > { %v2397_v1 = vmul.f32 %v2396_v4, %v2394_v2 }
0x1412   : > { %v2398_v5 = vmul.f32 %v2397_v1, %v2394_v2 }
0x1414   : > { %v2399_v6 = vadd.f32 %v2398_v5, %v2394_v2 }
0x1416   : > { %v2400_v7 = vmul.f32 0.7978846, %v2399_v6 }
0x1418   : > { %3114 = vtanh.f32 %v2400_v7 }
0x1425   : > { %v3115_v8 = vpop.eup %3114 }
0x1426   : > { %v2402_v15 = vadd.f32 1.0, %v3115_v8 }
0x1428   : > { %v2403_v17 = vmul.f32 %v2402_v15, %v2395_v14 }
0x142a   : > { %v2413_v19 = vpack.c.bf16 %v2403_v17, %v2403_v17 }
0x142c   : > { %2960 = vmatmul.mubr.msk.bf16.vlgmr.msra.gmra.mxu1 %vm3905_vm11, %v2413_v19 }
0x14ec   : > { %v2475_v9 = vpop.f32.mrf.mxu1 }
0x14ed   : > { %v2481_v12 = vadd.f32 %v2475_v9, %v3584_v54 }
0x14ee   : > { %v2961_v13 = vpop.f32.mrf.mxu1 }
0x14ef   : > { %v2490_v16 = vadd.f32 %v2696_v11, %v2481_v12 }
0x14f0   : > { %v2478_v18 = vpop.f32.mrf.mxu1 }
0x14f1   : > { %2491 = vst.msk [vmem:[%s539_s23] sm:$0xff] %vm3909_vm12, %v2490_v16 }
0x14f2   : > { %v2962_v20 = vpop.f32.mrf.mxu1 }
0x14f3   : > { %3129 = shalt.err (!%p3126_p9)
}
0x14f4   : > { %s3130_s23 = scalar_lea.hbm %s3784_s30, 128  ;;  %s3134_s0 = scalar_lea.hbm %s3908_s18, 256 }
0x14f5   : > { %p3131_p10 = scmp.ne.s32.totalorder %s3784_s30, %s3130_s23  ;;  %p3135_p13 = scmp.lt.s32.totalorder %s3784_s30, %s3908_s18 }
0x14f6   : > { %p3136_p0 = scmp.lt.s32.totalorder %s3134_s0, %s3130_s23 }
0x14f7   : > { %p3132_p11 = pnand %p3131_p10, %p3328_p5 }
0x14f8   : > { %p3137_p1 = por %p3136_p0, %p3135_p13 }
0x14f9   : > { %p3133_p12 = pneg %p3132_p11 }
0x14fb   : > { %p3138_p2 = pnand %p3137_p1, %p3133_p12 }
0x14fd   : > { %3141 = shalt.err (!%p3138_p2)
}
0x14fe   : > { %2963 = dma.vmem_to_hbm [thread:$0]  (%p3328_p5), %s3786_s27, 128, %s3784_s30, %s2493_s28  }
0x14ff PF: > { %s3910_s22 = sld [smem:[#allocation7_spill]] }
0x1500   : > { %s3911_s17 = sld [smem:[#allocation5_spill]] }
0x1505   : > { %p2969_p3 = scmp.ge.s32.totalorder %s3910_s22, 2 }
0x1506   : > { %s2518_s21 = sand.u32 1, %s3911_s17  }
0x1507   : > { %p2966_p4 = pnand %p2969_p3, %p3332_p6  ;;  %s2519_s20 = scalar_lea.sflag [#allocation3], %s2518_s21 }
0x1509   : > { %p2967_p7 = pneg %p2966_p4 }
0x150b   : > { %3159 = dma.done.wait (%p2967_p7), %s2519_s20, 128  }
0x150c   : > { %3161 = vsyncadd (%p2967_p7), %s2519_s20, 4294967168  ;;  %s3913_s27 = sld [smem:[#allocation8_spill]]  ;;  %s3916_s24 = smov %s3168_s25 }
0x150d   : > { %s3914_s23 = sld [smem:[#allocation6_spill]] }
0x150e   : > { %s3915_s26 = sld [smem:[#allocation9_spill]] }
0x1512   : > { %p27_p8 = scmp.ge.s32.totalorder %s3913_s27, 4  }
0x1513   : > { %s3917_s25 = smov %s3914_s23 }
0x1514   :  { %29 = sbr.rel (!%p27_p8) target bundleno = 7 (0x7), region = 141 }
0x1519   :  { %2524 = vsyncpa [#allocation3], 1 }
0x151a   :  { %2526 = vsyncpa [#allocation3 + $0x1], 1 }

// kernel: intra_modal_modeling.2
= control target key start
LH: loop header
LB: loop body
LE: loop exit
PB: predicated region body
PF: predicated region fallthrough
CT: control target
= control target key end

     0   :  { %s5101_s6 = smov 1   ;;  %s5102_s10 = smov 2   ;;  %s5854_s0 = inlined_call_operand.smem [shape: u32[30], index: -1, kind: input, shape index: {}] }
   0x1   :  { %s5156_s5 = sld [smem:[%s5854_s0]]   ;;  %s5103_s14 = smov 3  }
   0x2   :  { %s5161_s9 = sld [smem:[%s5854_s0 + %s5101_s6]]   ;;  %s5104_s18 = smov 4  }
   0x3   :  { %s5166_s13 = sld [smem:[%s5854_s0 + %s5102_s10]]   ;;  %s5105_s22 = smov 5  }
   0x4   :  { %s5171_s17 = sld [smem:[%s5854_s0 + %s5103_s14]]   ;;  %s5106_s26 = smov 6  }
   0x5   :  { %s5176_s21 = sld [smem:[%s5854_s0 + %s5104_s18]]   ;;  %s5107_s30 = smov 7  }
   0x6   :  { %s5181_s25 = sld [smem:[%s5854_s0 + %s5105_s22]]   ;;  %s5108_s4 = smov 8  }
   0x7   :  { %5898 = sst [smem:[#allocation5_spill]] %s5156_s5  ;;  %s5109_s10 = smov 9  }
   0x8   :  { %5899 = sst [smem:[#allocation6_spill]] %s5161_s9  ;;  %s5110_s15 = smov 10  }
   0x9   :  { %5900 = sst [smem:[#allocation7_spill]] %s5166_s13  ;;  %s5111_s20 = smov 11  }
   0xa   :  { %5901 = sst [smem:[#allocation8_spill]] %s5171_s17  ;;  %s5113_s1 = smov 13  }
   0xb   :  { %s5186_s29 = sld [smem:[%s5854_s0 + %s5106_s26]]   ;;  %s5112_s26 = smov 12  }
   0xc   :  { %s5191_s3 = sld [smem:[%s5854_s0 + %s5107_s30]]   ;;  %s5114_s7 = smov 14  }
   0xd   :  { %s5196_s8 = sld [smem:[%s5854_s0 + %s5108_s4]]   ;;  %s5116_s22 = smov 16  }
   0xe   :  { %s5201_s14 = sld [smem:[%s5854_s0 + %s5109_s10]]   ;;  %s5117_s28 = smov 17  }
   0xf   :  { %s5206_s19 = sld [smem:[%s5854_s0 + %s5110_s15]]   ;;  %s5115_s15 = smov 15  }
  0x10   :  { %s5211_s24 = sld [smem:[%s5854_s0 + %s5111_s20]]  }
  0x11   :  { %s5216_s30 = sld [smem:[%s5854_s0 + %s5112_s26]]  }
  0x12   :  { %5902 = sst [smem:[#allocation9_spill]] %s5191_s3 }
  0x13   :  { %s5221_s6 = sld [smem:[%s5854_s0 + %s5113_s1]]  }
  0x14   :  { %s5226_s12 = sld [smem:[%s5854_s0 + %s5114_s7]]   ;;  %s5118_s7 = smov 18  }
  0x15   :  { %s5231_s20 = sld [smem:[%s5854_s0 + %s5115_s15]]   ;;  %s5119_s15 = smov 19  }
  0x16   :  { %s5236_s27 = sld [smem:[%s5854_s0 + %s5116_s22]]   ;;  %s5120_s22 = smov 20  }
  0x17   :  { %s5241_s4 = sld [smem:[%s5854_s0 + %s5117_s28]]   ;;  %s5121_s28 = smov 21  }
  0x1a   :  { %5903 = sst [smem:[#allocation10_spill]] %s5226_s12 }
  0x1b   :  { %5904 = sst [smem:[#allocation11_spill]] %s5231_s20 }
  0x1c   :  { %5905 = sst [smem:[#allocation12_spill]] %s5236_s27 }
  0x1d   :  { %5906 = sst [smem:[#allocation13_spill]] %s5241_s4 }
  0x1e   :  { %s5246_s12 = sld [smem:[%s5854_s0 + %s5118_s7]]   ;;  %s5122_s7 = smov 22  }
  0x1f   :  { %s5251_s20 = sld [smem:[%s5854_s0 + %s5119_s15]]   ;;  %s5123_s15 = smov 23  }
  0x20   :  { %s5256_s27 = sld [smem:[%s5854_s0 + %s5120_s22]]   ;;  %s5124_s22 = smov 24  }
  0x21   :  { %s5261_s4 = sld [smem:[%s5854_s0 + %s5121_s28]]   ;;  %s5125_s28 = smov 25  }
  0x24   :  { %5907 = sst [smem:[#allocation14_spill]] %s5246_s12 }
  0x25   :  { %5908 = sst [smem:[#allocation15_spill]] %s5251_s20 }
  0x26   :  { %5909 = sst [smem:[#allocation16_spill]] %s5256_s27 }
  0x27   :  { %5910 = sst [smem:[#allocation17_spill]] %s5261_s4 }
  0x28   :  { %s5266_s12 = sld [smem:[%s5854_s0 + %s5122_s7]]   ;;  %s5126_s7 = smov 26  }
  0x29   :  { %s5271_s20 = sld [smem:[%s5854_s0 + %s5123_s15]]   ;;  %s5127_s15 = smov 27  }
  0x2a   :  { %s5276_s27 = sld [smem:[%s5854_s0 + %s5124_s22]]   ;;  %s5128_s22 = smov 28  }
  0x2b   :  { %s5281_s4 = sld [smem:[%s5854_s0 + %s5125_s28]]   ;;  %s5129_s28 = smov 29  }
  0x2e   :  { %5911 = sst [smem:[#allocation18_spill]] %s5266_s12 }
  0x2f   :  { %5912 = sst [smem:[#allocation19_spill]] %s5271_s20 }
  0x30   :  { %5913 = sst [smem:[#allocation20_spill]] %s5276_s27 }
  0x31   :  { %5914 = sst [smem:[#allocation21_spill]] %s5281_s4 }
  0x32   :  { %s5286_s12 = sld [smem:[%s5854_s0 + %s5126_s7]]  }
  0x33   :  { %s5291_s20 = sld [smem:[%s5854_s0 + %s5127_s15]]  }
  0x34   :  { %s5296_s27 = sld [smem:[%s5854_s0 + %s5128_s22]]  }
  0x35   :  { %s5301_s4 = sld [smem:[%s5854_s0 + %s5129_s28]]  }
  0x3a   :  { %5915 = sst [smem:[#allocation22_spill]] %s5296_s27 }
  0x3b   :  { %5916 = sst [smem:[#allocation23_spill]] %s5301_s4 }
  0x3c   :  { %65 = vsyncpa [#allocation3], 0 }
  0x3d   :  { %67 = vsyncpa [#allocation3 + $0x1], 0  ;;  %s5303_s7 = smov 0   ;;  %s5305_s10 = smov 0  }
  0x3e   :  { %s5307_s11 = smov 0   ;;  %s5309_s15 = smov 0  }
  0x3f LB: > { %s5917_s3 = sld [smem:[#allocation9_spill]]  ;;  %s5324_s0 = sadd.s32 4294967295, %s5099_s15   ;;  %s5091_s10 = sphi %s5305_s10, %s5967_s10   ;;  %s5087_s7 = sphi %s5303_s7, %s5966_s7   ;;  %s5099_s15 = sphi %s5309_s15, %s5963_s15   ;;  %s5095_s11 = sphi %s5307_s11, %s5968_s11  }
  0x40   : > { %s5918_s17 = sld [smem:[#allocation8_spill]]  ;;  %s4204_s16 = sadd.s32 4294967294, %s5099_s15  }
  0x41   : > { %5919 = sst [smem:[#allocation24_spill]] %s5087_s7  ;;  %s5328_s18 = sadd.s32 1, %s5099_s15  }
  0x42   : > { %5920 = sst [smem:[#allocation25_spill]] %s5095_s11  ;;  %s683_s22 = sadd.s32 1, %s5095_s11 }
  0x43   : > { %5921 = sst [smem:[#allocation26_spill]] %s5099_s15  ;;  %s680_s23 = ssub.s32 %s5099_s15, %s5328_s18 }
  0x44   : > { %5922 = sst [smem:[#allocation27_spill]] %s5328_s18  ;;  %p693_p0 = scmp.ne.s32.totalorder %s5095_s11, %s5091_s10 }
  0x45   : > { %p681_p1 = scmp.eq.s32.totalorder %s680_s23, 0  ;;  %p694_p2 = scmp.eq.s32.totalorder %s5324_s0, 1 }
  0x46   : > { %p699_p3 = scmp.ne.s32.totalorder %s5091_s10, %s5087_s7  ;;  %p700_p4 = scmp.eq.s32.totalorder %s4204_s16, 1 }
  0x47   : > { %s5339_s26 = scalar_select %p681_p1, %s5095_s11, %s683_s22  }
  0x48   : > { %p5341_p5 = por %p694_p2, %p693_p0  ;;  %p5345_p6 = por %p700_p4, %p699_p3 }
  0x49   : > { %5923 = sst [smem:[#allocation28_spill]] %s5339_s26  ;;  %p4207_p7 = scmp.ge.s32.totalorder %s5099_s15, 1 }
  0x4a   : > { %s5924_s28 = scalar_select %p5341_p5, 1, 0 }
  0x4b   : > { %s5926_s1 = scalar_select %p5345_p6, 1, 0 }
  0x4c   : > { %5925 = sst [smem:[#allocation29_spill]] %s5924_s28  ;;  %p832_p8 = scmp.lt.s32.totalorder %s5099_s15, 3 }
  0x4d   : > { %5927 = sst [smem:[#allocation30_spill]] %s5926_s1 }
  0x4e   : > { %p833_p9 = pnand %p4207_p7, %p832_p8 }
  0x4f   : > { %s5928_s9 = sld [smem:[#allocation6_spill]] (!%p833_p9)  ;;  %p918_p10 = scmp.lt.s32.totalorder (!%p833_p9), %s5324_s0, 1 }
  0x50   : > { %836 = sbr.rel (%p833_p9) target bundleno = 9243 (0x241b), region = 128  ;;  %s5929_s5 = sld [smem:[#allocation5_spill]] (!%p833_p9) }
  0x51   : > { %s5861_s23 = smov (!%p833_p9), 96   ;;  %s5887_s26 = smov (!%p833_p9), 112  }
  0x52   : > { %s5863_s11 = smov (!%p833_p9), 72   ;;  %s5930_s13 = sld [smem:[#allocation7_spill]] (!%p833_p9) }
  0x53   : > { %s5936_s18 = smov (!%p833_p9), 72   ;;  %s5939_s1 = smov (!%p833_p9), 40  }
  0x54   : > { %s5940_s7 = smov (!%p833_p9), 48   ;;  %s5941_s15 = smov (!%p833_p9), 8  }
  0x55   : > { %v4898_v0 = vld [vmem:[%s5918_s17 + $0x8] sm:$0xff]   ;;  %v5130_v1 = vmov 0.0   ;;  %v4899_v2 = vld [vmem:[%s5918_s17] sm:$0xff]   ;;  %vm5131_vm0 = vmmov 0   ;;  %s5362_s2 = scalar_select %p918_p10, %s5324_s0, 1  ;;  %vm962_vm1 = vcmask 261120  }
  0x56   : > { %4528 = vmatprep.subr.bf16.mxu0 %v5130_v1  ;;  %4536 = vmatprep.subr.bf16.mxu1 %v5130_v1  ;;  %v935_v3 = vld [vmem:[%s5928_s9] sm:$0xff]  ;;  %s5865_s9 = smov 80   ;;  %vm1018_vm2 = vcmask 64512   ;;  %vm1082_vm3 = vcmask 1043456   ;;  %vm1470_vm4 = vcmask 130048   ;;  %vm1472_vm5 = vcmask 195584  }
  0x57   : > { %4529 = vmatpush3.bf16.msra.mxu0 %v4898_v0  ;;  %4532 = vmatprep.mubr.msk.bf16.mxu0 %vm5131_vm0, %v5130_v1  ;;  %s5366_s16 = sshll.u32 %s5362_s2, 3  ;;  %v4212_v7 = vld [vmem:[%s5176_s21] ss:$0 sm:$0xff]  ;;  %vm1688_vm6 = vcmask 523264   ;;  %s5942_s4 = smov 16  }
  0x58   : > { %4530 = vmatprep.subr.bf16.mxu0 %v5130_v1  ;;  %4538 = vmatprep.mubr.msk.bf16.mxu1 %vm5131_vm0, %v5130_v1  ;;  %s921_s22 = scalar_lea.vmem %s5929_s5, %s5366_s16  ;;  %s5888_s5 = smov 88  }
  0x59   : > { %v934_v4 = vld [vmem:[%s921_s22] sm:$0xff]  ;;  %s5869_s22 = smov 120   ;;  %s5943_s28 = smov 24  }
  0x5a   : > { %v5371_v5 = vadd.f32 %v935_v3, %v934_v4  ;;  %s5945_s27 = smov 112  }
  0x5b   : > { %4531 = vmatpush3.bf16.msra.mxu0 %v4899_v2 }
  0x5c   : > { %4542 = vmatprep.subr.bf16.mxu0 %v5130_v1  ;;  %v942_v6 = vpack.c.bf16 %v5371_v5, %v5371_v5 }
  0x5e   : > { %4533 = vmatmul.mubr.msk.bf16.vlgmr.msra.gmra.mxu0 %vm962_vm1, %v942_v6 }
  0x5f   : > { %4544 = vmatprep.mubr.msk.bf16.mxu0 %vm5131_vm0, %v5130_v1 }
 0x11e   : > { %v1000_v8 = vpop.f32.mrf.mxu0 }
 0x11f   : > { %v1001_v9 = vadd.f32 %v4212_v7, %v1000_v8 }
 0x120   : > { %v4534_v10 = vpop.f32.mrf.mxu0 }
 0x121   : > { %v1006_v11 = vmul.f32 0.35355338, %v1001_v9  ;;  %v5379_v12 = vpack.c.bf16 %v1001_v9, %v1001_v9 }
 0x122   : > { %v1003_v13 = vpop.f32.mrf.mxu0 }
 0x123   : > { %v1007_v14 = vpack.c.bf16 %v1006_v11, %v1006_v11  ;;  %1016 = vrot.lane.b32.xlu0 %v5379_v12, %s5861_s23  ;;  %s5867_s23 = smov 104  }
 0x124   : > { %v4535_v15 = vpop.f32.mrf.mxu0 }
 0x125   : > { %1127 = vrot.lane.b32.xlu1 %v1007_v14, %s5869_s22  ;;  %s5871_s22 = smov 48  }
 0x127   : > { %1129 = vrot.lane.b32.xlu0 %v5379_v12, %s5888_s5 }
 0x129   : > { %1239 = vrot.lane.b32.xlu1 %v5379_v12, %s5865_s9  ;;  %s5881_s9 = smov 64  }
 0x12b   : > { %1237 = vrot.lane.b32.xlu0 %v1007_v14, %s5887_s26 }
 0x12d   : > { %1349 = vrot.lane.b32.xlu1 %v5379_v12, %s5863_s11  ;;  %s5414_s11 = scalar_lea.vmem %s5930_s13, %s5362_s2  ;;  %s5883_s2 = smov 56  }
 0x12e   : > { %v5417_v27 = vld [vmem:[%s5414_s11] ss:$0 sm:$0xff]  ;;  %s5935_s13 = smov 80  }
 0x12f   : > { %1347 = vrot.lane.b32.xlu0 %v1007_v14, %s5867_s23  ;;  %s5873_s23 = smov 40  }
 0x195   : > { %v1017_v16 = vpop.permute.xlu0 %1016 }
 0x196   : > { %v1023_v17 = vsel %vm1018_vm2, %v1017_v16, 0 }
 0x197   : > { %4537 = vmatpush3.bf16.xpose.msra.mxu1 %v1023_v17  ;;  %v1128_v19 = vpop.permute.xlu1 %1127 }
 0x198   : > { %4548 = vmatprep.subr.bf16.mxu1 %v5130_v1 }
 0x199   : > { %v1130_v18 = vpop.permute.xlu0 %1129 }
 0x19a   : > { %v1135_v20 = vsel %vm1018_vm2, %v1130_v18, 0 }
 0x19b   : > { %v1240_v21 = vpop.permute.xlu1 %1239 }
 0x19c   : > { %v1245_v22 = vsel %vm1018_vm2, %v1240_v21, 0 }
 0x19d   : > { %v1238_v24 = vpop.permute.xlu0 %1237 }
 0x19e   : > { %4539 = vmatmul.mubr.msk.bf16.vlgmr.msra.gmra.mxu1 %vm1018_vm2, %v1007_v14 }
 0x19f   : > { %4549 = vmatpush3.bf16.xpose.msra.mxu1 %v1135_v20  ;;  %4550 = vmatprep.mubr.msk.bf16.mxu1 %vm5131_vm0, %v5130_v1  ;;  %v1350_v23 = vpop.permute.xlu1 %1349 }
 0x1a0   : > { %4560 = vmatprep.subr.bf16.mxu1 %v5130_v1  ;;  %v1355_v25 = vsel %vm1018_vm2, %v1350_v23, 0 }
 0x1a1   : > { %v1348_v26 = vpop.permute.xlu0 %1347 }
 0x1a6   : > { %4551 = vmatmul.mubr.msk.bf16.vlgmr.msra.gmra.mxu1 %vm1018_vm2, %v1128_v19 }
 0x1a7   : > { %4561 = vmatpush3.bf16.xpose.msra.mxu1 %v1245_v22  ;;  %4562 = vmatprep.mubr.msk.bf16.mxu1 %vm5131_vm0, %v5130_v1 }
 0x1a8   : > { %4572 = vmatprep.subr.bf16.mxu1 %v5130_v1 }
 0x1ae   : > { %4563 = vmatmul.mubr.msk.bf16.vlgmr.msra.gmra.mxu1 %vm1018_vm2, %v1238_v24 }
 0x1af   : > { %4573 = vmatpush3.bf16.xpose.msra.mxu1 %v1355_v25  ;;  %4574 = vmatprep.mubr.msk.bf16.mxu1 %vm5131_vm0, %v5130_v1 }
 0x1b0   : > { %4584 = vmatprep.subr.bf16.mxu1 %v5130_v1 }
 0x1b6   : > { %4575 = vmatmul.mubr.msk.bf16.vlgmr.msra.gmra.mxu1 %vm1018_vm2, %v1348_v26 }
 0x1b7   : > { %4588 = vmatprep.mubr.msk.bf16.mxu1 %vm5131_vm0, %v5130_v1 }
 0x25e   : > { %v1059_v28 = vpop.f32.mrf.mxu1 }
 0x25f   : > { %v1060_v29 = vadd.f32 %v5417_v27, %v1059_v28 }
 0x260   : > { %v4540_v30 = vpop.f32.mrf.mxu1 }
 0x261   : > { %v1065_v31 = vsel %vm1018_vm2, %v1060_v29, -inf }
 0x262   : > { %1066 = vmax.xlane.f32.xlu1 %v1065_v31  ;;  %v1062_v32 = vpop.f32.mrf.mxu1 }
 0x264   : > { %v4541_v33 = vpop.f32.mrf.mxu1 }
 0x266   : > { %v1171_v34 = vpop.f32.mrf.mxu1 }
 0x267   : > { %v1172_v35 = vadd.f32 %v5417_v27, %v1171_v34 }
 0x268   : > { %v4552_v36 = vpop.f32.mrf.mxu1 }
 0x269   : > { %v1177_v37 = vsel %vm1018_vm2, %v1172_v35, -inf }
 0x26a   : > { %1178 = vmax.xlane.f32.xlu0 %v1177_v37  ;;  %v1174_v38 = vpop.f32.mrf.mxu1 }
 0x26c   : > { %v4553_v39 = vpop.f32.mrf.mxu1 }
 0x26e   : > { %v1281_v40 = vpop.f32.mrf.mxu1 }
 0x26f   : > { %v1282_v41 = vadd.f32 %v5417_v27, %v1281_v40 }
 0x270   : > { %v4564_v42 = vpop.f32.mrf.mxu1 }
 0x271   : > { %v1287_v43 = vsel %vm1018_vm2, %v1282_v41, -inf }
 0x272   : > { %1288 = vmax.xlane.f32.xlu0 %v1287_v43  ;;  %v1284_v44 = vpop.f32.mrf.mxu1  ;;  %v4900_v43 = vld [vmem:[%s5181_s25 + $0x8] sm:$0xff]  }
 0x273   : > { %4585 = vmatpush3.bf16.msra.mxu1 %v4900_v43  ;;  %v4901_v44 = vld [vmem:[%s5181_s25] sm:$0xff]  }
 0x274   : > { %v4565_v45 = vpop.f32.mrf.mxu1  ;;  %4586 = vmatprep.subr.bf16.mxu1 %v5130_v1  ;;  %v4235_v43 = vld [vmem:[%s5216_s30] ss:$0 sm:$0xff] }
 0x276   : > { %v1391_v46 = vpop.f32.mrf.mxu1 }
 0x277   : > { %v1392_v47 = vadd.f32 %v5417_v27, %v1391_v46  ;;  %4587 = vmatpush3.bf16.msra.mxu1 %v4901_v44 }
 0x278   : > { %v4576_v48 = vpop.f32.mrf.mxu1  ;;  %4600 = vmatprep.subr.bf16.mxu1 %v5130_v1 }
 0x279   : > { %v1397_v49 = vsel %vm1018_vm2, %v1392_v47, -inf }
 0x27a   : > { %1398 = vmax.xlane.f32.xlu1 %v1397_v49  ;;  %v1394_v50 = vpop.f32.mrf.mxu1 }
 0x27c   : > { %v4577_v51 = vpop.f32.mrf.mxu1 }
 0x2eb   : > { %v1067_v52 = vpop.xlane.xlu1 %1066 }
 0x2ec   : > { %v1068_v53 = vsub.f32 %v1060_v29, %v1067_v52 }
 0x2ee   : > { %v1069_v54 = vmul.f32 1.442695, %v1068_v53 }
 0x2f0   : > { %4960 = vpow2.f32 %v1069_v54 }
 0x2f3   : > { %v1179_v55 = vpop.xlane.xlu0 %1178 }
 0x2f4   : > { %v1180_v56 = vsub.f32 %v1172_v35, %v1179_v55 }
 0x2f6   : > { %v1181_v57 = vmul.f32 1.442695, %v1180_v56 }
 0x2f8   : > { %4962 = vpow2.f32 %v1181_v57 }
 0x2fb   : > { %v1289_v58 = vpop.xlane.xlu0 %1288 }
 0x2fc   : > { %v1290_v59 = vsub.f32 %v1282_v41, %v1289_v58 }
 0x2fd   : > { %v4961_v60 = vpop.eup %4960 }
 0x2fe   : > { %v1291_v61 = vmul.f32 1.442695, %v1290_v59  ;;  %v1071_v62 = vsel %vm1018_vm2, %v4961_v60, 0.0 }
 0x2ff   : > { %1072 = vadd.xlane.f32.xlu0 %v1071_v62 }
 0x300   : > { %4964 = vpow2.f32 %v1291_v61 }
 0x303   : > { %v1399_v4 = vpop.xlane.xlu1 %1398 }
 0x304   : > { %v1400_v6 = vsub.f32 %v1392_v47, %v1399_v4 }
 0x305   : > { %v4963_v63 = vpop.eup %4962 }
 0x306   : > { %v1183_v0 = vsel %vm1018_vm2, %v4963_v63, 0.0  ;;  %v1401_v7 = vmul.f32 1.442695, %v1400_v6 }
 0x307   : > { %1184 = vadd.xlane.f32.xlu1 %v1183_v0 }
 0x308   : > { %4966 = vpow2.f32 %v1401_v7 }
 0x30d   : > { %v4965_v2 = vpop.eup %4964 }
 0x30e   : > { %v1293_v3 = vsel %vm1018_vm2, %v4965_v2, 0.0 }
 0x30f   : > { %1294 = vadd.xlane.f32.xlu0 %v1293_v3 }
 0x315   : > { %v4967_v8 = vpop.eup %4966 }
 0x316   : > { %v1403_v9 = vsel %vm1018_vm2, %v4967_v8, 0.0 }
 0x318   : > { %1189 = vrot.lane.b32.xlu1 %v5379_v12, %s5883_s2  ;;  %s5934_s2 = smov 104  }
 0x325   : > { %1077 = vrot.lane.b32.xlu0 %v5379_v12, %s5881_s9  ;;  %s5933_s9 = smov 120  }
 0x329   : > { %1409 = vrot.lane.b32.xlu0 %v5379_v12, %s5873_s23  ;;  %s5879_s23 = smov 16  }
 0x33c   : > { %1404 = vadd.xlane.f32.xlu1 %v1403_v9 }
 0x34d   : > { %1299 = vrot.lane.b32.xlu1 %v5379_v12, %s5871_s22  ;;  %s5875_s22 = smov 8  }
 0x388   : > { %v1073_v10 = vpop.xlane.xlu0 %1072 }
 0x389   : > { %4968 = vrcp.f32 %v1073_v10 }
 0x390   : > { %v1185_v11 = vpop.xlane.xlu1 %1184 }
 0x391   : > { %4970 = vrcp.f32 %v1185_v11  ;;  %v4902_v11 = vld [vmem:[%s5201_s14 + $0x8] sm:$0xff]  }
 0x394   : > { %v1190_v18 = vpop.permute.xlu1 %1189 }
 0x395   : > { %v1195_v21 = vsel %vm1082_vm3, %v1190_v18, 0 }
 0x396   : > { %v4969_v13 = vpop.eup %4968 }
 0x397   : > { %v1075_v15 = vmul.f32 %v4969_v13, %v4961_v60  ;;  %v4225_v60 = vld [vmem:[%s5186_s29] ss:$0 sm:$0xff] }
 0x398   : > { %v1295_v14 = vpop.xlane.xlu0 %1294  ;;  %v4903_v13 = vld [vmem:[%s5201_s14] sm:$0xff]  }
 0x399   : > { %v1076_v19 = vpack.c.bf16 %v1075_v15, %v1075_v15  ;;  %4972 = vrcp.f32 %v1295_v14 }
 0x39c   : > { %v1078_v16 = vpop.permute.xlu0 %1077 }
 0x39d   : > { %v1084_v17 = vsel %vm1082_vm3, %v1078_v16, 0 }
 0x39e   : > { %4543 = vmatpush3.bf16.msra.mxu0 %v1084_v17  ;;  %v4971_v20 = vpop.eup %4970  ;;  %v4229_v17 = vld [vmem:[%s5917_s3] ss:$0 sm:$0xff] }
 0x39f   : > { %4554 = vmatprep.subr.bf16.mxu0 %v5130_v1  ;;  %v1187_v12 = vmul.f32 %v4971_v20, %v4963_v63 }
 0x3a0   : > { %v1410_v29 = vpop.permute.xlu0 %1409 }
 0x3a1   : > { %4545 = vmatmul.mubr.msk.bf16.vlgmr.msra.gmra.mxu0 %vm1018_vm2, %v1076_v19  ;;  %v1188_v22 = vpack.c.bf16 %v1187_v12, %v1187_v12  ;;  %v1415_v31 = vsel %vm1082_vm3, %v1410_v29, 0  ;;  %v4230_v19 = vld [vmem:[%s5196_s8] ss:$0 sm:$0xff] }
 0x3a2   : > { %4555 = vmatpush3.bf16.msra.mxu0 %v1195_v21  ;;  %4556 = vmatprep.mubr.msk.bf16.mxu0 %vm5131_vm0, %v5130_v1 }
 0x3a3   : > { %4566 = vmatprep.subr.bf16.mxu0 %v5130_v1 }
 0x3a6   : > { %v4973_v23 = vpop.eup %4972 }
 0x3a7   : > { %v1297_v25 = vmul.f32 %v4973_v23, %v4965_v2  ;;  %v4905_v23 = vld [vmem:[%s5211_s24 + $0x10] sm:$0xff]  }
 0x3a9   : > { %4557 = vmatmul.mubr.msk.bf16.vlgmr.msra.gmra.mxu0 %vm1018_vm2, %v1188_v22  ;;  %v1298_v30 = vpack.c.bf16 %v1297_v25, %v1297_v25  ;;  %v4904_v22 = vld [vmem:[%s5211_s24 + $0x18] sm:$0xff]   ;;  %v4907_v25 = vld [vmem:[%s5211_s24] sm:$0xff]  }
 0x3aa   : > { %4568 = vmatprep.mubr.msk.bf16.mxu0 %vm5131_vm0, %v5130_v1 }
 0x3c5   : > { %v1405_v24 = vpop.xlane.xlu1 %1404 }
 0x3c6   : > { %4974 = vrcp.f32 %v1405_v24  ;;  %v4906_v24 = vld [vmem:[%s5211_s24 + $0x8] sm:$0xff]  }
 0x3c9   : > { %v1300_v26 = vpop.permute.xlu1 %1299 }
 0x3ca   : > { %v1305_v28 = vsel %vm1082_vm3, %v1300_v26, 0  ;;  %v4231_v26 = vld [vmem:[%s5206_s19] ss:$0 sm:$0xff] }
 0x3cb   : > { %4567 = vmatpush3.bf16.msra.mxu0 %v1305_v28 }
 0x3cc   : > { %4578 = vmatprep.subr.bf16.mxu0 %v5130_v1 }
 0x3ce   : > { %4569 = vmatmul.mubr.msk.bf16.vlgmr.msra.gmra.mxu0 %vm1018_vm2, %v1298_v30 }
 0x3cf   : > { %4579 = vmatpush3.bf16.msra.mxu0 %v1415_v31  ;;  %4580 = vmatprep.mubr.msk.bf16.mxu0 %vm5131_vm0, %v5130_v1 }
 0x3d0   : > { %4592 = vmatprep.subr.bf16.mxu0 %v5130_v1 }
 0x3d3   : > { %v4975_v32 = vpop.eup %4974 }
 0x3d4   : > { %v1407_v33 = vmul.f32 %v4975_v32, %v4967_v8 }
 0x3d6   : > { %v1408_v34 = vpack.c.bf16 %v1407_v33, %v1407_v33 }
 0x3d8   : > { %4581 = vmatmul.mubr.msk.bf16.vlgmr.msra.gmra.mxu0 %vm1018_vm2, %v1408_v34 }
 0x3d9   : > { %4596 = vmatprep.mubr.msk.bf16.mxu0 %vm5131_vm0, %v5130_v1  ;;  %4593 = vmatpush3.bf16.msra.mxu0 %v4902_v11 }
 0x3da   : > { %4594 = vmatprep.subr.bf16.mxu0 %v5130_v1 }
 0x3dd   : > { %4595 = vmatpush3.bf16.msra.mxu0 %v4903_v13 }
 0x3de   : > { %4612 = vmatprep.subr.bf16.mxu0 %v5130_v1 }
 0x461   : > { %v1120_v35 = vpop.f32.mrf.mxu0 }
 0x463   : > { %v4546_v36 = vpop.f32.mrf.mxu0 }
 0x465   : > { %v1123_v37 = vpop.f32.mrf.mxu0 }
 0x467   : > { %v4547_v38 = vpop.f32.mrf.mxu0 }
 0x469   : > { %v1231_v39 = vpop.f32.mrf.mxu0 }
 0x46a   : > { %1458 = vrot.lane.b32.xlu1 %v1231_v39, %s5875_s22  ;;  %s5877_s22 = smov 24  }
 0x46b   : > { %v4558_v40 = vpop.f32.mrf.mxu0 }
 0x46d   : > { %v1234_v41 = vpop.f32.mrf.mxu0 }
 0x46f   : > { %v4559_v42 = vpop.f32.mrf.mxu0 }
 0x48e   : > { %v1341_v45 = vpop.f32.mrf.mxu0 }
 0x48f   : > { %1462 = vrot.lane.b32.xlu0 %v1341_v45, %s5879_s23  ;;  %s5932_s23 = smov 96  }
 0x490   : > { %v4570_v46 = vpop.f32.mrf.mxu0 }
 0x492   : > { %v1344_v47 = vpop.f32.mrf.mxu0 }
 0x494   : > { %v4571_v48 = vpop.f32.mrf.mxu0 }
 0x498   : > { %v1451_v49 = vpop.f32.mrf.mxu0 }
 0x499   : > { %1466 = vrot.lane.b32.xlu1 %v1451_v49, %s5877_s22  ;;  %s5931_s22 = sld [smem:[#allocation10_spill]] }
 0x49a   : > { %v4582_v50 = vpop.f32.mrf.mxu0 }
 0x49c   : > { %v1454_v51 = vpop.f32.mrf.mxu0 }
 0x49e   : > { %v4583_v52 = vpop.f32.mrf.mxu0 }
 0x4dc   : > { %v1459_v53 = vpop.permute.xlu1 %1458 }
 0x4dd   : > { %v1469_v55 = vsel %vm1018_vm2, %v1120_v35, %v1459_v53 }
 0x501   : > { %v1463_v54 = vpop.permute.xlu0 %1462 }
 0x502   : > { %v1471_v56 = vsel %vm1470_vm4, %v1469_v55, %v1463_v54 }
 0x50b   : > { %v1467_v57 = vpop.permute.xlu1 %1466 }
 0x50c   : > { %v1473_v58 = vsel %vm1472_vm5, %v1471_v56, %v1467_v57  ;;  %v4908_v56 = vld [vmem:[%s5918_s17 + $0x18] sm:$0xff]   ;;  %v4909_v57 = vld [vmem:[%s5918_s17 + $0x10] sm:$0xff]  }
 0x50d   : > { %v1478_v59 = vpack.c.bf16 %v1473_v58, %v1473_v58 }
 0x50f   : > { %4589 = vmatmul.mubr.msk.bf16.vlgmr.msra.gmra.mxu1 %vm962_vm1, %v1478_v59 }
 0x510   : > { %4608 = vmatprep.mubr.msk.bf16.mxu1 %vm5131_vm0, %v5130_v1  ;;  %4601 = vmatpush3.bf16.msra.mxu1 %v4904_v22 }
 0x511   : > { %4602 = vmatprep.subr.bf16.mxu1 %v5130_v1 }
 0x514   : > { %4603 = vmatpush3.bf16.msra.mxu1 %v4905_v23 }
 0x515   : > { %4604 = vmatprep.subr.bf16.mxu1 %v5130_v1 }
 0x518   : > { %4605 = vmatpush3.bf16.msra.mxu1 %v4906_v24 }
 0x519   : > { %4606 = vmatprep.subr.bf16.mxu1 %v5130_v1 }
 0x51c   : > { %4607 = vmatpush3.bf16.msra.mxu1 %v4907_v25 }
 0x51d   : > { %4626 = vmatprep.subr.bf16.mxu1 %v5130_v1 }
 0x5cf   : > { %v1535_v61 = vpop.f32.mrf.mxu1 }
 0x5d0   : > { %v1536_v62 = vadd.f32 %v4225_v60, %v1535_v61 }
 0x5d1   : > { %v4590_v63 = vpop.f32.mrf.mxu1 }
 0x5d2   : > { %v1541_v0 = vadd.f32 %v1536_v62, %v5371_v5  ;;  %v4241_v62 = vld [vmem:[%s5221_s6] ss:$0 sm:$0xff] }
 0x5d3   : > { %v1538_v2 = vpop.f32.mrf.mxu1 }
 0x5d4   : > { %v1544_v3 = vsel %vm962_vm1, %v1541_v0, 0.0 }
 0x5d5   : > { %1545 = vadd.xlane.f32.xlu0 %v1544_v3  ;;  %v4591_v4 = vpop.f32.mrf.mxu1 }
 0x65e   : > { %v1546_v6 = vpop.xlane.xlu0 %1545 }
 0x65f   : > { %v1548_v7 = vmul.f32 0.03125, %v1546_v6  ;;  %v4248_v6 = vld [vmem:[%s5176_s21 + $0x1] ss:$0 sm:$0xff] }
 0x661   : > { %v1549_v8 = vsub.f32 %v1541_v0, %v1548_v7  ;;  %v4242_v0 = vld [vmem:[%s5931_s22] ss:$0 sm:$0xff] }
 0x663   : > { %v1550_v9 = vmul.f32 %v1549_v8, %v1549_v8 }
 0x665   : > { %v1551_v10 = vsel %vm962_vm1, %v1550_v9, 0.0 }
 0x666   : > { %1552 = vadd.xlane.f32.xlu1 %v1551_v10 }
 0x6ef   : > { %v1553_v5 = vpop.xlane.xlu1 %1552 }
 0x6f0   : > { %v1554_v14 = vmul.f32 0.03125, %v1553_v5 }
 0x6f2   : > { %v1555_v15 = vadd.f32 1e-05, %v1554_v14 }
 0x6f4   : > { %4976 = vrsqrt.f32 %v1555_v15 }
 0x701   : > { %v4977_v16 = vpop.eup %4976 }
 0x702   : > { %v1557_v18 = vmul.f32 %v4977_v16, %v1549_v8 }
 0x704   : > { %v1564_v20 = vmul.f32 %v4229_v17, %v1557_v18 }
 0x706   : > { %v1571_v21 = vadd.f32 %v4230_v19, %v1564_v20 }
 0x708   : > { %v1576_v12 = vpack.c.bf16 %v1571_v21, %v1571_v21 }
 0x70a   : > { %4597 = vmatmul.mubr.msk.bf16.vlgmr.msra.gmra.mxu0 %vm962_vm1, %v1576_v12 }
 0x70b   : > { %4616 = vmatprep.mubr.msk.bf16.mxu0 %vm5131_vm0, %v5130_v1  ;;  %4613 = vmatpush3.bf16.msra.mxu0 %v4908_v56 }
 0x70c   : > { %4614 = vmatprep.subr.bf16.mxu0 %v5130_v1 }
 0x70f   : > { %4615 = vmatpush3.bf16.msra.mxu0 %v4909_v57 }
 0x710   : > { %4620 = vmatprep.subr.bf16.mxu0 %v5130_v1 }
 0x7ca   : > { %v1633_v28 = vpop.f32.mrf.mxu0 }
 0x7cb   : > { %v1634_v29 = vadd.f32 %v4231_v26, %v1633_v28 }
 0x7cc   : > { %v4598_v30 = vpop.f32.mrf.mxu0 }
 0x7cd   : > { %v1640_v31 = vmul.f32 0.044715, %v1634_v29  ;;  %v1639_v39 = vmul.f32 0.5, %v1634_v29 }
 0x7ce   : > { %v1636_v32 = vpop.f32.mrf.mxu0 }
 0x7cf   : > { %v1641_v33 = vmul.f32 %v1640_v31, %v1634_v29 }
 0x7d0   : > { %v4599_v34 = vpop.f32.mrf.mxu0 }
 0x7d1   : > { %v1642_v35 = vmul.f32 %v1641_v33, %v1634_v29 }
 0x7d3   : > { %v1643_v36 = vadd.f32 %v1642_v35, %v1634_v29 }
 0x7d5   : > { %v1644_v37 = vmul.f32 0.7978846, %v1643_v36 }
 0x7d7   : > { %4978 = vtanh.f32 %v1644_v37 }
 0x7e4   : > { %v4979_v38 = vpop.eup %4978 }
 0x7e5   : > { %v1646_v40 = vadd.f32 1.0, %v4979_v38 }
 0x7e7   : > { %v1647_v41 = vmul.f32 %v1646_v40, %v1639_v39 }
 0x7e9   : > { %v1656_v42 = vpack.c.bf16 %v1647_v41, %v1647_v41 }
 0x7eb   : > { %4609 = vmatmul.mubr.msk.bf16.vlgmr.msra.gmra.mxu1 %vm1688_vm6, %v1656_v42 }
 0x7ec   : > { %4628 = vmatprep.mubr.msk.bf16.mxu1 %vm5131_vm0, %v5130_v1 }
 0x8ab   : > { %v1726_v44 = vpop.f32.mrf.mxu1 }
 0x8ac   : > { %v1727_v45 = vadd.f32 %v4235_v43, %v1726_v44 }
 0x8ad   : > { %v4610_v46 = vpop.f32.mrf.mxu1 }
 0x8ae   : > { %v1732_v47 = vadd.f32 %v1727_v45, %v1571_v21 }
 0x8af   : > { %v1729_v48 = vpop.f32.mrf.mxu1 }
 0x8b0   : > { %v1735_v49 = vsel %vm962_vm1, %v1732_v47, 0.0 }
 0x8b1   : > { %1736 = vadd.xlane.f32.xlu0 %v1735_v49  ;;  %v4611_v50 = vpop.f32.mrf.mxu1 }
 0x93a   : > { %v1737_v51 = vpop.xlane.xlu0 %1736 }
 0x93b   : > { %v1738_v52 = vmul.f32 0.03125, %v1737_v51 }
 0x93d   : > { %v1739_v53 = vsub.f32 %v1732_v47, %v1738_v52 }
 0x93f   : > { %v1740_v54 = vmul.f32 %v1739_v53, %v1739_v53 }
 0x941   : > { %v1741_v55 = vsel %vm962_vm1, %v1740_v54, 0.0 }
 0x942   : > { %1742 = vadd.xlane.f32.xlu0 %v1741_v55 }
 0x9cb   : > { %v1743_v58 = vpop.xlane.xlu0 %1742 }
 0x9cc   : > { %v1744_v59 = vmul.f32 0.03125, %v1743_v58 }
 0x9ce   : > { %v1745_v60 = vadd.f32 1e-05, %v1744_v59 }
 0x9d0   : > { %4980 = vrsqrt.f32 %v1745_v60 }
 0x9dd   : > { %v4981_v61 = vpop.eup %4980 }
 0x9de   : > { %v1747_v63 = vmul.f32 %v4981_v61, %v1739_v53 }
 0x9e0   : > { %v1754_v2 = vmul.f32 %v4241_v62, %v1747_v63 }
 0x9e2   : > { %v5506_v3 = vadd.f32 %v4242_v0, %v1754_v2 }
 0x9e4   : > { %v1767_v4 = vpack.c.bf16 %v5506_v3, %v5506_v3 }
 0x9e6   : > { %4617 = vmatmul.mubr.msk.bf16.vlgmr.msra.gmra.mxu0 %vm962_vm1, %v1767_v4 }
 0x9e7   : > { %4622 = vmatprep.mubr.msk.bf16.mxu0 %vm5131_vm0, %v5130_v1 }
 0xaa6   : > { %v1825_v7 = vpop.f32.mrf.mxu0 }
 0xaa7   : > { %v1826_v8 = vadd.f32 %v4248_v6, %v1825_v7 }
 0xaa8   : > { %v4618_v9 = vpop.f32.mrf.mxu0 }
 0xaa9   : > { %v1831_v10 = vmul.f32 0.35355338, %v1826_v8  ;;  %v5514_v11 = vpack.c.bf16 %v1826_v8, %v1826_v8 }
 0xaaa   : > { %v1828_v13 = vpop.f32.mrf.mxu0 }
 0xaab   : > { %1946 = vrot.lane.b32.xlu0 %v5514_v11, %s5888_s5  ;;  %1835 = vrot.lane.b32.xlu1 %v5514_v11, %s5932_s23  ;;  %v1832_v14 = vpack.c.bf16 %v1831_v10, %v1831_v10  ;;  %s5938_s5 = smov 64  }
 0xaac   : > { %v4619_v5 = vpop.f32.mrf.mxu0 }
 0xaaf   : > { %2054 = vrot.lane.b32.xlu0 %v1832_v14, %s5887_s26  ;;  %1944 = vrot.lane.b32.xlu1 %v1832_v14, %s5933_s9  ;;  %s5937_s26 = smov 56  }
 0xab3   : > { %2164 = vrot.lane.b32.xlu0 %v1832_v14, %s5934_s2  ;;  %2056 = vrot.lane.b32.xlu1 %v5514_v11, %s5935_s13 }
 0xab7   : > { %2166 = vrot.lane.b32.xlu1 %v5514_v11, %s5936_s18 }
 0xb1d   : > { %v1836_v15 = vpop.permute.xlu1 %1835  ;;  %v1947_v17 = vpop.permute.xlu0 %1946 }
 0xb1e   : > { %v1841_v16 = vsel %vm1018_vm2, %v1836_v15, 0  ;;  %v1952_v19 = vsel %vm1018_vm2, %v1947_v17, 0 }
 0xb1f   : > { %4621 = vmatpush3.bf16.xpose.msra.mxu0 %v1841_v16 }
 0xb20   : > { %4632 = vmatprep.subr.bf16.mxu0 %v5130_v1 }
 0xb21   : > { %v1945_v18 = vpop.permute.xlu1 %1944  ;;  %v2055_v22 = vpop.permute.xlu0 %2054 }
 0xb25   : > { %v2057_v20 = vpop.permute.xlu1 %2056  ;;  %v2165_v24 = vpop.permute.xlu0 %2164 }
 0xb26   : > { %4623 = vmatmul.mubr.msk.bf16.vlgmr.msra.gmra.mxu0 %vm1018_vm2, %v1832_v14  ;;  %v2062_v21 = vsel %vm1018_vm2, %v2057_v20, 0 }
 0xb27   : > { %4633 = vmatpush3.bf16.xpose.msra.mxu0 %v1952_v19  ;;  %4634 = vmatprep.mubr.msk.bf16.mxu0 %vm5131_vm0, %v5130_v1 }
 0xb28   : > { %4644 = vmatprep.subr.bf16.mxu0 %v5130_v1 }
 0xb29   : > { %v2167_v12 = vpop.permute.xlu1 %2166 }
 0xb2a   : > { %v2172_v23 = vsel %vm1018_vm2, %v2167_v12, 0 }
 0xb2e   : > { %4635 = vmatmul.mubr.msk.bf16.vlgmr.msra.gmra.mxu0 %vm1018_vm2, %v1945_v18 }
 0xb2f   : > { %4645 = vmatpush3.bf16.xpose.msra.mxu0 %v2062_v21  ;;  %4646 = vmatprep.mubr.msk.bf16.mxu0 %vm5131_vm0, %v5130_v1 }
 0xb30   : > { %4656 = vmatprep.subr.bf16.mxu0 %v5130_v1 }
 0xb36   : > { %4647 = vmatmul.mubr.msk.bf16.vlgmr.msra.gmra.mxu0 %vm1018_vm2, %v2055_v22 }
 0xb37   : > { %4657 = vmatpush3.bf16.xpose.msra.mxu0 %v2172_v23  ;;  %4658 = vmatprep.mubr.msk.bf16.mxu0 %vm5131_vm0, %v5130_v1 }
 0xb38   : > { %4668 = vmatprep.subr.bf16.mxu0 %v5130_v1 }
 0xb3e   : > { %4659 = vmatmul.mubr.msk.bf16.vlgmr.msra.gmra.mxu0 %vm1018_vm2, %v2165_v24 }
 0xb3f   : > { %4672 = vmatprep.mubr.msk.bf16.mxu0 %vm5131_vm0, %v5130_v1 }
 0xbe6   : > { %v1877_v25 = vpop.f32.mrf.mxu0 }
 0xbe7   : > { %v1878_v26 = vadd.f32 %v5417_v27, %v1877_v25 }
 0xbe8   : > { %v4624_v28 = vpop.f32.mrf.mxu0 }
 0xbe9   : > { %v1883_v29 = vsel %vm1018_vm2, %v1878_v26, -inf }
 0xbea   : > { %1884 = vmax.xlane.f32.xlu1 %v1883_v29  ;;  %v1880_v30 = vpop.f32.mrf.mxu0 }
 0xbec   : > { %v4625_v31 = vpop.f32.mrf.mxu0 }
 0xbee   : > { %v1988_v32 = vpop.f32.mrf.mxu0 }
 0xbef   : > { %v1989_v33 = vadd.f32 %v5417_v27, %v1988_v32 }
 0xbf0   : > { %v4636_v34 = vpop.f32.mrf.mxu0 }
 0xbf1   : > { %v1994_v35 = vsel %vm1018_vm2, %v1989_v33, -inf }
 0xbf2   : > { %1995 = vmax.xlane.f32.xlu0 %v1994_v35  ;;  %v1991_v36 = vpop.f32.mrf.mxu0 }
 0xbf4   : > { %v4637_v37 = vpop.f32.mrf.mxu0 }
 0xbf6   : > { %v2098_v38 = vpop.f32.mrf.mxu0 }
 0xbf7   : > { %v2099_v39 = vadd.f32 %v5417_v27, %v2098_v38 }
 0xbf8   : > { %v4648_v40 = vpop.f32.mrf.mxu0 }
 0xbf9   : > { %v2104_v41 = vsel %vm1018_vm2, %v2099_v39, -inf  ;;  %v4910_v40 = vld [vmem:[%s5181_s25 + $0x18] sm:$0xff]  }
 0xbfa   : > { %2105 = vmax.xlane.f32.xlu0 %v2104_v41  ;;  %v2101_v42 = vpop.f32.mrf.mxu0  ;;  %4669 = vmatpush3.bf16.msra.mxu0 %v4910_v40  ;;  %v4911_v41 = vld [vmem:[%s5181_s25 + $0x10] sm:$0xff]  }
 0xbfb   : > { %4670 = vmatprep.subr.bf16.mxu0 %v5130_v1 }
 0xbfc   : > { %v4649_v43 = vpop.f32.mrf.mxu0 }
 0xbfe   : > { %v2208_v44 = vpop.f32.mrf.mxu0  ;;  %4671 = vmatpush3.bf16.msra.mxu0 %v4911_v41 }
 0xbff   : > { %v2209_v45 = vadd.f32 %v5417_v27, %v2208_v44  ;;  %4684 = vmatprep.subr.bf16.mxu0 %v5130_v1 }
 0xc00   : > { %v4660_v46 = vpop.f32.mrf.mxu0 }
 0xc01   : > { %v2214_v47 = vsel %vm1018_vm2, %v2209_v45, -inf }
 0xc02   : > { %2215 = vmax.xlane.f32.xlu1 %v2214_v47  ;;  %v2211_v48 = vpop.f32.mrf.mxu0 }
 0xc04   : > { %v4661_v49 = vpop.f32.mrf.mxu0 }
 0xc73   : > { %v1885_v50 = vpop.xlane.xlu1 %1884 }
 0xc74   : > { %v1886_v51 = vsub.f32 %v1878_v26, %v1885_v50 }
 0xc76   : > { %v1887_v52 = vmul.f32 1.442695, %v1886_v51 }
 0xc78   : > { %4982 = vpow2.f32 %v1887_v52 }
 0xc7b   : > { %v1996_v53 = vpop.xlane.xlu0 %1995 }
 0xc7c   : > { %v1997_v54 = vsub.f32 %v1989_v33, %v1996_v53 }
 0xc7e   : > { %v1998_v55 = vmul.f32 1.442695, %v1997_v54 }
 0xc80   : > { %4984 = vpow2.f32 %v1998_v55 }
 0xc83   : > { %v2106_v56 = vpop.xlane.xlu0 %2105 }
 0xc84   : > { %v2107_v57 = vsub.f32 %v2099_v39, %v2106_v56 }
 0xc85   : > { %v4983_v58 = vpop.eup %4982 }
 0xc86   : > { %v2108_v59 = vmul.f32 1.442695, %v2107_v57  ;;  %v1889_v27 = vsel %vm1018_vm2, %v4983_v58, 0.0  ;;  %v4265_v57 = vld [vmem:[%s5186_s29 + $0x1] ss:$0 sm:$0xff] }
 0xc87   : > { %1890 = vadd.xlane.f32.xlu0 %v1889_v27 }
 0xc88   : > { %4986 = vpow2.f32 %v2108_v59 }
 0xc8b   : > { %v2216_v0 = vpop.xlane.xlu1 %2215 }
 0xc8c   : > { %v2217_v2 = vsub.f32 %v2209_v45, %v2216_v0 }
 0xc8d   : > { %v4985_v60 = vpop.eup %4984 }
 0xc8e   : > { %v2000_v61 = vsel %vm1018_vm2, %v4985_v60, 0.0  ;;  %v2218_v4 = vmul.f32 1.442695, %v2217_v2 }
 0xc8f   : > { %2001 = vadd.xlane.f32.xlu1 %v2000_v61 }
 0xc90   : > { %4988 = vpow2.f32 %v2218_v4 }
 0xc95   : > { %v4987_v62 = vpop.eup %4986 }
 0xc96   : > { %v2110_v63 = vsel %vm1018_vm2, %v4987_v62, 0.0 }
 0xc97   : > { %2111 = vadd.xlane.f32.xlu0 %v2110_v63 }
 0xc9d   : > { %v4989_v6 = vpop.eup %4988 }
 0xc9e   : > { %v2220_v7 = vsel %vm1018_vm2, %v4989_v6, 0.0 }
 0xca0   : > { %2006 = vrot.lane.b32.xlu1 %v5514_v11, %s5937_s26 }
 0xcad   : > { %1895 = vrot.lane.b32.xlu0 %v5514_v11, %s5938_s5 }
 0xcb1   : > { %2226 = vrot.lane.b32.xlu0 %v5514_v11, %s5939_s1 }
 0xcc4   : > { %2221 = vadd.xlane.f32.xlu1 %v2220_v7 }
 0xcd5   : > { %2116 = vrot.lane.b32.xlu1 %v5514_v11, %s5940_s7 }
 0xd10   : > { %v1891_v8 = vpop.xlane.xlu0 %1890 }
 0xd11   : > { %4990 = vrcp.f32 %v1891_v8  ;;  %v4912_v8 = vld [vmem:[%s5201_s14 + $0x18] sm:$0xff]  }
 0xd18   : > { %v2002_v9 = vpop.xlane.xlu1 %2001 }
 0xd19   : > { %4992 = vrcp.f32 %v2002_v9  ;;  %v4913_v9 = vld [vmem:[%s5201_s14 + $0x10] sm:$0xff]  }
 0xd1c   : > { %v2007_v16 = vpop.permute.xlu1 %2006 }
 0xd1d   : > { %v2012_v19 = vsel %vm1082_vm3, %v2007_v16, 0  ;;  %v4272_v16 = vld [vmem:[%s5196_s8 + $0x1] ss:$0 sm:$0xff] }
 0xd1e   : > { %v4991_v10 = vpop.eup %4990 }
 0xd1f   : > { %v1893_v5 = vmul.f32 %v4991_v10, %v4983_v58 }
 0xd20   : > { %v2112_v13 = vpop.xlane.xlu0 %2111 }
 0xd21   : > { %v1894_v17 = vpack.c.bf16 %v1893_v5, %v1893_v5  ;;  %4994 = vrcp.f32 %v2112_v13 }
 0xd24   : > { %v1896_v14 = vpop.permute.xlu0 %1895 }
 0xd25   : > { %v1901_v15 = vsel %vm1082_vm3, %v1896_v14, 0  ;;  %v4271_v14 = vld [vmem:[%s5917_s3 + $0x1] ss:$0 sm:$0xff] }
 0xd26   : > { %4627 = vmatpush3.bf16.msra.mxu1 %v1901_v15  ;;  %v4993_v18 = vpop.eup %4992 }
 0xd27   : > { %4638 = vmatprep.subr.bf16.mxu1 %v5130_v1  ;;  %v2004_v11 = vmul.f32 %v4993_v18, %v4985_v60 }
 0xd28   : > { %v2227_v25 = vpop.permute.xlu0 %2226 }
 0xd29   : > { %4629 = vmatmul.mubr.msk.bf16.vlgmr.msra.gmra.mxu1 %vm1018_vm2, %v1894_v17  ;;  %v2005_v20 = vpack.c.bf16 %v2004_v11, %v2004_v11  ;;  %v2232_v28 = vsel %vm1082_vm3, %v2227_v25, 0  ;;  %v4914_v11 = vld [vmem:[%s5211_s24 + $0x38] sm:$0xff]  }
 0xd2a   : > { %4639 = vmatpush3.bf16.msra.mxu1 %v2012_v19  ;;  %4640 = vmatprep.mubr.msk.bf16.mxu1 %vm5131_vm0, %v5130_v1 }
 0xd2b   : > { %4650 = vmatprep.subr.bf16.mxu1 %v5130_v1 }
 0xd2e   : > { %v4995_v21 = vpop.eup %4994 }
 0xd2f   : > { %v2114_v22 = vmul.f32 %v4995_v21, %v4987_v62  ;;  %v4916_v21 = vld [vmem:[%s5211_s24 + $0x28] sm:$0xff]  }
 0xd31   : > { %4641 = vmatmul.mubr.msk.bf16.vlgmr.msra.gmra.mxu1 %vm1018_vm2, %v2005_v20  ;;  %v2115_v26 = vpack.c.bf16 %v2114_v22, %v2114_v22  ;;  %v4915_v20 = vld [vmem:[%s5211_s24 + $0x30] sm:$0xff]   ;;  %v4278_v22 = vld [vmem:[%s5206_s19 + $0x1] ss:$0 sm:$0xff] }
 0xd32   : > { %4652 = vmatprep.mubr.msk.bf16.mxu1 %vm5131_vm0, %v5130_v1 }
 0xd4d   : > { %v2222_v12 = vpop.xlane.xlu1 %2221 }
 0xd4e   : > { %4996 = vrcp.f32 %v2222_v12  ;;  %v4917_v12 = vld [vmem:[%s5211_s24 + $0x20] sm:$0xff]  }
 0xd51   : > { %v2117_v23 = vpop.permute.xlu1 %2116 }
 0xd52   : > { %v2122_v24 = vsel %vm1082_vm3, %v2117_v23, 0 }
 0xd53   : > { %4651 = vmatpush3.bf16.msra.mxu1 %v2122_v24 }
 0xd54   : > { %4662 = vmatprep.subr.bf16.mxu1 %v5130_v1 }
 0xd56   : > { %4653 = vmatmul.mubr.msk.bf16.vlgmr.msra.gmra.mxu1 %vm1018_vm2, %v2115_v26 }
 0xd57   : > { %4663 = vmatpush3.bf16.msra.mxu1 %v2232_v28  ;;  %4664 = vmatprep.mubr.msk.bf16.mxu1 %vm5131_vm0, %v5130_v1 }
 0xd58   : > { %4676 = vmatprep.subr.bf16.mxu1 %v5130_v1 }
 0xd5b   : > { %v4997_v29 = vpop.eup %4996 }
 0xd5c   : > { %v2224_v30 = vmul.f32 %v4997_v29, %v4989_v6 }
 0xd5e   : > { %v2225_v31 = vpack.c.bf16 %v2224_v30, %v2224_v30 }
 0xd60   : > { %4665 = vmatmul.mubr.msk.bf16.vlgmr.msra.gmra.mxu1 %vm1018_vm2, %v2225_v31 }
 0xd61   : > { %4680 = vmatprep.mubr.msk.bf16.mxu1 %vm5131_vm0, %v5130_v1  ;;  %4677 = vmatpush3.bf16.msra.mxu1 %v4912_v8 }
 0xd62   : > { %4678 = vmatprep.subr.bf16.mxu1 %v5130_v1 }
 0xd65   : > { %4679 = vmatpush3.bf16.msra.mxu1 %v4913_v9 }
 0xd66   : > { %4696 = vmatprep.subr.bf16.mxu1 %v5130_v1 }
 0xde9   : > { %v1937_v32 = vpop.f32.mrf.mxu1 }
 0xdeb   : > { %v4630_v33 = vpop.f32.mrf.mxu1 }
 0xded   : > { %v1940_v34 = vpop.f32.mrf.mxu1 }
 0xdef   : > { %v4631_v35 = vpop.f32.mrf.mxu1 }
 0xdf1   : > { %v2048_v36 = vpop.f32.mrf.mxu1 }
 0xdf2   : > { %2275 = vrot.lane.b32.xlu1 %v2048_v36, %s5941_s15 }
 0xdf3   : > { %v4642_v37 = vpop.f32.mrf.mxu1 }
 0xdf5   : > { %v2051_v38 = vpop.f32.mrf.mxu1 }
 0xdf7   : > { %v4643_v39 = vpop.f32.mrf.mxu1 }
 0xdf8   : > { %v4291_v39 = vld [vmem:[%s5216_s30 + $0x1] ss:$0 sm:$0xff] }
 0xe16   : > { %v2158_v42 = vpop.f32.mrf.mxu1 }
 0xe17   : > { %2279 = vrot.lane.b32.xlu0 %v2158_v42, %s5942_s4 }
 0xe18   : > { %v4654_v43 = vpop.f32.mrf.mxu1 }
 0xe1a   : > { %v2161_v44 = vpop.f32.mrf.mxu1 }
 0xe1c   : > { %v4655_v45 = vpop.f32.mrf.mxu1 }
 0xe20   : > { %v2268_v46 = vpop.f32.mrf.mxu1 }
 0xe21   : > { %2283 = vrot.lane.b32.xlu1 %v2268_v46, %s5943_s28 }
 0xe22   : > { %v4666_v47 = vpop.f32.mrf.mxu1 }
 0xe24   : > { %v2271_v48 = vpop.f32.mrf.mxu1 }
 0xe26   : > { %v4667_v49 = vpop.f32.mrf.mxu1 }
 0xe64   : > { %v2276_v50 = vpop.permute.xlu1 %2275 }
 0xe65   : > { %v2286_v52 = vsel %vm1018_vm2, %v1937_v32, %v2276_v50 }
 0xe89   : > { %v2280_v51 = vpop.permute.xlu0 %2279 }
 0xe8a   : > { %v2287_v53 = vsel %vm1470_vm4, %v2286_v52, %v2280_v51  ;;  %v4918_v52 = vld [vmem:[%s5918_s17 + $0x28] sm:$0xff]  }
 0xe93   : > { %v2284_v54 = vpop.permute.xlu1 %2283 }
 0xe94   : > { %v2288_v55 = vsel %vm1472_vm5, %v2287_v53, %v2284_v54  ;;  %v4919_v53 = vld [vmem:[%s5918_s17 + $0x20] sm:$0xff]   ;;  %s5944_s17 = smov 88  }
 0xe95   : > { %v2294_v56 = vpack.c.bf16 %v2288_v55, %v2288_v55 }
 0xe97   : > { %4673 = vmatmul.mubr.msk.bf16.vlgmr.msra.gmra.mxu0 %vm962_vm1, %v2294_v56 }
 0xe98   : > { %4692 = vmatprep.mubr.msk.bf16.mxu0 %vm5131_vm0, %v5130_v1  ;;  %4685 = vmatpush3.bf16.msra.mxu0 %v4914_v11 }
 0xe99   : > { %4686 = vmatprep.subr.bf16.mxu0 %v5130_v1 }
 0xe9c   : > { %4687 = vmatpush3.bf16.msra.mxu0 %v4915_v20 }
 0xe9d   : > { %4688 = vmatprep.subr.bf16.mxu0 %v5130_v1 }
 0xea0   : > { %4689 = vmatpush3.bf16.msra.mxu0 %v4916_v21 }
 0xea1   : > { %4690 = vmatprep.subr.bf16.mxu0 %v5130_v1 }
 0xea4   : > { %4691 = vmatpush3.bf16.msra.mxu0 %v4917_v12  ;;  %v5038_v12 = vld [vmem:[%s5414_s11] ss:$0 sm:$0xff]  ;;  %s5952_s11 = sld [smem:[#allocation16_spill]] }
 0xea5   : > { %4710 = vmatprep.subr.bf16.mxu0 %v5130_v1 }
 0xf57   : > { %v2352_v58 = vpop.f32.mrf.mxu0 }
 0xf58   : > { %v2353_v59 = vadd.f32 %v4265_v57, %v2352_v58  ;;  %v4299_v58 = vld [vmem:[%s5221_s6 + $0x1] ss:$0 sm:$0xff] }
 0xf59   : > { %v4674_v27 = vpop.f32.mrf.mxu0 }
 0xf5a   : > { %v2358_v60 = vadd.f32 %v2353_v59, %v5506_v3  ;;  %v4300_v27 = vld [vmem:[%s5931_s22 + $0x1] ss:$0 sm:$0xff] }
 0xf5b   : > { %v2355_v61 = vpop.f32.mrf.mxu0 }
 0xf5c   : > { %v2363_v62 = vsel %vm962_vm1, %v2358_v60, 0.0 }
 0xf5d   : > { %2364 = vadd.xlane.f32.xlu0 %v2363_v62  ;;  %v4675_v63 = vpop.f32.mrf.mxu0 }
 0xf5e   : > { %v4306_v63 = vld [vmem:[%s5176_s21 + $0x2] ss:$0 sm:$0xff] }
 0xfe6   : > { %v2365_v0 = vpop.xlane.xlu0 %2364 }
 0xfe7   : > { %v2366_v2 = vmul.f32 0.03125, %v2365_v0 }
 0xfe9   : > { %v2367_v4 = vsub.f32 %v2358_v60, %v2366_v2 }
 0xfeb   : > { %v2368_v6 = vmul.f32 %v2367_v4, %v2367_v4 }
 0xfed   : > { %v2369_v7 = vsel %vm962_vm1, %v2368_v6, 0.0 }
 0xfee   : > { %2370 = vadd.xlane.f32.xlu1 %v2369_v7 }
0x1077   : > { %v2371_v3 = vpop.xlane.xlu1 %2370 }
0x1078   : > { %v2372_v10 = vmul.f32 0.03125, %v2371_v3 }
0x107a   : > { %v2373_v13 = vadd.f32 1e-05, %v2372_v10 }
0x107c   : > { %4998 = vrsqrt.f32 %v2373_v13 }
0x1089   : > { %v4999_v5 = vpop.eup %4998 }
0x108a   : > { %v2375_v15 = vmul.f32 %v4999_v5, %v2367_v4 }
0x108c   : > { %v2382_v17 = vmul.f32 %v4271_v14, %v2375_v15 }
0x108e   : > { %v2389_v18 = vadd.f32 %v4272_v16, %v2382_v17 }
0x1090   : > { %v2395_v19 = vpack.c.bf16 %v2389_v18, %v2389_v18 }
0x1092   : > { %4681 = vmatmul.mubr.msk.bf16.vlgmr.msra.gmra.mxu1 %vm962_vm1, %v2395_v19 }
0x1093   : > { %4700 = vmatprep.mubr.msk.bf16.mxu1 %vm5131_vm0, %v5130_v1  ;;  %4697 = vmatpush3.bf16.msra.mxu1 %v4918_v52 }
0x1094   : > { %4698 = vmatprep.subr.bf16.mxu1 %v5130_v1 }
0x1097   : > { %4699 = vmatpush3.bf16.msra.mxu1 %v4919_v53 }
0x1098   : > { %4704 = vmatprep.subr.bf16.mxu1 %v5130_v1 }
0x1152   : > { %v2453_v23 = vpop.f32.mrf.mxu1 }
0x1153   : > { %v2454_v24 = vadd.f32 %v4278_v22, %v2453_v23 }
0x1154   : > { %v4682_v25 = vpop.f32.mrf.mxu1 }
0x1155   : > { %v2460_v26 = vmul.f32 0.044715, %v2454_v24  ;;  %v2459_v35 = vmul.f32 0.5, %v2454_v24 }
0x1156   : > { %v2456_v28 = vpop.f32.mrf.mxu1 }
0x1157   : > { %v2461_v29 = vmul.f32 %v2460_v26, %v2454_v24 }
0x1158   : > { %v4683_v30 = vpop.f32.mrf.mxu1 }
0x1159   : > { %v2462_v31 = vmul.f32 %v2461_v29, %v2454_v24 }
0x115b   : > { %v2463_v32 = vadd.f32 %v2462_v31, %v2454_v24 }
0x115d   : > { %v2464_v33 = vmul.f32 0.7978846, %v2463_v32 }
0x115f   : > { %5000 = vtanh.f32 %v2464_v33 }
0x116c   : > { %v5001_v34 = vpop.eup %5000 }
0x116d   : > { %v2466_v36 = vadd.f32 1.0, %v5001_v34 }
0x116f   : > { %v2467_v37 = vmul.f32 %v2466_v36, %v2459_v35 }
0x1171   : > { %v2477_v38 = vpack.c.bf16 %v2467_v37, %v2467_v37 }
0x1173   : > { %4693 = vmatmul.mubr.msk.bf16.vlgmr.msra.gmra.mxu0 %vm1688_vm6, %v2477_v38 }
0x1174   : > { %4712 = vmatprep.mubr.msk.bf16.mxu0 %vm5131_vm0, %v5130_v1 }
0x1233   : > { %v2547_v40 = vpop.f32.mrf.mxu0 }
0x1234   : > { %v2548_v41 = vadd.f32 %v4291_v39, %v2547_v40 }
0x1235   : > { %v4694_v42 = vpop.f32.mrf.mxu0 }
0x1236   : > { %v2553_v43 = vadd.f32 %v2548_v41, %v2389_v18 }
0x1237   : > { %v2550_v44 = vpop.f32.mrf.mxu0 }
0x1238   : > { %v2558_v45 = vsel %vm962_vm1, %v2553_v43, 0.0 }
0x1239   : > { %2559 = vadd.xlane.f32.xlu0 %v2558_v45  ;;  %v4695_v46 = vpop.f32.mrf.mxu0 }
0x12c2   : > { %v2560_v47 = vpop.xlane.xlu0 %2559 }
0x12c3   : > { %v2561_v48 = vmul.f32 0.03125, %v2560_v47 }
0x12c5   : > { %v2562_v49 = vsub.f32 %v2553_v43, %v2561_v48 }
0x12c7   : > { %v2563_v50 = vmul.f32 %v2562_v49, %v2562_v49 }
0x12c9   : > { %v2564_v51 = vsel %vm962_vm1, %v2563_v50, 0.0 }
0x12ca   : > { %2565 = vadd.xlane.f32.xlu0 %v2564_v51 }
0x1353   : > { %v2566_v54 = vpop.xlane.xlu0 %2565 }
0x1354   : > { %v2567_v55 = vmul.f32 0.03125, %v2566_v54 }
0x1356   : > { %v2568_v56 = vadd.f32 1e-05, %v2567_v55 }
0x1358   : > { %5002 = vrsqrt.f32 %v2568_v56 }
0x1365   : > { %v5003_v57 = vpop.eup %5002 }
0x1366   : > { %v2570_v59 = vmul.f32 %v5003_v57, %v2562_v49 }
0x1368   : > { %v2577_v60 = vmul.f32 %v4299_v58, %v2570_v59 }
0x136a   : > { %v5634_v61 = vadd.f32 %v4300_v27, %v2577_v60 }
0x136c   : > { %v2590_v62 = vpack.c.bf16 %v5634_v61, %v5634_v61 }
0x136e   : > { %4701 = vmatmul.mubr.msk.bf16.vlgmr.msra.gmra.mxu1 %vm962_vm1, %v2590_v62 }
0x136f   : > { %4706 = vmatprep.mubr.msk.bf16.mxu1 %vm5131_vm0, %v5130_v1 }
0x142e   : > { %v2648_v0 = vpop.f32.mrf.mxu1 }
0x142f   : > { %v2649_v2 = vadd.f32 %v4306_v63, %v2648_v0 }
0x1430   : > { %v4702_v4 = vpop.f32.mrf.mxu1 }
0x1431   : > { %v2654_v6 = vmul.f32 0.35355338, %v2649_v2  ;;  %v5642_v7 = vpack.c.bf16 %v2649_v2, %v2649_v2 }
0x1432   : > { %v2651_v8 = vpop.f32.mrf.mxu1 }
0x1433   : > { %2769 = vrot.lane.b32.xlu0 %v5642_v7, %s5944_s17  ;;  %2658 = vrot.lane.b32.xlu1 %v5642_v7, %s5932_s23  ;;  %v2655_v3 = vpack.c.bf16 %v2654_v6, %v2654_v6  ;;  %s5949_s17 = sld [smem:[#allocation14_spill]] }
0x1434   : > { %v4703_v9 = vpop.f32.mrf.mxu1 }
0x1437   : > { %2877 = vrot.lane.b32.xlu0 %v2655_v3, %s5945_s27  ;;  %2767 = vrot.lane.b32.xlu1 %v2655_v3, %s5933_s9  ;;  %s5947_s9 = sld [smem:[#allocation13_spill]]  ;;  %s928_s27 = scalar_lea.vmem %s5291_s20, %s5366_s16 }
0x143b   : > { %2987 = vrot.lane.b32.xlu0 %v2655_v3, %s5934_s2  ;;  %2879 = vrot.lane.b32.xlu1 %v5642_v7, %s5935_s13  ;;  %s5948_s13 = sld [smem:[#allocation12_spill]] }
0x143c   : > { %s5957_s2 = sld [smem:[#allocation22_spill]] }
0x143f   : > { %2989 = vrot.lane.b32.xlu1 %v5642_v7, %s5936_s18  ;;  %s5954_s18 = sld [smem:[#allocation21_spill]] }
0x14a5   : > { %v2659_v10 = vpop.permute.xlu1 %2658  ;;  %v2770_v5 = vpop.permute.xlu0 %2769 }
0x14a6   : > { %v2664_v13 = vsel %vm1018_vm2, %v2659_v10, 0  ;;  %v2775_v15 = vsel %vm1018_vm2, %v2770_v5, 0 }
0x14a7   : > { %4705 = vmatpush3.bf16.xpose.msra.mxu1 %v2664_v13 }
0x14a8   : > { %4716 = vmatprep.subr.bf16.mxu1 %v5130_v1 }
0x14a9   : > { %v2768_v14 = vpop.permute.xlu1 %2767  ;;  %v2878_v19 = vpop.permute.xlu0 %2877 }
0x14ad   : > { %v2880_v16 = vpop.permute.xlu1 %2879  ;;  %v2988_v20 = vpop.permute.xlu0 %2987 }
0x14ae   : > { %4707 = vmatmul.mubr.msk.bf16.vlgmr.msra.gmra.mxu1 %vm1018_vm2, %v2655_v3  ;;  %v2885_v17 = vsel %vm1018_vm2, %v2880_v16, 0 }
0x14af   : > { %4717 = vmatpush3.bf16.xpose.msra.mxu1 %v2775_v15  ;;  %4718 = vmatprep.mubr.msk.bf16.mxu1 %vm5131_vm0, %v5130_v1 }
0x14b0   : > { %4728 = vmatprep.subr.bf16.mxu1 %v5130_v1 }
0x14b1   : > { %v2990_v18 = vpop.permute.xlu1 %2989 }
0x14b2   : > { %v2995_v11 = vsel %vm1018_vm2, %v2990_v18, 0 }
0x14b6   : > { %4719 = vmatmul.mubr.msk.bf16.vlgmr.msra.gmra.mxu1 %vm1018_vm2, %v2768_v14 }
0x14b7   : > { %4729 = vmatpush3.bf16.xpose.msra.mxu1 %v2885_v17  ;;  %4730 = vmatprep.mubr.msk.bf16.mxu1 %vm5131_vm0, %v5130_v1 }
0x14b8   : > { %4740 = vmatprep.subr.bf16.mxu1 %v5130_v1 }
0x14be   : > { %4731 = vmatmul.mubr.msk.bf16.vlgmr.msra.gmra.mxu1 %vm1018_vm2, %v2878_v19 }
0x14bf   : > { %4741 = vmatpush3.bf16.xpose.msra.mxu1 %v2995_v11  ;;  %4742 = vmatprep.mubr.msk.bf16.mxu1 %vm5131_vm0, %v5130_v1 }
0x14c0   : > { %4752 = vmatprep.subr.bf16.mxu1 %v5130_v1 }
0x14c6   : > { %4743 = vmatmul.mubr.msk.bf16.vlgmr.msra.gmra.mxu1 %vm1018_vm2, %v2988_v20 }
0x14c7   : > { %4756 = vmatprep.mubr.msk.bf16.mxu1 %vm5131_vm0, %v5130_v1 }
0x156e   : > { %v2700_v21 = vpop.f32.mrf.mxu1 }
0x156f   : > { %v2701_v22 = vadd.f32 %v5038_v12, %v2700_v21 }
0x1570   : > { %v4708_v23 = vpop.f32.mrf.mxu1 }
0x1571   : > { %v2706_v24 = vsel %vm1018_vm2, %v2701_v22, -inf }
0x1572   : > { %2707 = vmax.xlane.f32.xlu1 %v2706_v24  ;;  %v2703_v25 = vpop.f32.mrf.mxu1 }
0x1574   : > { %v4709_v26 = vpop.f32.mrf.mxu1 }
0x1576   : > { %v2811_v28 = vpop.f32.mrf.mxu1 }
0x1577   : > { %v2812_v29 = vadd.f32 %v5038_v12, %v2811_v28 }
0x1578   : > { %v4720_v30 = vpop.f32.mrf.mxu1 }
0x1579   : > { %v2817_v31 = vsel %vm1018_vm2, %v2812_v29, -inf }
0x157a   : > { %2818 = vmax.xlane.f32.xlu0 %v2817_v31  ;;  %v2814_v32 = vpop.f32.mrf.mxu1 }
0x157c   : > { %v4721_v33 = vpop.f32.mrf.mxu1 }
0x157e   : > { %v2921_v34 = vpop.f32.mrf.mxu1 }
0x157f   : > { %v2922_v35 = vadd.f32 %v5038_v12, %v2921_v34 }
0x1580   : > { %v4732_v36 = vpop.f32.mrf.mxu1 }
0x1581   : > { %v2927_v37 = vsel %vm1018_vm2, %v2922_v35, -inf  ;;  %v4920_v36 = vld [vmem:[%s5181_s25 + $0x28] sm:$0xff]  }
0x1582   : > { %2928 = vmax.xlane.f32.xlu0 %v2927_v37  ;;  %v2924_v38 = vpop.f32.mrf.mxu1  ;;  %4753 = vmatpush3.bf16.msra.mxu1 %v4920_v36  ;;  %v4921_v37 = vld [vmem:[%s5181_s25 + $0x20] sm:$0xff]  }
0x1583   : > { %4754 = vmatprep.subr.bf16.mxu1 %v5130_v1 }
0x1584   : > { %v4733_v39 = vpop.f32.mrf.mxu1 }
0x1586   : > { %v3031_v40 = vpop.f32.mrf.mxu1  ;;  %4755 = vmatpush3.bf16.msra.mxu1 %v4921_v37 }
0x1587   : > { %v3032_v41 = vadd.f32 %v5038_v12, %v3031_v40  ;;  %4768 = vmatprep.subr.bf16.mxu1 %v5130_v1 }
0x1588   : > { %v4744_v42 = vpop.f32.mrf.mxu1 }
0x1589   : > { %v3037_v43 = vsel %vm1018_vm2, %v3032_v41, -inf }
0x158a   : > { %3038 = vmax.xlane.f32.xlu1 %v3037_v43  ;;  %v3034_v44 = vpop.f32.mrf.mxu1 }
0x158c   : > { %v4745_v45 = vpop.f32.mrf.mxu1 }
0x15fb   : > { %v2708_v46 = vpop.xlane.xlu1 %2707 }
0x15fc   : > { %v2709_v47 = vsub.f32 %v2701_v22, %v2708_v46 }
0x15fe   : > { %v2710_v48 = vmul.f32 1.442695, %v2709_v47 }
0x1600   : > { %5004 = vpow2.f32 %v2710_v48 }
0x1603   : > { %v2819_v49 = vpop.xlane.xlu0 %2818 }
0x1604   : > { %v2820_v50 = vsub.f32 %v2812_v29, %v2819_v49 }
0x1606   : > { %v2821_v51 = vmul.f32 1.442695, %v2820_v50 }
0x1608   : > { %5006 = vpow2.f32 %v2821_v51 }
0x160b   : > { %v2929_v52 = vpop.xlane.xlu0 %2928 }
0x160c   : > { %v2930_v53 = vsub.f32 %v2922_v35, %v2929_v52 }
0x160d   : > { %v5005_v54 = vpop.eup %5004 }
0x160e   : > { %v2931_v55 = vmul.f32 1.442695, %v2930_v53  ;;  %v2712_v56 = vsel %vm1018_vm2, %v5005_v54, 0.0  ;;  %v4323_v53 = vld [vmem:[%s5186_s29 + $0x2] ss:$0 sm:$0xff] }
0x160f   : > { %2713 = vadd.xlane.f32.xlu0 %v2712_v56 }
0x1610   : > { %5008 = vpow2.f32 %v2931_v55 }
0x1613   : > { %v3039_v60 = vpop.xlane.xlu1 %3038 }
0x1614   : > { %v3040_v62 = vsub.f32 %v3032_v41, %v3039_v60 }
0x1615   : > { %v5007_v57 = vpop.eup %5006 }
0x1616   : > { %v2823_v58 = vsel %vm1018_vm2, %v5007_v57, 0.0  ;;  %v3041_v63 = vmul.f32 1.442695, %v3040_v62 }
0x1617   : > { %2824 = vadd.xlane.f32.xlu1 %v2823_v58 }
0x1618   : > { %5010 = vpow2.f32 %v3041_v63 }
0x161d   : > { %v5009_v59 = vpop.eup %5008 }
0x161e   : > { %v2933_v27 = vsel %vm1018_vm2, %v5009_v59, 0.0 }
0x161f   : > { %2934 = vadd.xlane.f32.xlu0 %v2933_v27 }
0x1625   : > { %v5011_v0 = vpop.eup %5010 }
0x1626   : > { %v3043_v2 = vsel %vm1018_vm2, %v5011_v0, 0.0 }
0x1628   : > { %2829 = vrot.lane.b32.xlu1 %v5642_v7, %s5937_s26  ;;  %s5955_s26 = sld [smem:[#allocation19_spill]] }
0x1635   : > { %2718 = vrot.lane.b32.xlu0 %v5642_v7, %s5938_s5  ;;  %s5946_s5 = sld [smem:[#allocation11_spill]] }
0x1639   : > { %3049 = vrot.lane.b32.xlu0 %v5642_v7, %s5939_s1  ;;  %s909_s1 = sand.u32 1, %s5091_s10  }
0x163a   : > { %s4208_s23 = sshll.u32 %s909_s1, 3 }
0x164c   : > { %3044 = vadd.xlane.f32.xlu1 %v3043_v2 }
0x165d   : > { %2939 = vrot.lane.b32.xlu1 %v5642_v7, %s5940_s7  ;;  %s5951_s7 = sld [smem:[#allocation15_spill]] }
0x1698   : > { %v2714_v4 = vpop.xlane.xlu0 %2713 }
0x1699   : > { %5012 = vrcp.f32 %v2714_v4  ;;  %v4922_v4 = vld [vmem:[%s5201_s14 + $0x28] sm:$0xff]  }
0x16a0   : > { %v2825_v6 = vpop.xlane.xlu1 %2824 }
0x16a1   : > { %5014 = vrcp.f32 %v2825_v6  ;;  %v4923_v6 = vld [vmem:[%s5201_s14 + $0x20] sm:$0xff]  }
0x16a4   : > { %v2830_v5 = vpop.permute.xlu1 %2829 }
0x16a5   : > { %v2835_v16 = vsel %vm1082_vm3, %v2830_v5, 0  ;;  %v4330_v5 = vld [vmem:[%s5196_s8 + $0x2] ss:$0 sm:$0xff] }
0x16a6   : > { %v5013_v8 = vpop.eup %5012 }
0x16a7   : > { %v2716_v3 = vmul.f32 %v5013_v8, %v5005_v54 }
0x16a8   : > { %v2935_v9 = vpop.xlane.xlu0 %2934 }
0x16a9   : > { %v2717_v14 = vpack.c.bf16 %v2716_v3, %v2716_v3  ;;  %5016 = vrcp.f32 %v2935_v9 }
0x16ac   : > { %v2719_v10 = vpop.permute.xlu0 %2718 }
0x16ad   : > { %v2724_v13 = vsel %vm1082_vm3, %v2719_v10, 0  ;;  %v4329_v10 = vld [vmem:[%s5917_s3 + $0x2] ss:$0 sm:$0xff] }
0x16ae   : > { %4711 = vmatpush3.bf16.msra.mxu0 %v2724_v13  ;;  %v5015_v15 = vpop.eup %5014 }
0x16af   : > { %4722 = vmatprep.subr.bf16.mxu0 %v5130_v1  ;;  %v2827_v7 = vmul.f32 %v5015_v15, %v5007_v57 }
0x16b0   : > { %v3050_v12 = vpop.permute.xlu0 %3049 }
0x16b1   : > { %4713 = vmatmul.mubr.msk.bf16.vlgmr.msra.gmra.mxu0 %vm1018_vm2, %v2717_v14  ;;  %v2828_v17 = vpack.c.bf16 %v2827_v7, %v2827_v7  ;;  %v3055_v23 = vsel %vm1082_vm3, %v3050_v12, 0  ;;  %v4924_v7 = vld [vmem:[%s5211_s24 + $0x58] sm:$0xff]  }
0x16b2   : > { %4723 = vmatpush3.bf16.msra.mxu0 %v2835_v16  ;;  %4724 = vmatprep.mubr.msk.bf16.mxu0 %vm5131_vm0, %v5130_v1 }
0x16b3   : > { %4734 = vmatprep.subr.bf16.mxu0 %v5130_v1 }
0x16b6   : > { %v5017_v18 = vpop.eup %5016 }
0x16b7   : > { %v2937_v11 = vmul.f32 %v5017_v18, %v5009_v59  ;;  %v4926_v18 = vld [vmem:[%s5211_s24 + $0x48] sm:$0xff]  }
0x16b9   : > { %4725 = vmatmul.mubr.msk.bf16.vlgmr.msra.gmra.mxu0 %vm1018_vm2, %v2828_v17  ;;  %v2938_v22 = vpack.c.bf16 %v2937_v11, %v2937_v11  ;;  %v4925_v17 = vld [vmem:[%s5211_s24 + $0x50] sm:$0xff]   ;;  %v4336_v11 = vld [vmem:[%s5206_s19 + $0x2] ss:$0 sm:$0xff] }
0x16ba   : > { %4736 = vmatprep.mubr.msk.bf16.mxu0 %vm5131_vm0, %v5130_v1 }
0x16d5   : > { %v3045_v19 = vpop.xlane.xlu1 %3044 }
0x16d6   : > { %5018 = vrcp.f32 %v3045_v19  ;;  %v4927_v19 = vld [vmem:[%s5211_s24 + $0x40] sm:$0xff]  }
0x16d9   : > { %v2940_v20 = vpop.permute.xlu1 %2939 }
0x16da   : > { %v2945_v21 = vsel %vm1082_vm3, %v2940_v20, 0 }
0x16db   : > { %4735 = vmatpush3.bf16.msra.mxu0 %v2945_v21 }
0x16dc   : > { %4746 = vmatprep.subr.bf16.mxu0 %v5130_v1 }
0x16de   : > { %4737 = vmatmul.mubr.msk.bf16.vlgmr.msra.gmra.mxu0 %vm1018_vm2, %v2938_v22 }
0x16df   : > { %4747 = vmatpush3.bf16.msra.mxu0 %v3055_v23  ;;  %4748 = vmatprep.mubr.msk.bf16.mxu0 %vm5131_vm0, %v5130_v1 }
0x16e0   : > { %4760 = vmatprep.subr.bf16.mxu0 %v5130_v1 }
0x16e3   : > { %v5019_v24 = vpop.eup %5018 }
0x16e4   : > { %v3047_v25 = vmul.f32 %v5019_v24, %v5011_v0 }
0x16e6   : > { %v3048_v26 = vpack.c.bf16 %v3047_v25, %v3047_v25 }
0x16e8   : > { %4749 = vmatmul.mubr.msk.bf16.vlgmr.msra.gmra.mxu0 %vm1018_vm2, %v3048_v26 }
0x16e9   : > { %4764 = vmatprep.mubr.msk.bf16.mxu0 %vm5131_vm0, %v5130_v1  ;;  %4761 = vmatpush3.bf16.msra.mxu0 %v4922_v4 }
0x16ea   : > { %4762 = vmatprep.subr.bf16.mxu0 %v5130_v1 }
0x16ed   : > { %4763 = vmatpush3.bf16.msra.mxu0 %v4923_v6 }
0x16ee   : > { %4780 = vmatprep.subr.bf16.mxu0 %v5130_v1 }
0x1771   : > { %v2760_v28 = vpop.f32.mrf.mxu0 }
0x1773   : > { %v4714_v29 = vpop.f32.mrf.mxu0 }
0x1775   : > { %v2763_v30 = vpop.f32.mrf.mxu0 }
0x1777   : > { %v4715_v31 = vpop.f32.mrf.mxu0 }
0x1779   : > { %v2871_v32 = vpop.f32.mrf.mxu0 }
0x177a   : > { %3098 = vrot.lane.b32.xlu1 %v2871_v32, %s5941_s15  ;;  %s5953_s15 = sld [smem:[#allocation18_spill]] }
0x177b   : > { %v4726_v33 = vpop.f32.mrf.mxu0 }
0x177d   : > { %v2874_v34 = vpop.f32.mrf.mxu0 }
0x177f   : > { %v4727_v35 = vpop.f32.mrf.mxu0 }
0x1780   : > { %v4349_v35 = vld [vmem:[%s5216_s30 + $0x2] ss:$0 sm:$0xff] }
0x179e   : > { %v2981_v38 = vpop.f32.mrf.mxu0 }
0x179f   : > { %3102 = vrot.lane.b32.xlu0 %v2981_v38, %s5942_s4  ;;  %s5950_s4 = sld [smem:[#allocation17_spill]] }
0x17a0   : > { %v4738_v39 = vpop.f32.mrf.mxu0 }
0x17a2   : > { %v2984_v40 = vpop.f32.mrf.mxu0 }
0x17a4   : > { %v4739_v41 = vpop.f32.mrf.mxu0 }
0x17a8   : > { %v3091_v42 = vpop.f32.mrf.mxu0 }
0x17a9   : > { %3106 = vrot.lane.b32.xlu1 %v3091_v42, %s5943_s28  ;;  %s5956_s28 = sld [smem:[#allocation20_spill]] }
0x17aa   : > { %v4750_v43 = vpop.f32.mrf.mxu0 }
0x17ac   : > { %v3094_v44 = vpop.f32.mrf.mxu0 }
0x17ae   : > { %v4751_v45 = vpop.f32.mrf.mxu0 }
0x17ec   : > { %v3099_v46 = vpop.permute.xlu1 %3098 }
0x17ed   : > { %v3109_v48 = vsel %vm1018_vm2, %v2760_v28, %v3099_v46 }
0x1811   : > { %v3103_v47 = vpop.permute.xlu0 %3102 }
0x1812   : > { %v3110_v49 = vsel %vm1470_vm4, %v3109_v48, %v3103_v47  ;;  %v4928_v48 = vld [vmem:[%s5946_s5 + $0x8] sm:$0xff]  }
0x181b   : > { %v3107_v50 = vpop.permute.xlu1 %3106 }
0x181c   : > { %v3111_v51 = vsel %vm1472_vm5, %v3110_v49, %v3107_v50  ;;  %v4929_v49 = vld [vmem:[%s5946_s5] sm:$0xff]   ;;  %v4932_v50 = vld [vmem:[%s5947_s9 + $0x14] ss:$8 sps:$4 sm:$0xff]  }
0x181d   : > { %v3117_v52 = vpack.c.bf16 %v3111_v51, %v3111_v51 }
0x181f   : > { %4757 = vmatmul.mubr.msk.bf16.vlgmr.msra.gmra.mxu1 %vm962_vm1, %v3117_v52 }
0x1820   : > { %4776 = vmatprep.mubr.msk.bf16.mxu1 %vm5131_vm0, %v5130_v1  ;;  %4769 = vmatpush3.bf16.msra.mxu1 %v4924_v7 }
0x1821   : > { %4770 = vmatprep.subr.bf16.mxu1 %v5130_v1 }
0x1824   : > { %4771 = vmatpush3.bf16.msra.mxu1 %v4925_v17 }
0x1825   : > { %4772 = vmatprep.subr.bf16.mxu1 %v5130_v1 }
0x1828   : > { %4773 = vmatpush3.bf16.msra.mxu1 %v4926_v18 }
0x1829   : > { %4774 = vmatprep.subr.bf16.mxu1 %v5130_v1 }
0x182c   : > { %4775 = vmatpush3.bf16.msra.mxu1 %v4927_v19 }
0x18df   : > { %v3175_v54 = vpop.f32.mrf.mxu1 }
0x18e0   : > { %v3176_v55 = vadd.f32 %v4323_v53, %v3175_v54 }
0x18e1   : > { %v4758_v56 = vpop.f32.mrf.mxu1 }
0x18e2   : > { %v3181_v57 = vadd.f32 %v3176_v55, %v5634_v61  ;;  %v4357_v55 = vld [vmem:[%s5221_s6 + $0x2] ss:$0 sm:$0xff] }
0x18e3   : > { %v3178_v58 = vpop.f32.mrf.mxu1 }
0x18e4   : > { %v3186_v59 = vsel %vm962_vm1, %v3181_v57, 0.0 }
0x18e5   : > { %3187 = vadd.xlane.f32.xlu0 %v3186_v59  ;;  %v4759_v27 = vpop.f32.mrf.mxu1 }
0x18e6   : > { %v4930_v27 = vld [vmem:[%s5947_s9 + $0x10] ss:$8 sps:$4 sm:$0xff]  }
0x196e   : > { %v3188_v60 = vpop.xlane.xlu0 %3187 }
0x196f   : > { %v3189_v62 = vmul.f32 0.03125, %v3188_v60 }
0x1971   : > { %v3190_v63 = vsub.f32 %v3181_v57, %v3189_v62  ;;  %v4358_v57 = vld [vmem:[%s5931_s22 + $0x2] ss:$0 sm:$0xff]  ;;  %v4935_v62 = vld [vmem:[%s5947_s9 + $0x4] ss:$8 sps:$4 sm:$0xff]  }
0x1973   : > { %v3191_v0 = vmul.f32 %v3190_v63, %v3190_v63 }
0x1975   : > { %v3192_v2 = vsel %vm962_vm1, %v3191_v0, 0.0  ;;  %v5146_v0 = vmov 0  }
0x1976   : > { %3193 = vadd.xlane.f32.xlu1 %v3192_v2  ;;  %v4359_v2 = vld [vmem:[%s5948_s13] ss:$0 sm:$0xff]  ;;  %s911_s13 = scalar_lea.vmem [#allocation2], %s4208_s23 }
0x19ff   : > { %v3194_v61 = vpop.xlane.xlu1 %3193 }
0x1a00   : > { %v3195_v8 = vmul.f32 0.03125, %v3194_v61 }
0x1a02   : > { %v3196_v9 = vadd.f32 1e-05, %v3195_v8 }
0x1a04   : > { %5020 = vrsqrt.f32 %v3196_v9 }
0x1a11   : > { %v5021_v3 = vpop.eup %5020 }
0x1a12   : > { %v3198_v13 = vmul.f32 %v5021_v3, %v3190_v63  ;;  %v4933_v63 = vld [vmem:[%s5947_s9] ss:$8 sps:$4 sm:$0xff]  }
0x1a14   : > { %v3205_v14 = vmul.f32 %v4329_v10, %v3198_v13  ;;  %v3483_v10 = vlaneseq }
0x1a16   : > { %v3212_v15 = vadd.f32 %v4330_v5, %v3205_v14  ;;  %v3484_v13 = vshrl.u32 %v3483_v10, 7 }
0x1a18   : > { %v3218_v16 = vpack.c.bf16 %v3212_v15, %v3212_v15  ;;  %v5768_v5 = vsub.s32 0, %v3484_v13  ;;  %v5770_v14 = vsub.s32 1, %v3484_v13 }
0x1a1a   : > { %4765 = vmatmul.mubr.msk.bf16.vlgmr.msra.gmra.mxu0 %vm962_vm1, %v3218_v16 }
0x1a1b   : > { %4784 = vmatprep.mubr.msk.bf16.mxu0 %vm5131_vm0, %v5130_v1  ;;  %4781 = vmatpush3.bf16.msra.mxu0 %v4928_v48 }
0x1a1c   : > { %4782 = vmatprep.subr.bf16.mxu0 %v5130_v1 }
0x1a1f   : > { %4783 = vmatpush3.bf16.msra.mxu0 %v4929_v49  ;;  %v3557_v49 = vld [vmem:[%s5951_s7] sm:$0x3]  ;;  %s4056_s7 = sshll.u32 %s911_s13, 4  ;;  %s4057_s7 = int_to_ptr.vmem [resolvable:$true] %s4056_s7 }
0x1a20   : > { %3528 = vmatprep.subr.bf16.mxu0 %v4932_v50  ;;  %v3558_v50 = vld [vmem:[%s5952_s11] sm:$0x3] }
0x1ada   : > { %v3276_v20 = vpop.f32.mrf.mxu0 }
0x1adb   : > { %v3277_v21 = vadd.f32 %v4336_v11, %v3276_v20 }
0x1adc   : > { %v4766_v12 = vpop.f32.mrf.mxu0 }
0x1add   : > { %v3283_v22 = vmul.f32 0.044715, %v3277_v21  ;;  %v3282_v31 = vmul.f32 0.5, %v3277_v21 }
0x1ade   : > { %v3279_v23 = vpop.f32.mrf.mxu0 }
0x1adf   : > { %v3284_v24 = vmul.f32 %v3283_v22, %v3277_v21 }
0x1ae0   : > { %v4767_v25 = vpop.f32.mrf.mxu0 }
0x1ae1   : > { %v3285_v26 = vmul.f32 %v3284_v24, %v3277_v21 }
0x1ae3   : > { %v3286_v28 = vadd.f32 %v3285_v26, %v3277_v21 }
0x1ae5   : > { %v3287_v29 = vmul.f32 0.7978846, %v3286_v28 }
0x1ae7   : > { %5022 = vtanh.f32 %v3287_v29 }
0x1af4   : > { %v5023_v30 = vpop.eup %5022 }
0x1af5   : > { %v3289_v32 = vadd.f32 1.0, %v5023_v30  ;;  %v4936_v30 = vld [vmem:[%s5950_s4 + $0x78] sm:$0xff]  }
0x1af6   : > { %4495 = vmatprep.subr.bf16.mxu1 %v4936_v30  ;;  %v4952_v30 = vld [vmem:[%s5954_s18 + $0x38] sm:$0xff]  }
0x1af7   : > { %v3290_v33 = vmul.f32 %v3289_v32, %v3282_v31  ;;  %v4937_v31 = vld [vmem:[%s5950_s4 + $0x38] sm:$0xff]   ;;  %v4938_v32 = vld [vmem:[%s5950_s4 + $0x70] sm:$0xff]  }
0x1af9   : > { %v3300_v34 = vpack.c.bf16 %v3290_v33, %v3290_v33  ;;  %v4939_v33 = vld [vmem:[%s5950_s4 + $0x30] sm:$0xff]  }
0x1afb   : > { %4777 = vmatmul.mubr.msk.bf16.vlgmr.msra.gmra.mxu1 %vm1688_vm6, %v3300_v34  ;;  %v4940_v34 = vld [vmem:[%s5950_s4 + $0x68] sm:$0xff]  }
0x1afc   : > { %4496 = vmatpush3.bf16.msra.mxu1 %v4937_v31  ;;  %v4953_v31 = vld [vmem:[%s5954_s18 + $0x30] sm:$0xff]  }
0x1afd   : > { %4497 = vmatprep.subr.bf16.mxu1 %v4938_v32  ;;  %v4954_v32 = vld [vmem:[%s5954_s18 + $0x28] sm:$0xff]  }
0x1b00   : > { %4498 = vmatpush3.bf16.msra.mxu1 %v4939_v33  ;;  %v4955_v33 = vld [vmem:[%s5954_s18 + $0x20] sm:$0xff]  }
0x1b01   : > { %4499 = vmatprep.subr.bf16.mxu1 %v4940_v34  ;;  %v4956_v34 = vld [vmem:[%s5954_s18 + $0x18] sm:$0xff]  }
0x1bbb   : > { %v3370_v36 = vpop.f32.mrf.mxu1 }
0x1bbc   : > { %v3371_v37 = vadd.f32 %v4349_v35, %v3370_v36  ;;  %v4941_v35 = vld [vmem:[%s5950_s4 + $0x28] sm:$0xff]   ;;  %v4942_v36 = vld [vmem:[%s5950_s4 + $0x60] sm:$0xff]  }
0x1bbd   : > { %v4778_v38 = vpop.f32.mrf.mxu1  ;;  %4500 = vmatpush3.bf16.msra.mxu1 %v4941_v35  ;;  %v4957_v35 = vld [vmem:[%s5954_s18 + $0x10] sm:$0xff]  }
0x1bbe   : > { %v3376_v39 = vadd.f32 %v3371_v37, %v3212_v15  ;;  %v3481_v15 = vld [vmem:[%s5949_s17] sm:$0x3]  ;;  %4501 = vmatprep.subr.bf16.mxu1 %v4942_v36  ;;  %v4944_v38 = vld [vmem:[%s5950_s4 + $0x58] sm:$0xff]   ;;  %v4958_v36 = vld [vmem:[%s5954_s18 + $0x8] sm:$0xff]  }
0x1bbf   : > { %v3373_v40 = vpop.f32.mrf.mxu1  ;;  %v3486_v16 = vrot.slane %v3481_v15, %v5768_v5  ;;  %v3490_v7 = vrot.slane %v3481_v15, %v5770_v14  ;;  %v4943_v37 = vld [vmem:[%s5950_s4 + $0x20] sm:$0xff]  }
0x1bc0   : > { %v3381_v41 = vsel %vm962_vm1, %v3376_v39, 0.0  ;;  %v4946_v40 = vld [vmem:[%s5950_s4 + $0x50] sm:$0xff]  }
0x1bc1   : > { %3382 = vadd.xlane.f32.xlu0 %v3381_v41  ;;  %v4779_v42 = vpop.f32.mrf.mxu1  ;;  %4502 = vmatpush3.bf16.msra.mxu1 %v4943_v37  ;;  %v4947_v41 = vld [vmem:[%s5950_s4 + $0x10] sm:$0xff]   ;;  %v4959_v37 = vld [vmem:[%s5954_s18] sm:$0xff]  }
0x1bc2   : > { %4503 = vmatprep.subr.bf16.mxu1 %v4944_v38  ;;  %v4948_v42 = vld [vmem:[%s5950_s4 + $0x48] sm:$0xff]  }
0x1c4a   : > { %v3383_v43 = vpop.xlane.xlu0 %3382 }
0x1c4b   : > { %v3384_v44 = vmul.f32 0.03125, %v3383_v43  ;;  %v4949_v43 = vld [vmem:[%s5950_s4 + $0x8] sm:$0xff]  }
0x1c4d   : > { %v3385_v45 = vsub.f32 %v3376_v39, %v3384_v44  ;;  %v4945_v39 = vld [vmem:[%s5950_s4 + $0x18] sm:$0xff]   ;;  %v4950_v44 = vld [vmem:[%s5950_s4 + $0x40] sm:$0xff]  }
0x1c4e   : > { %4504 = vmatpush3.bf16.msra.mxu1 %v4945_v39 }
0x1c4f   : > { %v3386_v46 = vmul.f32 %v3385_v45, %v3385_v45  ;;  %4505 = vmatprep.subr.bf16.mxu1 %v4946_v40 }
0x1c51   : > { %v3387_v47 = vsel %vm962_vm1, %v3386_v46, 0.0 }
0x1c52   : > { %3388 = vadd.xlane.f32.xlu0 %v3387_v47  ;;  %4506 = vmatpush3.bf16.msra.mxu1 %v4947_v41 }
0x1c53   : > { %4507 = vmatprep.subr.bf16.mxu1 %v4948_v42  ;;  %v4385_v42 = vld [vmem:[%s5955_s26] ss:$0 sm:$0xff]  ;;  %s5039_s26 = scalar_lea.vmem %s4057_s7, 128 }
0x1c54   : > { %p5040_p11 = scmp.ne.s32.totalorder %s4057_s7, %s5039_s26 }
0x1c56   : > { %4508 = vmatpush3.bf16.msra.mxu1 %v4949_v43  ;;  %p5041_p12 = pnand %p5040_p11, %p5341_p5 }
0x1c57   : > { %4509 = vmatprep.subr.bf16.mxu1 %v4950_v44  ;;  %v4386_v44 = vld [vmem:[%s5956_s28] ss:$0 sm:$0xff]  ;;  %s5147_s28 = smov [#allocation2]  }
0x1c58   : > { %p5042_p13 = pneg %p5041_p12  ;;  %s5043_s23 = sshll.u32 %s5147_s28, 4  ;;  %s5044_s23 = int_to_ptr.vmem [resolvable:$false] %s5043_s23 }
0x1c59   : > { %s5045_s3 = scalar_lea.vmem %s5044_s23, 256  ;;  %p5046_p0 = scmp.lt.s32.totalorder %s4057_s7, %s5044_s23 }
0x1c5a   : > { %p5047_p1 = scmp.lt.s32.totalorder %s5045_s3, %s5039_s26 }
0x1c5c   : > { %p5048_p2 = por %p5047_p1, %p5046_p0 }
0x1c5e   : > { %p5049_p3 = pnand %p5048_p2, %p5042_p13 }
0x1cdb   : > { %v3389_v51 = vpop.xlane.xlu0 %3388 }
0x1cdc   : > { %v3390_v52 = vmul.f32 0.03125, %v3389_v51  ;;  %v3580_v51 = vrot.slane %v3557_v49, %v5768_v5 }
0x1cde   : > { %v3391_v53 = vadd.f32 1e-05, %v3390_v52  ;;  %v3584_v52 = vrot.slane %v3557_v49, %v5770_v14 }
0x1ce0   : > { %5024 = vrsqrt.f32 %v3391_v53 }
0x1ced   : > { %v5025_v54 = vpop.eup %5024 }
0x1cee   : > { %v3393_v56 = vmul.f32 %v5025_v54, %v3385_v45  ;;  %v4951_v45 = vld [vmem:[%s5950_s4] sm:$0xff]   ;;  %v3593_v54 = vrot.slane %v3558_v50, %v5768_v5 }
0x1cef   : > { %4510 = vmatpush3.bf16.msra.mxu1 %v4951_v45 }
0x1cf0   : > { %v3400_v58 = vmul.f32 %v4357_v55, %v3393_v56  ;;  %4808 = vmatprep.subr.mxu1 %v5130_v1  ;;  %v3597_v55 = vrot.slane %v3558_v50, %v5770_v14 }
0x1cf2   : > { %v3407_v59 = vadd.f32 %v4358_v57, %v3400_v58 }
0x1cf4   : > { %v3412_v60 = vpack.c.bf16 %v3407_v59, %v3407_v59 }
0x1cf6   : > { %4785 = vmatmul.mubr.msk.bf16.vlgmr.msra.gmra.mxu0 %vm962_vm1, %v3412_v60 }
0x1cf7   : > { %3529 = vmatpush1.bf16.msra.mxu0 %v4930_v27  ;;  %3548 = vmatprep.mubr.bf16.mxu0 %v5146_v0 }
0x1cf8   : > { %3530 = vmatprep.subr.bf16.mxu0 %v4935_v62 }
0x1cfb   : > { %3531 = vmatpush1.bf16.msra.mxu0 %v4933_v63 }
0x1cfc   : > { %4788 = vmatprep.subr.bf16.mxu0 %v5130_v1 }
0x1db6   : > { %v3469_v4 = vpop.f32.mrf.mxu0 }
0x1db7   : > { %v3470_v6 = vadd.f32 %v4359_v2, %v3469_v4 }
0x1db8   : > { %v4786_v61 = vpop.f32.mrf.mxu0 }
0x1db9   : > { %3475 = vst.msk [vmem:[%s928_s27] sm:$0xff] %vm962_vm1, %v3470_v6  ;;  %v3480_v8 = vpack.c.bf16 %v3470_v6, %v3470_v6  ;;  %s4399_s27 = sshll.u32 %s5324_s0, 7 }
0x1dba   : > { %v3472_v9 = vpop.f32.mrf.mxu0  ;;  %s4054_s11 = scalar_lea.hbm %s5957_s2, %s4399_s27 }
0x1dbb   : > { %4367 = vmatmul.mubr.msk.bf16.vlgmr.msra.gmra.mxu0 %vm962_vm1, %v3480_v8 }
0x1dbc   : > { %v4787_v3 = vpop.f32.mrf.mxu0  ;;  %4804 = vmatprep.mubr.msk.bf16.mxu0 %vm5131_vm0, %v5130_v1  ;;  %4789 = vmatpush3.bf16.msra.mxu0 %v4952_v30 }
0x1dbd   : > { %4790 = vmatprep.subr.bf16.mxu0 %v5130_v1 }
0x1dc0   : > { %4791 = vmatpush3.bf16.msra.mxu0 %v4953_v31 }
0x1dc1   : > { %4792 = vmatprep.subr.bf16.mxu0 %v5130_v1 }
0x1dc4   : > { %4793 = vmatpush3.bf16.msra.mxu0 %v4954_v32 }
0x1dc5   : > { %4794 = vmatprep.subr.bf16.mxu0 %v5130_v1 }
0x1dc8   : > { %4795 = vmatpush3.bf16.msra.mxu0 %v4955_v33 }
0x1dc9   : > { %4796 = vmatprep.subr.bf16.mxu0 %v5130_v1 }
0x1dcc   : > { %4797 = vmatpush3.bf16.msra.mxu0 %v4956_v34 }
0x1dcd   : > { %4798 = vmatprep.subr.bf16.mxu0 %v5130_v1 }
0x1dd0   : > { %4799 = vmatpush3.bf16.msra.mxu0 %v4957_v35 }
0x1dd1   : > { %4800 = vmatprep.subr.bf16.mxu0 %v5130_v1 }
0x1dd4   : > { %4801 = vmatpush3.bf16.msra.mxu0 %v4958_v36 }
0x1dd5   : > { %4802 = vmatprep.subr.bf16.mxu0 %v5130_v1 }
0x1dd8   : > { %4803 = vmatpush3.bf16.msra.mxu0 %v4959_v37 }
0x1e7b   : > { %v3550_v17 = vpop.f32.mrf.mxu0 }
0x1e7c   : > { %v3551_v19 = vadd.f32 %v3550_v17, %v3486_v16 }
0x1e7d   : > { %v3552_v18 = vpop.f32.mrf.mxu0 }
0x1e7e   : > { %v3553_v11 = vadd.f32 %v3552_v18, %v3490_v7 }
0x1e7f   : > { %v3554_v20 = vpop.f32.mrf.mxu0 }
0x1e80   : > { %v3559_v21 = vadd.f32 %v3553_v11, %v3551_v19 }
0x1e81   : > { %v3555_v12 = vpop.f32.mrf.mxu0 }
0x1e82   : > { %3560 = vadd.xlane.f32.xlu1 %v3559_v21  ;;  %v4368_v21 = vld [vmem:[%s5953_s15] ss:$0 sm:$0xff]  ;;  %s4036_s15 = scalar_lea.sflag [#allocation3], %s909_s1 }
0x1f0b   : > { %v3561_v22 = vpop.xlane.xlu1 %3560 }
0x1f0c   : > { %v3563_v23 = vmul.f32 0.00390625, %v3561_v22 }
0x1f0e   : > { %v3564_v24 = vsub.f32 %v3551_v19, %v3563_v23  ;;  %v3565_v25 = vsub.f32 %v3553_v11, %v3563_v23 }
0x1f10   : > { %v3566_v26 = vmul.f32 %v3564_v24, %v3564_v24  ;;  %v3567_v28 = vmul.f32 %v3565_v25, %v3565_v25 }
0x1f12   : > { %v3568_v29 = vadd.f32 %v3567_v28, %v3566_v26 }
0x1f14   : > { %3569 = vadd.xlane.f32.xlu0 %v3568_v29 }
0x1f9d   : > { %v3570_v46 = vpop.xlane.xlu0 %3569 }
0x1f9e   : > { %v3571_v47 = vmul.f32 0.00390625, %v3570_v46 }
0x1fa0   : > { %v3572_v48 = vadd.f32 1e-05, %v3571_v47 }
0x1fa2   : > { %5026 = vrsqrt.f32 %v3572_v48 }
0x1faf   : > { %v5027_v53 = vpop.eup %5026 }
0x1fb0   : > { %v3574_v56 = vmul.f32 %v5027_v53, %v3564_v24  ;;  %v3575_v57 = vmul.f32 %v5027_v53, %v3565_v25 }
0x1fb2   : > { %v3587_v58 = vmul.f32 %v3580_v51, %v3574_v56  ;;  %v3588_v59 = vmul.f32 %v3584_v52, %v3575_v57  ;;  %v4387_v56 = vld [vmem:[%s5286_s12] ss:$0 sm:$0xff] }
0x1fb4   : > { %v3600_v27 = vadd.f32 %v3593_v54, %v3587_v58  ;;  %v3601_v60 = vadd.f32 %v3597_v55, %v3588_v59 }
0x1fb6   : > { %v3605_v62 = vmul.f32 0.044715, %v3601_v60  ;;  %v3604_v63 = vmul.f32 0.044715, %v3600_v27  ;;  %v3603_v5 = vmul.f32 0.5, %v3601_v60  ;;  %v3602_v15 = vmul.f32 0.5, %v3600_v27 }
0x1fb8   : > { %v3607_v0 = vmul.f32 %v3605_v62, %v3601_v60  ;;  %v3606_v2 = vmul.f32 %v3604_v63, %v3600_v27 }
0x1fba   : > { %v3609_v4 = vmul.f32 %v3607_v0, %v3601_v60  ;;  %v3608_v6 = vmul.f32 %v3606_v2, %v3600_v27 }
0x1fbc   : > { %v3611_v61 = vadd.f32 %v3609_v4, %v3601_v60  ;;  %v3610_v8 = vadd.f32 %v3608_v6, %v3600_v27 }
0x1fbe   : > { %v3613_v9 = vmul.f32 0.7978846, %v3611_v61  ;;  %v3612_v3 = vmul.f32 0.7978846, %v3610_v8 }
0x1fc0   : > { %5028 = vtanh.f32 %v3613_v9 }
0x1fc1   : > { %5030 = vtanh.f32 %v3612_v3 }
0x1fcd   : > { %v5029_v10 = vpop.eup %5028 }
0x1fce   : > { %v5031_v13 = vpop.eup %5030  ;;  %v3617_v14 = vadd.f32 1.0, %v5029_v10 }
0x1fcf   : > { %v3616_v16 = vadd.f32 1.0, %v5031_v13 }
0x1fd0   : > { %v3619_v7 = vmul.f32 %v3617_v14, %v3603_v5 }
0x1fd1   : > { %v3618_v17 = vmul.f32 %v3616_v16, %v3602_v15 }
0x1fd2   : > { %v3653_v18 = vpack.c.bf16 %v3619_v7, %v3619_v7 }
0x1fd3   : > { %v3652_v19 = vpack.c.bf16 %v3618_v17, %v3618_v17 }
0x1fd4   : > { %3789 = vmatprep.mubr.bf16.mxu1 %v3653_v18 }
0x1fd5   : > { %3790 = vmatmul.mubr.bf16.vlgmr.msra.gmra.mxu1 %v3652_v19 }
0x1fd6   : > { %4810 = vmatprep.mubr.msk.f32.mxu1 %vm5131_vm0, %v5130_v1 }
0x2095   : > { %v4511_v11 = vpop.f32.mrf.mxu1 }
0x2097   : > { %v4512_v20 = vpop.f32.mrf.mxu1 }
0x2098   : > { %v4513_v12 = vadd.f32 %v4512_v20, %v4511_v11 }
0x2099   : > { %v4514_v22 = vpop.f32.mrf.mxu1 }
0x209a   : > { %v3792_v23 = vadd.f32 %v4513_v12, %v4368_v21 }
0x209b   : > { %v4515_v24 = vpop.f32.mrf.mxu1 }
0x209c   : > { %3799 = vadd.xlane.f32.xlu1 %v3792_v23 }
0x2125   : > { %v3800_v25 = vpop.xlane.xlu1 %3799 }
0x2126   : > { %v3802_v26 = vmul.f32 0.0078125, %v3800_v25 }
0x2128   : > { %v3803_v28 = vsub.f32 %v3792_v23, %v3802_v26 }
0x212a   : > { %v3804_v29 = vmul.f32 %v3803_v28, %v3803_v28 }
0x212c   : > { %3805 = vadd.xlane.f32.xlu0 %v3804_v29 }
0x21b5   : > { %v3806_v38 = vpop.xlane.xlu0 %3805 }
0x21b6   : > { %v3807_v39 = vmul.f32 0.0078125, %v3806_v38 }
0x21b8   : > { %v3808_v40 = vadd.f32 1e-05, %v3807_v39 }
0x21ba   : > { %5032 = vrsqrt.f32 %v3808_v40 }
0x21c7   : > { %v5033_v41 = vpop.eup %5032 }
0x21c8   : > { %v3810_v43 = vmul.f32 %v5033_v41, %v3803_v28 }
0x21ca   : > { %v3817_v45 = vmul.f32 %v4385_v42, %v3810_v43 }
0x21cc   : > { %v3824_v46 = vadd.f32 %v4386_v44, %v3817_v45 }
0x21ce   : > { %v3826_v47 = vmul.f32 0.044715, %v3824_v46  ;;  %v3825_v52 = vmul.f32 0.5, %v3824_v46 }
0x21d0   : > { %v3827_v48 = vmul.f32 %v3826_v47, %v3824_v46 }
0x21d2   : > { %v3828_v49 = vmul.f32 %v3827_v48, %v3824_v46 }
0x21d4   : > { %v3829_v50 = vadd.f32 %v3828_v49, %v3824_v46 }
0x21d6   : > { %v3830_v51 = vmul.f32 0.7978846, %v3829_v50 }
0x21d8   : > { %5034 = vtanh.f32 %v3830_v51 }
0x21e5   : > { %v5035_v1 = vpop.eup %5034 }
0x21e6   : > { %v3832_v53 = vadd.f32 1.0, %v5035_v1 }
0x21e8   : > { %v3833_v54 = vmul.f32 %v3832_v53, %v3825_v52 }
0x21ea   : > { %v3850_v55 = vpack.c.bf16 %v3833_v54, %v3833_v54 }
0x21ec   : > { %4805 = vmatmul.mubr.bf16.vlgmr.msra.gmra.mxu0 %v3850_v55 }
0x22ac   : > { %v3940_v57 = vpop.f32.mrf.mxu0 }
0x22ad   : > { %v3941_v58 = vadd.f32 %v4387_v56, %v3940_v57 }
0x22ae   : > { %v4806_v59 = vpop.f32.mrf.mxu0 }
0x22af   : > { %v3947_v27 = vmul.f32 %v3941_v58, %v3941_v58  ;;  %3946 = vst.msk [vmem:[%s911_s13] sm:$0xff] %vm1688_vm6, %v3941_v58 }
0x22b0   : > { %v3943_v60 = vpop.f32.mrf.mxu0 }
0x22b1   : > { %v3948_v62 = vsel %vm1688_vm6, %v3947_v27, 0.0 }
0x22b2   : > { %3949 = vadd.xlane.f32.xlu1 %v3948_v62  ;;  %v4807_v63 = vpop.f32.mrf.mxu0 }
0x233b   : > { %v3950_v0 = vpop.xlane.xlu1 %3949 }
0x233c   : > { %v3951_v2 = vadd.f32 1e-12, %v3950_v0 }
0x233e   : > { %5036 = vrsqrt.f32 %v3951_v2 }
0x234b   : > { %v5037_v4 = vpop.eup %5036 }
0x234c   : > { %v3953_v6 = vmul.f32 %v5037_v4, %v3941_v58 }
0x234e   : > { %4809 = vmatpush3.xpose.msk.msra.mxu1 %vm1688_vm6, %v3953_v6 }
0x2351   : > { %4811 = vmatmul.mubr.msk.f32.vlgmr.msra.gmra.mxu1 %vm1688_vm6, %v3953_v6 }
0x2352   : > { %5052 = shalt.err (!%p5049_p3)
}
0x2353   : > { %s5053_s4 = scalar_lea.hbm %s4054_s11, 128  ;;  %s5057_s0 = scalar_lea.hbm %s5957_s2, 256 }
0x2354   : > { %p5054_p4 = scmp.ne.s32.totalorder %s4054_s11, %s5053_s4  ;;  %p5058_p9 = scmp.lt.s32.totalorder %s4054_s11, %s5957_s2 }
0x2355   : > { %p5059_p10 = scmp.lt.s32.totalorder %s5057_s0, %s5053_s4 }
0x2356   : > { %p5055_p7 = pnand %p5054_p4, %p5341_p5 }
0x2357   : > { %p5060_p11 = por %p5059_p10, %p5058_p9 }
0x2358   : > { %p5056_p8 = pneg %p5055_p7 }
0x235a   : > { %p5061_p12 = pnand %p5060_p11, %p5056_p8 }
0x235c   : > { %5064 = shalt.err (!%p5061_p12)
}
0x235d   : > { %s5959_s3 = sld [smem:[#allocation23_spill]] }
0x235e   : > { %4813 = dma.vmem_to_hbm [thread:$0]  (%p5341_p5), %s4057_s7, 128, %s4054_s11, %s4036_s15  }
0x2363   : > { %s932_s1 = scalar_lea.vmem %s5959_s3, %s5366_s16 }
0x2411   : > { %v4023_v61 = vpop.f32.mrf.mxu1 }
0x2412   : > { %v4024_v8 = vadd.f32 1.0, %v4023_v61 }
0x2413   : > { %v4812_v9 = vpop.f32.mrf.mxu1 }
0x2414   : > { %v4027_v3 = vmul.f32 0.5, %v4024_v8 }
0x2416   : > { %v4028_v10 = vmax.f32 %v4027_v3, 0.0 }
0x2418   : > { %v4029_v13 = vmin.f32 %v4028_v10, 1.0 }
0x241a   : > { %4030 = vst.msk [vmem:[%s932_s1] sm:$0xff] %vm1018_vm2, %v4029_v13 }
0x241b PF: > { %s5960_s13 = sld [smem:[#allocation26_spill]] }
0x241c   : > { %s5961_s4 = sld [smem:[#allocation24_spill]] }
0x2421   : > { %p4819_p13 = scmp.ge.s32.totalorder %s5960_s13, 2 }
0x2422   : > { %s4078_s26 = sand.u32 1, %s5961_s4  }
0x2423   : > { %p4816_p0 = pnand %p4819_p13, %p5345_p6  ;;  %s4079_s17 = scalar_lea.sflag [#allocation3], %s4078_s26 }
0x2425   : > { %p4817_p1 = pneg %p4816_p0 }
0x2427   : > { %5082 = dma.done.wait (%p4817_p1), %s4079_s17, 128  }
0x2428   : > { %5084 = vsyncadd (%p4817_p1), %s4079_s17, 4294967168  ;;  %s5963_s15 = sld [smem:[#allocation27_spill]]  ;;  %s5966_s7 = smov %s5091_s10 }
0x2429   : > { %s5964_s11 = sld [smem:[#allocation25_spill]] }
0x242a   : > { %s5965_s28 = sld [smem:[#allocation28_spill]] }
0x242e   : > { %p70_p5 = scmp.ge.s32.totalorder %s5963_s15, 4  }
0x242f   : > { %s5967_s10 = smov %s5964_s11 }
0x2430   : > { %s5968_s11 = smov %s5965_s28  ;;  %72 = sbr.rel (!%p70_p5) target bundleno = 63 (0x3f), region = 243 }
0x2435   :  { %4091 = vsyncpa [#allocation3], 1 }
0x2436   :  { %4093 = vsyncpa [#allocation3 + $0x1], 1 }

</bundles_post_ra>
